<compile_context>
chip_gen: v5e
topology: v5e:2x2
jax: 0.10.0
libtpu: 0.0.40
codegen_flags: <defaults>
</compile_context>

<pallas_src>
import functools

import jax
import jax.numpy as jnp
import numpy as np
from jax import lax
from jax.experimental import pallas as pl
from jax.experimental.pallas import tpu as pltpu

LANE = 128  # vreg lane width


def _round_up(x, m):
    return (x + m - 1) // m * m


def _pad_to(x, axis, size):
    pad = size - x.shape[axis]
    if pad == 0:
        return x
    widths = [(0, 0)] * x.ndim
    widths[axis] = (0, pad)
    return jnp.pad(x, widths)


def _vmem_limit(*byte_counts, headroom=2 << 20, cap=48 << 20, floor=4 << 20):
    # x2 for BlockSpec double-buffering; clamp so the request also fits v7x (64 MiB phys).
    need = 2 * sum(int(b) for b in byte_counts) + headroom
    return int(min(cap, max(floor, need)))


def _pick_row_tile(tn, h2p, vp, budget=24 << 20):
    """Largest row tile of (T*N) keeping the fused-head working set under `budget`
    (budget chosen below v7x's 32 MiB default scoped VMEM)."""
    for tr in (1024, 512, 256, 128, 64, 32, 16, 8):
        if tn % tr:
            continue
        need = (2 * (tr * h2p * 2 + tr * vp * 4)      # seq-in (bf16) + out (f32), double-buffered
                + 2 * (h2p * vp * 2 + vp * 4)         # head weight (bf16) + bias (f32)
                + tr * vp * 4)                        # f32 logits temporary
        if need <= budget:
            return tr
    return min(tn, 8)


# ----------------------------------------------------------------------------
# Kernel 1: bidirectional LSTM over a constant per-step input.
# ----------------------------------------------------------------------------
def _bilstm_kernel(codes_ref, wih_f_ref, wih_b_ref, whh_f_ref, whh_b_ref,
                   bias_f_ref, bias_b_ref, seq_ref, *, T, unroll):
    """seq_ref: (T*N, 2*Hp) bf16.  Lanes [0:Hp) = forward h at time t (rows t*N..),
    lanes [Hp:2Hp) = backward h at time T-1-t."""
    N = codes_ref.shape[0]
    Hp = whh_f_ref.shape[0]
    mxu_dtype = seq_ref.dtype

    codes = codes_ref[...]
    # Hoisted input projection (codes is identical at every timestep); f32 accumulation.
    gx_f = jnp.dot(codes, wih_f_ref[...], preferred_element_type=jnp.float32) + bias_f_ref[...]
    gx_b = jnp.dot(codes, wih_b_ref[...], preferred_element_type=jnp.float32) + bias_b_ref[...]
    whh_f = whh_f_ref[...]
    whh_b = whh_b_ref[...]

    def gate_math(gates, c):
        # Elementwise gate math stays f32 (v5e has no bf16 VPU/EUP path).
        # Gate slices are 128-lane aligned because Hp is a multiple of 128.
        i = jax.nn.sigmoid(gates[:, 0 * Hp:1 * Hp])
        f = jax.nn.sigmoid(gates[:, 1 * Hp:2 * Hp])
        g = jnp.tanh(gates[:, 2 * Hp:3 * Hp])
        o = jax.nn.sigmoid(gates[:, 3 * Hp:4 * Hp])
        c = f * c + i * g
        h = o * jnp.tanh(c)
        return h, c

    def step(t, carry):
        h_f, c_f, h_b, c_b = carry                      # h: bf16 (MXU lhs), c: f32
        g_f = jnp.dot(h_f, whh_f, preferred_element_type=jnp.float32) + gx_f
        g_b = jnp.dot(h_b, whh_b, preferred_element_type=jnp.float32) + gx_b
        h_f_f32, c_f = gate_math(g_f, c_f)
        h_b_f32, c_b = gate_math(g_b, c_b)
        h_f = h_f_f32.astype(mxu_dtype)
        h_b = h_b_f32.astype(mxu_dtype)
        # NOTE: running the backward direction "forward" and writing its output at time
        # T-1-t is only valid because the per-timestep input is the constant codes vector.
        row_f = pl.multiple_of(t * N, N)
        row_b = pl.multiple_of((T - 1 - t) * N, N)
        seq_ref[pl.ds(row_f, N), 0:Hp] = h_f            # full (16,128) bf16 tiles (aligned)
        seq_ref[pl.ds(row_b, N), Hp:2 * Hp] = h_b
        return (h_f, c_f, h_b, c_b)

    h0 = jnp.zeros((N, Hp), mxu_dtype)
    c0 = jnp.zeros((N, Hp), jnp.float32)
    lax.fori_loop(0, T, step, (h0, c0, h0, c0), unroll=unroll)


# ----------------------------------------------------------------------------
# Kernel 2: BottledLinear(2H -> V) + log_softmax, row-tiled over T*N.
# ----------------------------------------------------------------------------
def _head_kernel(seq_ref, w_ref, b_ref, out_ref):
    logits = (jnp.dot(seq_ref[...], w_ref[...], preferred_element_type=jnp.float32)
              + b_ref[...])                                        # (TR, Vp) f32
    m = jnp.max(logits, axis=-1, keepdims=True)
    z = logits - m
    lse = jnp.log(jnp.sum(jnp.exp(z), axis=-1, keepdims=True))
    # Output kept f32; switch to bf16 here if downstream tolerates it (halves writeback).
    out_ref[...] = (z - lse).astype(out_ref.dtype)


# ----------------------------------------------------------------------------
# pallas_call plumbing
# ----------------------------------------------------------------------------
def _decoder_pallas(codes_p, wih_f, wih_b, whh_f, whh_b, bias_f, bias_b,
                    w_head, b_head, *, seqlen):
    """Operands already padded / re-laid-out / cast.  Returns (T*Np, Vp) f32 log-probs."""
    Np, C = codes_p.shape
    Hp = whh_f.shape[0]
    Vp = w_head.shape[1]
    T = seqlen
    TN = T * Np
    H2p = 2 * Hp
    itm = codes_p.dtype.itemsize

    # ---------------- recurrence ----------------
    carry_bytes = Np * Hp * (2 * itm + 2 * 4)          # h (bf16) + c (f32), both directions
    unroll = True if (T <= 16 and carry_bytes <= 48 * 1024) else 2

    lstm_bytes = (codes_p.size * itm + 2 * wih_f.size * itm + 2 * whh_f.size * itm
                  + 2 * bias_f.size * 4 + TN * H2p * itm)
    seq = pl.pallas_call(
        functools.partial(_bilstm_kernel, T=T, unroll=unroll),
        out_shape=jax.ShapeDtypeStruct((TN, H2p), codes_p.dtype),
        grid_spec=pltpu.PrefetchScalarGridSpec(
            num_scalar_prefetch=0,
            grid=(1,),
            in_specs=[
                pl.BlockSpec((Np, C), lambda i: (0, 0)),
                pl.BlockSpec((C, 4 * Hp), lambda i: (0, 0)),
                pl.BlockSpec((C, 4 * Hp), lambda i: (0, 0)),
                pl.BlockSpec((Hp, 4 * Hp), lambda i: (0, 0)),
                pl.BlockSpec((Hp, 4 * Hp), lambda i: (0, 0)),
                pl.BlockSpec((1, 4 * Hp), lambda i: (0, 0)),
                pl.BlockSpec((1, 4 * Hp), lambda i: (0, 0)),
            ],
            out_specs=pl.BlockSpec((TN, H2p), lambda i: (0, 0)),
        ),
        compiler_params=pltpu.CompilerParams(
            dimension_semantics=("arbitrary",),
            vmem_limit_bytes=_vmem_limit(lstm_bytes),
        ),
    )(codes_p, wih_f, wih_b, whh_f, whh_b, bias_f, bias_b)

    # ---------------- head ----------------
    TR = _pick_row_tile(TN, H2p, Vp)
    head_bytes = TR * H2p * itm + H2p * Vp * itm + Vp * 4 + 2 * (TR * Vp * 4)
    out = pl.pallas_call(
        _head_kernel,
        out_shape=jax.ShapeDtypeStruct((TN, Vp), jnp.float32),
        grid_spec=pltpu.PrefetchScalarGridSpec(
            num_scalar_prefetch=0,
            grid=(TN // TR,),
            in_specs=[
                pl.BlockSpec((TR, H2p), lambda i: (i, 0)),
                pl.BlockSpec((H2p, Vp), lambda i: (0, 0)),
                pl.BlockSpec((1, Vp), lambda i: (0, 0)),
            ],
            out_specs=pl.BlockSpec((TR, Vp), lambda i: (i, 0)),
        ),
        compiler_params=pltpu.CompilerParams(
            dimension_semantics=("parallel",),   # independent row tiles (v7x: both cores)
            vmem_limit_bytes=_vmem_limit(head_bytes),
        ),
    )(seq, w_head, b_head)
    return out


# ----------------------------------------------------------------------------
# Module wrapper (weight re-layout, lane/sublane padding, bf16 casting)
# ----------------------------------------------------------------------------
def init_params(key, code_len, rnn_dim, vocab_size):
    H, C, V = rnn_dim, code_len, vocab_size
    ks = jax.random.split(key, 10)
    k_lstm = 1.0 / np.sqrt(H)

    def u(k, shape, bound):
        return jax.random.uniform(k, shape, jnp.float32, -bound, bound)

    return dict(
        wih_f=u(ks[0], (4 * H, C), k_lstm), whh_f=u(ks[1], (4 * H, H), k_lstm),
        bih_f=u(ks[2], (4 * H,), k_lstm), bhh_f=u(ks[3], (4 * H,), k_lstm),
        wih_b=u(ks[4], (4 * H, C), k_lstm), whh_b=u(ks[5], (4 * H, H), k_lstm),
        bih_b=u(ks[6], (4 * H,), k_lstm), bhh_b=u(ks[7], (4 * H,), k_lstm),
        w_head=u(ks[8], (V, 2 * H), 1.0 / np.sqrt(2 * H)),
        b_head=u(ks[9], (V,), 1.0 / np.sqrt(2 * H)),
    )


@functools.partial(jax.jit, static_argnames=("seqlen", "mxu_dtype"))
def rnn_decoder_forward(tok_embs, codes, params, *, seqlen, mxu_dtype=jnp.bfloat16):
    del tok_embs  # unused in the reference forward (immediately overwritten)
    N, C = codes.shape
    H = params["whh_f"].shape[1]
    V = params["w_head"].shape[0]
    T = seqlen

    Hp = _round_up(H, LANE)                         # lane-dense hidden
    Vp = _round_up(V, LANE)                         # lane-dense vocab
    sub = 8 * 4 // np.dtype(mxu_dtype).itemsize     # sublane pack (16 for bf16)
    Np = _round_up(N, sub)

    def prep_dir(wih, whh, bih, bhh):
        # PyTorch layouts: wih (4H, C), whh (4H, H), biases (4H,), gate order [i, f, g, o].
        # Pad each per-gate H block to Hp (zero pad -> padded hidden units stay exactly 0).
        wih_t = _pad_to(wih.T.reshape(C, 4, H), 2, Hp).reshape(C, 4 * Hp)
        whh_t = _pad_to(_pad_to(whh.T.reshape(H, 4, H), 2, Hp), 0, Hp).reshape(Hp, 4 * Hp)
        bias = _pad_to((bih + bhh).reshape(4, H), 1, Hp).reshape(1, 4 * Hp)
        return wih_t.astype(mxu_dtype), whh_t.astype(mxu_dtype), bias.astype(jnp.float32)

    wih_f, whh_f, bias_f = prep_dir(params["wih_f"], params["whh_f"],
                                    params["bih_f"], params["bhh_f"])
    wih_b, whh_b, bias_b = prep_dir(params["wih_b"], params["whh_b"],
                                    params["bih_b"], params["bhh_b"])

    # Head weight (V, 2H) -> (2*Hp, Vp): rows [0:H) forward, [Hp:Hp+H) backward, zero elsewhere.
    w_head_t = _pad_to(_pad_to(params["w_head"].T.reshape(2, H, V), 1, Hp), 2, Vp)
    w_head_t = w_head_t.reshape(2 * Hp, Vp).astype(mxu_dtype)
    # Padded vocab columns get a very negative bias so exp() contributes exactly 0.
    b_head = jnp.full((1, Vp), -1e30, jnp.float32).at[0, :V].set(params["b_head"])

    codes_p = _pad_to(codes, 0, Np).astype(mxu_dtype)

    out = _decoder_pallas(codes_p, wih_f, wih_b, whh_f, whh_b, bias_f, bias_b,
                          w_head_t, b_head, seqlen=T)              # (T*Np, Vp) f32
    # Leading-dim split reshape is free; slicing removes batch/vocab padding.
    return out.reshape(T, Np, Vp)[:, :N, :V]


# ----------------------------------------------------------------------------
# Pure-JAX f32 reference (module semantics) for correctness check
# ----------------------------------------------------------------------------
def _ref_forward(tok_embs, codes, params, seqlen):
    del tok_embs
    N, C = codes.shape
    H = params["whh_f"].shape[1]
    T = seqlen

    def run_dir(wih, whh, bih, bhh):
        b = bih + bhh

        def step(carry, _):
            h, c = carry
            gates = codes @ wih.T + h @ whh.T + b
            i = jax.nn.sigmoid(gates[:, 0 * H:1 * H])
            f = jax.nn.sigmoid(gates[:, 1 * H:2 * H])
            g = jnp.tanh(gates[:, 2 * H:3 * H])
            o = jax.nn.sigmoid(gates[:, 3 * H:4 * H])
            c_new = f * c + i * g
            h_new = o * jnp.tanh(c_new)
            return (h_new, c_new), h_new

        h0 = jnp.zeros((N, H), jnp.float32)
        _, hs = lax.scan(step, (h0, h0), None, length=T)
        return hs

    fwd = run_dir(params["wih_f"], params["whh_f"], params["bih_f"], params["bhh_f"])
    bwd = run_dir(params["wih_b"], params["whh_b"], params["bih_b"], params["bhh_b"])[::-1]
    out = jnp.concatenate([fwd, bwd], axis=-1)
    logits = out @ params["w_head"].T + params["b_head"]
    return jax.nn.log_softmax(logits, axis=2)


if __name__ == "__main__":
    code_len = 8        # == emb_dim fed to the LSTM
    tok_emb_dim = 8
    seqlen = 8
    rnn_dim = 16
    vocab_size = 32
    batch = 2

    key = jax.random.PRNGKey(0)
    k_params, k_codes, k_toks = jax.random.split(key, 3)

    params = init_params(k_params, code_len, rnn_dim, vocab_size)
    codes = jax.random.normal(k_codes, (batch, code_len), jnp.float32)
    tok_embs = jax.random.normal(k_toks, (seqlen + 1, batch, tok_emb_dim), jnp.float32)

    out = rnn_decoder_forward(tok_embs, codes, params, seqlen=seqlen)
    out = jax.block_until_ready(out)
    assert out.shape == (seqlen, batch, vocab_size)

    ref = _ref_forward(tok_embs, codes, params, seqlen)
    # bf16 MXU operands with f32 accumulation: loosened tolerance is the intentional
    # precision/perf trade recommended by the review, not a bug.
    np.testing.assert_allclose(np.asarray(out), np.asarray(ref), atol=5e-2, rtol=5e-2)

    print("KERNEL_OK")
</pallas_src>

<mosaic_0001>
module attributes {stable_mosaic.version = 11 : i64} {
  func.func @_bilstm_kernel(%arg0: i32, %arg1: memref<16x8xbf16, #tpu.memory_space<vmem>>, %arg2: memref<8x512xbf16, #tpu.memory_space<vmem>>, %arg3: memref<8x512xbf16, #tpu.memory_space<vmem>>, %arg4: memref<128x512xbf16, #tpu.memory_space<vmem>>, %arg5: memref<128x512xbf16, #tpu.memory_space<vmem>>, %arg6: memref<1x512xf32, #tpu.memory_space<vmem>>, %arg7: memref<1x512xf32, #tpu.memory_space<vmem>>, %arg8: memref<128x256xbf16, #tpu.memory_space<vmem>>) attributes {dimension_semantics = [#tpu.dimension_semantics<arbitrary>], iteration_bounds = array<i64: 1>, scalar_prefetch = 0 : i64, scratch_operands = 0 : i64, tpu.core_type = #tpu.core_type<tc>, window_params = [{pipeline_mode = #tpu.pipeline_mode<synchronous>, transform_indices = @transform_0, window_bounds = array<i64: 16, 8>}, {pipeline_mode = #tpu.pipeline_mode<synchronous>, transform_indices = @transform_1, window_bounds = array<i64: 8, 512>}, {pipeline_mode = #tpu.pipeline_mode<synchronous>, transform_indices = @transform_2, window_bounds = array<i64: 8, 512>}, {pipeline_mode = #tpu.pipeline_mode<synchronous>, transform_indices = @transform_3, window_bounds = array<i64: 128, 512>}, {pipeline_mode = #tpu.pipeline_mode<synchronous>, transform_indices = @transform_4, window_bounds = array<i64: 128, 512>}, {pipeline_mode = #tpu.pipeline_mode<synchronous>, transform_indices = @transform_5, window_bounds = array<i64: 1, 512>}, {pipeline_mode = #tpu.pipeline_mode<synchronous>, transform_indices = @transform_6, window_bounds = array<i64: 1, 512>}, {pipeline_mode = #tpu.pipeline_mode<synchronous>, transform_indices = @transform_7, window_bounds = array<i64: 128, 256>}]} {
    %c0 = arith.constant 0 : index
    %c0_0 = arith.constant 0 : index
    %0 = vector.load %arg1[%c0, %c0_0] : memref<16x8xbf16, #tpu.memory_space<vmem>>, vector<16x8xbf16>
    %c0_1 = arith.constant 0 : index
    %c0_2 = arith.constant 0 : index
    %1 = vector.load %arg2[%c0_1, %c0_2] : memref<8x512xbf16, #tpu.memory_space<vmem>>, vector<8x512xbf16>
    %cst = arith.constant dense<0.000000e+00> : vector<16x512xf32>
    %2 = tpu.matmul %0, %1, %cst {dimension_numbers = #tpu.dot_dimension_numbers<[1], [0], [0], [1], [0, 0, 1, 1], [], []>} : vector<16x8xbf16>, vector<8x512xbf16>, vector<16x512xf32> -> vector<16x512xf32>
    %c0_3 = arith.constant 0 : index
    %c0_4 = arith.constant 0 : index
    %3 = vector.load %arg6[%c0_3, %c0_4] : memref<1x512xf32, #tpu.memory_space<vmem>>, vector<1x512xf32>
    %4 = vector.broadcast %3 : vector<1x512xf32> to vector<16x512xf32>
    %5 = arith.addf %2, %4 : vector<16x512xf32>
    %c0_5 = arith.constant 0 : index
    %c0_6 = arith.constant 0 : index
    %6 = vector.load %arg3[%c0_5, %c0_6] : memref<8x512xbf16, #tpu.memory_space<vmem>>, vector<8x512xbf16>
    %cst_7 = arith.constant dense<0.000000e+00> : vector<16x512xf32>
    %7 = tpu.matmul %0, %6, %cst_7 {dimension_numbers = #tpu.dot_dimension_numbers<[1], [0], [0], [1], [0, 0, 1, 1], [], []>} : vector<16x8xbf16>, vector<8x512xbf16>, vector<16x512xf32> -> vector<16x512xf32>
    %c0_8 = arith.constant 0 : index
    %c0_9 = arith.constant 0 : index
    %8 = vector.load %arg7[%c0_8, %c0_9] : memref<1x512xf32, #tpu.memory_space<vmem>>, vector<1x512xf32>
    %9 = vector.broadcast %8 : vector<1x512xf32> to vector<16x512xf32>
    %10 = arith.addf %7, %9 : vector<16x512xf32>
    %c0_10 = arith.constant 0 : index
    %c0_11 = arith.constant 0 : index
    %11 = vector.load %arg4[%c0_10, %c0_11] : memref<128x512xbf16, #tpu.memory_space<vmem>>, vector<128x512xbf16>
    %c0_12 = arith.constant 0 : index
    %c0_13 = arith.constant 0 : index
    %12 = vector.load %arg5[%c0_12, %c0_13] : memref<128x512xbf16, #tpu.memory_space<vmem>>, vector<128x512xbf16>
    %cst_14 = arith.constant 0.000000e+00 : bf16
    %13 = vector.broadcast %cst_14 : bf16 to vector<16x128xbf16>
    %cst_15 = arith.constant 0.000000e+00 : f32
    %14 = vector.broadcast %cst_15 : f32 to vector<16x128xf32>
    %c0_i32 = arith.constant 0 : i32
    %cst_16 = arith.constant dense<0.000000e+00> : vector<16x512xf32>
    %15 = tpu.matmul %13, %11, %cst_16 {dimension_numbers = #tpu.dot_dimension_numbers<[1], [0], [0], [1], [0, 0, 1, 1], [], []>} : vector<16x128xbf16>, vector<128x512xbf16>, vector<16x512xf32> -> vector<16x512xf32>
    %16 = arith.addf %15, %5 : vector<16x512xf32>
    %cst_17 = arith.constant dense<0.000000e+00> : vector<16x512xf32>
    %17 = tpu.matmul %13, %12, %cst_17 {dimension_numbers = #tpu.dot_dimension_numbers<[1], [0], [0], [1], [0, 0, 1, 1], [], []>} : vector<16x128xbf16>, vector<128x512xbf16>, vector<16x512xf32> -> vector<16x512xf32>
    %18 = arith.addf %17, %10 : vector<16x512xf32>
    %19 = vector.extract_strided_slice %16 {offsets = [0, 0], sizes = [16, 128], strides = [1, 1]} : vector<16x512xf32> to vector<16x128xf32>
    %20 = arith.negf %19 : vector<16x128xf32>
    %21 = math.exp %20 : vector<16x128xf32>
    %cst_18 = arith.constant 1.000000e+00 : f32
    %22 = vector.broadcast %cst_18 : f32 to vector<16x128xf32>
    %23 = arith.addf %22, %21 : vector<16x128xf32>
    %24 = arith.divf %22, %23 : vector<16x128xf32>
    %25 = vector.extract_strided_slice %16 {offsets = [0, 128], sizes = [16, 128], strides = [1, 1]} : vector<16x512xf32> to vector<16x128xf32>
    %26 = arith.negf %25 : vector<16x128xf32>
    %27 = math.exp %26 : vector<16x128xf32>
    %cst_19 = arith.constant 1.000000e+00 : f32
    %28 = vector.broadcast %cst_19 : f32 to vector<16x128xf32>
    %29 = arith.addf %28, %27 : vector<16x128xf32>
    %30 = arith.divf %28, %29 : vector<16x128xf32>
    %31 = vector.extract_strided_slice %16 {offsets = [0, 256], sizes = [16, 128], strides = [1, 1]} : vector<16x512xf32> to vector<16x128xf32>
    %32 = math.tanh %31 : vector<16x128xf32>
    %33 = vector.extract_strided_slice %16 {offsets = [0, 384], sizes = [16, 128], strides = [1, 1]} : vector<16x512xf32> to vector<16x128xf32>
    %34 = arith.negf %33 : vector<16x128xf32>
    %35 = math.exp %34 : vector<16x128xf32>
    %cst_20 = arith.constant 1.000000e+00 : f32
    %36 = vector.broadcast %cst_20 : f32 to vector<16x128xf32>
    %37 = arith.addf %36, %35 : vector<16x128xf32>
    %38 = arith.divf %36, %37 : vector<16x128xf32>
    %39 = arith.mulf %30, %14 : vector<16x128xf32>
    %40 = arith.mulf %24, %32 : vector<16x128xf32>
    %41 = arith.addf %39, %40 : vector<16x128xf32>
    %42 = math.tanh %41 : vector<16x128xf32>
    %43 = arith.mulf %38, %42 : vector<16x128xf32>
    %44 = vector.extract_strided_slice %18 {offsets = [0, 0], sizes = [16, 128], strides = [1, 1]} : vector<16x512xf32> to vector<16x128xf32>
    %45 = arith.negf %44 : vector<16x128xf32>
    %46 = math.exp %45 : vector<16x128xf32>
    %cst_21 = arith.constant 1.000000e+00 : f32
    %47 = vector.broadcast %cst_21 : f32 to vector<16x128xf32>
    %48 = arith.addf %47, %46 : vector<16x128xf32>
    %49 = arith.divf %47, %48 : vector<16x128xf32>
    %50 = vector.extract_strided_slice %18 {offsets = [0, 128], sizes = [16, 128], strides = [1, 1]} : vector<16x512xf32> to vector<16x128xf32>
    %51 = arith.negf %50 : vector<16x128xf32>
    %52 = math.exp %51 : vector<16x128xf32>
    %cst_22 = arith.constant 1.000000e+00 : f32
    %53 = vector.broadcast %cst_22 : f32 to vector<16x128xf32>
    %54 = arith.addf %53, %52 : vector<16x128xf32>
    %55 = arith.divf %53, %54 : vector<16x128xf32>
    %56 = vector.extract_strided_slice %18 {offsets = [0, 256], sizes = [16, 128], strides = [1, 1]} : vector<16x512xf32> to vector<16x128xf32>
    %57 = math.tanh %56 : vector<16x128xf32>
    %58 = vector.extract_strided_slice %18 {offsets = [0, 384], sizes = [16, 128], strides = [1, 1]} : vector<16x512xf32> to vector<16x128xf32>
    %59 = arith.negf %58 : vector<16x128xf32>
    %60 = math.exp %59 : vector<16x128xf32>
    %cst_23 = arith.constant 1.000000e+00 : f32
    %61 = vector.broadcast %cst_23 : f32 to vector<16x128xf32>
    %62 = arith.addf %61, %60 : vector<16x128xf32>
    %63 = arith.divf %61, %62 : vector<16x128xf32>
    %64 = arith.mulf %55, %14 : vector<16x128xf32>
    %65 = arith.mulf %49, %57 : vector<16x128xf32>
    %66 = arith.addf %64, %65 : vector<16x128xf32>
    %67 = math.tanh %66 : vector<16x128xf32>
    %68 = arith.mulf %63, %67 : vector<16x128xf32>
    %69 = arith.truncf %43 : vector<16x128xf32> to vector<16x128xbf16>
    %70 = arith.truncf %68 : vector<16x128xf32> to vector<16x128xbf16>
    %c16_i32 = arith.constant 16 : i32
    %71 = arith.muli %c0_i32, %c16_i32 : i32
    %72 = tpu.assume_multiple %71, 16 : i32
    %c7_i32 = arith.constant 7 : i32
    %73 = arith.subi %c7_i32, %c0_i32 : i32
    %c16_i32_24 = arith.constant 16 : i32
    %74 = arith.muli %73, %c16_i32_24 : i32
    %75 = tpu.assume_multiple %74, 16 : i32
    %76 = arith.index_cast %72 : i32 to index
    %c0_25 = arith.constant 0 : index
    %77 = vector.load %arg8[%76, %c0_25] : memref<128x256xbf16, #tpu.memory_space<vmem>>, vector<16x128xbf16>
    tpu.vector_store %arg8[%76, %c0_25], %69 {strides = array<i32>} : memref<128x256xbf16, #tpu.memory_space<vmem>>, vector<16x128xbf16>,
    %78 = arith.index_cast %75 : i32 to index
    %c128 = arith.constant 128 : index
    %79 = vector.load %arg8[%78, %c128] : memref<128x256xbf16, #tpu.memory_space<vmem>>, vector<16x128xbf16>
    tpu.vector_store %arg8[%78, %c128], %70 {strides = array<i32>} : memref<128x256xbf16, #tpu.memory_space<vmem>>, vector<16x128xbf16>,
    %c1_i32 = arith.constant 1 : i32
    %cst_26 = arith.constant dense<0.000000e+00> : vector<16x512xf32>
    %80 = tpu.matmul %69, %11, %cst_26 {dimension_numbers = #tpu.dot_dimension_numbers<[1], [0], [0], [1], [0, 0, 1, 1], [], []>} : vector<16x128xbf16>, vector<128x512xbf16>, vector<16x512xf32> -> vector<16x512xf32>
    %81 = arith.addf %80, %5 : vector<16x512xf32>
    %cst_27 = arith.constant dense<0.000000e+00> : vector<16x512xf32>
    %82 = tpu.matmul %70, %12, %cst_27 {dimension_numbers = #tpu.dot_dimension_numbers<[1], [0], [0], [1], [0, 0, 1, 1], [], []>} : vector<16x128xbf16>, vector<128x512xbf16>, vector<16x512xf32> -> vector<16x512xf32>
    %83 = arith.addf %82, %10 : vector<16x512xf32>
    %84 = vector.extract_strided_slice %81 {offsets = [0, 0], sizes = [16, 128], strides = [1, 1]} : vector<16x512xf32> to vector<16x128xf32>
    %85 = arith.negf %84 : vector<16x128xf32>
    %86 = math.exp %85 : vector<16x128xf32>
    %cst_28 = arith.constant 1.000000e+00 : f32
    %87 = vector.broadcast %cst_28 : f32 to vector<16x128xf32>
    %88 = arith.addf %87, %86 : vector<16x128xf32>
    %89 = arith.divf %87, %88 : vector<16x128xf32>
    %90 = vector.extract_strided_slice %81 {offsets = [0, 128], sizes = [16, 128], strides = [1, 1]} : vector<16x512xf32> to vector<16x128xf32>
    %91 = arith.negf %90 : vector<16x128xf32>
    %92 = math.exp %91 : vector<16x128xf32>
    %cst_29 = arith.constant 1.000000e+00 : f32
    %93 = vector.broadcast %cst_29 : f32 to vector<16x128xf32>
    %94 = arith.addf %93, %92 : vector<16x128xf32>
    %95 = arith.divf %93, %94 : vector<16x128xf32>
    %96 = vector.extract_strided_slice %81 {offsets = [0, 256], sizes = [16, 128], strides = [1, 1]} : vector<16x512xf32> to vector<16x128xf32>
    %97 = math.tanh %96 : vector<16x128xf32>
    %98 = vector.extract_strided_slice %81 {offsets = [0, 384], sizes = [16, 128], strides = [1, 1]} : vector<16x512xf32> to vector<16x128xf32>
    %99 = arith.negf %98 : vector<16x128xf32>
    %100 = math.exp %99 : vector<16x128xf32>
    %cst_30 = arith.constant 1.000000e+00 : f32
    %101 = vector.broadcast %cst_30 : f32 to vector<16x128xf32>
    %102 = arith.addf %101, %100 : vector<16x128xf32>
    %103 = arith.divf %101, %102 : vector<16x128xf32>
    %104 = arith.mulf %95, %41 : vector<16x128xf32>
    %105 = arith.mulf %89, %97 : vector<16x128xf32>
    %106 = arith.addf %104, %105 : vector<16x128xf32>
    %107 = math.tanh %106 : vector<16x128xf32>
    %108 = arith.mulf %103, %107 : vector<16x128xf32>
    %109 = vector.extract_strided_slice %83 {offsets = [0, 0], sizes = [16, 128], strides = [1, 1]} : vector<16x512xf32> to vector<16x128xf32>
    %110 = arith.negf %109 : vector<16x128xf32>
    %111 = math.exp %110 : vector<16x128xf32>
    %cst_31 = arith.constant 1.000000e+00 : f32
    %112 = vector.broadcast %cst_31 : f32 to vector<16x128xf32>
    %113 = arith.addf %112, %111 : vector<16x128xf32>
    %114 = arith.divf %112, %113 : vector<16x128xf32>
    %115 = vector.extract_strided_slice %83 {offsets = [0, 128], sizes = [16, 128], strides = [1, 1]} : vector<16x512xf32> to vector<16x128xf32>
    %116 = arith.negf %115 : vector<16x128xf32>
    %117 = math.exp %116 : vector<16x128xf32>
    %cst_32 = arith.constant 1.000000e+00 : f32
    %118 = vector.broadcast %cst_32 : f32 to vector<16x128xf32>
    %119 = arith.addf %118, %117 : vector<16x128xf32>
    %120 = arith.divf %118, %119 : vector<16x128xf32>
    %121 = vector.extract_strided_slice %83 {offsets = [0, 256], sizes = [16, 128], strides = [1, 1]} : vector<16x512xf32> to vector<16x128xf32>
    %122 = math.tanh %121 : vector<16x128xf32>
    %123 = vector.extract_strided_slice %83 {offsets = [0, 384], sizes = [16, 128], strides = [1, 1]} : vector<16x512xf32> to vector<16x128xf32>
    %124 = arith.negf %123 : vector<16x128xf32>
    %125 = math.exp %124 : vector<16x128xf32>
    %cst_33 = arith.constant 1.000000e+00 : f32
    %126 = vector.broadcast %cst_33 : f32 to vector<16x128xf32>
    %127 = arith.addf %126, %125 : vector<16x128xf32>
    %128 = arith.divf %126, %127 : vector<16x128xf32>
    %129 = arith.mulf %120, %66 : vector<16x128xf32>
    %130 = arith.mulf %114, %122 : vector<16x128xf32>
    %131 = arith.addf %129, %130 : vector<16x128xf32>
    %132 = math.tanh %131 : vector<16x128xf32>
    %133 = arith.mulf %128, %132 : vector<16x128xf32>
    %134 = arith.truncf %108 : vector<16x128xf32> to vector<16x128xbf16>
    %135 = arith.truncf %133 : vector<16x128xf32> to vector<16x128xbf16>
    %c16_i32_34 = arith.constant 16 : i32
    %136 = arith.muli %c1_i32, %c16_i32_34 : i32
    %137 = tpu.assume_multiple %136, 16 : i32
    %c7_i32_35 = arith.constant 7 : i32
    %138 = arith.subi %c7_i32_35, %c1_i32 : i32
    %c16_i32_36 = arith.constant 16 : i32
    %139 = arith.muli %138, %c16_i32_36 : i32
    %140 = tpu.assume_multiple %139, 16 : i32
    %141 = arith.index_cast %137 : i32 to index
    %c0_37 = arith.constant 0 : index
    %142 = vector.load %arg8[%141, %c0_37] : memref<128x256xbf16, #tpu.memory_space<vmem>>, vector<16x128xbf16>
    tpu.vector_store %arg8[%141, %c0_37], %134 {strides = array<i32>} : memref<128x256xbf16, #tpu.memory_space<vmem>>, vector<16x128xbf16>,
    %143 = arith.index_cast %140 : i32 to index
    %c128_38 = arith.constant 128 : index
    %144 = vector.load %arg8[%143, %c128_38] : memref<128x256xbf16, #tpu.memory_space<vmem>>, vector<16x128xbf16>
    tpu.vector_store %arg8[%143, %c128_38], %135 {strides = array<i32>} : memref<128x256xbf16, #tpu.memory_space<vmem>>, vector<16x128xbf16>,
    %c2_i32 = arith.constant 2 : i32
    %cst_39 = arith.constant dense<0.000000e+00> : vector<16x512xf32>
    %145 = tpu.matmul %134, %11, %cst_39 {dimension_numbers = #tpu.dot_dimension_numbers<[1], [0], [0], [1], [0, 0, 1, 1], [], []>} : vector<16x128xbf16>, vector<128x512xbf16>, vector<16x512xf32> -> vector<16x512xf32>
    %146 = arith.addf %145, %5 : vector<16x512xf32>
    %cst_40 = arith.constant dense<0.000000e+00> : vector<16x512xf32>
    %147 = tpu.matmul %135, %12, %cst_40 {dimension_numbers = #tpu.dot_dimension_numbers<[1], [0], [0], [1], [0, 0, 1, 1], [], []>} : vector<16x128xbf16>, vector<128x512xbf16>, vector<16x512xf32> -> vector<16x512xf32>
    %148 = arith.addf %147, %10 : vector<16x512xf32>
    %149 = vector.extract_strided_slice %146 {offsets = [0, 0], sizes = [16, 128], strides = [1, 1]} : vector<16x512xf32> to vector<16x128xf32>
    %150 = arith.negf %149 : vector<16x128xf32>
    %151 = math.exp %150 : vector<16x128xf32>
    %cst_41 = arith.constant 1.000000e+00 : f32
    %152 = vector.broadcast %cst_41 : f32 to vector<16x128xf32>
    %153 = arith.addf %152, %151 : vector<16x128xf32>
    %154 = arith.divf %152, %153 : vector<16x128xf32>
    %155 = vector.extract_strided_slice %146 {offsets = [0, 128], sizes = [16, 128], strides = [1, 1]} : vector<16x512xf32> to vector<16x128xf32>
    %156 = arith.negf %155 : vector<16x128xf32>
    %157 = math.exp %156 : vector<16x128xf32>
    %cst_42 = arith.constant 1.000000e+00 : f32
    %158 = vector.broadcast %cst_42 : f32 to vector<16x128xf32>
    %159 = arith.addf %158, %157 : vector<16x128xf32>
    %160 = arith.divf %158, %159 : vector<16x128xf32>
    %161 = vector.extract_strided_slice %146 {offsets = [0, 256], sizes = [16, 128], strides = [1, 1]} : vector<16x512xf32> to vector<16x128xf32>
    %162 = math.tanh %161 : vector<16x128xf32>
    %163 = vector.extract_strided_slice %146 {offsets = [0, 384], sizes = [16, 128], strides = [1, 1]} : vector<16x512xf32> to vector<16x128xf32>
    %164 = arith.negf %163 : vector<16x128xf32>
    %165 = math.exp %164 : vector<16x128xf32>
    %cst_43 = arith.constant 1.000000e+00 : f32
    %166 = vector.broadcast %cst_43 : f32 to vector<16x128xf32>
    %167 = arith.addf %166, %165 : vector<16x128xf32>
    %168 = arith.divf %166, %167 : vector<16x128xf32>
    %169 = arith.mulf %160, %106 : vector<16x128xf32>
    %170 = arith.mulf %154, %162 : vector<16x128xf32>
    %171 = arith.addf %169, %170 : vector<16x128xf32>
    %172 = math.tanh %171 : vector<16x128xf32>
    %173 = arith.mulf %168, %172 : vector<16x128xf32>
    %174 = vector.extract_strided_slice %148 {offsets = [0, 0], sizes = [16, 128], strides = [1, 1]} : vector<16x512xf32> to vector<16x128xf32>
    %175 = arith.negf %174 : vector<16x128xf32>
    %176 = math.exp %175 : vector<16x128xf32>
    %cst_44 = arith.constant 1.000000e+00 : f32
    %177 = vector.broadcast %cst_44 : f32 to vector<16x128xf32>
    %178 = arith.addf %177, %176 : vector<16x128xf32>
    %179 = arith.divf %177, %178 : vector<16x128xf32>
    %180 = vector.extract_strided_slice %148 {offsets = [0, 128], sizes = [16, 128], strides = [1, 1]} : vector<16x512xf32> to vector<16x128xf32>
    %181 = arith.negf %180 : vector<16x128xf32>
    %182 = math.exp %181 : vector<16x128xf32>
    %cst_45 = arith.constant 1.000000e+00 : f32
    %183 = vector.broadcast %cst_45 : f32 to vector<16x128xf32>
    %184 = arith.addf %183, %182 : vector<16x128xf32>
    %185 = arith.divf %183, %184 : vector<16x128xf32>
    %186 = vector.extract_strided_slice %148 {offsets = [0, 256], sizes = [16, 128], strides = [1, 1]} : vector<16x512xf32> to vector<16x128xf32>
    %187 = math.tanh %186 : vector<16x128xf32>
    %188 = vector.extract_strided_slice %148 {offsets = [0, 384], sizes = [16, 128], strides = [1, 1]} : vector<16x512xf32> to vector<16x128xf32>
    %189 = arith.negf %188 : vector<16x128xf32>
    %190 = math.exp %189 : vector<16x128xf32>
    %cst_46 = arith.constant 1.000000e+00 : f32
    %191 = vector.broadcast %cst_46 : f32 to vector<16x128xf32>
    %192 = arith.addf %191, %190 : vector<16x128xf32>
    %193 = arith.divf %191, %192 : vector<16x128xf32>
    %194 = arith.mulf %185, %131 : vector<16x128xf32>
    %195 = arith.mulf %179, %187 : vector<16x128xf32>
    %196 = arith.addf %194, %195 : vector<16x128xf32>
    %197 = math.tanh %196 : vector<16x128xf32>
    %198 = arith.mulf %193, %197 : vector<16x128xf32>
    %199 = arith.truncf %173 : vector<16x128xf32> to vector<16x128xbf16>
    %200 = arith.truncf %198 : vector<16x128xf32> to vector<16x128xbf16>
    %c16_i32_47 = arith.constant 16 : i32
    %201 = arith.muli %c2_i32, %c16_i32_47 : i32
    %202 = tpu.assume_multiple %201, 16 : i32
    %c7_i32_48 = arith.constant 7 : i32
    %203 = arith.subi %c7_i32_48, %c2_i32 : i32
    %c16_i32_49 = arith.constant 16 : i32
    %204 = arith.muli %203, %c16_i32_49 : i32
    %205 = tpu.assume_multiple %204, 16 : i32
    %206 = arith.index_cast %202 : i32 to index
    %c0_50 = arith.constant 0 : index
    %207 = vector.load %arg8[%206, %c0_50] : memref<128x256xbf16, #tpu.memory_space<vmem>>, vector<16x128xbf16>
    tpu.vector_store %arg8[%206, %c0_50], %199 {strides = array<i32>} : memref<128x256xbf16, #tpu.memory_space<vmem>>, vector<16x128xbf16>,
    %208 = arith.index_cast %205 : i32 to index
    %c128_51 = arith.constant 128 : index
    %209 = vector.load %arg8[%208, %c128_51] : memref<128x256xbf16, #tpu.memory_space<vmem>>, vector<16x128xbf16>
    tpu.vector_store %arg8[%208, %c128_51], %200 {strides = array<i32>} : memref<128x256xbf16, #tpu.memory_space<vmem>>, vector<16x128xbf16>,
    %c3_i32 = arith.constant 3 : i32
    %cst_52 = arith.constant dense<0.000000e+00> : vector<16x512xf32>
    %210 = tpu.matmul %199, %11, %cst_52 {dimension_numbers = #tpu.dot_dimension_numbers<[1], [0], [0], [1], [0, 0, 1, 1], [], []>} : vector<16x128xbf16>, vector<128x512xbf16>, vector<16x512xf32> -> vector<16x512xf32>
    %211 = arith.addf %210, %5 : vector<16x512xf32>
    %cst_53 = arith.constant dense<0.000000e+00> : vector<16x512xf32>
    %212 = tpu.matmul %200, %12, %cst_53 {dimension_numbers = #tpu.dot_dimension_numbers<[1], [0], [0], [1], [0, 0, 1, 1], [], []>} : vector<16x128xbf16>, vector<128x512xbf16>, vector<16x512xf32> -> vector<16x512xf32>
    %213 = arith.addf %212, %10 : vector<16x512xf32>
    %214 = vector.extract_strided_slice %211 {offsets = [0, 0], sizes = [16, 128], strides = [1, 1]} : vector<16x512xf32> to vector<16x128xf32>
    %215 = arith.negf %214 : vector<16x128xf32>
    %216 = math.exp %215 : vector<16x128xf32>
    %cst_54 = arith.constant 1.000000e+00 : f32
    %217 = vector.broadcast %cst_54 : f32 to vector<16x128xf32>
    %218 = arith.addf %217, %216 : vector<16x128xf32>
    %219 = arith.divf %217, %218 : vector<16x128xf32>
    %220 = vector.extract_strided_slice %211 {offsets = [0, 128], sizes = [16, 128], strides = [1, 1]} : vector<16x512xf32> to vector<16x128xf32>
    %221 = arith.negf %220 : vector<16x128xf32>
    %222 = math.exp %221 : vector<16x128xf32>
    %cst_55 = arith.constant 1.000000e+00 : f32
    %223 = vector.broadcast %cst_55 : f32 to vector<16x128xf32>
    %224 = arith.addf %223, %222 : vector<16x128xf32>
    %225 = arith.divf %223, %224 : vector<16x128xf32>
    %226 = vector.extract_strided_slice %211 {offsets = [0, 256], sizes = [16, 128], strides = [1, 1]} : vector<16x512xf32> to vector<16x128xf32>
    %227 = math.tanh %226 : vector<16x128xf32>
    %228 = vector.extract_strided_slice %211 {offsets = [0, 384], sizes = [16, 128], strides = [1, 1]} : vector<16x512xf32> to vector<16x128xf32>
    %229 = arith.negf %228 : vector<16x128xf32>
    %230 = math.exp %229 : vector<16x128xf32>
    %cst_56 = arith.constant 1.000000e+00 : f32
    %231 = vector.broadcast %cst_56 : f32 to vector<16x128xf32>
    %232 = arith.addf %231, %230 : vector<16x128xf32>
    %233 = arith.divf %231, %232 : vector<16x128xf32>
    %234 = arith.mulf %225, %171 : vector<16x128xf32>
    %235 = arith.mulf %219, %227 : vector<16x128xf32>
    %236 = arith.addf %234, %235 : vector<16x128xf32>
    %237 = math.tanh %236 : vector<16x128xf32>
    %238 = arith.mulf %233, %237 : vector<16x128xf32>
    %239 = vector.extract_strided_slice %213 {offsets = [0, 0], sizes = [16, 128], strides = [1, 1]} : vector<16x512xf32> to vector<16x128xf32>
    %240 = arith.negf %239 : vector<16x128xf32>
    %241 = math.exp %240 : vector<16x128xf32>
    %cst_57 = arith.constant 1.000000e+00 : f32
    %242 = vector.broadcast %cst_57 : f32 to vector<16x128xf32>
    %243 = arith.addf %242, %241 : vector<16x128xf32>
    %244 = arith.divf %242, %243 : vector<16x128xf32>
    %245 = vector.extract_strided_slice %213 {offsets = [0, 128], sizes = [16, 128], strides = [1, 1]} : vector<16x512xf32> to vector<16x128xf32>
    %246 = arith.negf %245 : vector<16x128xf32>
    %247 = math.exp %246 : vector<16x128xf32>
    %cst_58 = arith.constant 1.000000e+00 : f32
    %248 = vector.broadcast %cst_58 : f32 to vector<16x128xf32>
    %249 = arith.addf %248, %247 : vector<16x128xf32>
    %250 = arith.divf %248, %249 : vector<16x128xf32>
    %251 = vector.extract_strided_slice %213 {offsets = [0, 256], sizes = [16, 128], strides = [1, 1]} : vector<16x512xf32> to vector<16x128xf32>
    %252 = math.tanh %251 : vector<16x128xf32>
    %253 = vector.extract_strided_slice %213 {offsets = [0, 384], sizes = [16, 128], strides = [1, 1]} : vector<16x512xf32> to vector<16x128xf32>
    %254 = arith.negf %253 : vector<16x128xf32>
    %255 = math.exp %254 : vector<16x128xf32>
    %cst_59 = arith.constant 1.000000e+00 : f32
    %256 = vector.broadcast %cst_59 : f32 to vector<16x128xf32>
    %257 = arith.addf %256, %255 : vector<16x128xf32>
    %258 = arith.divf %256, %257 : vector<16x128xf32>
    %259 = arith.mulf %250, %196 : vector<16x128xf32>
    %260 = arith.mulf %244, %252 : vector<16x128xf32>
    %261 = arith.addf %259, %260 : vector<16x128xf32>
    %262 = math.tanh %261 : vector<16x128xf32>
    %263 = arith.mulf %258, %262 : vector<16x128xf32>
    %264 = arith.truncf %238 : vector<16x128xf32> to vector<16x128xbf16>
    %265 = arith.truncf %263 : vector<16x128xf32> to vector<16x128xbf16>
    %c16_i32_60 = arith.constant 16 : i32
    %266 = arith.muli %c3_i32, %c16_i32_60 : i32
    %267 = tpu.assume_multiple %266, 16 : i32
    %c7_i32_61 = arith.constant 7 : i32
    %268 = arith.subi %c7_i32_61, %c3_i32 : i32
    %c16_i32_62 = arith.constant 16 : i32
    %269 = arith.muli %268, %c16_i32_62 : i32
    %270 = tpu.assume_multiple %269, 16 : i32
    %271 = arith.index_cast %267 : i32 to index
    %c0_63 = arith.constant 0 : index
    %272 = vector.load %arg8[%271, %c0_63] : memref<128x256xbf16, #tpu.memory_space<vmem>>, vector<16x128xbf16>
    tpu.vector_store %arg8[%271, %c0_63], %264 {strides = array<i32>} : memref<128x256xbf16, #tpu.memory_space<vmem>>, vector<16x128xbf16>,
    %273 = arith.index_cast %270 : i32 to index
    %c128_64 = arith.constant 128 : index
    %274 = vector.load %arg8[%273, %c128_64] : memref<128x256xbf16, #tpu.memory_space<vmem>>, vector<16x128xbf16>
    tpu.vector_store %arg8[%273, %c128_64], %265 {strides = array<i32>} : memref<128x256xbf16, #tpu.memory_space<vmem>>, vector<16x128xbf16>,
    %c4_i32 = arith.constant 4 : i32
    %cst_65 = arith.constant dense<0.000000e+00> : vector<16x512xf32>
    %275 = tpu.matmul %264, %11, %cst_65 {dimension_numbers = #tpu.dot_dimension_numbers<[1], [0], [0], [1], [0, 0, 1, 1], [], []>} : vector<16x128xbf16>, vector<128x512xbf16>, vector<16x512xf32> -> vector<16x512xf32>
    %276 = arith.addf %275, %5 : vector<16x512xf32>
    %cst_66 = arith.constant dense<0.000000e+00> : vector<16x512xf32>
    %277 = tpu.matmul %265, %12, %cst_66 {dimension_numbers = #tpu.dot_dimension_numbers<[1], [0], [0], [1], [0, 0, 1, 1], [], []>} : vector<16x128xbf16>, vector<128x512xbf16>, vector<16x512xf32> -> vector<16x512xf32>
    %278 = arith.addf %277, %10 : vector<16x512xf32>
    %279 = vector.extract_strided_slice %276 {offsets = [0, 0], sizes = [16, 128], strides = [1, 1]} : vector<16x512xf32> to vector<16x128xf32>
    %280 = arith.negf %279 : vector<16x128xf32>
    %281 = math.exp %280 : vector<16x128xf32>
    %cst_67 = arith.constant 1.000000e+00 : f32
    %282 = vector.broadcast %cst_67 : f32 to vector<16x128xf32>
    %283 = arith.addf %282, %281 : vector<16x128xf32>
    %284 = arith.divf %282, %283 : vector<16x128xf32>
    %285 = vector.extract_strided_slice %276 {offsets = [0, 128], sizes = [16, 128], strides = [1, 1]} : vector<16x512xf32> to vector<16x128xf32>
    %286 = arith.negf %285 : vector<16x128xf32>
    %287 = math.exp %286 : vector<16x128xf32>
    %cst_68 = arith.constant 1.000000e+00 : f32
    %288 = vector.broadcast %cst_68 : f32 to vector<16x128xf32>
    %289 = arith.addf %288, %287 : vector<16x128xf32>
    %290 = arith.divf %288, %289 : vector<16x128xf32>
    %291 = vector.extract_strided_slice %276 {offsets = [0, 256], sizes = [16, 128], strides = [1, 1]} : vector<16x512xf32> to vector<16x128xf32>
    %292 = math.tanh %291 : vector<16x128xf32>
    %293 = vector.extract_strided_slice %276 {offsets = [0, 384], sizes = [16, 128], strides = [1, 1]} : vector<16x512xf32> to vector<16x128xf32>
    %294 = arith.negf %293 : vector<16x128xf32>
    %295 = math.exp %294 : vector<16x128xf32>
    %cst_69 = arith.constant 1.000000e+00 : f32
    %296 = vector.broadcast %cst_69 : f32 to vector<16x128xf32>
    %297 = arith.addf %296, %295 : vector<16x128xf32>
    %298 = arith.divf %296, %297 : vector<16x128xf32>
    %299 = arith.mulf %290, %236 : vector<16x128xf32>
    %300 = arith.mulf %284, %292 : vector<16x128xf32>
    %301 = arith.addf %299, %300 : vector<16x128xf32>
    %302 = math.tanh %301 : vector<16x128xf32>
    %303 = arith.mulf %298, %302 : vector<16x128xf32>
    %304 = vector.extract_strided_slice %278 {offsets = [0, 0], sizes = [16, 128], strides = [1, 1]} : vector<16x512xf32> to vector<16x128xf32>
    %305 = arith.negf %304 : vector<16x128xf32>
    %306 = math.exp %305 : vector<16x128xf32>
    %cst_70 = arith.constant 1.000000e+00 : f32
    %307 = vector.broadcast %cst_70 : f32 to vector<16x128xf32>
    %308 = arith.addf %307, %306 : vector<16x128xf32>
    %309 = arith.divf %307, %308 : vector<16x128xf32>
    %310 = vector.extract_strided_slice %278 {offsets = [0, 128], sizes = [16, 128], strides = [1, 1]} : vector<16x512xf32> to vector<16x128xf32>
    %311 = arith.negf %310 : vector<16x128xf32>
    %312 = math.exp %311 : vector<16x128xf32>
    %cst_71 = arith.constant 1.000000e+00 : f32
    %313 = vector.broadcast %cst_71 : f32 to vector<16x128xf32>
    %314 = arith.addf %313, %312 : vector<16x128xf32>
    %315 = arith.divf %313, %314 : vector<16x128xf32>
    %316 = vector.extract_strided_slice %278 {offsets = [0, 256], sizes = [16, 128], strides = [1, 1]} : vector<16x512xf32> to vector<16x128xf32>
    %317 = math.tanh %316 : vector<16x128xf32>
    %318 = vector.extract_strided_slice %278 {offsets = [0, 384], sizes = [16, 128], strides = [1, 1]} : vector<16x512xf32> to vector<16x128xf32>
    %319 = arith.negf %318 : vector<16x128xf32>
    %320 = math.exp %319 : vector<16x128xf32>
    %cst_72 = arith.constant 1.000000e+00 : f32
    %321 = vector.broadcast %cst_72 : f32 to vector<16x128xf32>
    %322 = arith.addf %321, %320 : vector<16x128xf32>
    %323 = arith.divf %321, %322 : vector<16x128xf32>
    %324 = arith.mulf %315, %261 : vector<16x128xf32>
    %325 = arith.mulf %309, %317 : vector<16x128xf32>
    %326 = arith.addf %324, %325 : vector<16x128xf32>
    %327 = math.tanh %326 : vector<16x128xf32>
    %328 = arith.mulf %323, %327 : vector<16x128xf32>
    %329 = arith.truncf %303 : vector<16x128xf32> to vector<16x128xbf16>
    %330 = arith.truncf %328 : vector<16x128xf32> to vector<16x128xbf16>
    %c16_i32_73 = arith.constant 16 : i32
    %331 = arith.muli %c4_i32, %c16_i32_73 : i32
    %332 = tpu.assume_multiple %331, 16 : i32
    %c7_i32_74 = arith.constant 7 : i32
    %333 = arith.subi %c7_i32_74, %c4_i32 : i32
    %c16_i32_75 = arith.constant 16 : i32
    %334 = arith.muli %333, %c16_i32_75 : i32
    %335 = tpu.assume_multiple %334, 16 : i32
    %336 = arith.index_cast %332 : i32 to index
    %c0_76 = arith.constant 0 : index
    %337 = vector.load %arg8[%336, %c0_76] : memref<128x256xbf16, #tpu.memory_space<vmem>>, vector<16x128xbf16>
    tpu.vector_store %arg8[%336, %c0_76], %329 {strides = array<i32>} : memref<128x256xbf16, #tpu.memory_space<vmem>>, vector<16x128xbf16>,
    %338 = arith.index_cast %335 : i32 to index
    %c128_77 = arith.constant 128 : index
    %339 = vector.load %arg8[%338, %c128_77] : memref<128x256xbf16, #tpu.memory_space<vmem>>, vector<16x128xbf16>
    tpu.vector_store %arg8[%338, %c128_77], %330 {strides = array<i32>} : memref<128x256xbf16, #tpu.memory_space<vmem>>, vector<16x128xbf16>,
    %c5_i32 = arith.constant 5 : i32
    %cst_78 = arith.constant dense<0.000000e+00> : vector<16x512xf32>
    %340 = tpu.matmul %329, %11, %cst_78 {dimension_numbers = #tpu.dot_dimension_numbers<[1], [0], [0], [1], [0, 0, 1, 1], [], []>} : vector<16x128xbf16>, vector<128x512xbf16>, vector<16x512xf32> -> vector<16x512xf32>
    %341 = arith.addf %340, %5 : vector<16x512xf32>
    %cst_79 = arith.constant dense<0.000000e+00> : vector<16x512xf32>
    %342 = tpu.matmul %330, %12, %cst_79 {dimension_numbers = #tpu.dot_dimension_numbers<[1], [0], [0], [1], [0, 0, 1, 1], [], []>} : vector<16x128xbf16>, vector<128x512xbf16>, vector<16x512xf32> -> vector<16x512xf32>
    %343 = arith.addf %342, %10 : vector<16x512xf32>
    %344 = vector.extract_strided_slice %341 {offsets = [0, 0], sizes = [16, 128], strides = [1, 1]} : vector<16x512xf32> to vector<16x128xf32>
    %345 = arith.negf %344 : vector<16x128xf32>
    %346 = math.exp %345 : vector<16x128xf32>
    %cst_80 = arith.constant 1.000000e+00 : f32
    %347 = vector.broadcast %cst_80 : f32 to vector<16x128xf32>
    %348 = arith.addf %347, %346 : vector<16x128xf32>
    %349 = arith.divf %347, %348 : vector<16x128xf32>
    %350 = vector.extract_strided_slice %341 {offsets = [0, 128], sizes = [16, 128], strides = [1, 1]} : vector<16x512xf32> to vector<16x128xf32>
    %351 = arith.negf %350 : vector<16x128xf32>
    %352 = math.exp %351 : vector<16x128xf32>
    %cst_81 = arith.constant 1.000000e+00 : f32
    %353 = vector.broadcast %cst_81 : f32 to vector<16x128xf32>
    %354 = arith.addf %353, %352 : vector<16x128xf32>
    %355 = arith.divf %353, %354 : vector<16x128xf32>
    %356 = vector.extract_strided_slice %341 {offsets = [0, 256], sizes = [16, 128], strides = [1, 1]} : vector<16x512xf32> to vector<16x128xf32>
    %357 = math.tanh %356 : vector<16x128xf32>
    %358 = vector.extract_strided_slice %341 {offsets = [0, 384], sizes = [16, 128], strides = [1, 1]} : vector<16x512xf32> to vector<16x128xf32>
    %359 = arith.negf %358 : vector<16x128xf32>
    %360 = math.exp %359 : vector<16x128xf32>
    %cst_82 = arith.constant 1.000000e+00 : f32
    %361 = vector.broadcast %cst_82 : f32 to vector<16x128xf32>
    %362 = arith.addf %361, %360 : vector<16x128xf32>
    %363 = arith.divf %361, %362 : vector<16x128xf32>
    %364 = arith.mulf %355, %301 : vector<16x128xf32>
    %365 = arith.mulf %349, %357 : vector<16x128xf32>
    %366 = arith.addf %364, %365 : vector<16x128xf32>
    %367 = math.tanh %366 : vector<16x128xf32>
    %368 = arith.mulf %363, %367 : vector<16x128xf32>
    %369 = vector.extract_strided_slice %343 {offsets = [0, 0], sizes = [16, 128], strides = [1, 1]} : vector<16x512xf32> to vector<16x128xf32>
    %370 = arith.negf %369 : vector<16x128xf32>
    %371 = math.exp %370 : vector<16x128xf32>
    %cst_83 = arith.constant 1.000000e+00 : f32
    %372 = vector.broadcast %cst_83 : f32 to vector<16x128xf32>
    %373 = arith.addf %372, %371 : vector<16x128xf32>
    %374 = arith.divf %372, %373 : vector<16x128xf32>
    %375 = vector.extract_strided_slice %343 {offsets = [0, 128], sizes = [16, 128], strides = [1, 1]} : vector<16x512xf32> to vector<16x128xf32>
    %376 = arith.negf %375 : vector<16x128xf32>
    %377 = math.exp %376 : vector<16x128xf32>
    %cst_84 = arith.constant 1.000000e+00 : f32
    %378 = vector.broadcast %cst_84 : f32 to vector<16x128xf32>
    %379 = arith.addf %378, %377 : vector<16x128xf32>
    %380 = arith.divf %378, %379 : vector<16x128xf32>
    %381 = vector.extract_strided_slice %343 {offsets = [0, 256], sizes = [16, 128], strides = [1, 1]} : vector<16x512xf32> to vector<16x128xf32>
    %382 = math.tanh %381 : vector<16x128xf32>
    %383 = vector.extract_strided_slice %343 {offsets = [0, 384], sizes = [16, 128], strides = [1, 1]} : vector<16x512xf32> to vector<16x128xf32>
    %384 = arith.negf %383 : vector<16x128xf32>
    %385 = math.exp %384 : vector<16x128xf32>
    %cst_85 = arith.constant 1.000000e+00 : f32
    %386 = vector.broadcast %cst_85 : f32 to vector<16x128xf32>
    %387 = arith.addf %386, %385 : vector<16x128xf32>
    %388 = arith.divf %386, %387 : vector<16x128xf32>
    %389 = arith.mulf %380, %326 : vector<16x128xf32>
    %390 = arith.mulf %374, %382 : vector<16x128xf32>
    %391 = arith.addf %389, %390 : vector<16x128xf32>
    %392 = math.tanh %391 : vector<16x128xf32>
    %393 = arith.mulf %388, %392 : vector<16x128xf32>
    %394 = arith.truncf %368 : vector<16x128xf32> to vector<16x128xbf16>
    %395 = arith.truncf %393 : vector<16x128xf32> to vector<16x128xbf16>
    %c16_i32_86 = arith.constant 16 : i32
    %396 = arith.muli %c5_i32, %c16_i32_86 : i32
    %397 = tpu.assume_multiple %396, 16 : i32
    %c7_i32_87 = arith.constant 7 : i32
    %398 = arith.subi %c7_i32_87, %c5_i32 : i32
    %c16_i32_88 = arith.constant 16 : i32
    %399 = arith.muli %398, %c16_i32_88 : i32
    %400 = tpu.assume_multiple %399, 16 : i32
    %401 = arith.index_cast %397 : i32 to index
    %c0_89 = arith.constant 0 : index
    %402 = vector.load %arg8[%401, %c0_89] : memref<128x256xbf16, #tpu.memory_space<vmem>>, vector<16x128xbf16>
    tpu.vector_store %arg8[%401, %c0_89], %394 {strides = array<i32>} : memref<128x256xbf16, #tpu.memory_space<vmem>>, vector<16x128xbf16>,
    %403 = arith.index_cast %400 : i32 to index
    %c128_90 = arith.constant 128 : index
    %404 = vector.load %arg8[%403, %c128_90] : memref<128x256xbf16, #tpu.memory_space<vmem>>, vector<16x128xbf16>
    tpu.vector_store %arg8[%403, %c128_90], %395 {strides = array<i32>} : memref<128x256xbf16, #tpu.memory_space<vmem>>, vector<16x128xbf16>,
    %c6_i32 = arith.constant 6 : i32
    %cst_91 = arith.constant dense<0.000000e+00> : vector<16x512xf32>
    %405 = tpu.matmul %394, %11, %cst_91 {dimension_numbers = #tpu.dot_dimension_numbers<[1], [0], [0], [1], [0, 0, 1, 1], [], []>} : vector<16x128xbf16>, vector<128x512xbf16>, vector<16x512xf32> -> vector<16x512xf32>
    %406 = arith.addf %405, %5 : vector<16x512xf32>
    %cst_92 = arith.constant dense<0.000000e+00> : vector<16x512xf32>
    %407 = tpu.matmul %395, %12, %cst_92 {dimension_numbers = #tpu.dot_dimension_numbers<[1], [0], [0], [1], [0, 0, 1, 1], [], []>} : vector<16x128xbf16>, vector<128x512xbf16>, vector<16x512xf32> -> vector<16x512xf32>
    %408 = arith.addf %407, %10 : vector<16x512xf32>
    %409 = vector.extract_strided_slice %406 {offsets = [0, 0], sizes = [16, 128], strides = [1, 1]} : vector<16x512xf32> to vector<16x128xf32>
    %410 = arith.negf %409 : vector<16x128xf32>
    %411 = math.exp %410 : vector<16x128xf32>
    %cst_93 = arith.constant 1.000000e+00 : f32
    %412 = vector.broadcast %cst_93 : f32 to vector<16x128xf32>
    %413 = arith.addf %412, %411 : vector<16x128xf32>
    %414 = arith.divf %412, %413 : vector<16x128xf32>
    %415 = vector.extract_strided_slice %406 {offsets = [0, 128], sizes = [16, 128], strides = [1, 1]} : vector<16x512xf32> to vector<16x128xf32>
    %416 = arith.negf %415 : vector<16x128xf32>
    %417 = math.exp %416 : vector<16x128xf32>
    %cst_94 = arith.constant 1.000000e+00 : f32
    %418 = vector.broadcast %cst_94 : f32 to vector<16x128xf32>
    %419 = arith.addf %418, %417 : vector<16x128xf32>
    %420 = arith.divf %418, %419 : vector<16x128xf32>
    %421 = vector.extract_strided_slice %406 {offsets = [0, 256], sizes = [16, 128], strides = [1, 1]} : vector<16x512xf32> to vector<16x128xf32>
    %422 = math.tanh %421 : vector<16x128xf32>
    %423 = vector.extract_strided_slice %406 {offsets = [0, 384], sizes = [16, 128], strides = [1, 1]} : vector<16x512xf32> to vector<16x128xf32>
    %424 = arith.negf %423 : vector<16x128xf32>
    %425 = math.exp %424 : vector<16x128xf32>
    %cst_95 = arith.constant 1.000000e+00 : f32
    %426 = vector.broadcast %cst_95 : f32 to vector<16x128xf32>
    %427 = arith.addf %426, %425 : vector<16x128xf32>
    %428 = arith.divf %426, %427 : vector<16x128xf32>
    %429 = arith.mulf %420, %366 : vector<16x128xf32>
    %430 = arith.mulf %414, %422 : vector<16x128xf32>
    %431 = arith.addf %429, %430 : vector<16x128xf32>
    %432 = math.tanh %431 : vector<16x128xf32>
    %433 = arith.mulf %428, %432 : vector<16x128xf32>
    %434 = vector.extract_strided_slice %408 {offsets = [0, 0], sizes = [16, 128], strides = [1, 1]} : vector<16x512xf32> to vector<16x128xf32>
    %435 = arith.negf %434 : vector<16x128xf32>
    %436 = math.exp %435 : vector<16x128xf32>
    %cst_96 = arith.constant 1.000000e+00 : f32
    %437 = vector.broadcast %cst_96 : f32 to vector<16x128xf32>
    %438 = arith.addf %437, %436 : vector<16x128xf32>
    %439 = arith.divf %437, %438 : vector<16x128xf32>
    %440 = vector.extract_strided_slice %408 {offsets = [0, 128], sizes = [16, 128], strides = [1, 1]} : vector<16x512xf32> to vector<16x128xf32>
    %441 = arith.negf %440 : vector<16x128xf32>
    %442 = math.exp %441 : vector<16x128xf32>
    %cst_97 = arith.constant 1.000000e+00 : f32
    %443 = vector.broadcast %cst_97 : f32 to vector<16x128xf32>
    %444 = arith.addf %443, %442 : vector<16x128xf32>
    %445 = arith.divf %443, %444 : vector<16x128xf32>
    %446 = vector.extract_strided_slice %408 {offsets = [0, 256], sizes = [16, 128], strides = [1, 1]} : vector<16x512xf32> to vector<16x128xf32>
    %447 = math.tanh %446 : vector<16x128xf32>
    %448 = vector.extract_strided_slice %408 {offsets = [0, 384], sizes = [16, 128], strides = [1, 1]} : vector<16x512xf32> to vector<16x128xf32>
    %449 = arith.negf %448 : vector<16x128xf32>
    %450 = math.exp %449 : vector<16x128xf32>
    %cst_98 = arith.constant 1.000000e+00 : f32
    %451 = vector.broadcast %cst_98 : f32 to vector<16x128xf32>
    %452 = arith.addf %451, %450 : vector<16x128xf32>
    %453 = arith.divf %451, %452 : vector<16x128xf32>
    %454 = arith.mulf %445, %391 : vector<16x128xf32>
    %455 = arith.mulf %439, %447 : vector<16x128xf32>
    %456 = arith.addf %454, %455 : vector<16x128xf32>
    %457 = math.tanh %456 : vector<16x128xf32>
    %458 = arith.mulf %453, %457 : vector<16x128xf32>
    %459 = arith.truncf %433 : vector<16x128xf32> to vector<16x128xbf16>
    %460 = arith.truncf %458 : vector<16x128xf32> to vector<16x128xbf16>
    %c16_i32_99 = arith.constant 16 : i32
    %461 = arith.muli %c6_i32, %c16_i32_99 : i32
    %462 = tpu.assume_multiple %461, 16 : i32
    %c7_i32_100 = arith.constant 7 : i32
    %463 = arith.subi %c7_i32_100, %c6_i32 : i32
    %c16_i32_101 = arith.constant 16 : i32
    %464 = arith.muli %463, %c16_i32_101 : i32
    %465 = tpu.assume_multiple %464, 16 : i32
    %466 = arith.index_cast %462 : i32 to index
    %c0_102 = arith.constant 0 : index
    %467 = vector.load %arg8[%466, %c0_102] : memref<128x256xbf16, #tpu.memory_space<vmem>>, vector<16x128xbf16>
    tpu.vector_store %arg8[%466, %c0_102], %459 {strides = array<i32>} : memref<128x256xbf16, #tpu.memory_space<vmem>>, vector<16x128xbf16>,
    %468 = arith.index_cast %465 : i32 to index
    %c128_103 = arith.constant 128 : index
    %469 = vector.load %arg8[%468, %c128_103] : memref<128x256xbf16, #tpu.memory_space<vmem>>, vector<16x128xbf16>
    tpu.vector_store %arg8[%468, %c128_103], %460 {strides = array<i32>} : memref<128x256xbf16, #tpu.memory_space<vmem>>, vector<16x128xbf16>,
    %c7_i32_104 = arith.constant 7 : i32
    %cst_105 = arith.constant dense<0.000000e+00> : vector<16x512xf32>
    %470 = tpu.matmul %459, %11, %cst_105 {dimension_numbers = #tpu.dot_dimension_numbers<[1], [0], [0], [1], [0, 0, 1, 1], [], []>} : vector<16x128xbf16>, vector<128x512xbf16>, vector<16x512xf32> -> vector<16x512xf32>
    %471 = arith.addf %470, %5 : vector<16x512xf32>
    %cst_106 = arith.constant dense<0.000000e+00> : vector<16x512xf32>
    %472 = tpu.matmul %460, %12, %cst_106 {dimension_numbers = #tpu.dot_dimension_numbers<[1], [0], [0], [1], [0, 0, 1, 1], [], []>} : vector<16x128xbf16>, vector<128x512xbf16>, vector<16x512xf32> -> vector<16x512xf32>
    %473 = arith.addf %472, %10 : vector<16x512xf32>
    %474 = vector.extract_strided_slice %471 {offsets = [0, 0], sizes = [16, 128], strides = [1, 1]} : vector<16x512xf32> to vector<16x128xf32>
    %475 = arith.negf %474 : vector<16x128xf32>
    %476 = math.exp %475 : vector<16x128xf32>
    %cst_107 = arith.constant 1.000000e+00 : f32
    %477 = vector.broadcast %cst_107 : f32 to vector<16x128xf32>
    %478 = arith.addf %477, %476 : vector<16x128xf32>
    %479 = arith.divf %477, %478 : vector<16x128xf32>
    %480 = vector.extract_strided_slice %471 {offsets = [0, 128], sizes = [16, 128], strides = [1, 1]} : vector<16x512xf32> to vector<16x128xf32>
    %481 = arith.negf %480 : vector<16x128xf32>
    %482 = math.exp %481 : vector<16x128xf32>
    %cst_108 = arith.constant 1.000000e+00 : f32
    %483 = vector.broadcast %cst_108 : f32 to vector<16x128xf32>
    %484 = arith.addf %483, %482 : vector<16x128xf32>
    %485 = arith.divf %483, %484 : vector<16x128xf32>
    %486 = vector.extract_strided_slice %471 {offsets = [0, 256], sizes = [16, 128], strides = [1, 1]} : vector<16x512xf32> to vector<16x128xf32>
    %487 = math.tanh %486 : vector<16x128xf32>
    %488 = vector.extract_strided_slice %471 {offsets = [0, 384], sizes = [16, 128], strides = [1, 1]} : vector<16x512xf32> to vector<16x128xf32>
    %489 = arith.negf %488 : vector<16x128xf32>
    %490 = math.exp %489 : vector<16x128xf32>
    %cst_109 = arith.constant 1.000000e+00 : f32
    %491 = vector.broadcast %cst_109 : f32 to vector<16x128xf32>
    %492 = arith.addf %491, %490 : vector<16x128xf32>
    %493 = arith.divf %491, %492 : vector<16x128xf32>
    %494 = arith.mulf %485, %431 : vector<16x128xf32>
    %495 = arith.mulf %479, %487 : vector<16x128xf32>
    %496 = arith.addf %494, %495 : vector<16x128xf32>
    %497 = math.tanh %496 : vector<16x128xf32>
    %498 = arith.mulf %493, %497 : vector<16x128xf32>
    %499 = vector.extract_strided_slice %473 {offsets = [0, 0], sizes = [16, 128], strides = [1, 1]} : vector<16x512xf32> to vector<16x128xf32>
    %500 = arith.negf %499 : vector<16x128xf32>
    %501 = math.exp %500 : vector<16x128xf32>
    %cst_110 = arith.constant 1.000000e+00 : f32
    %502 = vector.broadcast %cst_110 : f32 to vector<16x128xf32>
    %503 = arith.addf %502, %501 : vector<16x128xf32>
    %504 = arith.divf %502, %503 : vector<16x128xf32>
    %505 = vector.extract_strided_slice %473 {offsets = [0, 128], sizes = [16, 128], strides = [1, 1]} : vector<16x512xf32> to vector<16x128xf32>
    %506 = arith.negf %505 : vector<16x128xf32>
    %507 = math.exp %506 : vector<16x128xf32>
    %cst_111 = arith.constant 1.000000e+00 : f32
    %508 = vector.broadcast %cst_111 : f32 to vector<16x128xf32>
    %509 = arith.addf %508, %507 : vector<16x128xf32>
    %510 = arith.divf %508, %509 : vector<16x128xf32>
    %511 = vector.extract_strided_slice %473 {offsets = [0, 256], sizes = [16, 128], strides = [1, 1]} : vector<16x512xf32> to vector<16x128xf32>
    %512 = math.tanh %511 : vector<16x128xf32>
    %513 = vector.extract_strided_slice %473 {offsets = [0, 384], sizes = [16, 128], strides = [1, 1]} : vector<16x512xf32> to vector<16x128xf32>
    %514 = arith.negf %513 : vector<16x128xf32>
    %515 = math.exp %514 : vector<16x128xf32>
    %cst_112 = arith.constant 1.000000e+00 : f32
    %516 = vector.broadcast %cst_112 : f32 to vector<16x128xf32>
    %517 = arith.addf %516, %515 : vector<16x128xf32>
    %518 = arith.divf %516, %517 : vector<16x128xf32>
    %519 = arith.mulf %510, %456 : vector<16x128xf32>
    %520 = arith.mulf %504, %512 : vector<16x128xf32>
    %521 = arith.addf %519, %520 : vector<16x128xf32>
    %522 = math.tanh %521 : vector<16x128xf32>
    %523 = arith.mulf %518, %522 : vector<16x128xf32>
    %524 = arith.truncf %498 : vector<16x128xf32> to vector<16x128xbf16>
    %525 = arith.truncf %523 : vector<16x128xf32> to vector<16x128xbf16>
    %c16_i32_113 = arith.constant 16 : i32
    %526 = arith.muli %c7_i32_104, %c16_i32_113 : i32
    %527 = tpu.assume_multiple %526, 16 : i32
    %c7_i32_114 = arith.constant 7 : i32
    %528 = arith.subi %c7_i32_114, %c7_i32_104 : i32
    %c16_i32_115 = arith.constant 16 : i32
    %529 = arith.muli %528, %c16_i32_115 : i32
    %530 = tpu.assume_multiple %529, 16 : i32
    %531 = arith.index_cast %527 : i32 to index
    %c0_116 = arith.constant 0 : index
    %532 = vector.load %arg8[%531, %c0_116] : memref<128x256xbf16, #tpu.memory_space<vmem>>, vector<16x128xbf16>
    tpu.vector_store %arg8[%531, %c0_116], %524 {strides = array<i32>} : memref<128x256xbf16, #tpu.memory_space<vmem>>, vector<16x128xbf16>,
    %533 = arith.index_cast %530 : i32 to index
    %c128_117 = arith.constant 128 : index
    %534 = vector.load %arg8[%533, %c128_117] : memref<128x256xbf16, #tpu.memory_space<vmem>>, vector<16x128xbf16>
    tpu.vector_store %arg8[%533, %c128_117], %525 {strides = array<i32>} : memref<128x256xbf16, #tpu.memory_space<vmem>>, vector<16x128xbf16>,
    %c8_i32 = arith.constant 8 : i32
    return
  }
  func.func @transform_0(%arg0: i32) -> (i32, i32) {
    %c0_i32 = arith.constant 0 : i32
    %c0_i32_0 = arith.constant 0 : i32
    %c0_i32_1 = arith.constant 0 : i32
    return %c0_i32, %c0_i32_0 : i32, i32
  }
  func.func @transform_1(%arg0: i32) -> (i32, i32) {
    %c0_i32 = arith.constant 0 : i32
    %c0_i32_0 = arith.constant 0 : i32
    %c0_i32_1 = arith.constant 0 : i32
    return %c0_i32, %c0_i32_0 : i32, i32
  }
  func.func @transform_2(%arg0: i32) -> (i32, i32) {
    %c0_i32 = arith.constant 0 : i32
    %c0_i32_0 = arith.constant 0 : i32
    %c0_i32_1 = arith.constant 0 : i32
    return %c0_i32, %c0_i32_0 : i32, i32
  }
  func.func @transform_3(%arg0: i32) -> (i32, i32) {
    %c0_i32 = arith.constant 0 : i32
    %c0_i32_0 = arith.constant 0 : i32
    %c0_i32_1 = arith.constant 0 : i32
    return %c0_i32, %c0_i32_0 : i32, i32
  }
  func.func @transform_4(%arg0: i32) -> (i32, i32) {
    %c0_i32 = arith.constant 0 : i32
    %c0_i32_0 = arith.constant 0 : i32
    %c0_i32_1 = arith.constant 0 : i32
    return %c0_i32, %c0_i32_0 : i32, i32
  }
  func.func @transform_5(%arg0: i32) -> (i32, i32) {
    %c0_i32 = arith.constant 0 : i32
    %c0_i32_0 = arith.constant 0 : i32
    %c0_i32_1 = arith.constant 0 : i32
    return %c0_i32, %c0_i32_0 : i32, i32
  }
  func.func @transform_6(%arg0: i32) -> (i32, i32) {
    %c0_i32 = arith.constant 0 : i32
    %c0_i32_0 = arith.constant 0 : i32
    %c0_i32_1 = arith.constant 0 : i32
    return %c0_i32, %c0_i32_0 : i32, i32
  }
  func.func @transform_7(%arg0: i32) -> (i32, i32) {
    %c0_i32 = arith.constant 0 : i32
    %c0_i32_0 = arith.constant 0 : i32
    %c0_i32_1 = arith.constant 0 : i32
    return %c0_i32, %c0_i32_0 : i32, i32
  }
}

module attributes {stable_mosaic.version = 11 : i64} {
  func.func @_head_kernel(%arg0: i32, %arg1: memref<128x256xbf16, #tpu.memory_space<vmem>>, %arg2: memref<256x128xbf16, #tpu.memory_space<vmem>>, %arg3: memref<1x128xf32, #tpu.memory_space<vmem>>, %arg4: memref<128x128xf32, #tpu.memory_space<vmem>>) attributes {dimension_semantics = [#tpu.dimension_semantics<parallel>], iteration_bounds = array<i64: 1>, scalar_prefetch = 0 : i64, scratch_operands = 0 : i64, tpu.core_type = #tpu.core_type<tc>, window_params = [{transform_indices = @transform_0, window_bounds = array<i64: 128, 256>}, {pipeline_mode = #tpu.pipeline_mode<synchronous>, transform_indices = @transform_1, window_bounds = array<i64: 256, 128>}, {pipeline_mode = #tpu.pipeline_mode<synchronous>, transform_indices = @transform_2, window_bounds = array<i64: 1, 128>}, {transform_indices = @transform_3, window_bounds = array<i64: 128, 128>}]} {
    %c0 = arith.constant 0 : index
    %c0_0 = arith.constant 0 : index
    %0 = vector.load %arg1[%c0, %c0_0] : memref<128x256xbf16, #tpu.memory_space<vmem>>, vector<128x256xbf16>
    %c0_1 = arith.constant 0 : index
    %c0_2 = arith.constant 0 : index
    %1 = vector.load %arg2[%c0_1, %c0_2] : memref<256x128xbf16, #tpu.memory_space<vmem>>, vector<256x128xbf16>
    %cst = arith.constant dense<0.000000e+00> : vector<128x128xf32>
    %2 = tpu.matmul %0, %1, %cst {dimension_numbers = #tpu.dot_dimension_numbers<[1], [0], [0], [1], [0, 0, 1, 1], [], []>} : vector<128x256xbf16>, vector<256x128xbf16>, vector<128x128xf32> -> vector<128x128xf32>
    %c0_3 = arith.constant 0 : index
    %c0_4 = arith.constant 0 : index
    %3 = vector.load %arg3[%c0_3, %c0_4] : memref<1x128xf32, #tpu.memory_space<vmem>>, vector<1x128xf32>
    %4 = vector.broadcast %3 : vector<1x128xf32> to vector<128x128xf32>
    %5 = arith.addf %2, %4 : vector<128x128xf32>
    %cst_5 = arith.constant dense<0xFF800000> : vector<128xf32>
    %6 = vector.multi_reduction <maximumf>, %5, %cst_5 [1] : vector<128x128xf32> to vector<128xf32>
    %7 = vector.shape_cast %6 : vector<128xf32> to vector<128x1xf32>
    %8 = vector.broadcast %7 : vector<128x1xf32> to vector<128x128xf32>
    %9 = arith.subf %5, %8 : vector<128x128xf32>
    %10 = math.exp %9 : vector<128x128xf32>
    %cst_6 = arith.constant dense<0.000000e+00> : vector<128xf32>
    %11 = vector.multi_reduction <add>, %10, %cst_6 [1] : vector<128x128xf32> to vector<128xf32>
    %12 = vector.shape_cast %11 : vector<128xf32> to vector<128x1xf32>
    %13 = math.log %12 : vector<128x1xf32>
    %14 = vector.broadcast %13 : vector<128x1xf32> to vector<128x128xf32>
    %15 = arith.subf %9, %14 : vector<128x128xf32>
    %c0_7 = arith.constant 0 : index
    %c0_8 = arith.constant 0 : index
    %16 = vector.load %arg4[%c0_7, %c0_8] : memref<128x128xf32, #tpu.memory_space<vmem>>, vector<128x128xf32>
    tpu.vector_store %arg4[%c0_7, %c0_8], %15 {strides = array<i32>} : memref<128x128xf32, #tpu.memory_space<vmem>>, vector<128x128xf32>,
    return
  }
  func.func @transform_0(%arg0: i32) -> (i32, i32) {
    %c0_i32 = arith.constant 0 : i32
    %c0_i32_0 = arith.constant 0 : i32
    return %arg0, %c0_i32 : i32, i32
  }
  func.func @transform_1(%arg0: i32) -> (i32, i32) {
    %c0_i32 = arith.constant 0 : i32
    %c0_i32_0 = arith.constant 0 : i32
    %c0_i32_1 = arith.constant 0 : i32
    return %c0_i32, %c0_i32_0 : i32, i32
  }
  func.func @transform_2(%arg0: i32) -> (i32, i32) {
    %c0_i32 = arith.constant 0 : i32
    %c0_i32_0 = arith.constant 0 : i32
    %c0_i32_1 = arith.constant 0 : i32
    return %c0_i32, %c0_i32_0 : i32, i32
  }
  func.func @transform_3(%arg0: i32) -> (i32, i32) {
    %c0_i32 = arith.constant 0 : i32
    %c0_i32_0 = arith.constant 0 : i32
    return %arg0, %c0_i32 : i32, i32
  }
}

</mosaic_0001>

<bundles_post_ra>
// kernel: rnn_decoder_forward.3
= control target key start
LH: loop header
LB: loop body
LE: loop exit
PB: predicated region body
PF: predicated region fallthrough
CT: control target
= control target key end

     0   :  { %s1122_s1 = inlined_call_operand.vmem [shape: bf16[256,128], index: 1, kind: input, shape index: {}]   ;;  %s1123_s2 = inlined_call_operand.vmem [shape: f32[1,128], index: 2, kind: input, shape index: {}]   ;;  %s1124_s0 = inlined_call_operand.vmem [shape: bf16[128,256], index: 0, kind: input, shape index: {}]   ;;  %s1125_s3 = inlined_call_operand.vmem [shape: f32[128,128], index: 3, kind: output, shape index: {}]  }
   0x1   :  { %v671_v0 = vld [vmem:[%s1122_s1 + $0x38] sm:$0xff]  ;;  %v670_v2 = vld [vmem:[%s1122_s1 + $0x30] sm:$0xff]  ;;  %v669_v4 = vld [vmem:[%s1122_s1 + $0x28] sm:$0xff] }
   0x2   :  { %v679_v1 = vld [vmem:[%s1122_s1 + $0x78] sm:$0xff]  ;;  %242 = vmatpush.bf16.msra.mxu0 %v671_v0  ;;  %680 = vmatpush.bf16.msra.mxu2 %v671_v0  ;;  %v678_v3 = vld [vmem:[%s1122_s1 + $0x70] sm:$0xff]  ;;  %v677_v5 = vld [vmem:[%s1122_s1 + $0x68] sm:$0xff] }
   0x3   :  { %291 = vmatpush.bf16.msra.mxu1 %v679_v1  ;;  %688 = vmatpush.bf16.msra.mxu3 %v679_v1  ;;  %v668_v6 = vld [vmem:[%s1122_s1 + $0x20] sm:$0xff]  ;;  %v667_v8 = vld [vmem:[%s1122_s1 + $0x18] sm:$0xff]  ;;  %v666_v10 = vld [vmem:[%s1122_s1 + $0x10] sm:$0xff] }
   0x4   :  { %v676_v7 = vld [vmem:[%s1122_s1 + $0x60] sm:$0xff]  ;;  %v675_v9 = vld [vmem:[%s1122_s1 + $0x58] sm:$0xff]  ;;  %v674_v11 = vld [vmem:[%s1122_s1 + $0x50] sm:$0xff] }
   0x5   :  { %v665_v12 = vld [vmem:[%s1122_s1 + $0x8] sm:$0xff]  ;;  %v664_v14 = vld [vmem:[%s1122_s1] sm:$0xff]  ;;  %v530_v28 = vld [vmem:[%s1124_s0 + $0x10] sm:$0xf] }
   0x6   :  { %243 = vmatpush.bf16.msra.mxu0 %v670_v2  ;;  %681 = vmatpush.bf16.msra.mxu2 %v670_v2  ;;  %v673_v13 = vld [vmem:[%s1122_s1 + $0x48] sm:$0xff]  ;;  %v672_v15 = vld [vmem:[%s1122_s1 + $0x40] sm:$0xff]  ;;  %v651_v29 = vld [vmem:[%s1124_s0 + $0x14] sm:$0xf0] }
   0x7   :  { %292 = vmatpush.bf16.msra.mxu1 %v678_v3  ;;  %689 = vmatpush.bf16.msra.mxu3 %v678_v3  ;;  %v522_v16 = vld [vmem:[%s1124_s0] sm:$0xf]  ;;  %v649_v17 = vld [vmem:[%s1124_s0 + $0x4] sm:$0xf0]  ;;  %v648_v20 = vld [vmem:[%s1124_s0 + $0x4] sm:$0xf]  ;;  %v531_v36 = vor.u32 %v651_v29, %v530_v28 }
   0x8   :  { %v554_v18 = vld [vmem:[%s1124_s0 + $0x40] sm:$0xf]  ;;  %v657_v19 = vld [vmem:[%s1124_s0 + $0x44] sm:$0xf0]  ;;  %v524_v21 = vld [vmem:[%s1124_s0 + $0x8] sm:$0xf0]  ;;  %v523_v24 = vor.u32 %v649_v17, %v522_v16 }
   0x9   :  { %v656_v22 = vld [vmem:[%s1124_s0 + $0x44] sm:$0xf]  ;;  %v556_v23 = vld [vmem:[%s1124_s0 + $0x48] sm:$0xf0]  ;;  %v555_v25 = vor.u32 %v657_v19, %v554_v18  ;;  %v527_v26 = vor.u32 %v648_v20, %v524_v21  ;;  %v562_v30 = vld [vmem:[%s1124_s0 + $0x50] sm:$0xf] }
   0xa   :  { %244 = vmatpush.bf16.msra.mxu0 %v669_v4  ;;  %682 = vmatpush.bf16.msra.mxu2 %v669_v4  ;;  %v559_v27 = vor.u32 %v656_v22, %v556_v23  ;;  %v659_v31 = vld [vmem:[%s1124_s0 + $0x54] sm:$0xf0]  ;;  %v650_v32 = vld [vmem:[%s1124_s0 + $0x14] sm:$0xf]  ;;  %v532_v33 = vld [vmem:[%s1124_s0 + $0x18] sm:$0xf0] }
   0xb   :  { %293 = vmatpush.bf16.msra.mxu1 %v677_v5  ;;  %690 = vmatpush.bf16.msra.mxu3 %v677_v5  ;;  %v658_v34 = vld [vmem:[%s1124_s0 + $0x54] sm:$0xf]  ;;  %v564_v35 = vld [vmem:[%s1124_s0 + $0x58] sm:$0xf0]  ;;  %v563_v37 = vor.u32 %v659_v31, %v562_v30  ;;  %v535_v38 = vor.u32 %v650_v32, %v532_v33  ;;  %v538_v40 = vld [vmem:[%s1124_s0 + $0x20] sm:$0xf] }
   0xc   :  { %v567_v39 = vor.u32 %v658_v34, %v564_v35  ;;  %v653_v41 = vld [vmem:[%s1124_s0 + $0x24] sm:$0xf0]  ;;  %v570_v42 = vld [vmem:[%s1124_s0 + $0x60] sm:$0xf]  ;;  %v652_v44 = vld [vmem:[%s1124_s0 + $0x24] sm:$0xf] }
   0xd   :  { %v661_v43 = vld [vmem:[%s1124_s0 + $0x64] sm:$0xf0]  ;;  %v540_v45 = vld [vmem:[%s1124_s0 + $0x28] sm:$0xf0]  ;;  %v660_v46 = vld [vmem:[%s1124_s0 + $0x64] sm:$0xf]  ;;  %v539_v48 = vor.u32 %v653_v41, %v538_v40 }
   0xe   :  { %245 = vmatpush.bf16.msra.mxu0 %v668_v6  ;;  %683 = vmatpush.bf16.msra.mxu2 %v668_v6  ;;  %v572_v47 = vld [vmem:[%s1124_s0 + $0x68] sm:$0xf0]  ;;  %v571_v49 = vor.u32 %v661_v43, %v570_v42  ;;  %v543_v50 = vor.u32 %v652_v44, %v540_v45  ;;  %v546_v52 = vld [vmem:[%s1124_s0 + $0x30] sm:$0xf]  ;;  %v655_v53 = vld [vmem:[%s1124_s0 + $0x34] sm:$0xf0] }
   0xf   :  { %294 = vmatpush.bf16.msra.mxu1 %v676_v7  ;;  %691 = vmatpush.bf16.msra.mxu3 %v676_v7  ;;  %v575_v51 = vor.u32 %v660_v46, %v572_v47  ;;  %v578_v54 = vld [vmem:[%s1124_s0 + $0x70] sm:$0xf]  ;;  %v663_v55 = vld [vmem:[%s1124_s0 + $0x74] sm:$0xf0]  ;;  %v654_v56 = vld [vmem:[%s1124_s0 + $0x34] sm:$0xf]  ;;  %v547_v60 = vor.u32 %v655_v53, %v546_v52 }
  0x10   :  { %v548_v57 = vld [vmem:[%s1124_s0 + $0x38] sm:$0xf0]  ;;  %v662_v58 = vld [vmem:[%s1124_s0 + $0x74] sm:$0xf]  ;;  %v579_v61 = vor.u32 %v663_v55, %v578_v54  ;;  %v928_v0 = vld [vmem:[%s1123_s2] ss:$0 sm:$0xff] }
  0x11   :  { %v580_v59 = vld [vmem:[%s1124_s0 + $0x78] sm:$0xf0]  ;;  %v551_v62 = vor.u32 %v654_v56, %v548_v57 }
  0x12   :  { %246 = vmatpush.bf16.msra.mxu0 %v667_v8  ;;  %684 = vmatpush.bf16.msra.mxu2 %v667_v8  ;;  %v583_v63 = vor.u32 %v662_v58, %v580_v59 }
  0x13   :  { %295 = vmatpush.bf16.msra.mxu1 %v675_v9  ;;  %692 = vmatpush.bf16.msra.mxu3 %v675_v9 }
  0x16   :  { %247 = vmatpush.bf16.msra.mxu0 %v666_v10  ;;  %685 = vmatpush.bf16.msra.mxu2 %v666_v10 }
  0x17   :  { %296 = vmatpush.bf16.msra.mxu1 %v674_v11  ;;  %693 = vmatpush.bf16.msra.mxu3 %v674_v11 }
  0x1a   :  { %248 = vmatpush.bf16.msra.mxu0 %v665_v12  ;;  %686 = vmatpush.bf16.msra.mxu2 %v665_v12 }
  0x1b   :  { %297 = vmatpush.bf16.msra.mxu1 %v673_v13  ;;  %694 = vmatpush.bf16.msra.mxu3 %v673_v13 }
  0x1e   :  { %249 = vmatpush.bf16.msra.mxu0 %v664_v14  ;;  %687 = vmatpush.bf16.msra.mxu2 %v664_v14 }
  0x1f   :  { %298 = vmatpush.bf16.msra.mxu1 %v672_v15  ;;  %695 = vmatpush.bf16.msra.mxu3 %v672_v15 }
  0x21   :  { %250 = vmatmul.bf16.vlgmr.msra.gmra.mxu0 %v523_v24  ;;  %270 = vmatmul.bf16.vlgmr.msra.gmra.mxu2 %v555_v25 }
  0x22   :  { %299 = vmatmul.bf16.vlgmr.msra.gmra.mxu1 %v527_v26  ;;  %319 = vmatmul.bf16.vlgmr.msra.gmra.mxu3 %v559_v27 }
  0x31   :  { %255 = vmatmul.bf16.gmra.mxu0 %v531_v36  ;;  %275 = vmatmul.bf16.gmra.mxu2 %v563_v37 }
  0x32   :  { %304 = vmatmul.bf16.gmra.mxu1 %v535_v38  ;;  %324 = vmatmul.bf16.gmra.mxu3 %v567_v39 }
  0x41   :  { %260 = vmatmul.bf16.gmra.mxu0 %v539_v48  ;;  %280 = vmatmul.bf16.gmra.mxu2 %v571_v49 }
  0x42   :  { %309 = vmatmul.bf16.gmra.mxu1 %v543_v50  ;;  %329 = vmatmul.bf16.gmra.mxu3 %v575_v51 }
  0x51   :  { %265 = vmatmul.bf16.gmra.mxu0 %v547_v60  ;;  %285 = vmatmul.bf16.gmra.mxu2 %v579_v61 }
  0x52   :  { %314 = vmatmul.bf16.gmra.mxu1 %v551_v62  ;;  %334 = vmatmul.bf16.gmra.mxu3 %v583_v63 }
  0x9e   :  { %v251_v1 = vpop.f32.mrf.mxu0 }
  0x9f   :  { %v252_v2 = vadd.f32 %v928_v0, %v251_v1  ;;  %v300_v3 = vpop.f32.mrf.mxu1 }
  0xa1   :  { %v931_v4 = vadd.f32 %v300_v3, %v252_v2 }
  0xa3   :  { %340 = vmax.xlane.f32.xlu0 %v931_v4 }
  0xa4   :  { %v271_v5 = vpop.f32.mrf.mxu2 }
  0xa5   :  { %v272_v6 = vadd.f32 %v928_v0, %v271_v5  ;;  %v320_v7 = vpop.f32.mrf.mxu3 }
  0xa6   :  { %v253_v8 = vpop.f32.mrf.mxu0 }
  0xa7   :  { %v935_v9 = vadd.f32 %v320_v7, %v272_v6  ;;  %v254_v10 = vadd.f32 %v928_v0, %v253_v8  ;;  %v302_v11 = vpop.f32.mrf.mxu1 }
  0xa9   :  { %v938_v12 = vadd.f32 %v302_v11, %v254_v10  ;;  %356 = vmax.xlane.f32.xlu2 %v935_v9 }
  0xab   :  { %342 = vmax.xlane.f32.xlu0 %v938_v12 }
  0xac   :  { %v273_v13 = vpop.f32.mrf.mxu2 }
  0xad   :  { %v274_v14 = vadd.f32 %v928_v0, %v273_v13  ;;  %v322_v15 = vpop.f32.mrf.mxu3 }
  0xae   :  { %v256_v16 = vpop.f32.mrf.mxu0 }
  0xaf   :  { %v257_v17 = vadd.f32 %v928_v0, %v256_v16  ;;  %v305_v18 = vpop.f32.mrf.mxu1  ;;  %v944_v19 = vadd.f32 %v322_v15, %v274_v14 }
  0xb1   :  { %v946_v20 = vadd.f32 %v305_v18, %v257_v17 }
  0xb3   :  { %344 = vmax.xlane.f32.xlu1 %v946_v20  ;;  %358 = vmax.xlane.f32.xlu0 %v944_v19 }
  0xb4   :  { %v276_v21 = vpop.f32.mrf.mxu2 }
  0xb5   :  { %v277_v22 = vadd.f32 %v928_v0, %v276_v21  ;;  %v325_v23 = vpop.f32.mrf.mxu3 }
  0xb6   :  { %v258_v24 = vpop.f32.mrf.mxu0 }
  0xb7   :  { %v951_v25 = vadd.f32 %v325_v23, %v277_v22  ;;  %v307_v26 = vpop.f32.mrf.mxu1  ;;  %v259_v28 = vadd.f32 %v928_v0, %v258_v24 }
  0xb9   :  { %v958_v34 = vadd.f32 %v307_v26, %v259_v28 }
  0xbb   :  { %360 = vmax.xlane.f32.xlu1 %v951_v25 }
  0xbc   :  { %v278_v27 = vpop.f32.mrf.mxu2 }
  0xbd   :  { %v279_v29 = vadd.f32 %v928_v0, %v278_v27  ;;  %v327_v30 = vpop.f32.mrf.mxu3 }
  0xbe   :  { %v261_v31 = vpop.f32.mrf.mxu0 }
  0xbf   :  { %v956_v32 = vadd.f32 %v327_v30, %v279_v29  ;;  %v310_v33 = vpop.f32.mrf.mxu1  ;;  %v262_v35 = vadd.f32 %v928_v0, %v261_v31 }
  0xc1   :  { %362 = vmax.xlane.f32.xlu2 %v956_v32  ;;  %v964_v40 = vadd.f32 %v310_v33, %v262_v35 }
  0xc3   :  { %346 = vmax.xlane.f32.xlu1 %v958_v34 }
  0xc4   :  { %v281_v36 = vpop.f32.mrf.mxu2 }
  0xc5   :  { %v282_v37 = vadd.f32 %v928_v0, %v281_v36  ;;  %v330_v38 = vpop.f32.mrf.mxu3 }
  0xc6   :  { %v263_v39 = vpop.f32.mrf.mxu0 }
  0xc7   :  { %v966_v41 = vadd.f32 %v330_v38, %v282_v37  ;;  %v312_v42 = vpop.f32.mrf.mxu1  ;;  %v264_v43 = vadd.f32 %v928_v0, %v263_v39 }
  0xc9   :  { %348 = vmax.xlane.f32.xlu2 %v964_v40  ;;  %364 = vmax.xlane.f32.xlu0 %v966_v41  ;;  %v971_v47 = vadd.f32 %v312_v42, %v264_v43 }
  0xcc   :  { %v283_v44 = vpop.f32.mrf.mxu2 }
  0xcd   :  { %v332_v45 = vpop.f32.mrf.mxu3  ;;  %v284_v60 = vadd.f32 %v928_v0, %v283_v44 }
  0xce   :  { %v266_v46 = vpop.f32.mrf.mxu0 }
  0xcf   :  { %v267_v48 = vadd.f32 %v928_v0, %v266_v46  ;;  %v315_v49 = vpop.f32.mrf.mxu1  ;;  %v990_v1 = vadd.f32 %v332_v45, %v284_v60 }
  0xd1   :  { %v974_v50 = vadd.f32 %v315_v49, %v267_v48  ;;  %350 = vmax.xlane.f32.xlu2 %v971_v47 }
  0xd3   :  { %352 = vmax.xlane.f32.xlu0 %v974_v50 }
  0xd4   :  { %v286_v51 = vpop.f32.mrf.mxu2 }
  0xd5   :  { %v287_v52 = vadd.f32 %v928_v0, %v286_v51  ;;  %v335_v53 = vpop.f32.mrf.mxu3 }
  0xd6   :  { %v268_v54 = vpop.f32.mrf.mxu0 }
  0xd7   :  { %v979_v55 = vadd.f32 %v335_v53, %v287_v52  ;;  %v269_v56 = vadd.f32 %v928_v0, %v268_v54  ;;  %v317_v57 = vpop.f32.mrf.mxu1 }
  0xd9   :  { %v982_v58 = vadd.f32 %v317_v57, %v269_v56  ;;  %368 = vmax.xlane.f32.xlu2 %v979_v55 }
  0xdb   :  { %354 = vmax.xlane.f32.xlu1 %v982_v58 }
  0xdc   :  { %v288_v59 = vpop.f32.mrf.mxu2 }
  0xdd   :  { %v289_v61 = vadd.f32 %v928_v0, %v288_v59  ;;  %v337_v62 = vpop.f32.mrf.mxu3 }
  0xdf   :  { %v988_v63 = vadd.f32 %v337_v62, %v289_v61 }
  0xe1   :  { %370 = vmax.xlane.f32.xlu0 %v988_v63 }
  0xe3   :  { %366 = vmax.xlane.f32.xlu1 %v990_v1 }
 0x116   :  { %v341_v2 = vpop.xlane.xlu0 %340 }
 0x117   :  { %v995_v3 = vsub.f32 %v931_v4, %v341_v2 }
 0x119   :  { %v388_v5 = vmul.f32 1.442695, %v995_v3 }
 0x11b   :  { %697 = vpow2.f32 %v388_v5 }
 0x11c   :  { %v357_v6 = vpop.xlane.xlu2 %356 }
 0x11d   :  { %v999_v7 = vsub.f32 %v935_v9, %v357_v6 }
 0x11e   :  { %v343_v0 = vpop.xlane.xlu0 %342 }
 0x11f   :  { %v404_v8 = vmul.f32 1.442695, %v999_v7  ;;  %v1003_v10 = vsub.f32 %v938_v12, %v343_v0 }
 0x121   :  { %v698_v11 = vpop.eup %697  ;;  %699 = vpow2.f32 %v404_v8  ;;  %v390_v13 = vmul.f32 1.442695, %v1003_v10 }
 0x122   :  { %420 = vadd.xlane.f32.xlu1 %v698_v11 }
 0x123   :  { %701 = vpow2.f32 %v390_v13 }
 0x126   :  { %v345_v4 = vpop.xlane.xlu1 %344  ;;  %v359_v14 = vpop.xlane.xlu0 %358 }
 0x127   :  { %v700_v15 = vpop.eup %699  ;;  %v1007_v16 = vsub.f32 %v946_v20, %v345_v4  ;;  %v1010_v9 = vsub.f32 %v944_v19, %v359_v14 }
 0x128   :  { %436 = vadd.xlane.f32.xlu0 %v700_v15 }
 0x129   :  { %v702_v17 = vpop.eup %701  ;;  %v392_v12 = vmul.f32 1.442695, %v1007_v16  ;;  %v406_v18 = vmul.f32 1.442695, %v1010_v9 }
 0x12a   :  { %422 = vadd.xlane.f32.xlu2 %v702_v17 }
 0x12b   :  { %703 = vpow2.f32 %v392_v12 }
 0x12c   :  { %705 = vpow2.f32 %v406_v18 }
 0x12e   :  { %v361_v21 = vpop.xlane.xlu1 %360 }
 0x12f   :  { %v1015_v22 = vsub.f32 %v951_v25, %v361_v21 }
 0x131   :  { %v704_v23 = vpop.eup %703  ;;  %v408_v20 = vmul.f32 1.442695, %v1015_v22 }
 0x132   :  { %v706_v24 = vpop.eup %705  ;;  %424 = vadd.xlane.f32.xlu0 %v704_v23 }
 0x133   :  { %707 = vpow2.f32 %v408_v20  ;;  %438 = vadd.xlane.f32.xlu1 %v706_v24 }
 0x134   :  { %v363_v19 = vpop.xlane.xlu2 %362 }
 0x135   :  { %v1019_v26 = vsub.f32 %v956_v32, %v363_v19 }
 0x136   :  { %v347_v27 = vpop.xlane.xlu1 %346 }
 0x137   :  { %v410_v28 = vmul.f32 1.442695, %v1019_v26  ;;  %v1023_v29 = vsub.f32 %v958_v34, %v347_v27 }
 0x139   :  { %v708_v30 = vpop.eup %707  ;;  %709 = vpow2.f32 %v410_v28  ;;  %v394_v25 = vmul.f32 1.442695, %v1023_v29 }
 0x13a   :  { %440 = vadd.xlane.f32.xlu2 %v708_v30 }
 0x13b   :  { %711 = vpow2.f32 %v394_v25 }
 0x13c   :  { %v349_v31 = vpop.xlane.xlu2 %348  ;;  %v365_v33 = vpop.xlane.xlu0 %364 }
 0x13d   :  { %v1027_v35 = vsub.f32 %v964_v40, %v349_v31  ;;  %v1030_v32 = vsub.f32 %v966_v41, %v365_v33 }
 0x13f   :  { %v710_v36 = vpop.eup %709  ;;  %v396_v37 = vmul.f32 1.442695, %v1027_v35  ;;  %v412_v34 = vmul.f32 1.442695, %v1030_v32 }
 0x140   :  { %442 = vadd.xlane.f32.xlu0 %v710_v36 }
 0x141   :  { %v712_v38 = vpop.eup %711  ;;  %713 = vpow2.f32 %v396_v37 }
 0x142   :  { %426 = vadd.xlane.f32.xlu1 %v712_v38  ;;  %715 = vpow2.f32 %v412_v34 }
 0x144   :  { %v351_v39 = vpop.xlane.xlu2 %350 }
 0x145   :  { %v1035_v42 = vsub.f32 %v971_v47, %v351_v39 }
 0x146   :  { %v353_v43 = vpop.xlane.xlu0 %352 }
 0x147   :  { %v714_v40 = vpop.eup %713  ;;  %v398_v44 = vmul.f32 1.442695, %v1035_v42  ;;  %v1039_v41 = vsub.f32 %v974_v50, %v353_v43 }
 0x148   :  { %428 = vadd.xlane.f32.xlu2 %v714_v40  ;;  %v716_v45 = vpop.eup %715 }
 0x149   :  { %717 = vpow2.f32 %v398_v44  ;;  %v400_v46 = vmul.f32 1.442695, %v1039_v41 }
 0x14a   :  { %444 = vadd.xlane.f32.xlu1 %v716_v45 }
 0x14b   :  { %719 = vpow2.f32 %v400_v46 }
 0x14c   :  { %v369_v48 = vpop.xlane.xlu2 %368 }
 0x14d   :  { %v1043_v49 = vsub.f32 %v979_v55, %v369_v48 }
 0x14e   :  { %v355_v47 = vpop.xlane.xlu1 %354 }
 0x14f   :  { %v718_v51 = vpop.eup %717  ;;  %v416_v52 = vmul.f32 1.442695, %v1043_v49  ;;  %v1047_v53 = vsub.f32 %v982_v58, %v355_v47 }
 0x150   :  { %430 = vadd.xlane.f32.xlu0 %v718_v51 }
 0x151   :  { %v720_v50 = vpop.eup %719  ;;  %721 = vpow2.f32 %v416_v52  ;;  %v402_v54 = vmul.f32 1.442695, %v1047_v53 }
 0x152   :  { %432 = vadd.xlane.f32.xlu1 %v720_v50 }
 0x153   :  { %723 = vpow2.f32 %v402_v54 }
 0x154   :  { %v371_v56 = vpop.xlane.xlu0 %370 }
 0x155   :  { %v1051_v57 = vsub.f32 %v988_v63, %v371_v56 }
 0x156   :  { %v367_v55 = vpop.xlane.xlu1 %366 }
 0x157   :  { %v722_v59 = vpop.eup %721  ;;  %v418_v60 = vmul.f32 1.442695, %v1051_v57  ;;  %v1055_v61 = vsub.f32 %v990_v1, %v367_v55 }
 0x158   :  { %448 = vadd.xlane.f32.xlu0 %v722_v59 }
 0x159   :  { %v724_v58 = vpop.eup %723  ;;  %725 = vpow2.f32 %v418_v60  ;;  %v414_v62 = vmul.f32 1.442695, %v1055_v61 }
 0x15a   :  { %434 = vadd.xlane.f32.xlu2 %v724_v58 }
 0x15b   :  { %727 = vpow2.f32 %v414_v62 }
 0x15f   :  { %v726_v2 = vpop.eup %725 }
 0x160   :  { %450 = vadd.xlane.f32.xlu1 %v726_v2 }
 0x161   :  { %v728_v5 = vpop.eup %727 }
 0x162   :  { %446 = vadd.xlane.f32.xlu2 %v728_v5 }
 0x195   :  { %v421_v63 = vpop.xlane.xlu1 %420 }
 0x196   :  { %729 = vlog2.f32 %v421_v63 }
 0x19b   :  { %v437_v6 = vpop.xlane.xlu0 %436 }
 0x19c   :  { %v730_v0 = vpop.eup %729  ;;  %731 = vlog2.f32 %v437_v6 }
 0x19d   :  { %v453_v8 = vmul.f32 0.6931472, %v730_v0  ;;  %v423_v11 = vpop.xlane.xlu2 %422 }
 0x19e   :  { %733 = vlog2.f32 %v423_v11 }
 0x19f   :  { %v484_v1 = vsub.f32 %v995_v3, %v453_v8 }
 0x1a1   :  { %500 = vst [vmem:[%s1125_s3] sm:$0xff] %v484_v1 }
 0x1a2   :  { %v732_v13 = vpop.eup %731 }
 0x1a3   :  { %v469_v4 = vmul.f32 0.6931472, %v732_v13 }
 0x1a4   :  { %v734_v14 = vpop.eup %733 }
 0x1a5   :  { %v492_v15 = vsub.f32 %v999_v7, %v469_v4  ;;  %v455_v17 = vmul.f32 0.6931472, %v734_v14  ;;  %v425_v12 = vpop.xlane.xlu0 %424 }
 0x1a6   :  { %v439_v18 = vpop.xlane.xlu1 %438  ;;  %735 = vlog2.f32 %v425_v12 }
 0x1a7   :  { %508 = vst [vmem:[%s1125_s3 + $0x40] sm:$0xff] %v492_v15  ;;  %v485_v21 = vsub.f32 %v1003_v10, %v455_v17  ;;  %737 = vlog2.f32 %v439_v18 }
 0x1a9   :  { %501 = vst [vmem:[%s1125_s3 + $0x8] sm:$0xff] %v485_v21 }
 0x1ac   :  { %v736_v3 = vpop.eup %735 }
 0x1ad   :  { %v738_v23 = vpop.eup %737  ;;  %v457_v20 = vmul.f32 0.6931472, %v736_v3  ;;  %v441_v24 = vpop.xlane.xlu2 %440 }
 0x1ae   :  { %v471_v7 = vmul.f32 0.6931472, %v738_v23  ;;  %739 = vlog2.f32 %v441_v24 }
 0x1af   :  { %v486_v19 = vsub.f32 %v1007_v16, %v457_v20 }
 0x1b0   :  { %v493_v27 = vsub.f32 %v1010_v9, %v471_v7 }
 0x1b1   :  { %502 = vst [vmem:[%s1125_s3 + $0x10] sm:$0xff] %v486_v19 }
 0x1b2   :  { %509 = vst [vmem:[%s1125_s3 + $0x48] sm:$0xff] %v493_v27 }
 0x1b3   :  { %v443_v10 = vpop.xlane.xlu0 %442 }
 0x1b4   :  { %v740_v28 = vpop.eup %739  ;;  %741 = vlog2.f32 %v443_v10 }
 0x1b5   :  { %v473_v30 = vmul.f32 0.6931472, %v740_v28  ;;  %v427_v25 = vpop.xlane.xlu1 %426 }
 0x1b6   :  { %743 = vlog2.f32 %v427_v25 }
 0x1b7   :  { %v494_v31 = vsub.f32 %v1015_v22, %v473_v30 }
 0x1b9   :  { %510 = vst [vmem:[%s1125_s3 + $0x50] sm:$0xff] %v494_v31 }
 0x1ba   :  { %v742_v16 = vpop.eup %741 }
 0x1bb   :  { %v475_v9 = vmul.f32 0.6931472, %v742_v16  ;;  %v429_v33 = vpop.xlane.xlu2 %428 }
 0x1bc   :  { %v744_v36 = vpop.eup %743  ;;  %745 = vlog2.f32 %v429_v33 }
 0x1bd   :  { %v495_v37 = vsub.f32 %v1019_v26, %v475_v9  ;;  %v459_v34 = vmul.f32 0.6931472, %v744_v36  ;;  %v445_v38 = vpop.xlane.xlu1 %444 }
 0x1be   :  { %747 = vlog2.f32 %v445_v38 }
 0x1bf   :  { %511 = vst [vmem:[%s1125_s3 + $0x58] sm:$0xff] %v495_v37  ;;  %v487_v22 = vsub.f32 %v1023_v29, %v459_v34 }
 0x1c1   :  { %503 = vst [vmem:[%s1125_s3 + $0x18] sm:$0xff] %v487_v22 }
 0x1c2   :  { %v746_v39 = vpop.eup %745 }
 0x1c3   :  { %v461_v43 = vmul.f32 0.6931472, %v746_v39  ;;  %v431_v40 = vpop.xlane.xlu0 %430 }
 0x1c4   :  { %v748_v44 = vpop.eup %747  ;;  %749 = vlog2.f32 %v431_v40 }
 0x1c5   :  { %v488_v26 = vsub.f32 %v1027_v35, %v461_v43  ;;  %v477_v45 = vmul.f32 0.6931472, %v748_v44  ;;  %v433_v46 = vpop.xlane.xlu1 %432 }
 0x1c6   :  { %751 = vlog2.f32 %v433_v46 }
 0x1c7   :  { %504 = vst [vmem:[%s1125_s3 + $0x20] sm:$0xff] %v488_v26  ;;  %v496_v29 = vsub.f32 %v1030_v32, %v477_v45 }
 0x1c9   :  { %512 = vst [vmem:[%s1125_s3 + $0x60] sm:$0xff] %v496_v29 }
 0x1ca   :  { %v750_v48 = vpop.eup %749 }
 0x1cb   :  { %v463_v47 = vmul.f32 0.6931472, %v750_v48  ;;  %v449_v51 = vpop.xlane.xlu0 %448 }
 0x1cc   :  { %v752_v52 = vpop.eup %751  ;;  %753 = vlog2.f32 %v449_v51 }
 0x1cd   :  { %v489_v35 = vsub.f32 %v1035_v42, %v463_v47  ;;  %v465_v50 = vmul.f32 0.6931472, %v752_v52  ;;  %v435_v54 = vpop.xlane.xlu2 %434 }
 0x1ce   :  { %755 = vlog2.f32 %v435_v54 }
 0x1cf   :  { %505 = vst [vmem:[%s1125_s3 + $0x28] sm:$0xff] %v489_v35  ;;  %v490_v32 = vsub.f32 %v1039_v41, %v465_v50 }
 0x1d1   :  { %506 = vst [vmem:[%s1125_s3 + $0x30] sm:$0xff] %v490_v32 }
 0x1d2   :  { %v754_v56 = vpop.eup %753 }
 0x1d3   :  { %v481_v55 = vmul.f32 0.6931472, %v754_v56  ;;  %v451_v59 = vpop.xlane.xlu1 %450 }
 0x1d4   :  { %v756_v60 = vpop.eup %755  ;;  %757 = vlog2.f32 %v451_v59 }
 0x1d5   :  { %v498_v42 = vsub.f32 %v1043_v49, %v481_v55  ;;  %v467_v58 = vmul.f32 0.6931472, %v756_v60  ;;  %v447_v62 = vpop.xlane.xlu2 %446 }
 0x1d6   :  { %759 = vlog2.f32 %v447_v62 }
 0x1d7   :  { %514 = vst [vmem:[%s1125_s3 + $0x70] sm:$0xff] %v498_v42  ;;  %v491_v41 = vsub.f32 %v1047_v53, %v467_v58 }
 0x1d9   :  { %507 = vst [vmem:[%s1125_s3 + $0x38] sm:$0xff] %v491_v41 }
 0x1da   :  { %v758_v2 = vpop.eup %757 }
 0x1db   :  { %v483_v5 = vmul.f32 0.6931472, %v758_v2 }
 0x1dc   :  { %v760_v63 = vpop.eup %759 }
 0x1dd   :  { %v499_v6 = vsub.f32 %v1051_v57, %v483_v5  ;;  %v479_v0 = vmul.f32 0.6931472, %v760_v63 }
 0x1df   :  { %515 = vst [vmem:[%s1125_s3 + $0x78] sm:$0xff] %v499_v6  ;;  %v497_v49 = vsub.f32 %v1055_v61, %v479_v0 }
 0x1e1   :  { %513 = vst [vmem:[%s1125_s3 + $0x68] sm:$0xff] %v497_v49 }

// kernel: rnn_decoder_forward.2
= control target key start
LH: loop header
LB: loop body
LE: loop exit
PB: predicated region body
PF: predicated region fallthrough
CT: control target
= control target key end

     0   :  { %vm60_vm0 = vcmask 1043456   ;;  %vm56_vm1 = vcmask 64512   ;;  %s7546_s1 = inlined_call_operand.vmem [shape: bf16[8,512], index: 1, kind: input, shape index: {}]   ;;  %s7547_s2 = inlined_call_operand.vmem [shape: bf16[8,512], index: 2, kind: input, shape index: {}]   ;;  %s7548_s0 = inlined_call_operand.vmem [shape: bf16[16,8], index: 0, kind: input, shape index: {}]   ;;  %s7549_s3 = inlined_call_operand.vmem [shape: bf16[128,512], index: 3, kind: input, shape index: {}]   ;;  %s7550_s4 = inlined_call_operand.vmem [shape: bf16[128,512], index: 4, kind: input, shape index: {}]   ;;  %s7551_s5 = inlined_call_operand.vmem [shape: f32[1,512], index: 5, kind: input, shape index: {}]   ;;  %s7552_s6 = inlined_call_operand.vmem [shape: f32[1,512], index: 6, kind: input, shape index: {}]   ;;  %s7553_s7 = inlined_call_operand.vmem [shape: bf16[128,256], index: 7, kind: output, shape index: {}]  }
   0x1   :  { %v29_v0 = vld [vmem:[%s7546_s1] sm:$0xff]  ;;  %v30_v1 = vld [vmem:[%s7546_s1 + $0x8] sm:$0xff]  ;;  %v4121_v18 = vld [vmem:[%s7549_s3 + $0xec] sm:$0xf0] }
   0x2   :  { %v48_v2 = vunpack.c.l.b16 %v29_v0  ;;  %v49_v3 = vunpack.c.h.b16 %v29_v0  ;;  %v50_v4 = vunpack.c.l.b16 %v30_v1  ;;  %v51_v5 = vunpack.c.h.b16 %v30_v1  ;;  %v129_v6 = vld [vmem:[%s7547_s2] sm:$0xff]  ;;  %v130_v7 = vld [vmem:[%s7547_s2 + $0x8] sm:$0xff]  ;;  %v3826_v24 = vld [vmem:[%s7549_s3 + $0xf0] sm:$0xf0] }
   0x3   :  { %v143_v8 = vunpack.c.l.b16 %v129_v6  ;;  %v144_v9 = vunpack.c.h.b16 %v129_v6  ;;  %v145_v10 = vunpack.c.l.b16 %v130_v7  ;;  %v146_v11 = vunpack.c.h.b16 %v130_v7  ;;  %v4724_v16 = vld [vmem:[%s7548_s0] sm:$0xff]  ;;  %v3832_v25 = vld [vmem:[%s7549_s3 + $0xe8] sm:$0xf]  ;;  %v4122_v30 = vld [vmem:[%s7549_s3 + $0xf4] sm:$0xf0] }
   0x4   :  { %v52_v12 = vpack.c.b16 %v48_v2, %v48_v2  ;;  %v53_v13 = vpack.c.b16 %v49_v3, %v49_v3  ;;  %v54_v14 = vpack.c.b16 %v50_v4, %v50_v4  ;;  %v55_v15 = vpack.c.b16 %v51_v5, %v51_v5  ;;  %v3824_v17 = vld [vmem:[%s7549_s3 + $0xe0] sm:$0xf]  ;;  %v4119_v23 = vld [vmem:[%s7549_s3 + $0xe4] sm:$0xf]  ;;  %v4120_v33 = vld [vmem:[%s7549_s3 + $0xec] sm:$0xf] }
   0x5   :  { %v147_v19 = vpack.c.b16 %v143_v8, %v143_v8  ;;  %v148_v20 = vpack.c.b16 %v144_v9, %v144_v9  ;;  %v149_v21 = vpack.c.b16 %v145_v10, %v145_v10  ;;  %v150_v22 = vpack.c.b16 %v146_v11, %v146_v11  ;;  %v3834_v34 = vld [vmem:[%s7549_s3 + $0xf8] sm:$0xf0]  ;;  %v3808_v39 = vld [vmem:[%s7549_s3 + $0xc0] sm:$0xf]  ;;  %v4117_v40 = vld [vmem:[%s7549_s3 + $0xcc] sm:$0xf0] }
   0x6   :  { %v62_v26 = vsel %vm60_vm0, %v52_v12, 0  ;;  %v65_v27 = vsel %vm60_vm0, %v53_v13, 0  ;;  %v68_v28 = vsel %vm60_vm0, %v54_v14, 0  ;;  %v71_v29 = vsel %vm60_vm0, %v55_v15, 0  ;;  %v4115_v43 = vld [vmem:[%s7549_s3 + $0xc4] sm:$0xf] }
   0x7   :  { %80 = vmatpush.bf16.msra.mxu0 %v62_v26  ;;  %94 = vmatpush.bf16.msra.mxu1 %v65_v27  ;;  %v152_v31 = vsel %vm60_vm0, %v147_v19, 0  ;;  %v155_v32 = vsel %vm60_vm0, %v148_v20, 0  ;;  %v158_v35 = vsel %vm60_vm0, %v149_v21, 0  ;;  %v161_v36 = vsel %vm60_vm0, %v150_v22, 0  ;;  %v3810_v44 = vld [vmem:[%s7549_s3 + $0xd0] sm:$0xf0] }
   0x8   :  { %108 = vmatpush.bf16.msra.mxu2 %v68_v28  ;;  %122 = vmatpush.bf16.msra.mxu3 %v71_v29  ;;  %v4758_v37 = vor.u32 %v4121_v18, %v3824_v17  ;;  %v4760_v38 = vor.u32 %v4119_v23, %v3826_v24  ;;  %v4772_v41 = vor.u32 %v4122_v30, %v3832_v25  ;;  %v3816_v45 = vld [vmem:[%s7549_s3 + $0xc8] sm:$0xf]  ;;  %v4118_v46 = vld [vmem:[%s7549_s3 + $0xd4] sm:$0xf0]  ;;  %v4116_v47 = vld [vmem:[%s7549_s3 + $0xcc] sm:$0xf] }
   0x9   :  { %v4774_v42 = vor.u32 %v4120_v33, %v3834_v34  ;;  %v3818_v48 = vld [vmem:[%s7549_s3 + $0xd8] sm:$0xf0]  ;;  %v4800_v49 = vor.u32 %v4117_v40, %v3808_v39  ;;  %v4802_v50 = vor.u32 %v4115_v43, %v3810_v44  ;;  %v3792_v51 = vld [vmem:[%s7549_s3 + $0xa0] sm:$0xf]  ;;  %v4113_v52 = vld [vmem:[%s7549_s3 + $0xac] sm:$0xf0]  ;;  %v4812_v53 = vor.u32 %v4118_v46, %v3816_v45 }
   0xa   :  { %3702 = vmatmul.msk.bf16.vlgmr.msra.gmra.mxu0 %vm56_vm1, %v4724_v16  ;;  %3703 = vmatmul.msk.bf16.vlgmr.msra.gmra.mxu1 %vm56_vm1, %v4724_v16  ;;  %v4814_v54 = vor.u32 %v4116_v47, %v3818_v48  ;;  %v4111_v55 = vld [vmem:[%s7549_s3 + $0xa4] sm:$0xf]  ;;  %v3794_v56 = vld [vmem:[%s7549_s3 + $0xb0] sm:$0xf0]  ;;  %v3800_v57 = vld [vmem:[%s7549_s3 + $0xa8] sm:$0xf]  ;;  %v4836_v61 = vor.u32 %v4113_v52, %v3792_v51 }
   0xb   :  { %170 = vmatpush.bf16.msrb.mxu0 %v152_v31  ;;  %184 = vmatpush.bf16.msrb.mxu1 %v155_v32  ;;  %v4114_v58 = vld [vmem:[%s7549_s3 + $0xb4] sm:$0xf0]  ;;  %v4112_v59 = vld [vmem:[%s7549_s3 + $0xac] sm:$0xf]  ;;  %v3802_v60 = vld [vmem:[%s7549_s3 + $0xb8] sm:$0xf0]  ;;  %v4838_v62 = vor.u32 %v4111_v55, %v3794_v56 }
   0xc   :  { %3704 = vmatmul.msk.bf16.vlgmr.msra.gmra.mxu2 %vm56_vm1, %v4724_v16  ;;  %3705 = vmatmul.msk.bf16.vlgmr.msra.gmra.mxu3 %vm56_vm1, %v4724_v16  ;;  %v3776_v63 = vld [vmem:[%s7549_s3 + $0x80] sm:$0xf]  ;;  %v4109_v0 = vld [vmem:[%s7549_s3 + $0x8c] sm:$0xf0]  ;;  %v4848_v1 = vor.u32 %v4114_v58, %v3800_v57  ;;  %v4850_v2 = vor.u32 %v4112_v59, %v3802_v60  ;;  %v4107_v3 = vld [vmem:[%s7549_s3 + $0x84] sm:$0xf] }
   0xd   :  { %198 = vmatpush.bf16.msrb.mxu2 %v158_v35  ;;  %212 = vmatpush.bf16.msrb.mxu3 %v161_v36  ;;  %v3778_v4 = vld [vmem:[%s7549_s3 + $0x90] sm:$0xf0]  ;;  %v3784_v5 = vld [vmem:[%s7549_s3 + $0x88] sm:$0xf]  ;;  %v4110_v6 = vld [vmem:[%s7549_s3 + $0x94] sm:$0xf0]  ;;  %v4872_v9 = vor.u32 %v4109_v0, %v3776_v63 }
   0xe   :  { %v4108_v7 = vld [vmem:[%s7549_s3 + $0x8c] sm:$0xf]  ;;  %v3786_v8 = vld [vmem:[%s7549_s3 + $0x98] sm:$0xf0]  ;;  %v4874_v10 = vor.u32 %v4107_v3, %v3778_v4  ;;  %v3760_v11 = vld [vmem:[%s7549_s3 + $0x60] sm:$0xf]  ;;  %v4884_v13 = vor.u32 %v4110_v6, %v3784_v5 }
   0xf   :  { %443 = vmatpush.bf16.msra.mxu0 %v4758_v37  ;;  %457 = vmatpush.bf16.msra.mxu1 %v4760_v38  ;;  %v4105_v12 = vld [vmem:[%s7549_s3 + $0x6c] sm:$0xf0]  ;;  %v4886_v14 = vor.u32 %v4108_v7, %v3786_v8  ;;  %v4103_v15 = vld [vmem:[%s7549_s3 + $0x64] sm:$0xf]  ;;  %v3762_v17 = vld [vmem:[%s7549_s3 + $0x70] sm:$0xf0] }
  0x10   :  { %v3768_v18 = vld [vmem:[%s7549_s3 + $0x68] sm:$0xf]  ;;  %v4106_v19 = vld [vmem:[%s7549_s3 + $0x74] sm:$0xf0]  ;;  %v4104_v20 = vld [vmem:[%s7549_s3 + $0x6c] sm:$0xf]  ;;  %v4908_v22 = vor.u32 %v4105_v12, %v3760_v11  ;;  %v4910_v23 = vor.u32 %v4103_v15, %v3762_v17 }
  0x11   :  { %471 = vmatpush.bf16.msra.mxu2 %v4772_v41  ;;  %485 = vmatpush.bf16.msra.mxu3 %v4774_v42  ;;  %v3770_v21 = vld [vmem:[%s7549_s3 + $0x78] sm:$0xf0]  ;;  %v3744_v24 = vld [vmem:[%s7549_s3 + $0x40] sm:$0xf]  ;;  %v4101_v25 = vld [vmem:[%s7549_s3 + $0x4c] sm:$0xf0]  ;;  %v4920_v26 = vor.u32 %v4106_v19, %v3768_v18 }
  0x12   :  { %v4922_v27 = vor.u32 %v4104_v20, %v3770_v21  ;;  %v4099_v28 = vld [vmem:[%s7549_s3 + $0x44] sm:$0xf]  ;;  %v3746_v29 = vld [vmem:[%s7549_s3 + $0x50] sm:$0xf0]  ;;  %v3752_v30 = vld [vmem:[%s7549_s3 + $0x48] sm:$0xf]  ;;  %v4952_v34 = vor.u32 %v4101_v25, %v3744_v24 }
  0x13   :  { %444 = vmatpush.bf16.msra.mxu0 %v4800_v49  ;;  %458 = vmatpush.bf16.msra.mxu1 %v4802_v50  ;;  %v4102_v31 = vld [vmem:[%s7549_s3 + $0x54] sm:$0xf0]  ;;  %v4100_v32 = vld [vmem:[%s7549_s3 + $0x4c] sm:$0xf]  ;;  %v3754_v33 = vld [vmem:[%s7549_s3 + $0x58] sm:$0xf0]  ;;  %v4954_v35 = vor.u32 %v4099_v28, %v3746_v29 }
  0x14   :  { %v3728_v36 = vld [vmem:[%s7549_s3 + $0x20] sm:$0xf]  ;;  %v4097_v39 = vld [vmem:[%s7549_s3 + $0x2c] sm:$0xf0]  ;;  %v4966_v40 = vor.u32 %v4100_v32, %v3754_v33  ;;  %v4095_v43 = vld [vmem:[%s7549_s3 + $0x24] sm:$0xf] }
  0x15   :  { %472 = vmatpush.bf16.msra.mxu2 %v4812_v53  ;;  %486 = vmatpush.bf16.msra.mxu3 %v4814_v54  ;;  %7688 = vst [vmem:[#allocation2_spill] sm:$0xff] %v4954_v35  ;;  %v3730_v44 = vld [vmem:[%s7549_s3 + $0x30] sm:$0xf0]  ;;  %v3736_v45 = vld [vmem:[%s7549_s3 + $0x28] sm:$0xf]  ;;  %v4991_v52 = vor.u32 %v4097_v39, %v3728_v36 }
  0x16   :  { %7690 = vst [vmem:[#allocation4_spill] sm:$0xff] %v4966_v40  ;;  %v4098_v46 = vld [vmem:[%s7549_s3 + $0x34] sm:$0xf0]  ;;  %v4096_v47 = vld [vmem:[%s7549_s3 + $0x2c] sm:$0xf]  ;;  %v4993_v55 = vor.u32 %v4095_v43, %v3730_v44 }
  0x17   :  { %445 = vmatpush.bf16.msra.mxu0 %v4836_v61  ;;  %459 = vmatpush.bf16.msra.mxu1 %v4838_v62  ;;  %v3738_v48 = vld [vmem:[%s7549_s3 + $0x38] sm:$0xf0]  ;;  %v3712_v51 = vld [vmem:[%s7549_s3] sm:$0xf]  ;;  %7691 = vst [vmem:[#allocation5_spill] sm:$0xff] %v4991_v52  ;;  %v5006_v59 = vor.u32 %v4098_v46, %v3736_v45 }
  0x18   :  { %7692 = vst [vmem:[#allocation6_spill] sm:$0xff] %v4993_v55  ;;  %v4093_v56 = vld [vmem:[%s7549_s3 + $0xc] sm:$0xf0]  ;;  %v4091_v57 = vld [vmem:[%s7549_s3 + $0x4] sm:$0xf]  ;;  %v5008_v60 = vor.u32 %v4096_v47, %v3738_v48 }
  0x19   :  { %473 = vmatpush.bf16.msra.mxu2 %v4848_v1  ;;  %487 = vmatpush.bf16.msra.mxu3 %v4850_v2  ;;  %v3714_v58 = vld [vmem:[%s7549_s3 + $0x10] sm:$0xf0]  ;;  %7693 = vst [vmem:[#allocation7_spill] sm:$0xff] %v5006_v59  ;;  %v3720_v63 = vld [vmem:[%s7549_s3 + $0x8] sm:$0xf]  ;;  %v5039_v12 = vor.u32 %v4093_v56, %v3712_v51 }
  0x1a   :  { %3706 = vmatmul.msk.bf16.vlgmr.msrb.gmra.mxu0 %vm56_vm1, %v4724_v16  ;;  %3707 = vmatmul.msk.bf16.vlgmr.msrb.gmra.mxu1 %vm56_vm1, %v4724_v16  ;;  %7694 = vst [vmem:[#allocation8_spill] sm:$0xff] %v5008_v60  ;;  %v4094_v0 = vld [vmem:[%s7549_s3 + $0x14] sm:$0xf0]  ;;  %v4092_v3 = vld [vmem:[%s7549_s3 + $0xc] sm:$0xf]  ;;  %v5041_v15 = vor.u32 %v4091_v57, %v3714_v58 }
  0x1b   :  { %446 = vmatpush.bf16.msra.mxu0 %v4872_v9  ;;  %460 = vmatpush.bf16.msra.mxu1 %v4874_v10  ;;  %v3722_v4 = vld [vmem:[%s7549_s3 + $0x18] sm:$0xf0]  ;;  %v3952_v5 = vld [vmem:[%s7550_s4 + $0xe0] sm:$0xf]  ;;  %v4153_v6 = vld [vmem:[%s7550_s4 + $0xec] sm:$0xf0]  ;;  %v5054_v20 = vor.u32 %v4094_v0, %v3720_v63 }
  0x1c   :  { %3708 = vmatmul.msk.bf16.vlgmr.msrb.gmra.mxu2 %vm56_vm1, %v4724_v16  ;;  %3709 = vmatmul.msk.bf16.vlgmr.msrb.gmra.mxu3 %vm56_vm1, %v4724_v16  ;;  %v4964_v16 = vor.u32 %v4102_v31, %v3752_v30  ;;  %v4151_v7 = vld [vmem:[%s7550_s4 + $0xe4] sm:$0xf]  ;;  %v3954_v8 = vld [vmem:[%s7550_s4 + $0xf0] sm:$0xf0]  ;;  %v3960_v11 = vld [vmem:[%s7550_s4 + $0xe8] sm:$0xf]  ;;  %v5056_v21 = vor.u32 %v4092_v3, %v3722_v4  ;;  %v5058_v24 = vor.u32 %v4153_v6, %v3952_v5 }
  0x1d   :  { %474 = vmatpush.bf16.msra.mxu2 %v4884_v13  ;;  %488 = vmatpush.bf16.msra.mxu3 %v4886_v14  ;;  %7695 = vst [vmem:[#allocation9_spill] sm:$0xff] %v5039_v12  ;;  %v4154_v17 = vld [vmem:[%s7550_s4 + $0xf4] sm:$0xf0]  ;;  %v4152_v18 = vld [vmem:[%s7550_s4 + $0xec] sm:$0xf]  ;;  %v5060_v25 = vor.u32 %v4151_v7, %v3954_v8  ;;  %v7554_v0 = vmov 0  }
  0x1e   :  { %7689 = vst [vmem:[#allocation3_spill] sm:$0xff] %v4964_v16  ;;  %v3962_v19 = vld [vmem:[%s7550_s4 + $0xf8] sm:$0xf0]  ;;  %v3936_v28 = vld [vmem:[%s7550_s4 + $0xc0] sm:$0xf]  ;;  %v5068_v30 = vor.u32 %v4154_v17, %v3960_v11 }
  0x1f   :  { %447 = vmatpush.bf16.msra.mxu0 %v4908_v22  ;;  %461 = vmatpush.bf16.msra.mxu1 %v4910_v23  ;;  %7696 = vst [vmem:[#allocation10_spill] sm:$0xff] %v5041_v15  ;;  %v4149_v29 = vld [vmem:[%s7550_s4 + $0xcc] sm:$0xf0]  ;;  %v5070_v31 = vor.u32 %v4152_v18, %v3962_v19  ;;  %v4147_v32 = vld [vmem:[%s7550_s4 + $0xc4] sm:$0xf] }
  0x20   :  { %7697 = vst [vmem:[#allocation11_spill] sm:$0xff] %v5054_v20  ;;  %v3938_v33 = vld [vmem:[%s7550_s4 + $0xd0] sm:$0xf0]  ;;  %v3944_v36 = vld [vmem:[%s7550_s4 + $0xc8] sm:$0xf]  ;;  %v5096_v45 = vor.u32 %v4149_v29, %v3936_v28 }
  0x21   :  { %475 = vmatpush.bf16.msra.mxu2 %v4920_v26  ;;  %489 = vmatpush.bf16.msra.mxu3 %v4922_v27  ;;  %7698 = vst [vmem:[#allocation12_spill] sm:$0xff] %v5056_v21  ;;  %v4150_v39 = vld [vmem:[%s7550_s4 + $0xd4] sm:$0xf0]  ;;  %v4148_v43 = vld [vmem:[%s7550_s4 + $0xcc] sm:$0xf]  ;;  %v5098_v46 = vor.u32 %v4147_v32, %v3938_v33 }
  0x22   :  { %7699 = vst [vmem:[#allocation13_spill] sm:$0xff] %v5058_v24  ;;  %v3946_v44 = vld [vmem:[%s7550_s4 + $0xd8] sm:$0xf0]  ;;  %v3920_v47 = vld [vmem:[%s7550_s4 + $0xa0] sm:$0xf]  ;;  %v5108_v51 = vor.u32 %v4150_v39, %v3944_v36 }
  0x23   :  { %448 = vmatpush.bf16.msra.mxu0 %v4952_v34  ;;  %462 = vmatpush.bf16.msra.mxu1 %v4954_v35  ;;  %7700 = vst [vmem:[#allocation14_spill] sm:$0xff] %v5060_v25  ;;  %v4145_v48 = vld [vmem:[%s7550_s4 + $0xac] sm:$0xf0]  ;;  %v5110_v56 = vor.u32 %v4148_v43, %v3946_v44  ;;  %v4143_v57 = vld [vmem:[%s7550_s4 + $0xa4] sm:$0xf] }
  0x24   :  { %7701 = vst [vmem:[#allocation15_spill] sm:$0xff] %v5068_v30  ;;  %v3922_v58 = vld [vmem:[%s7550_s4 + $0xb0] sm:$0xf0]  ;;  %v3928_v63 = vld [vmem:[%s7550_s4 + $0xa8] sm:$0xf]  ;;  %v5136_v6 = vor.u32 %v4145_v48, %v3920_v47 }
  0x25   :  { %476 = vmatpush.bf16.msra.mxu2 %v4964_v16  ;;  %490 = vmatpush.bf16.msra.mxu3 %v4966_v40  ;;  %7702 = vst [vmem:[#allocation16_spill] sm:$0xff] %v5070_v31  ;;  %v4146_v3 = vld [vmem:[%s7550_s4 + $0xb4] sm:$0xf0]  ;;  %v4144_v4 = vld [vmem:[%s7550_s4 + $0xac] sm:$0xf]  ;;  %v5138_v7 = vor.u32 %v4143_v57, %v3922_v58 }
  0x26   :  { %7703 = vst [vmem:[#allocation17_spill] sm:$0xff] %v5096_v45  ;;  %v3930_v5 = vld [vmem:[%s7550_s4 + $0xb8] sm:$0xf0]  ;;  %v3904_v8 = vld [vmem:[%s7550_s4 + $0x80] sm:$0xf]  ;;  %v5148_v17 = vor.u32 %v4146_v3, %v3928_v63 }
  0x27   :  { %449 = vmatpush.bf16.msra.mxu0 %v4991_v52  ;;  %463 = vmatpush.bf16.msra.mxu1 %v4993_v55  ;;  %7704 = vst [vmem:[#allocation18_spill] sm:$0xff] %v5098_v46  ;;  %v4141_v11 = vld [vmem:[%s7550_s4 + $0x8c] sm:$0xf0]  ;;  %v5150_v18 = vor.u32 %v4144_v4, %v3930_v5  ;;  %v4139_v19 = vld [vmem:[%s7550_s4 + $0x84] sm:$0xf] }
  0x28   :  { %7705 = vst [vmem:[#allocation19_spill] sm:$0xff] %v5108_v51  ;;  %v3906_v28 = vld [vmem:[%s7550_s4 + $0x90] sm:$0xf0]  ;;  %v3912_v29 = vld [vmem:[%s7550_s4 + $0x88] sm:$0xf]  ;;  %v5172_v39 = vor.u32 %v4141_v11, %v3904_v8 }
  0x29   :  { %477 = vmatpush.bf16.msra.mxu2 %v5006_v59  ;;  %491 = vmatpush.bf16.msra.mxu3 %v5008_v60  ;;  %7706 = vst [vmem:[#allocation20_spill] sm:$0xff] %v5110_v56  ;;  %v4142_v32 = vld [vmem:[%s7550_s4 + $0x94] sm:$0xf0]  ;;  %v4140_v33 = vld [vmem:[%s7550_s4 + $0x8c] sm:$0xf]  ;;  %v5174_v43 = vor.u32 %v4139_v19, %v3906_v28 }
  0x2a   :  { %7707 = vst [vmem:[#allocation21_spill] sm:$0xff] %v5136_v6  ;;  %v3914_v36 = vld [vmem:[%s7550_s4 + $0x98] sm:$0xf0]  ;;  %v3888_v44 = vld [vmem:[%s7550_s4 + $0x60] sm:$0xf]  ;;  %v5184_v48 = vor.u32 %v4142_v32, %v3912_v29 }
  0x2b   :  { %450 = vmatpush.bf16.msra.mxu0 %v5039_v12  ;;  %464 = vmatpush.bf16.msra.mxu1 %v5041_v15  ;;  %7708 = vst [vmem:[#allocation22_spill] sm:$0xff] %v5138_v7  ;;  %v4137_v47 = vld [vmem:[%s7550_s4 + $0x6c] sm:$0xf0]  ;;  %v5186_v57 = vor.u32 %v4140_v33, %v3914_v36  ;;  %v4135_v58 = vld [vmem:[%s7550_s4 + $0x64] sm:$0xf] }
  0x2c   :  { %7709 = vst [vmem:[#allocation23_spill] sm:$0xff] %v5148_v17  ;;  %v3890_v63 = vld [vmem:[%s7550_s4 + $0x70] sm:$0xf0]  ;;  %v3896_v3 = vld [vmem:[%s7550_s4 + $0x68] sm:$0xf]  ;;  %v5208_v11 = vor.u32 %v4137_v47, %v3888_v44 }
  0x2d   :  { %478 = vmatpush.bf16.msra.mxu2 %v5054_v20  ;;  %492 = vmatpush.bf16.msra.mxu3 %v5056_v21  ;;  %7710 = vst [vmem:[#allocation24_spill] sm:$0xff] %v5150_v18  ;;  %v4138_v4 = vld [vmem:[%s7550_s4 + $0x74] sm:$0xf0]  ;;  %v4136_v5 = vld [vmem:[%s7550_s4 + $0x6c] sm:$0xf]  ;;  %v5210_v19 = vor.u32 %v4135_v58, %v3890_v63 }
  0x2e   :  { %451 = vmatmul.bf16.vlgmr.msra.gmra.mxu0 %v7554_v0  ;;  %465 = vmatmul.bf16.vlgmr.msra.gmra.mxu1 %v7554_v0  ;;  %7711 = vst [vmem:[#allocation25_spill] sm:$0xff] %v5172_v39  ;;  %v3898_v8 = vld [vmem:[%s7550_s4 + $0x78] sm:$0xf0]  ;;  %v3872_v28 = vld [vmem:[%s7550_s4 + $0x40] sm:$0xf]  ;;  %v5220_v32 = vor.u32 %v4138_v4, %v3896_v3 }
  0x2f   :  { %659 = vmatpush.bf16.msrb.mxu0 %v5058_v24  ;;  %673 = vmatpush.bf16.msrb.mxu1 %v5060_v25  ;;  %7712 = vst [vmem:[#allocation26_spill] sm:$0xff] %v5174_v43  ;;  %v4133_v29 = vld [vmem:[%s7550_s4 + $0x4c] sm:$0xf0]  ;;  %v5222_v33 = vor.u32 %v4136_v5, %v3898_v8  ;;  %v4131_v36 = vld [vmem:[%s7550_s4 + $0x44] sm:$0xf] }
  0x30   :  { %479 = vmatmul.bf16.vlgmr.msra.gmra.mxu2 %v7554_v0  ;;  %493 = vmatmul.bf16.vlgmr.msra.gmra.mxu3 %v7554_v0  ;;  %7713 = vst [vmem:[#allocation27_spill] sm:$0xff] %v5184_v48  ;;  %v3874_v44 = vld [vmem:[%s7550_s4 + $0x50] sm:$0xf0]  ;;  %v3880_v47 = vld [vmem:[%s7550_s4 + $0x48] sm:$0xf]  ;;  %v5244_v4 = vor.u32 %v4133_v29, %v3872_v28 }
  0x31   :  { %687 = vmatpush.bf16.msrb.mxu2 %v5068_v30  ;;  %701 = vmatpush.bf16.msrb.mxu3 %v5070_v31  ;;  %7714 = vst [vmem:[#allocation28_spill] sm:$0xff] %v5186_v57  ;;  %v4134_v58 = vld [vmem:[%s7550_s4 + $0x54] sm:$0xf0]  ;;  %v4132_v63 = vld [vmem:[%s7550_s4 + $0x4c] sm:$0xf]  ;;  %v5246_v5 = vor.u32 %v4131_v36, %v3874_v44 }
  0x32   :  { %7715 = vst [vmem:[#allocation29_spill] sm:$0xff] %v5208_v11  ;;  %v3882_v3 = vld [vmem:[%s7550_s4 + $0x58] sm:$0xf0]  ;;  %v3856_v8 = vld [vmem:[%s7550_s4 + $0x20] sm:$0xf] }
  0x33   :  { %660 = vmatpush.bf16.msrb.mxu0 %v5096_v45  ;;  %674 = vmatpush.bf16.msrb.mxu1 %v5098_v46  ;;  %7716 = vst [vmem:[#allocation30_spill] sm:$0xff] %v5210_v19  ;;  %v4129_v0 = vld [vmem:[%s7550_s4 + $0x2c] sm:$0xf0]  ;;  %v4127_v28 = vld [vmem:[%s7550_s4 + $0x24] sm:$0xf] }
  0x34   :  { %7717 = vst [vmem:[#allocation31_spill] sm:$0xff] %v5220_v32  ;;  %v3858_v29 = vld [vmem:[%s7550_s4 + $0x30] sm:$0xf0]  ;;  %v3864_v36 = vld [vmem:[%s7550_s4 + $0x28] sm:$0xf] }
  0x35   :  { %688 = vmatpush.bf16.msrb.mxu2 %v5108_v51  ;;  %702 = vmatpush.bf16.msrb.mxu3 %v5110_v56  ;;  %7718 = vst [vmem:[#allocation32_spill] sm:$0xff] %v5222_v33  ;;  %v4130_v44 = vld [vmem:[%s7550_s4 + $0x34] sm:$0xf0] }
  0x36   :  { %7719 = vst [vmem:[#allocation33_spill] sm:$0xff] %v5244_v4 }
  0x37   :  { %661 = vmatpush.bf16.msrb.mxu0 %v5136_v6  ;;  %675 = vmatpush.bf16.msrb.mxu1 %v5138_v7  ;;  %7720 = vst [vmem:[#allocation34_spill] sm:$0xff] %v5246_v5 }
  0x39   :  { %689 = vmatpush.bf16.msrb.mxu2 %v5148_v17  ;;  %703 = vmatpush.bf16.msrb.mxu3 %v5150_v18 }
  0x3b   :  { %662 = vmatpush.bf16.msrb.mxu0 %v5172_v39  ;;  %676 = vmatpush.bf16.msrb.mxu1 %v5174_v43 }
  0x3d   :  { %690 = vmatpush.bf16.msrb.mxu2 %v5184_v48  ;;  %704 = vmatpush.bf16.msrb.mxu3 %v5186_v57  ;;  %v5256_v57 = vor.u32 %v4134_v58, %v3880_v47  ;;  %v4128_v47 = vld [vmem:[%s7550_s4 + $0x2c] sm:$0xf]  ;;  %v3866_v58 = vld [vmem:[%s7550_s4 + $0x38] sm:$0xf0] }
  0x3f   :  { %663 = vmatpush.bf16.msrb.mxu0 %v5208_v11  ;;  %677 = vmatpush.bf16.msrb.mxu1 %v5210_v19  ;;  %7721 = vst [vmem:[#allocation35_spill] sm:$0xff] %v5256_v57  ;;  %v5258_v11 = vor.u32 %v4132_v63, %v3882_v3  ;;  %v5280_v63 = vor.u32 %v4129_v0, %v3856_v8  ;;  %v4123_v0 = vld [vmem:[%s7550_s4 + $0x4] sm:$0xf]  ;;  %v3842_v8 = vld [vmem:[%s7550_s4 + $0x10] sm:$0xf0] }
  0x40   :  { %v5282_v3 = vor.u32 %v4127_v28, %v3858_v29  ;;  %v5292_v19 = vor.u32 %v4130_v44, %v3864_v36  ;;  %v3848_v28 = vld [vmem:[%s7550_s4 + $0x8] sm:$0xf]  ;;  %v4126_v29 = vld [vmem:[%s7550_s4 + $0x14] sm:$0xf0]  ;;  %v4124_v36 = vld [vmem:[%s7550_s4 + $0xc] sm:$0xf] }
  0x41   :  { %691 = vmatpush.bf16.msrb.mxu2 %v5220_v32  ;;  %705 = vmatpush.bf16.msrb.mxu3 %v5222_v33  ;;  %7722 = vst [vmem:[#allocation36_spill] sm:$0xff] %v5258_v11  ;;  %v3840_v33 = vld [vmem:[%s7550_s4] sm:$0xf]  ;;  %v4125_v32 = vld [vmem:[%s7550_s4 + $0xc] sm:$0xf0] }
  0x42   :  { %7723 = vst [vmem:[#allocation37_spill] sm:$0xff] %v5280_v63  ;;  %v3850_v44 = vld [vmem:[%s7550_s4 + $0x18] sm:$0xf0] }
  0x43   :  { %664 = vmatpush.bf16.msrb.mxu0 %v5244_v4  ;;  %678 = vmatpush.bf16.msrb.mxu1 %v5246_v5  ;;  %7724 = vst [vmem:[#allocation38_spill] sm:$0xff] %v5282_v3  ;;  %v5294_v4 = vor.u32 %v4128_v47, %v3866_v58  ;;  %v5316_v47 = vor.u32 %v4125_v32, %v3840_v33  ;;  %v7731_v32 = vmov 0   ;;  %v7732_v33 = vld [vmem:[#allocation28_spill] sm:$0xff] }
  0x44   :  { %7725 = vst [vmem:[#allocation39_spill] sm:$0xff] %v5292_v19  ;;  %v5318_v58 = vor.u32 %v4123_v0, %v3842_v8  ;;  %v7733_v0 = vld [vmem:[#allocation29_spill] sm:$0xff]  ;;  %v7734_v8 = vld [vmem:[#allocation30_spill] sm:$0xff] }
  0x45   :  { %692 = vmatpush.bf16.msrb.mxu2 %v5256_v57  ;;  %706 = vmatpush.bf16.msrb.mxu3 %v5258_v11  ;;  %7726 = vst [vmem:[#allocation40_spill] sm:$0xff] %v5294_v4  ;;  %v5322_v11 = vor.u32 %v4126_v29, %v3848_v28  ;;  %v5324_v57 = vor.u32 %v4124_v36, %v3850_v44  ;;  %v7735_v28 = vld [vmem:[#allocation31_spill] sm:$0xff]  ;;  %v7736_v29 = vld [vmem:[#allocation32_spill] sm:$0xff]  ;;  %v7737_v36 = vld [vmem:[#allocation33_spill] sm:$0xff] }
  0x46   :  { %7727 = vst [vmem:[#allocation41_spill] sm:$0xff] %v5316_v47  ;;  %v7738_v44 = vld [vmem:[#allocation35_spill] sm:$0xff] }
  0x47   :  { %665 = vmatpush.bf16.msrb.mxu0 %v5280_v63  ;;  %679 = vmatpush.bf16.msrb.mxu1 %v5282_v3  ;;  %7728 = vst [vmem:[#allocation42_spill] sm:$0xff] %v5318_v58 }
  0x48   :  { %7729 = vst [vmem:[#allocation43_spill] sm:$0xff] %v5322_v11 }
  0x49   :  { %693 = vmatpush.bf16.msrb.mxu2 %v5292_v19  ;;  %707 = vmatpush.bf16.msrb.mxu3 %v5294_v4  ;;  %7730 = vst [vmem:[#allocation44_spill] sm:$0xff] %v5324_v57 }
  0x4b   :  { %666 = vmatpush.bf16.msrb.mxu0 %v5316_v47  ;;  %680 = vmatpush.bf16.msrb.mxu1 %v5318_v58 }
  0x4d   :  { %694 = vmatpush.bf16.msrb.mxu2 %v5322_v11  ;;  %708 = vmatpush.bf16.msrb.mxu3 %v5324_v57 }
  0x4e   :  { %667 = vmatmul.bf16.vlgmr.msrb.gmra.mxu0 %v7731_v32  ;;  %681 = vmatmul.bf16.vlgmr.msrb.gmra.mxu1 %v7731_v32 }
  0x4f   :  { %987 = vmatpush.bf16.msra.mxu0 %v4758_v37  ;;  %1001 = vmatpush.bf16.msra.mxu1 %v4760_v38 }
  0x50   :  { %695 = vmatmul.bf16.vlgmr.msrb.gmra.mxu2 %v7731_v32  ;;  %709 = vmatmul.bf16.vlgmr.msrb.gmra.mxu3 %v7731_v32  ;;  %v7739_v32 = vld [vmem:[#allocation36_spill] sm:$0xff] }
  0x51   :  { %1015 = vmatpush.bf16.msra.mxu2 %v4772_v41  ;;  %1029 = vmatpush.bf16.msra.mxu3 %v4774_v42 }
  0x53   :  { %988 = vmatpush.bf16.msra.mxu0 %v4800_v49  ;;  %1002 = vmatpush.bf16.msra.mxu1 %v4802_v50 }
  0x55   :  { %1016 = vmatpush.bf16.msra.mxu2 %v4812_v53  ;;  %1030 = vmatpush.bf16.msra.mxu3 %v4814_v54 }
  0x57   :  { %989 = vmatpush.bf16.msra.mxu0 %v4836_v61  ;;  %1003 = vmatpush.bf16.msra.mxu1 %v4838_v62 }
  0x59   :  { %1017 = vmatpush.bf16.msra.mxu2 %v4848_v1  ;;  %1031 = vmatpush.bf16.msra.mxu3 %v4850_v2 }
  0x5b   :  { %990 = vmatpush.bf16.msra.mxu0 %v4872_v9  ;;  %1004 = vmatpush.bf16.msra.mxu1 %v4874_v10 }
  0x5d   :  { %1018 = vmatpush.bf16.msra.mxu2 %v4884_v13  ;;  %1032 = vmatpush.bf16.msra.mxu3 %v4886_v14 }
  0x5f   :  { %991 = vmatpush.bf16.msra.mxu0 %v4908_v22  ;;  %1005 = vmatpush.bf16.msra.mxu1 %v4910_v23 }
  0x61   :  { %1019 = vmatpush.bf16.msra.mxu2 %v4920_v26  ;;  %1033 = vmatpush.bf16.msra.mxu3 %v4922_v27 }
  0x63   :  { %992 = vmatpush.bf16.msra.mxu0 %v4952_v34  ;;  %1006 = vmatpush.bf16.msra.mxu1 %v4954_v35 }
  0x65   :  { %1020 = vmatpush.bf16.msra.mxu2 %v4964_v16  ;;  %1034 = vmatpush.bf16.msra.mxu3 %v4966_v40 }
  0x67   :  { %993 = vmatpush.bf16.msra.mxu0 %v4991_v52  ;;  %1007 = vmatpush.bf16.msra.mxu1 %v4993_v55 }
  0x69   :  { %1021 = vmatpush.bf16.msra.mxu2 %v5006_v59  ;;  %1035 = vmatpush.bf16.msra.mxu3 %v5008_v60 }
  0x6b   :  { %994 = vmatpush.bf16.msra.mxu0 %v5039_v12  ;;  %1008 = vmatpush.bf16.msra.mxu1 %v5041_v15 }
  0x6d   :  { %1022 = vmatpush.bf16.msra.mxu2 %v5054_v20  ;;  %1036 = vmatpush.bf16.msra.mxu3 %v5056_v21 }
  0x6f   :  { %1049 = vmatpush.bf16.msrb.mxu0 %v5058_v24  ;;  %1063 = vmatpush.bf16.msrb.mxu1 %v5060_v25 }
  0x71   :  { %1077 = vmatpush.bf16.msrb.mxu2 %v5068_v30  ;;  %1091 = vmatpush.bf16.msrb.mxu3 %v5070_v31 }
  0x73   :  { %1050 = vmatpush.bf16.msrb.mxu0 %v5096_v45  ;;  %1064 = vmatpush.bf16.msrb.mxu1 %v5098_v46 }
  0x75   :  { %1078 = vmatpush.bf16.msrb.mxu2 %v5108_v51  ;;  %1092 = vmatpush.bf16.msrb.mxu3 %v5110_v56 }
  0x77   :  { %1051 = vmatpush.bf16.msrb.mxu0 %v5136_v6  ;;  %1065 = vmatpush.bf16.msrb.mxu1 %v5138_v7 }
  0x79   :  { %1079 = vmatpush.bf16.msrb.mxu2 %v5148_v17  ;;  %1093 = vmatpush.bf16.msrb.mxu3 %v5150_v18 }
  0x7b   :  { %1052 = vmatpush.bf16.msrb.mxu0 %v5172_v39  ;;  %1066 = vmatpush.bf16.msrb.mxu1 %v5174_v43 }
  0x7d   :  { %1080 = vmatpush.bf16.msrb.mxu2 %v5184_v48  ;;  %1094 = vmatpush.bf16.msrb.mxu3 %v7732_v33 }
  0x7f   :  { %1053 = vmatpush.bf16.msrb.mxu0 %v7733_v0  ;;  %1067 = vmatpush.bf16.msrb.mxu1 %v7734_v8 }
  0x81   :  { %1081 = vmatpush.bf16.msrb.mxu2 %v7735_v28  ;;  %1095 = vmatpush.bf16.msrb.mxu3 %v7736_v29 }
  0x83   :  { %1054 = vmatpush.bf16.msrb.mxu0 %v7737_v36  ;;  %1068 = vmatpush.bf16.msrb.mxu1 %v5246_v5 }
  0x85   :  { %1082 = vmatpush.bf16.msrb.mxu2 %v7738_v44  ;;  %1096 = vmatpush.bf16.msrb.mxu3 %v7739_v32 }
  0x87   :  { %1055 = vmatpush.bf16.msrb.mxu0 %v5280_v63  ;;  %1069 = vmatpush.bf16.msrb.mxu1 %v5282_v3  ;;  %v82_v5 = vpop.f32.mrf.mxu0  ;;  %v96_v44 = vpop.f32.mrf.mxu1 }
  0x89   :  { %1083 = vmatpush.bf16.msrb.mxu2 %v5292_v19  ;;  %1097 = vmatpush.bf16.msrb.mxu3 %v5294_v4 }
  0x8b   :  { %1056 = vmatpush.bf16.msrb.mxu0 %v5316_v47  ;;  %1070 = vmatpush.bf16.msrb.mxu1 %v5318_v58 }
  0x8d   :  { %1084 = vmatpush.bf16.msrb.mxu2 %v5322_v11  ;;  %1098 = vmatpush.bf16.msrb.mxu3 %v5324_v57  ;;  %v31_v11 = vld [vmem:[%s7551_s5] sm:$0xf] }
  0x8e   :  { %v33_v58 = vperm.slane %v31_v11, 0  ;;  %v34_v57 = vperm.slane %v31_v11, 1  ;;  %v36_v51 = vperm.slane %v31_v11, 3 }
  0x8f   :  { %v110_v36 = vpop.f32.mrf.mxu2  ;;  %v124_v32 = vpop.f32.mrf.mxu3 }
  0x90   :  { %v84_v29 = vpop.f32.mrf.mxu0  ;;  %v98_v63 = vpop.f32.mrf.mxu1  ;;  %v5403_v43 = vadd.f32 %v82_v5, %v33_v58  ;;  %v5405_v39 = vadd.f32 %v96_v44, %v34_v57  ;;  %v5411_v31 = vadd.f32 %v124_v32, %v36_v51 }
  0x91   :  { %v5413_v30 = vadd.f32 %v84_v29, %v33_v58  ;;  %v5415_v5 = vadd.f32 %v98_v63, %v34_v57 }
  0x92   :  { %7740 = vst [vmem:[#allocation45_spill] sm:$0xff] %v5403_v43 }
  0x93   :  { %7741 = vst [vmem:[#allocation46_spill] sm:$0xff] %v5405_v39 }
  0x94   :  { %7742 = vst [vmem:[#allocation47_spill] sm:$0xff] %v5411_v31 }
  0x95   :  { %7743 = vst [vmem:[#allocation48_spill] sm:$0xff] %v5413_v30 }
  0x96   :  { %7744 = vst [vmem:[#allocation49_spill] sm:$0xff] %v5415_v5 }
  0x97   :  { %v112_v28 = vpop.f32.mrf.mxu2  ;;  %v126_v3 = vpop.f32.mrf.mxu3 }
  0x98   :  { %v172_v8 = vpop.f32.mrf.mxu0  ;;  %v186_v19 = vpop.f32.mrf.mxu1 }
  0x9f   :  { %v200_v0 = vpop.f32.mrf.mxu2  ;;  %v214_v4 = vpop.f32.mrf.mxu3 }
  0xa0   :  { %v174_v33 = vpop.f32.mrf.mxu0  ;;  %v188_v47 = vpop.f32.mrf.mxu1 }
  0xa7   :  { %v5401_v48 = vpop.f32.mrf.mxu3  ;;  %v5407_v18 = vpop.f32.mrf.mxu2 }
  0xab   :  { %v452_v17 = vpop.f32.mrf.mxu0  ;;  %v466_v7 = vpop.f32.mrf.mxu1 }
  0xac   :  { %v453_v6 = vadd.f32 %v452_v17, %v5403_v43  ;;  %v467_v56 = vadd.f32 %v466_v7, %v5405_v39  ;;  %v35_v39 = vperm.slane %v31_v11, 2 }
  0xae   :  { %v3966_v46 = vmul.f32 -1.442695, %v453_v6  ;;  %v3968_v45 = vmul.f32 -1.442695, %v467_v56 }
  0xb0   :  { %4156 = vpow2.f32 %v3966_v46  ;;  %v5423_v46 = vld [vmem:[%s7552_s6] sm:$0xf] }
  0xb1   :  { %4158 = vpow2.f32 %v3968_v45  ;;  %v133_v32 = vperm.slane %v5423_v46, 0  ;;  %v134_v11 = vperm.slane %v5423_v46, 1 }
  0xb3   :  { %v494_v44 = vpop.f32.mrf.mxu3  ;;  %v454_v24 = vpop.f32.mrf.mxu0 }
  0xb4   :  { %v495_v25 = vadd.f32 %v494_v44, %v5411_v31  ;;  %v468_v21 = vpop.f32.mrf.mxu1  ;;  %v455_v17 = vadd.f32 %v454_v24, %v5413_v30  ;;  %v480_v45 = vpop.f32.mrf.mxu2  ;;  %v5445_v44 = vadd.f32 %v186_v19, %v134_v11 }
  0xb5   :  { %v469_v7 = vadd.f32 %v468_v21, %v5415_v5  ;;  %v5430_v21 = vadd.f32 %v110_v36, %v35_v39  ;;  %v7752_v5 = vperm.slane %v5423_v46, 3 }
  0xb6   :  { %v3970_v56 = vmul.f32 -1.442695, %v495_v25  ;;  %v4157_v6 = vpop.eup %4156  ;;  %v3967_v57 = vmul.f32 -1.442695, %v455_v17  ;;  %v5435_v25 = vadd.f32 %v126_v3, %v36_v51  ;;  %7749 = vst [vmem:[#allocation54_spill] sm:$0xff] %v5445_v44  ;;  %v7750_v51 = vperm.slane %v5423_v46, 2 }
  0xb7   :  { %v4159_v63 = vpop.eup %4158  ;;  %v5425_v58 = vadd.f32 1.0, %v4157_v6  ;;  %v3969_v29 = vmul.f32 -1.442695, %v469_v7  ;;  %7745 = vst [vmem:[#allocation50_spill] sm:$0xff] %v5430_v21  ;;  %v5453_v30 = vadd.f32 %v214_v4, %v7752_v5 }
  0xb8   :  { %4160 = vpow2.f32 %v3970_v56  ;;  %v5428_v24 = vadd.f32 1.0, %v4159_v63  ;;  %7746 = vst [vmem:[#allocation51_spill] sm:$0xff] %v5435_v25  ;;  %v481_v56 = vadd.f32 %v480_v45, %v5430_v21  ;;  %v5443_v63 = vadd.f32 %v172_v8, %v133_v32 }
  0xb9   :  { %4162 = vpow2.f32 %v3967_v57  ;;  %v5441_v57 = vadd.f32 %v112_v28, %v35_v39  ;;  %v5449_v3 = vadd.f32 %v200_v0, %v7750_v51  ;;  %7753 = vst [vmem:[#allocation56_spill] sm:$0xff] %v5453_v30  ;;  %v5455_v45 = vadd.f32 %v174_v33, %v133_v32 }
  0xba   :  { %4164 = vrcp.f32 %v5425_v58  ;;  %7748 = vst [vmem:[#allocation53_spill] sm:$0xff] %v5443_v63  ;;  %v732_v8 = vand.u32 2147483647, %v5425_v58  ;;  %vm728_vm2 = vweird.f32 %v5425_v58  ;;  %v734_v4 = vand.u32 2147483648, %v5425_v58 }
  0xbb   :  { %4166 = vrcp.f32 %v5428_v24  ;;  %v496_v7 = vpop.f32.mrf.mxu3  ;;  %7747 = vst [vmem:[#allocation52_spill] sm:$0xff] %v5441_v57  ;;  %vm766_vm3 = vweird.f32 %v5428_v24  ;;  %v772_v5 = vand.u32 2147483648, %v5428_v24 }
  0xbc   :  { %4168 = vpow2.f32 %v3969_v29  ;;  %v497_v6 = vadd.f32 %v496_v7, %v5435_v25  ;;  %7751 = vst [vmem:[#allocation55_spill] sm:$0xff] %v5449_v3  ;;  %v5457_v29 = vadd.f32 %v188_v47, %v134_v11  ;;  %v482_v28 = vpop.f32.mrf.mxu2  ;;  %v770_v11 = vand.u32 2147483647, %v5428_v24 }
  0xbd   :  { %7754 = vst [vmem:[#allocation57_spill] sm:$0xff] %v5455_v45  ;;  %4170 = vtanh.f32 %v481_v56  ;;  %v483_v56 = vadd.f32 %v482_v28, %v5441_v57  ;;  %vm5476_vm4 = vcmp.eq.f32.partialorder %v732_v8, 8.507059e+37  ;;  %v735_v15 = vor.u32 1.1754944e-38, %v734_v4 }
  0xbe   :  { %v4161_v36 = vpop.eup %4160  ;;  %7755 = vst [vmem:[#allocation58_spill] sm:$0xff] %v5457_v29  ;;  %v3971_v0 = vmul.f32 -1.442695, %v497_v6  ;;  %vm5485_vm7 = vcmp.eq.f32.partialorder %v770_v11, 8.507059e+37 }
  0xbf   :  { %v4163_v17 = vpop.eup %4162  ;;  %v5459_v7 = vadd.f32 1.0, %v4161_v36 }
  0xc0   :  { %v4165_v39 = vpop.eup %4164  ;;  %v5462_v19 = vadd.f32 1.0, %v4163_v17 }
  0xc1   :  { %v4167_v51 = vpop.eup %4166  ;;  %v724_v25 = vmul.f32 %v4165_v39, %v5425_v58  ;;  %4172 = vrcp.f32 %v5459_v7  ;;  %v812_v21 = vand.u32 2147483648, %v5459_v7  ;;  %vm729_vm5 = vweird.f32 %v4165_v39 }
  0xc2   :  { %v4169_v47 = vpop.eup %4168  ;;  %v762_v33 = vmul.f32 %v4167_v51, %v5428_v24  ;;  %4174 = vrcp.f32 %v5462_v19  ;;  %vm767_vm6 = vweird.f32 %v4167_v51  ;;  %vm743_vm8 = vweird.f32 %v5462_v19  ;;  %vm730_vm9 = vmor %vm728_vm2, %vm729_vm5 }
  0xc3   :  { %v725_v32 = vsub.f32 1.0, %v724_v25  ;;  %v5473_v17 = vadd.f32 1.0, %v4169_v47  ;;  %4176 = vpow2.f32 %v3971_v0  ;;  %v747_v25 = vand.u32 2147483647, %v5462_v19  ;;  %v4171_v43 = vpop.eup %4170  ;;  %vm768_vm10 = vmor %vm766_vm3, %vm767_vm6 }
  0xc4   :  { %v763_v6 = vsub.f32 1.0, %v762_v33  ;;  %v773_v47 = vor.u32 1.1754944e-38, %v772_v5  ;;  %v5494_v4 = vor.u32 1.1754944e-38, %v812_v21  ;;  %vm806_vm11 = vweird.f32 %v5459_v7 }
  0xc5   :  { %v726_v31 = vmul.f32 %v4165_v39, %v725_v32  ;;  %4178 = vrcp.f32 %v5473_v17  ;;  %vm5502_vm12 = vcmp.eq.f32.partialorder %v747_v25, 8.507059e+37  ;;  %vm781_vm13 = vweird.f32 %v5473_v17 }
  0xc6   :  { %v764_v20 = vmul.f32 %v4167_v51, %v763_v6  ;;  %4180 = vtanh.f32 %v483_v56  ;;  %v749_v6 = vand.u32 2147483648, %v5462_v19  ;;  %v787_v56 = vand.u32 2147483648, %v5473_v17 }
  0xc7   :  { %v5483_v28 = vpop.eup %4172  ;;  %v727_v8 = vadd.f32 %v4165_v39, %v726_v31  ;;  %v810_v33 = vand.u32 2147483647, %v5459_v7 }
  0xc8   :  { %v4175_v0 = vpop.eup %4174  ;;  %v765_v32 = vadd.f32 %v4167_v51, %v764_v20  ;;  %v802_v5 = vmul.f32 %v5483_v28, %v5459_v7  ;;  %vm807_vm15 = vweird.f32 %v5483_v28 }
  0xc9   :  { %v731_v31 = vsel %vm730_vm9, %v4165_v39, %v727_v8  ;;  %v739_v11 = vmul.f32 %v4175_v0, %v5462_v19  ;;  %v4177_v21 = vpop.eup %4176  ;;  %vm744_vm14 = vweird.f32 %v4175_v0  ;;  %vm5532_vm2 = vmor %vm806_vm11, %vm807_vm15  ;;  %vm811_vm5 = vcmp.eq.f32.partialorder %v810_v33, 8.507059e+37 }
  0xca   :  { %v736_v12 = vsel %vm5476_vm4, %v735_v15, %v731_v31  ;;  %v769_v39 = vsel %vm768_vm10, %v4167_v51, %v765_v32  ;;  %v803_v8 = vsub.f32 1.0, %v802_v5  ;;  %v5512_v52 = vadd.f32 1.0, %v4177_v21  ;;  %vm745_vm1 = vmor %vm743_vm8, %vm744_vm14 }
  0xcb   :  { %v668_v20 = vpop.f32.mrf.mxu0  ;;  %v682_v57 = vpop.f32.mrf.mxu1  ;;  %v774_v59 = vsel %vm5485_vm7, %v773_v47, %v769_v39  ;;  %v833_v25 = vmul.f32 %v4171_v43, %v736_v12  ;;  %v740_v55 = vsub.f32 1.0, %v739_v11  ;;  %v750_v15 = vor.u32 1.1754944e-38, %v749_v6 }
  0xcc   :  { %v669_v24 = vadd.f32 %v668_v20, %v5443_v63  ;;  %v4179_v60 = vpop.eup %4178  ;;  %v831_v40 = vmul.f32 0.0, %v774_v59  ;;  %v804_v16 = vmul.f32 %v5483_v28, %v803_v8  ;;  %v785_v5 = vand.u32 2147483647, %v5473_v17 }
  0xcd   :  { %v777_v36 = vmul.f32 %v4179_v60, %v5473_v17  ;;  %v4181_v51 = vpop.eup %4180  ;;  %v741_v32 = vmul.f32 %v4175_v0, %v740_v55  ;;  %4182 = vrcp.f32 %v5512_v52  ;;  %v683_v43 = vadd.f32 %v682_v57, %v5445_v44 }
  0xce   :  { %v5518_v31 = vadd.f32 %v833_v25, %v831_v40  ;;  %v3972_v12 = vmul.f32 -1.442695, %v669_v24  ;;  %vm782_vm0 = vweird.f32 %v4179_v60  ;;  %v805_v20 = vadd.f32 %v5483_v28, %v804_v16 }
  0xcf   :  { %v778_v47 = vsub.f32 1.0, %v777_v36  ;;  %v742_v59 = vadd.f32 %v4175_v0, %v741_v32  ;;  %v3974_v6 = vmul.f32 -1.442695, %v683_v43  ;;  %v788_v21 = vor.u32 1.1754944e-38, %v787_v56  ;;  %vm783_vm3 = vmor %vm781_vm13, %vm782_vm0 }
  0xd0   :  { %7762 = vst [vmem:[#allocation59_spill] sm:$0xff] %v5518_v31  ;;  %4184 = vtanh.f32 %v5518_v31  ;;  %vm786_vm4 = vcmp.eq.f32.partialorder %v785_v5, 8.507059e+37  ;;  %v7768_v25 = vperm.slane %v5423_v46, 3  ;;  %vm821_vm6 = vweird.f32 %v5512_v52 }
  0xd1   :  { %v779_v55 = vmul.f32 %v4179_v60, %v778_v47  ;;  %v746_v39 = vsel %vm745_vm1, %v4175_v0, %v742_v59  ;;  %4186 = vpow2.f32 %v3972_v12  ;;  %v809_v47 = vsel %vm5532_vm2, %v5483_v28, %v805_v20 }
  0xd2   :  { %v751_v19 = vsel %vm5502_vm12, %v750_v15, %v746_v39  ;;  %4188 = vpow2.f32 %v3974_v6  ;;  %v814_v33 = vsel %vm811_vm5, %v5494_v4, %v809_v47 }
  0xd3   :  { %v696_v11 = vpop.f32.mrf.mxu2  ;;  %v710_v40 = vpop.f32.mrf.mxu3  ;;  %v780_v36 = vadd.f32 %v4179_v60, %v779_v55  ;;  %v834_v43 = vmul.f32 %v4181_v51, %v751_v19  ;;  %v5568_v19 = vadd.f32 %v5401_v48, %v7768_v25 }
  0xd4   :  { %v711_v57 = vadd.f32 %v710_v40, %v5453_v30  ;;  %v670_v8 = vpop.f32.mrf.mxu0  ;;  %v684_v24 = vpop.f32.mrf.mxu1  ;;  %v697_v5 = vadd.f32 %v696_v11, %v5449_v3 }
  0xd5   :  { %v671_v16 = vadd.f32 %v670_v8, %v5455_v45  ;;  %v5539_v0 = vpop.eup %4182  ;;  %v685_v7 = vadd.f32 %v684_v24, %v5457_v29  ;;  %v784_v32 = vsel %vm783_vm3, %v4179_v60, %v780_v36  ;;  %7769 = vst [vmem:[#allocation62_spill] sm:$0xff] %v5568_v19  ;;  %v827_v36 = vand.u32 2147483648, %v5512_v52 }
  0xd6   :  { %v3976_v56 = vmul.f32 -1.442695, %v711_v57  ;;  %v817_v58 = vmul.f32 %v5539_v0, %v5512_v52  ;;  %v789_v12 = vsel %vm786_vm4, %v788_v21, %v784_v32  ;;  %v4185_v17 = vpop.eup %4184  ;;  %v7766_v21 = vperm.slane %v5423_v46, 2 }
  0xd7   :  { %v3973_v15 = vmul.f32 -1.442695, %v671_v16  ;;  %v3975_v59 = vmul.f32 -1.442695, %v685_v7  ;;  %v832_v55 = vmul.f32 0.0, %v789_v12  ;;  %v4187_v60 = vpop.eup %4186  ;;  %v839_v6 = vmul.f32 %v4185_v17, %v814_v33 }
  0xd8   :  { %4190 = vpow2.f32 %v3976_v56  ;;  %v4189_v40 = vpop.eup %4188  ;;  %v818_v39 = vsub.f32 1.0, %v817_v58  ;;  %v5552_v57 = vadd.f32 1.0, %v4187_v60  ;;  %v5563_v11 = vadd.f32 %v5407_v18, %v7766_v21 }
  0xd9   :  { %4192 = vpow2.f32 %v3973_v15  ;;  %v5554_v8 = vadd.f32 %v834_v43, %v832_v55  ;;  %v5556_v28 = vadd.f32 1.0, %v4189_v40  ;;  %v5558_v20 = vpack.c.bf16 %v839_v6, %v839_v6 }
  0xda   :  { %4194 = vpow2.f32 %v3975_v59  ;;  %7767 = vst [vmem:[#allocation61_spill] sm:$0xff] %v5563_v11  ;;  %v825_v16 = vand.u32 2147483647, %v5512_v52  ;;  %v819_v56 = vmul.f32 %v5539_v0, %v818_v39  ;;  %v860_v32 = vand.u32 2147483648, %v5552_v57 }
  0xdb   :  { %7765 = vst [vmem:[#allocation60_spill] sm:$0xff] %v5554_v8  ;;  %v698_v51 = vpop.f32.mrf.mxu2  ;;  %4196 = vtanh.f32 %v697_v5  ;;  %v712_v4 = vpop.f32.mrf.mxu3  ;;  %v898_v47 = vand.u32 2147483648, %v5556_v28  ;;  %v858_v12 = vand.u32 2147483647, %v5552_v57  ;;  %v896_v59 = vand.u32 2147483647, %v5556_v28 }
  0xdc   :  { %4198 = vrcp.f32 %v5552_v57  ;;  %974 = vst [vmem:[%s7553_s7] sm:$0xf] %v5558_v20  ;;  %v699_v48 = vadd.f32 %v698_v51, %v5563_v11  ;;  %v713_v15 = vadd.f32 %v712_v4, %v5568_v19  ;;  %vm822_vm7 = vweird.f32 %v5539_v0 }
  0xdd   :  { %4200 = vrcp.f32 %v5556_v28  ;;  %vm5599_vm8 = vcmp.eq.f32.partialorder %v825_v16, 8.507059e+37  ;;  %v828_v5 = vor.u32 1.1754944e-38, %v827_v36  ;;  %vm892_vm9 = vweird.f32 %v5556_v28  ;;  %vm823_vm13 = vmor %vm821_vm6, %vm822_vm7 }
  0xde   :  { %v4191_v24 = vpop.eup %4190  ;;  %4202 = vtanh.f32 %v5554_v8  ;;  %vm854_vm10 = vweird.f32 %v5552_v57  ;;  %v861_v60 = vor.u32 1.1754944e-38, %v860_v32  ;;  %v3977_v6 = vmul.f32 -1.442695, %v713_v15 }
  0xdf   :  { %v4193_v18 = vpop.eup %4192  ;;  %v5579_v46 = vadd.f32 1.0, %v4191_v24  ;;  %v899_v51 = vor.u32 1.1754944e-38, %v898_v47  ;;  %vm5606_vm11 = vcmp.eq.f32.partialorder %v858_v12, 8.507059e+37  ;;  %v820_v4 = vadd.f32 %v5539_v0, %v819_v56 }
  0xe0   :  { %v4195_v7 = vpop.eup %4194  ;;  %v5584_v58 = vadd.f32 1.0, %v4193_v18  ;;  %vm5612_vm12 = vcmp.eq.f32.partialorder %v896_v59, 8.507059e+37  ;;  %v983_v30 = vunpack.c.l.b16 %v5558_v20 }
  0xe1   :  { %4204 = vrcp.f32 %v5579_v46  ;;  %v5590_v43 = vadd.f32 1.0, %v4195_v7  ;;  %v5595_v17 = vpop.eup %4196  ;;  %v824_v32 = vsel %vm823_vm13, %v5539_v0, %v820_v4 }
  0xe2   :  { %4206 = vrcp.f32 %v5584_v58  ;;  %v4199_v33 = vpop.eup %4198  ;;  %v873_v16 = vand.u32 2147483647, %v5584_v58  ;;  %vm869_vm14 = vweird.f32 %v5584_v58  ;;  %v875_v7 = vand.u32 2147483648, %v5584_v58 }
  0xe3   :  { %4208 = vrcp.f32 %v5590_v43  ;;  %v4201_v40 = vpop.eup %4200  ;;  %v850_v39 = vmul.f32 %v4199_v33, %v5552_v57  ;;  %v913_v56 = vand.u32 2147483648, %v5590_v43  ;;  %v911_v59 = vand.u32 2147483647, %v5590_v43 }
  0xe4   :  { %4210 = vtanh.f32 %v699_v48  ;;  %v4203_v24 = vpop.eup %4202  ;;  %v888_v25 = vmul.f32 %v4201_v40, %v5556_v28  ;;  %v829_v52 = vsel %vm5599_vm8, %v828_v5, %v824_v32  ;;  %vm855_vm15 = vweird.f32 %v4199_v33 }
  0xe5   :  { %4212 = vpow2.f32 %v3977_v6  ;;  %v851_v48 = vsub.f32 1.0, %v850_v39  ;;  %v840_v11 = vmul.f32 %v4203_v24, %v829_v52  ;;  %vm893_vm0 = vweird.f32 %v4201_v40  ;;  %vm856_vm1 = vmor %vm854_vm10, %vm855_vm15 }
  0xe6   :  { %v889_v47 = vsub.f32 1.0, %v888_v25  ;;  %vm894_vm4 = vmor %vm892_vm9, %vm893_vm0  ;;  %vm907_vm5 = vweird.f32 %v5590_v43  ;;  %vm874_vm7 = vcmp.eq.f32.partialorder %v873_v16, 8.507059e+37  ;;  %vm912_vm9 = vcmp.eq.f32.partialorder %v911_v59, 8.507059e+37 }
  0xe7   :  { %v5621_v18 = vpop.eup %4204  ;;  %v852_v39 = vmul.f32 %v4199_v33, %v851_v48  ;;  %v968_v45 = vpack.c.bf16 %v840_v11, %v840_v11  ;;  %v938_v16 = vand.u32 2147483648, %v5579_v46 }
  0xe8   :  { %v4207_v15 = vpop.eup %4206  ;;  %v928_v12 = vmul.f32 %v5621_v18, %v5579_v46  ;;  %v890_v19 = vmul.f32 %v4201_v40, %v889_v47  ;;  %vm933_vm10 = vweird.f32 %v5621_v18 }
  0xe9   :  { %v4209_v6 = vpop.eup %4208  ;;  %v865_v8 = vmul.f32 %v4207_v15, %v5584_v58  ;;  %v853_v25 = vadd.f32 %v4199_v33, %v852_v39  ;;  %vm870_vm2 = vweird.f32 %v4207_v15  ;;  %975 = vst [vmem:[%s7553_s7 + $0x8] sm:$0xf] %v968_v45  ;;  %v939_v52 = vor.u32 1.1754944e-38, %v938_v16  ;;  %v7790_v16 = vld [vmem:[#allocation15_spill] sm:$0xff] }
  0xea   :  { %v929_v3 = vsub.f32 1.0, %v928_v12  ;;  %v903_v0 = vmul.f32 %v4209_v6, %v5590_v43  ;;  %v4211_v4 = vpop.eup %4210  ;;  %v891_v55 = vadd.f32 %v4201_v40, %v890_v19  ;;  %vm908_vm3 = vweird.f32 %v4209_v6  ;;  %vm871_vm6 = vmor %vm869_vm14, %vm870_vm2 }
  0xeb   :  { %v866_v29 = vsub.f32 1.0, %v865_v8  ;;  %v4213_v31 = vpop.eup %4212  ;;  %v857_v24 = vsel %vm856_vm1, %v4199_v33, %v853_v25  ;;  %v984_v8 = vunpack.c.l.b16 %v968_v45  ;;  %v876_v45 = vor.u32 1.1754944e-38, %v875_v7  ;;  %vm909_vm8 = vmor %vm907_vm5, %vm908_vm3 }
  0xec   :  { %v904_v5 = vsub.f32 1.0, %v903_v0  ;;  %v5640_v32 = vadd.f32 1.0, %v4213_v31  ;;  %v862_v57 = vsel %vm5606_vm11, %v861_v60, %v857_v24  ;;  %v895_v20 = vsel %vm894_vm4, %v4201_v40, %v891_v55 }
  0xed   :  { %v867_v48 = vmul.f32 %v4207_v15, %v866_v29  ;;  %v930_v11 = vmul.f32 %v5621_v18, %v929_v3  ;;  %v900_v33 = vsel %vm5612_vm12, %v899_v51, %v895_v20  ;;  %v959_v28 = vmul.f32 %v5595_v17, %v862_v57 }
  0xee   :  { %v905_v19 = vmul.f32 %v4209_v6, %v904_v5  ;;  %4214 = vrcp.f32 %v5640_v32  ;;  %v957_v31 = vmul.f32 0.0, %v900_v33  ;;  %v914_v40 = vor.u32 1.1754944e-38, %v913_v56 }
  0xef   :  { %v868_v29 = vadd.f32 %v4207_v15, %v867_v48  ;;  %v985_v51 = vpack.c.b16 %v984_v8, %v983_v30  ;;  %v931_v58 = vadd.f32 %v5621_v18, %v930_v11  ;;  %vm932_vm11 = vweird.f32 %v5579_v46 }
  0xf0   :  { %v906_v60 = vadd.f32 %v4209_v6, %v905_v19  ;;  %v5657_v21 = vadd.f32 %v959_v28, %v957_v31  ;;  %v936_v7 = vand.u32 2147483647, %v5579_v46  ;;  %vm5669_vm12 = vmor %vm932_vm11, %vm933_vm10  ;;  %v953_v39 = vand.u32 2147483648, %v5640_v32  ;;  %v7779_v31 = vld [vmem:[#allocation4_spill] sm:$0xff] }
  0xf1   :  { %v872_v3 = vsel %vm871_vm6, %v4207_v15, %v868_v29  ;;  %995 = vmatmul.bf16.vlgmr.msra.gmra.mxu0 %v985_v51  ;;  %1009 = vmatmul.bf16.vlgmr.msra.gmra.mxu1 %v985_v51  ;;  %v935_v46 = vsel %vm5669_vm12, %v5621_v18, %v931_v58  ;;  %v951_v55 = vand.u32 2147483647, %v5640_v32  ;;  %vm947_vm15 = vweird.f32 %v5640_v32  ;;  %v7778_v29 = vld [vmem:[#allocation3_spill] sm:$0xff]  ;;  %v7789_v58 = vld [vmem:[#allocation14_spill] sm:$0xff] }
  0xf2   :  { %v877_v17 = vsel %vm874_vm7, %v876_v45, %v872_v3  ;;  %v910_v36 = vsel %vm909_vm8, %v4209_v6, %v906_v60  ;;  %4216 = vtanh.f32 %v5657_v21  ;;  %1023 = vmatmul.bf16.vlgmr.msra.gmra.mxu2 %v985_v51  ;;  %1037 = vmatmul.bf16.vlgmr.msra.gmra.mxu3 %v985_v51  ;;  %vm937_vm13 = vcmp.eq.f32.partialorder %v936_v7, 8.507059e+37  ;;  %v7780_v45 = vld [vmem:[#allocation5_spill] sm:$0xff]  ;;  %v7781_v60 = vld [vmem:[#allocation6_spill] sm:$0xff]  ;;  %v7783_v3 = vld [vmem:[#allocation8_spill] sm:$0xff] }
  0xf3   :  { %v915_v43 = vsel %vm912_vm9, %v914_v40, %v910_v36  ;;  %v960_v47 = vmul.f32 %v4211_v4, %v877_v17  ;;  %1377 = vmatpush.bf16.msra.mxu0 %v4758_v37  ;;  %1391 = vmatpush.bf16.msra.mxu1 %v4760_v38  ;;  %v940_v25 = vsel %vm937_vm13, %v939_v52, %v935_v46  ;;  %v954_v24 = vor.u32 1.1754944e-38, %v953_v39  ;;  %v7782_v40 = vld [vmem:[#allocation7_spill] sm:$0xff]  ;;  %v7784_v51 = vld [vmem:[#allocation9_spill] sm:$0xff]  ;;  %v7785_v17 = vld [vmem:[#allocation10_spill] sm:$0xff] }
  0xf4   :  { %v958_v56 = vmul.f32 0.0, %v915_v43  ;;  %v4215_v30 = vpop.eup %4214  ;;  %1405 = vmatpush.bf16.msra.mxu2 %v4772_v41  ;;  %1419 = vmatpush.bf16.msra.mxu3 %v4774_v42  ;;  %vm952_vm1 = vcmp.eq.f32.partialorder %v951_v55, 8.507059e+37  ;;  %v7786_v36 = vld [vmem:[#allocation11_spill] sm:$0xff]  ;;  %v7787_v43 = vld [vmem:[#allocation12_spill] sm:$0xff]  ;;  %v7793_v7 = vld [vmem:[#allocation18_spill] sm:$0xff] }
  0xf5   :  { %v943_v59 = vmul.f32 %v4215_v30, %v5640_v32  ;;  %vm948_vm14 = vweird.f32 %v4215_v30  ;;  %v7794_v15 = vld [vmem:[#allocation19_spill] sm:$0xff]  ;;  %v7796_v46 = vld [vmem:[#allocation21_spill] sm:$0xff]  ;;  %v7797_v52 = vld [vmem:[#allocation22_spill] sm:$0xff] }
  0xf6   :  { %v5673_v12 = vadd.f32 %v960_v47, %v958_v56  ;;  %vm949_vm0 = vmor %vm947_vm15, %vm948_vm14  ;;  %v7788_v47 = vld [vmem:[#allocation13_spill] sm:$0xff]  ;;  %v7791_v56 = vld [vmem:[#allocation16_spill] sm:$0xff] }
  0xf7   :  { %v944_v6 = vsub.f32 1.0, %v943_v59  ;;  %1378 = vmatpush.bf16.msra.mxu0 %v4800_v49  ;;  %1392 = vmatpush.bf16.msra.mxu1 %v4802_v50  ;;  %v7795_v59 = vld [vmem:[#allocation20_spill] sm:$0xff] }
  0xf8   :  { %4218 = vtanh.f32 %v5673_v12  ;;  %v4217_v0 = vpop.eup %4216  ;;  %1406 = vmatpush.bf16.msra.mxu2 %v4812_v53  ;;  %1420 = vmatpush.bf16.msra.mxu3 %v4814_v54  ;;  %v7799_v39 = vld [vmem:[#allocation24_spill] sm:$0xff] }
  0xf9   :  { %v945_v4 = vmul.f32 %v4215_v30, %v944_v6  ;;  %v965_v18 = vmul.f32 %v4217_v0, %v940_v25  ;;  %v7798_v6 = vld [vmem:[#allocation23_spill] sm:$0xff]  ;;  %v7800_v0 = vld [vmem:[#allocation25_spill] sm:$0xff]  ;;  %v7803_v55 = vld [vmem:[#allocation28_spill] sm:$0xff] }
  0xfa   :  { %v7802_v25 = vld [vmem:[#allocation27_spill] sm:$0xff] }
  0xfb   :  { %v946_v5 = vadd.f32 %v4215_v30, %v945_v4  ;;  %v969_v48 = vpack.c.bf16 %v965_v18, %v965_v18  ;;  %1379 = vmatpush.bf16.msra.mxu0 %v4836_v61  ;;  %1393 = vmatpush.bf16.msra.mxu1 %v4838_v62  ;;  %v7801_v4 = vld [vmem:[#allocation26_spill] sm:$0xff]  ;;  %v7804_v18 = vld [vmem:[#allocation29_spill] sm:$0xff] }
  0xfc   :  { %1407 = vmatpush.bf16.msra.mxu2 %v4848_v1  ;;  %1421 = vmatpush.bf16.msra.mxu3 %v4850_v2 }
  0xfd   :  { %v950_v57 = vsel %vm949_vm0, %v4215_v30, %v946_v5  ;;  %3978 = vst [vmem:[%s7553_s7 + $0x74] sm:$0xf] %v969_v48  ;;  %v1045_v19 = vunpack.c.l.b16 %v969_v48  ;;  %v7792_v30 = vld [vmem:[#allocation17_spill] sm:$0xff]  ;;  %v7805_v5 = vld [vmem:[#allocation30_spill] sm:$0xff]  ;;  %v7807_v48 = vld [vmem:[#allocation32_spill] sm:$0xff] }
  0xfe   :  { %v4219_v8 = vpop.eup %4218  ;;  %v955_v20 = vsel %vm952_vm1, %v954_v24, %v950_v57  ;;  %v7806_v24 = vld [vmem:[#allocation31_spill] sm:$0xff]  ;;  %v7809_v57 = vld [vmem:[#allocation34_spill] sm:$0xff] }
  0xff   :  { %v966_v32 = vmul.f32 %v4219_v8, %v955_v20  ;;  %1380 = vmatpush.bf16.msra.mxu0 %v4872_v9  ;;  %1394 = vmatpush.bf16.msra.mxu1 %v4874_v10  ;;  %v7808_v8 = vld [vmem:[#allocation33_spill] sm:$0xff]  ;;  %v7810_v20 = vld [vmem:[#allocation35_spill] sm:$0xff] }
 0x100   :  { %1408 = vmatpush.bf16.msra.mxu2 %v4884_v13  ;;  %1422 = vmatpush.bf16.msra.mxu3 %v4886_v14 }
 0x101   :  { %v970_v11 = vpack.c.bf16 %v966_v32, %v966_v32  ;;  %v7811_v32 = vld [vmem:[#allocation36_spill] sm:$0xff] }
 0x103   :  { %3979 = vst [vmem:[%s7553_s7 + $0x7c] sm:$0xf] %v970_v11  ;;  %v1046_v33 = vunpack.c.l.b16 %v970_v11  ;;  %1381 = vmatpush.bf16.msra.mxu0 %v4908_v22  ;;  %1395 = vmatpush.bf16.msra.mxu1 %v4910_v23  ;;  %v7812_v11 = vld [vmem:[#allocation37_spill] sm:$0xff] }
 0x104   :  { %1409 = vmatpush.bf16.msra.mxu2 %v4920_v26  ;;  %1423 = vmatpush.bf16.msra.mxu3 %v4922_v27 }
 0x105   :  { %v1047_v28 = vpack.c.b16 %v1046_v33, %v1045_v19  ;;  %v7813_v19 = vld [vmem:[#allocation38_spill] sm:$0xff]  ;;  %v7814_v33 = vld [vmem:[#allocation39_spill] sm:$0xff] }
 0x107   :  { %1057 = vmatmul.bf16.vlgmr.msrb.gmra.mxu0 %v1047_v28  ;;  %1071 = vmatmul.bf16.vlgmr.msrb.gmra.mxu1 %v1047_v28 }
 0x108   :  { %1085 = vmatmul.bf16.vlgmr.msrb.gmra.mxu2 %v1047_v28  ;;  %1099 = vmatmul.bf16.vlgmr.msrb.gmra.mxu3 %v1047_v28  ;;  %v7815_v28 = vld [vmem:[#allocation40_spill] sm:$0xff] }
 0x109   :  { %1382 = vmatpush.bf16.msra.mxu0 %v4952_v34  ;;  %1396 = vmatpush.bf16.msra.mxu1 %v4954_v35 }
 0x10a   :  { %1410 = vmatpush.bf16.msra.mxu2 %v7778_v29  ;;  %1424 = vmatpush.bf16.msra.mxu3 %v7779_v31 }
 0x10d   :  { %1383 = vmatpush.bf16.msra.mxu0 %v7780_v45  ;;  %1397 = vmatpush.bf16.msra.mxu1 %v7781_v60 }
 0x10e   :  { %1411 = vmatpush.bf16.msra.mxu2 %v7782_v40  ;;  %1425 = vmatpush.bf16.msra.mxu3 %v7783_v3 }
 0x111   :  { %1384 = vmatpush.bf16.msra.mxu0 %v7784_v51  ;;  %1398 = vmatpush.bf16.msra.mxu1 %v7785_v17  ;;  %v7832_v51 = vld [vmem:[#allocation59_spill] sm:$0xff] }
 0x112   :  { %1412 = vmatpush.bf16.msra.mxu2 %v7786_v36  ;;  %1426 = vmatpush.bf16.msra.mxu3 %v7787_v43 }
 0x115   :  { %1439 = vmatpush.bf16.msrb.mxu0 %v7788_v47  ;;  %1453 = vmatpush.bf16.msrb.mxu1 %v7789_v58 }
 0x116   :  { %1467 = vmatpush.bf16.msrb.mxu2 %v7790_v16  ;;  %1481 = vmatpush.bf16.msrb.mxu3 %v7791_v56 }
 0x119   :  { %1440 = vmatpush.bf16.msrb.mxu0 %v7792_v30  ;;  %1454 = vmatpush.bf16.msrb.mxu1 %v7793_v7 }
 0x11a   :  { %1468 = vmatpush.bf16.msrb.mxu2 %v7794_v15  ;;  %1482 = vmatpush.bf16.msrb.mxu3 %v7795_v59 }
 0x11d   :  { %1441 = vmatpush.bf16.msrb.mxu0 %v7796_v46  ;;  %1455 = vmatpush.bf16.msrb.mxu1 %v7797_v52 }
 0x11e   :  { %1469 = vmatpush.bf16.msrb.mxu2 %v7798_v6  ;;  %1483 = vmatpush.bf16.msrb.mxu3 %v7799_v39  ;;  %v7823_v39 = vld [vmem:[#allocation48_spill] sm:$0xff]  ;;  %v7824_v6 = vld [vmem:[#allocation49_spill] sm:$0xff] }
 0x121   :  { %1442 = vmatpush.bf16.msrb.mxu0 %v7800_v0  ;;  %1456 = vmatpush.bf16.msrb.mxu1 %v7801_v4 }
 0x122   :  { %1470 = vmatpush.bf16.msrb.mxu2 %v7802_v25  ;;  %1484 = vmatpush.bf16.msrb.mxu3 %v7803_v55  ;;  %v7821_v55 = vld [vmem:[#allocation46_spill] sm:$0xff] }
 0x125   :  { %1443 = vmatpush.bf16.msrb.mxu0 %v7804_v18  ;;  %1457 = vmatpush.bf16.msrb.mxu1 %v7805_v5  ;;  %v7816_v5 = vld [vmem:[#allocation41_spill] sm:$0xff] }
 0x126   :  { %1471 = vmatpush.bf16.msrb.mxu2 %v7806_v24  ;;  %1485 = vmatpush.bf16.msrb.mxu3 %v7807_v48  ;;  %v7817_v24 = vld [vmem:[#allocation42_spill] sm:$0xff]  ;;  %v7818_v48 = vld [vmem:[#allocation43_spill] sm:$0xff]  ;;  %v7820_v18 = vld [vmem:[#allocation45_spill] sm:$0xff] }
 0x129   :  { %1444 = vmatpush.bf16.msrb.mxu0 %v7808_v8  ;;  %1458 = vmatpush.bf16.msrb.mxu1 %v7809_v57  ;;  %v7819_v8 = vld [vmem:[#allocation44_spill] sm:$0xff] }
 0x12a   :  { %1472 = vmatpush.bf16.msrb.mxu2 %v7810_v20  ;;  %1486 = vmatpush.bf16.msrb.mxu3 %v7811_v32 }
 0x12d   :  { %1445 = vmatpush.bf16.msrb.mxu0 %v7812_v11  ;;  %1459 = vmatpush.bf16.msrb.mxu1 %v7813_v19 }
 0x12e   :  { %1473 = vmatpush.bf16.msrb.mxu2 %v7814_v33  ;;  %1487 = vmatpush.bf16.msrb.mxu3 %v7815_v28  ;;  %v7822_v28 = vld [vmem:[#allocation47_spill] sm:$0xff] }
 0x131   :  { %1446 = vmatpush.bf16.msrb.mxu0 %v7816_v5  ;;  %1460 = vmatpush.bf16.msrb.mxu1 %v7817_v24 }
 0x132   :  { %1474 = vmatpush.bf16.msrb.mxu2 %v7818_v48  ;;  %1488 = vmatpush.bf16.msrb.mxu3 %v7819_v8 }
 0x16e   :  { %v996_v57 = vpop.f32.mrf.mxu0  ;;  %v1010_v20 = vpop.f32.mrf.mxu1 }
 0x16f   :  { %v997_v32 = vadd.f32 %v996_v57, %v7820_v18  ;;  %v1011_v11 = vadd.f32 %v1010_v20, %v7821_v55 }
 0x171   :  { %v3980_v25 = vmul.f32 -1.442695, %v997_v32  ;;  %v3982_v19 = vmul.f32 -1.442695, %v1011_v11 }
 0x173   :  { %4220 = vpow2.f32 %v3980_v25  ;;  %v7825_v25 = vld [vmem:[#allocation50_spill] sm:$0xff] }
 0x174   :  { %4222 = vpow2.f32 %v3982_v19 }
 0x175   :  { %v1038_v33 = vpop.f32.mrf.mxu3  ;;  %v1024_v24 = vpop.f32.mrf.mxu2 }
 0x176   :  { %v1039_v4 = vadd.f32 %v1038_v33, %v7822_v28  ;;  %v998_v5 = vpop.f32.mrf.mxu0  ;;  %v1012_v0 = vpop.f32.mrf.mxu1  ;;  %v1025_v11 = vadd.f32 %v1024_v24, %v7825_v25  ;;  %v7826_v33 = vld [vmem:[#allocation51_spill] sm:$0xff] }
 0x177   :  { %v999_v48 = vadd.f32 %v998_v5, %v7823_v39  ;;  %v1013_v8 = vadd.f32 %v1012_v0, %v7824_v6 }
 0x178   :  { %v3984_v52 = vmul.f32 -1.442695, %v1039_v4 }
 0x179   :  { %v4221_v46 = vpop.eup %4220  ;;  %v3981_v59 = vmul.f32 -1.442695, %v999_v48  ;;  %v3983_v20 = vmul.f32 -1.442695, %v1013_v8 }
 0x17a   :  { %v4223_v57 = vpop.eup %4222  ;;  %v1111_v18 = vadd.f32 1.0, %v4221_v46  ;;  %4224 = vpow2.f32 %v3984_v52 }
 0x17b   :  { %v1149_v32 = vadd.f32 1.0, %v4223_v57  ;;  %4226 = vpow2.f32 %v3981_v59 }
 0x17c   :  { %4228 = vrcp.f32 %v1111_v18  ;;  %v1122_v46 = vand.u32 2147483647, %v1111_v18  ;;  %v1124_v52 = vand.u32 2147483648, %v1111_v18  ;;  %vm1118_vm3 = vweird.f32 %v1111_v18 }
 0x17d   :  { %4230 = vrcp.f32 %v1149_v32  ;;  %v1040_v19 = vpop.f32.mrf.mxu3  ;;  %v1026_v4 = vpop.f32.mrf.mxu2  ;;  %v1162_v55 = vand.u32 2147483648, %v1149_v32  ;;  %vm1156_vm2 = vweird.f32 %v1149_v32 }
 0x17e   :  { %4232 = vpow2.f32 %v3983_v20  ;;  %v1041_v28 = vadd.f32 %v1040_v19, %v7826_v33  ;;  %v1160_v19 = vand.u32 2147483647, %v1149_v32  ;;  %vm5767_vm4 = vcmp.eq.f32.partialorder %v1122_v46, 8.507059e+37 }
 0x17f   :  { %4234 = vtanh.f32 %v1025_v11  ;;  %v7827_v11 = vld [vmem:[#allocation52_spill] sm:$0xff]  ;;  %v1125_v30 = vor.u32 1.1754944e-38, %v1124_v52  ;;  %v1163_v16 = vor.u32 1.1754944e-38, %v1162_v55 }
 0x180   :  { %v4225_v5 = vpop.eup %4224  ;;  %v3985_v59 = vmul.f32 -1.442695, %v1041_v28  ;;  %vm5772_vm7 = vcmp.eq.f32.partialorder %v1160_v19, 8.507059e+37 }
 0x181   :  { %v4227_v39 = vpop.eup %4226  ;;  %v5758_v0 = vadd.f32 1.0, %v4225_v5  ;;  %v1027_v5 = vadd.f32 %v1026_v4, %v7827_v11 }
 0x182   :  { %v4229_v48 = vpop.eup %4228  ;;  %v5760_v8 = vadd.f32 1.0, %v4227_v39 }
 0x183   :  { %v4231_v57 = vpop.eup %4230  ;;  %v1114_v6 = vmul.f32 %v4229_v48, %v1111_v18  ;;  %4236 = vrcp.f32 %v5758_v0  ;;  %vm1119_vm5 = vweird.f32 %v4229_v48 }
 0x184   :  { %v4233_v24 = vpop.eup %4232  ;;  %v1152_v20 = vmul.f32 %v4231_v57, %v1149_v32  ;;  %4238 = vrcp.f32 %v5760_v8  ;;  %v1058_v33 = vpop.f32.mrf.mxu0  ;;  %vm1157_vm6 = vweird.f32 %v4231_v57  ;;  %vm1120_vm8 = vmor %vm1118_vm3, %vm1119_vm5  ;;  %vm1133_vm9 = vweird.f32 %v5760_v8 }
 0x185   :  { %v1115_v25 = vsub.f32 1.0, %v1114_v6  ;;  %v5765_v15 = vadd.f32 1.0, %v4233_v24  ;;  %v1072_v39 = vpop.f32.mrf.mxu1  ;;  %4240 = vpow2.f32 %v3985_v59  ;;  %v4235_v56 = vpop.eup %4234  ;;  %v1059_v52 = vadd.f32 %v1058_v33, %v5443_v63  ;;  %vm1158_vm10 = vmor %vm1156_vm2, %vm1157_vm6 }
 0x186   :  { %v1153_v28 = vsub.f32 1.0, %v1152_v20  ;;  %v1073_v55 = vadd.f32 %v1072_v39, %v5445_v44  ;;  %v1137_v19 = vand.u32 2147483647, %v5760_v8  ;;  %vm1196_vm2 = vweird.f32 %v5758_v0 }
 0x187   :  { %v1116_v58 = vmul.f32 %v4229_v48, %v1115_v25  ;;  %4242 = vrcp.f32 %v5765_v15  ;;  %v1177_v18 = vand.u32 2147483648, %v5765_v15  ;;  %vm1171_vm11 = vweird.f32 %v5765_v15 }
 0x188   :  { %v1154_v4 = vmul.f32 %v4231_v57, %v1153_v28  ;;  %4244 = vtanh.f32 %v1027_v5  ;;  %v1139_v28 = vand.u32 2147483648, %v5760_v8  ;;  %v3986_v63 = vmul.f32 -1.442695, %v1059_v52 }
 0x189   :  { %v5776_v24 = vpop.eup %4236  ;;  %v1117_v46 = vadd.f32 %v4229_v48, %v1116_v58  ;;  %v3988_v47 = vmul.f32 -1.442695, %v1073_v55  ;;  %vm5800_vm12 = vcmp.eq.f32.partialorder %v1137_v19, 8.507059e+37  ;;  %v1175_v6 = vand.u32 2147483647, %v5765_v15  ;;  %v7836_v55 = vld [vmem:[#allocation56_spill] sm:$0xff] }
 0x18a   :  { %v4239_v25 = vpop.eup %4238  ;;  %v1155_v59 = vadd.f32 %v4231_v57, %v1154_v4  ;;  %v1192_v33 = vmul.f32 %v5776_v24, %v5758_v0  ;;  %v1140_v7 = vor.u32 1.1754944e-38, %v1139_v28  ;;  %v7837_v19 = vld [vmem:[#allocation57_spill] sm:$0xff]  ;;  %vm1197_vm3 = vweird.f32 %v5776_v24 }
 0x18b   :  { %v1086_v5 = vpop.f32.mrf.mxu2  ;;  %v1100_v11 = vpop.f32.mrf.mxu3  ;;  %v1121_v58 = vsel %vm1120_vm8, %v4229_v48, %v1117_v46  ;;  %v1129_v39 = vmul.f32 %v4239_v25, %v5760_v8  ;;  %vm1134_vm13 = vweird.f32 %v4239_v25  ;;  %vm1176_vm1 = vcmp.eq.f32.partialorder %v1175_v6, 8.507059e+37 }
 0x18c   :  { %v4241_v4 = vpop.eup %4240  ;;  %v1126_v20 = vsel %vm5767_vm4, %v1125_v30, %v1121_v58  ;;  %v1159_v44 = vsel %vm1158_vm10, %v4231_v57, %v1155_v59  ;;  %v1060_v57 = vpop.f32.mrf.mxu0  ;;  %v1101_v59 = vadd.f32 %v1100_v11, %v7836_v55  ;;  %vm1135_vm15 = vmor %vm1133_vm9, %vm1134_vm13 }
 0x18d   :  { %v4243_v43 = vpop.eup %4242  ;;  %v1164_v32 = vsel %vm5772_vm7, %v1163_v16, %v1159_v44  ;;  %v1223_v48 = vmul.f32 %v4235_v56, %v1126_v20  ;;  %v1130_v46 = vsub.f32 1.0, %v1129_v39  ;;  %v5796_v36 = vadd.f32 1.0, %v4241_v4  ;;  %v1074_v44 = vpop.f32.mrf.mxu1  ;;  %v7838_v4 = vld [vmem:[#allocation58_spill] sm:$0xff]  ;;  %vm5864_vm4 = vmor %vm1196_vm2, %vm1197_vm3 }
 0x18e   :  { %v4245_v17 = vpop.eup %4244  ;;  %v1221_v3 = vmul.f32 %v1164_v32, %v7832_v51  ;;  %v1167_v40 = vmul.f32 %v4243_v43, %v5765_v15  ;;  %v1193_v56 = vsub.f32 1.0, %v1192_v33  ;;  %v1061_v58 = vadd.f32 %v1060_v57, %v7837_v19  ;;  %v7839_v33 = vld [vmem:[#allocation55_spill] sm:$0xff]  ;;  %v7842_v15 = vld [vmem:[#allocation60_spill] sm:$0xff] }
 0x18f   :  { %v1131_v52 = vmul.f32 %v4239_v25, %v1130_v46  ;;  %4246 = vrcp.f32 %v5796_v36  ;;  %vm1172_vm14 = vweird.f32 %v4243_v43  ;;  %v1178_v39 = vor.u32 1.1754944e-38, %v1177_v18 }
 0x190   :  { %v5806_v16 = vadd.f32 %v1223_v48, %v1221_v3  ;;  %v1168_v20 = vsub.f32 1.0, %v1167_v40  ;;  %4248 = vpow2.f32 %v3986_v63  ;;  %v1075_v32 = vadd.f32 %v1074_v44, %v7838_v4  ;;  %vm1173_vm0 = vmor %vm1171_vm11, %vm1172_vm14 }
 0x191   :  { %v1132_v51 = vadd.f32 %v4239_v25, %v1131_v52  ;;  %4250 = vpow2.f32 %v3988_v47  ;;  %v1087_v40 = vadd.f32 %v1086_v5, %v7839_v33  ;;  %v3990_v63 = vmul.f32 -1.442695, %v1101_v59 }
 0x192   :  { %7835 = vst [vmem:[#allocation59_spill] sm:$0xff] %v5806_v16  ;;  %v1169_v28 = vmul.f32 %v4243_v43, %v1168_v20  ;;  %v3987_v46 = vmul.f32 -1.442695, %v1061_v58  ;;  %4252 = vtanh.f32 %v5806_v16  ;;  %v3989_v57 = vmul.f32 -1.442695, %v1075_v32 }
 0x193   :  { %v1102_v3 = vpop.f32.mrf.mxu3  ;;  %v1136_v48 = vsel %vm1135_vm15, %v4239_v25, %v1132_v51  ;;  %v1088_v18 = vpop.f32.mrf.mxu2  ;;  %v1194_v8 = vmul.f32 %v5776_v24, %v1193_v56  ;;  %4254 = vpow2.f32 %v3990_v63  ;;  %v7840_v25 = vld [vmem:[#allocation62_spill] sm:$0xff]  ;;  %v7841_v56 = vld [vmem:[#allocation61_spill] sm:$0xff]  ;;  %vm1211_vm5 = vweird.f32 %v5796_v36 }
 0x194   :  { %v1141_v47 = vsel %vm5800_vm12, %v1140_v7, %v1136_v48  ;;  %v1170_v11 = vadd.f32 %v4243_v43, %v1169_v28  ;;  %v1103_v5 = vadd.f32 %v1102_v3, %v7840_v25  ;;  %4256 = vpow2.f32 %v3987_v46  ;;  %v7866_v25 = vld [vmem:[#allocation3_spill] sm:$0xff] }
 0x195   :  { %v5818_v52 = vpop.eup %4246  ;;  %v1224_v51 = vmul.f32 %v4245_v17, %v1141_v47  ;;  %4258 = vpow2.f32 %v3989_v57  ;;  %v1089_v28 = vadd.f32 %v1088_v18, %v7841_v56  ;;  %v5847_v47 = vadd.f32 %v5776_v24, %v1194_v8 }
 0x196   :  { %v4249_v44 = vpop.eup %4248  ;;  %v1174_v20 = vsel %vm1173_vm0, %v4243_v43, %v1170_v11  ;;  %v1207_v30 = vmul.f32 %v5818_v52, %v5796_v36  ;;  %4260 = vtanh.f32 %v1087_v40  ;;  %v3991_v17 = vmul.f32 -1.442695, %v1103_v5 }
 0x197   :  { %v4251_v7 = vpop.eup %4250  ;;  %v1179_v59 = vsel %vm1176_vm1, %v1178_v39, %v1174_v20  ;;  %v5827_v58 = vadd.f32 1.0, %v4249_v44  ;;  %v7843_v39 = vand.u32 2147483648, %v5758_v0  ;;  %vm1212_vm14 = vweird.f32 %v5818_v52 }
 0x198   :  { %v1222_v32 = vmul.f32 %v1179_v59, %v7842_v15  ;;  %v5831_v6 = vadd.f32 1.0, %v4251_v7  ;;  %v1208_v3 = vsub.f32 1.0, %v1207_v30  ;;  %v5834_v43 = vpop.eup %4252  ;;  %v1200_v30 = vand.u32 2147483647, %v5758_v0  ;;  %vm5938_vm2 = vmor %vm1211_vm5, %vm1212_vm14 }
 0x199   :  { %4262 = vrcp.f32 %v5827_v58  ;;  %v5839_v48 = vor.u32 1.1754944e-38, %v7843_v39  ;;  %v4255_v46 = vpop.eup %4254  ;;  %v1248_v57 = vand.u32 2147483647, %v5827_v58  ;;  %v1250_v18 = vand.u32 2147483648, %v5827_v58 }
 0x19a   :  { %v5841_v63 = vadd.f32 %v1224_v51, %v1222_v32  ;;  %4264 = vrcp.f32 %v5831_v6  ;;  %v4257_v11 = vpop.eup %4256  ;;  %v5852_v5 = vadd.f32 1.0, %v4255_v46  ;;  %v1209_v20 = vmul.f32 %v5818_v52, %v1208_v3 }
 0x19b   :  { %4266 = vtanh.f32 %v1089_v28  ;;  %v4259_v44 = vpop.eup %4258  ;;  %v5855_v51 = vadd.f32 1.0, %v4257_v11  ;;  %v1288_v59 = vand.u32 2147483648, %v5831_v6  ;;  %v1286_v28 = vand.u32 2147483647, %v5831_v6 }
 0x19c   :  { %7844 = vst [vmem:[#allocation60_spill] sm:$0xff] %v5841_v63  ;;  %4268 = vtanh.f32 %v5841_v63  ;;  %v5858_v7 = vpop.eup %4260  ;;  %v5872_v15 = vadd.f32 1.0, %v4259_v44  ;;  %vm1282_vm6 = vweird.f32 %v5831_v6  ;;  %vm1244_vm7 = vweird.f32 %v5827_v58 }
 0x19d   :  { %4270 = vpow2.f32 %v3991_v17  ;;  %v1199_v0 = vsel %vm5864_vm4, %v5776_v24, %v5847_v47  ;;  %vm5882_vm8 = vcmp.eq.f32.partialorder %v1248_v57, 8.507059e+37  ;;  %v1251_v46 = vor.u32 1.1754944e-38, %v1250_v18 }
 0x19e   :  { %4272 = vrcp.f32 %v5852_v5  ;;  %v1265_v11 = vand.u32 2147483648, %v5855_v51  ;;  %v1303_v56 = vand.u32 2147483648, %v5872_v15  ;;  %vm5892_vm9 = vcmp.eq.f32.partialorder %v1200_v30, 8.507059e+37 }
 0x19f   :  { %v4263_v32 = vpop.eup %4262  ;;  %4274 = vrcp.f32 %v5855_v51  ;;  %v5897_v47 = vadd.f32 %v5818_v52, %v1209_v20  ;;  %v1289_v8 = vor.u32 1.1754944e-38, %v1288_v59  ;;  %vm5901_vm10 = vcmp.eq.f32.partialorder %v1286_v28, 8.507059e+37 }
 0x1a0   :  { %v4265_v3 = vpop.eup %4264  ;;  %v1240_v17 = vmul.f32 %v4263_v32, %v5827_v58  ;;  %4276 = vrcp.f32 %v5872_v15  ;;  %v1263_v63 = vand.u32 2147483647, %v5855_v51  ;;  %vm1245_vm12 = vweird.f32 %v4263_v32 }
 0x1a1   :  { %v5888_v44 = vpop.eup %4266  ;;  %v1278_v40 = vmul.f32 %v4265_v3, %v5831_v6  ;;  %vm1283_vm11 = vweird.f32 %v4265_v3  ;;  %vm1259_vm13 = vweird.f32 %v5855_v51  ;;  %v1266_v33 = vor.u32 1.1754944e-38, %v1265_v11  ;;  %vm5920_vm0 = vmor %vm1244_vm7, %vm1245_vm12 }
 0x1a2   :  { %v5899_v57 = vpop.eup %4268  ;;  %v1241_v18 = vsub.f32 1.0, %v1240_v17  ;;  %vm1297_vm15 = vweird.f32 %v5872_v15  ;;  %v1301_v30 = vand.u32 2147483647, %v5872_v15  ;;  %vm5925_vm1 = vcmp.eq.f32.partialorder %v1263_v63, 8.507059e+37  ;;  %vm1284_vm3 = vmor %vm1282_vm6, %vm1283_vm11 }
 0x1a3   :  { %v4271_v4 = vpop.eup %4270  ;;  %v1279_v19 = vsub.f32 1.0, %v1278_v40  ;;  %v1304_v40 = vor.u32 1.1754944e-38, %v1303_v56  ;;  %v1204_v56 = vsel %vm5892_vm9, %v5839_v48, %v1199_v0  ;;  %v1215_v63 = vand.u32 2147483647, %v5796_v36 }
 0x1a4   :  { %v5907_v55 = vpop.eup %4272  ;;  %v1242_v20 = vmul.f32 %v4263_v32, %v1241_v18  ;;  %v5910_v17 = vadd.f32 1.0, %v4271_v4  ;;  %vm1322_vm4 = vweird.f32 %v5852_v5  ;;  %v1214_v0 = vsel %vm5938_vm2, %v5818_v52, %v5897_v47 }
 0x1a5   :  { %v4275_v59 = vpop.eup %4274  ;;  %v1280_v28 = vmul.f32 %v4265_v3, %v1279_v19  ;;  %v1318_v16 = vmul.f32 %v5907_v55, %v5852_v5  ;;  %v7859_v31 = vand.u32 2147483648, %v5796_v36  ;;  %v1229_v39 = vmul.f32 %v5834_v43, %v1204_v56 }
 0x1a6   :  { %v4277_v60 = vpop.eup %4276  ;;  %v1243_v45 = vadd.f32 %v4263_v32, %v1242_v20  ;;  %v1255_v11 = vmul.f32 %v4275_v59, %v5855_v51  ;;  %4278 = vrcp.f32 %v5910_v17  ;;  %vm1260_vm7 = vweird.f32 %v4275_v59 }
 0x1a7   :  { %v1281_v18 = vadd.f32 %v4265_v3, %v1280_v28  ;;  %v1319_v20 = vsub.f32 1.0, %v1318_v16  ;;  %v1293_v58 = vmul.f32 %v4277_v60, %v5872_v15  ;;  %vm1298_vm5 = vweird.f32 %v4277_v60 }
 0x1a8   :  { %v1247_v48 = vsel %vm5920_vm0, %v4263_v32, %v1243_v45  ;;  %v1256_v16 = vsub.f32 1.0, %v1255_v11  ;;  %v1218_v52 = vor.u32 1.1754944e-38, %v7859_v31  ;;  %vm1323_vm6 = vweird.f32 %v5907_v55  ;;  %vm1299_vm11 = vmor %vm1297_vm15, %vm1298_vm5 }
 0x1a9   :  { %v1252_v24 = vsel %vm5882_vm8, %v1251_v46, %v1247_v48  ;;  %v1285_v28 = vsel %vm1284_vm3, %v4265_v3, %v1281_v18  ;;  %v1294_v29 = vsub.f32 1.0, %v1293_v58  ;;  %v1320_v32 = vmul.f32 %v5907_v55, %v1319_v20  ;;  %vm5993_vm12 = vmor %vm1322_vm4, %vm1323_vm6 }
 0x1aa   :  { %v1290_v6 = vsel %vm5901_vm10, %v1289_v8, %v1285_v28  ;;  %v1349_v45 = vmul.f32 %v5858_v7, %v1252_v24  ;;  %v1257_v4 = vmul.f32 %v4275_v59, %v1256_v16  ;;  %vm5964_vm8 = vcmp.eq.f32.partialorder %v1301_v30, 8.507059e+37  ;;  %vm1261_vm10 = vmor %vm1259_vm13, %vm1260_vm7 }
 0x1ab   :  { %v1347_v11 = vmul.f32 %v1290_v6, %v5657_v21  ;;  %v1295_v35 = vmul.f32 %v4277_v60, %v1294_v29  ;;  %vm1216_vm9 = vcmp.eq.f32.partialorder %v1215_v63, 8.507059e+37  ;;  %v1357_v8 = vpack.c.bf16 %v1229_v39, %v1229_v39 }
 0x1ac   :  { %v4279_v46 = vpop.eup %4278  ;;  %v1258_v3 = vadd.f32 %v4275_v59, %v1257_v4  ;;  %v1219_v36 = vsel %vm1216_vm9, %v1218_v52, %v1214_v0  ;;  %v1321_v30 = vadd.f32 %v5907_v55, %v1320_v32  ;;  %v7864_v58 = vand.u32 2147483648, %v5852_v5 }
 0x1ad   :  { %v5968_v7 = vadd.f32 %v1349_v45, %v1347_v11  ;;  %v1296_v21 = vadd.f32 %v4277_v60, %v1295_v35  ;;  %v1333_v29 = vmul.f32 %v4279_v46, %v5910_v17  ;;  %v1230_v47 = vmul.f32 %v5899_v57, %v1219_v36  ;;  %3992 = vst [vmem:[%s7553_s7 + $0x10] sm:$0xf] %v1357_v8  ;;  %v7869_v36 = vld [vmem:[#allocation6_spill] sm:$0xff] }
 0x1ae   :  { %v1262_v43 = vsel %vm1261_vm10, %v4275_v59, %v1258_v3  ;;  %v1326_v57 = vand.u32 2147483647, %v5852_v5  ;;  %v1325_v19 = vsel %vm5993_vm12, %v5907_v55, %v1321_v30  ;;  %v1329_v63 = vor.u32 1.1754944e-38, %v7864_v58  ;;  %v7865_v3 = vld [vmem:[#allocation2_spill] sm:$0xff]  ;;  %v7887_v58 = vld [vmem:[#allocation24_spill] sm:$0xff] }
 0x1af   :  { %4280 = vtanh.f32 %v5968_v7  ;;  %v1267_v51 = vsel %vm5925_vm1, %v1266_v33, %v1262_v43  ;;  %v1300_v56 = vsel %vm1299_vm11, %v4277_v60, %v1296_v21  ;;  %v1334_v35 = vsub.f32 1.0, %v1333_v29  ;;  %v7867_v21 = vld [vmem:[#allocation4_spill] sm:$0xff]  ;;  %v7868_v29 = vld [vmem:[#allocation5_spill] sm:$0xff]  ;;  %v7870_v43 = vld [vmem:[#allocation7_spill] sm:$0xff] }
 0x1b0   :  { %v1305_v18 = vsel %vm5964_vm8, %v1304_v40, %v1300_v56  ;;  %v1350_v20 = vmul.f32 %v5888_v44, %v1267_v51  ;;  %v1358_v15 = vpack.c.bf16 %v1230_v47, %v1230_v47  ;;  %v1373_v44 = vunpack.c.l.b16 %v1357_v8  ;;  %v7871_v47 = vld [vmem:[#allocation8_spill] sm:$0xff]  ;;  %v7872_v8 = vld [vmem:[#allocation9_spill] sm:$0xff]  ;;  %v7873_v30 = vld [vmem:[#allocation10_spill] sm:$0xff] }
 0x1b1   :  { %v1348_v60 = vmul.f32 %v1305_v18, %v5673_v12  ;;  %v1335_v59 = vmul.f32 %v4279_v46, %v1334_v35  ;;  %vm1327_vm13 = vcmp.eq.f32.partialorder %v1326_v57, 8.507059e+37  ;;  %vm1338_vm14 = vweird.f32 %v4279_v46  ;;  %v7874_v51 = vld [vmem:[#allocation11_spill] sm:$0xff]  ;;  %v7875_v56 = vld [vmem:[#allocation12_spill] sm:$0xff]  ;;  %v7876_v35 = vld [vmem:[#allocation13_spill] sm:$0xff] }
 0x1b2   :  { %3993 = vst [vmem:[%s7553_s7 + $0x18] sm:$0xf] %v1358_v15  ;;  %v1374_v40 = vunpack.c.l.b16 %v1358_v15  ;;  %v1343_v24 = vand.u32 2147483648, %v5910_v17  ;;  %v1330_v28 = vsel %vm1327_vm13, %v1329_v63, %v1325_v19  ;;  %vm1337_vm15 = vweird.f32 %v5910_v17  ;;  %v7877_v18 = vld [vmem:[#allocation14_spill] sm:$0xff]  ;;  %v7879_v15 = vld [vmem:[#allocation16_spill] sm:$0xff]  ;;  %v7880_v57 = vld [vmem:[#allocation17_spill] sm:$0xff] }
 0x1b3   :  { %v6006_v48 = vadd.f32 %v1350_v20, %v1348_v60  ;;  %v1336_v0 = vadd.f32 %v4279_v46, %v1335_v59  ;;  %v1341_v55 = vand.u32 2147483647, %v5910_v17  ;;  %vm1339_vm0 = vmor %vm1337_vm15, %vm1338_vm14  ;;  %v7878_v20 = vld [vmem:[#allocation15_spill] sm:$0xff]  ;;  %v7881_v33 = vld [vmem:[#allocation18_spill] sm:$0xff] }
 0x1b4   :  { %v1375_v16 = vpack.c.b16 %v1374_v40, %v1373_v44  ;;  %v1344_v32 = vor.u32 1.1754944e-38, %v1343_v24  ;;  %v7882_v60 = vld [vmem:[#allocation19_spill] sm:$0xff]  ;;  %v7883_v59 = vld [vmem:[#allocation20_spill] sm:$0xff]  ;;  %v7884_v44 = vld [vmem:[#allocation21_spill] sm:$0xff] }
 0x1b5   :  { %v4281_v12 = vpop.eup %4280  ;;  %4282 = vtanh.f32 %v6006_v48  ;;  %v1340_v6 = vsel %vm1339_vm0, %v4279_v46, %v1336_v0  ;;  %vm1342_vm1 = vcmp.eq.f32.partialorder %v1341_v55, 8.507059e+37  ;;  %v7885_v40 = vld [vmem:[#allocation22_spill] sm:$0xff]  ;;  %v7886_v19 = vld [vmem:[#allocation23_spill] sm:$0xff]  ;;  %v7888_v63 = vld [vmem:[#allocation25_spill] sm:$0xff] }
 0x1b6   :  { %1385 = vmatmul.bf16.vlgmr.msra.gmra.mxu0 %v1375_v16  ;;  %1399 = vmatmul.bf16.vlgmr.msra.gmra.mxu1 %v1375_v16  ;;  %v1355_v5 = vmul.f32 %v4281_v12, %v1330_v28  ;;  %v1345_v4 = vsel %vm1342_vm1, %v1344_v32, %v1340_v6  ;;  %v7890_v0 = vld [vmem:[#allocation27_spill] sm:$0xff]  ;;  %v7891_v12 = vld [vmem:[#allocation28_spill] sm:$0xff]  ;;  %v7892_v24 = vld [vmem:[#allocation29_spill] sm:$0xff] }
 0x1b7   :  { %1413 = vmatmul.bf16.vlgmr.msra.gmra.mxu2 %v1375_v16  ;;  %1427 = vmatmul.bf16.vlgmr.msra.gmra.mxu3 %v1375_v16  ;;  %v7889_v16 = vld [vmem:[#allocation26_spill] sm:$0xff]  ;;  %v7894_v55 = vld [vmem:[#allocation31_spill] sm:$0xff]  ;;  %v7896_v6 = vld [vmem:[#allocation33_spill] sm:$0xff] }
 0x1b8   :  { %v1359_v45 = vpack.c.bf16 %v1355_v5, %v1355_v5  ;;  %1767 = vmatpush.bf16.msra.mxu0 %v4758_v37  ;;  %1781 = vmatpush.bf16.msra.mxu1 %v4760_v38  ;;  %v7893_v28 = vld [vmem:[#allocation30_spill] sm:$0xff]  ;;  %v7895_v5 = vld [vmem:[#allocation32_spill] sm:$0xff]  ;;  %v7898_v32 = vld [vmem:[#allocation35_spill] sm:$0xff] }
 0x1b9   :  { %1795 = vmatpush.bf16.msra.mxu2 %v4772_v41  ;;  %1809 = vmatpush.bf16.msra.mxu3 %v4774_v42 }
 0x1ba   :  { %3994 = vst [vmem:[%s7553_s7 + $0x64] sm:$0xf] %v1359_v45  ;;  %v1435_v52 = vunpack.c.l.b16 %v1359_v45  ;;  %v7897_v45 = vld [vmem:[#allocation34_spill] sm:$0xff] }
 0x1bb   :  { %v4283_v17 = vpop.eup %4282 }
 0x1bc   :  { %v1356_v11 = vmul.f32 %v4283_v17, %v1345_v4  ;;  %1768 = vmatpush.bf16.msra.mxu0 %v4800_v49  ;;  %1782 = vmatpush.bf16.msra.mxu1 %v4802_v50  ;;  %v7899_v17 = vld [vmem:[#allocation36_spill] sm:$0xff]  ;;  %v7900_v4 = vld [vmem:[#allocation37_spill] sm:$0xff] }
 0x1bd   :  { %1796 = vmatpush.bf16.msra.mxu2 %v4812_v53  ;;  %1810 = vmatpush.bf16.msra.mxu3 %v4814_v54 }
 0x1be   :  { %v1360_v31 = vpack.c.bf16 %v1356_v11, %v1356_v11  ;;  %v7901_v11 = vld [vmem:[#allocation38_spill] sm:$0xff] }
 0x1c0   :  { %3995 = vst [vmem:[%s7553_s7 + $0x6c] sm:$0xf] %v1360_v31  ;;  %v1436_v39 = vunpack.c.l.b16 %v1360_v31  ;;  %1769 = vmatpush.bf16.msra.mxu0 %v4836_v61  ;;  %1783 = vmatpush.bf16.msra.mxu1 %v4838_v62  ;;  %v7902_v31 = vld [vmem:[#allocation39_spill] sm:$0xff] }
 0x1c1   :  { %1797 = vmatpush.bf16.msra.mxu2 %v4848_v1  ;;  %1811 = vmatpush.bf16.msra.mxu3 %v4850_v2 }
 0x1c2   :  { %v1437_v46 = vpack.c.b16 %v1436_v39, %v1435_v52  ;;  %v7903_v52 = vld [vmem:[#allocation40_spill] sm:$0xff]  ;;  %v7904_v39 = vld [vmem:[#allocation41_spill] sm:$0xff] }
 0x1c4   :  { %1770 = vmatpush.bf16.msra.mxu0 %v4872_v9  ;;  %1784 = vmatpush.bf16.msra.mxu1 %v4874_v10 }
 0x1c5   :  { %1798 = vmatpush.bf16.msra.mxu2 %v4884_v13  ;;  %1812 = vmatpush.bf16.msra.mxu3 %v4886_v14 }
 0x1c6   :  { %1447 = vmatmul.bf16.vlgmr.msrb.gmra.mxu0 %v1437_v46  ;;  %1461 = vmatmul.bf16.vlgmr.msrb.gmra.mxu1 %v1437_v46 }
 0x1c7   :  { %1475 = vmatmul.bf16.vlgmr.msrb.gmra.mxu2 %v1437_v46  ;;  %1489 = vmatmul.bf16.vlgmr.msrb.gmra.mxu3 %v1437_v46  ;;  %v7905_v46 = vld [vmem:[#allocation42_spill] sm:$0xff] }
 0x1c8   :  { %1771 = vmatpush.bf16.msra.mxu0 %v4908_v22  ;;  %1785 = vmatpush.bf16.msra.mxu1 %v4910_v23 }
 0x1c9   :  { %1799 = vmatpush.bf16.msra.mxu2 %v4920_v26  ;;  %1813 = vmatpush.bf16.msra.mxu3 %v4922_v27 }
 0x1cc   :  { %1772 = vmatpush.bf16.msra.mxu0 %v4952_v34  ;;  %1786 = vmatpush.bf16.msra.mxu1 %v7865_v3 }
 0x1cd   :  { %1800 = vmatpush.bf16.msra.mxu2 %v7866_v25  ;;  %1814 = vmatpush.bf16.msra.mxu3 %v7867_v21 }
 0x1d0   :  { %1773 = vmatpush.bf16.msra.mxu0 %v7868_v29  ;;  %1787 = vmatpush.bf16.msra.mxu1 %v7869_v36 }
 0x1d1   :  { %1801 = vmatpush.bf16.msra.mxu2 %v7870_v43  ;;  %1815 = vmatpush.bf16.msra.mxu3 %v7871_v47 }
 0x1d4   :  { %1774 = vmatpush.bf16.msra.mxu0 %v7872_v8  ;;  %1788 = vmatpush.bf16.msra.mxu1 %v7873_v30  ;;  %v7925_v30 = vld [vmem:[#allocation55_spill] sm:$0xff] }
 0x1d5   :  { %1802 = vmatpush.bf16.msra.mxu2 %v7874_v51  ;;  %1816 = vmatpush.bf16.msra.mxu3 %v7875_v56 }
 0x1d8   :  { %1829 = vmatpush.bf16.msrb.mxu0 %v7876_v35  ;;  %1843 = vmatpush.bf16.msrb.mxu1 %v7877_v18  ;;  %v7922_v18 = vld [vmem:[#allocation59_spill] sm:$0xff] }
 0x1d9   :  { %1857 = vmatpush.bf16.msrb.mxu2 %v7878_v20  ;;  %1871 = vmatpush.bf16.msrb.mxu3 %v7879_v15 }
 0x1dc   :  { %1830 = vmatpush.bf16.msrb.mxu0 %v7880_v57  ;;  %1844 = vmatpush.bf16.msrb.mxu1 %v7881_v33 }
 0x1dd   :  { %1858 = vmatpush.bf16.msrb.mxu2 %v7882_v60  ;;  %1872 = vmatpush.bf16.msrb.mxu3 %v7883_v59  ;;  %v7917_v59 = vld [vmem:[#allocation52_spill] sm:$0xff] }
 0x1e0   :  { %1831 = vmatpush.bf16.msrb.mxu0 %v7884_v44  ;;  %1845 = vmatpush.bf16.msrb.mxu1 %v7885_v40 }
 0x1e1   :  { %1859 = vmatpush.bf16.msrb.mxu2 %v7886_v19  ;;  %1873 = vmatpush.bf16.msrb.mxu3 %v7887_v58 }
 0x1e4   :  { %1832 = vmatpush.bf16.msrb.mxu0 %v7888_v63  ;;  %1846 = vmatpush.bf16.msrb.mxu1 %v7889_v16  ;;  %v7911_v16 = vld [vmem:[#allocation48_spill] sm:$0xff]  ;;  %v7912_v63 = vld [vmem:[#allocation49_spill] sm:$0xff] }
 0x1e5   :  { %1860 = vmatpush.bf16.msrb.mxu2 %v7890_v0  ;;  %1874 = vmatpush.bf16.msrb.mxu3 %v7891_v12 }
 0x1e8   :  { %1833 = vmatpush.bf16.msrb.mxu0 %v7892_v24  ;;  %1847 = vmatpush.bf16.msrb.mxu1 %v7893_v28  ;;  %v7909_v28 = vld [vmem:[#allocation46_spill] sm:$0xff] }
 0x1e9   :  { %1861 = vmatpush.bf16.msrb.mxu2 %v7894_v55  ;;  %1875 = vmatpush.bf16.msrb.mxu3 %v7895_v5  ;;  %v7906_v5 = vld [vmem:[#allocation43_spill] sm:$0xff]  ;;  %v7908_v55 = vld [vmem:[#allocation45_spill] sm:$0xff] }
 0x1ec   :  { %1834 = vmatpush.bf16.msrb.mxu0 %v7896_v6  ;;  %1848 = vmatpush.bf16.msrb.mxu1 %v7897_v45  ;;  %v7907_v6 = vld [vmem:[#allocation44_spill] sm:$0xff] }
 0x1ed   :  { %1862 = vmatpush.bf16.msrb.mxu2 %v7898_v32  ;;  %1876 = vmatpush.bf16.msrb.mxu3 %v7899_v17 }
 0x1f0   :  { %1835 = vmatpush.bf16.msrb.mxu0 %v7900_v4  ;;  %1849 = vmatpush.bf16.msrb.mxu1 %v7901_v11 }
 0x1f1   :  { %1863 = vmatpush.bf16.msrb.mxu2 %v7902_v31  ;;  %1877 = vmatpush.bf16.msrb.mxu3 %v7903_v52  ;;  %v7910_v52 = vld [vmem:[#allocation47_spill] sm:$0xff] }
 0x1f4   :  { %1836 = vmatpush.bf16.msrb.mxu0 %v7904_v39  ;;  %1850 = vmatpush.bf16.msrb.mxu1 %v7905_v46 }
 0x1f5   :  { %1864 = vmatpush.bf16.msrb.mxu2 %v7906_v5  ;;  %1878 = vmatpush.bf16.msrb.mxu3 %v7907_v6 }
 0x233   :  { %v1386_v45 = vpop.f32.mrf.mxu0  ;;  %v1400_v32 = vpop.f32.mrf.mxu1 }
 0x234   :  { %v1387_v17 = vadd.f32 %v1386_v45, %v7908_v55  ;;  %v1401_v4 = vadd.f32 %v1400_v32, %v7909_v28 }
 0x236   :  { %v3996_v24 = vmul.f32 -1.442695, %v1387_v17  ;;  %v3998_v11 = vmul.f32 -1.442695, %v1401_v4 }
 0x238   :  { %4284 = vpow2.f32 %v3996_v24  ;;  %v7913_v24 = vld [vmem:[#allocation50_spill] sm:$0xff] }
 0x239   :  { %4286 = vpow2.f32 %v3998_v11 }
 0x23a   :  { %v1428_v31 = vpop.f32.mrf.mxu3  ;;  %v1414_v46 = vpop.f32.mrf.mxu2 }
 0x23b   :  { %v1429_v12 = vadd.f32 %v1428_v31, %v7910_v52  ;;  %v1388_v39 = vpop.f32.mrf.mxu0  ;;  %v1402_v0 = vpop.f32.mrf.mxu1  ;;  %v1415_v4 = vadd.f32 %v1414_v46, %v7913_v24  ;;  %v7914_v52 = vld [vmem:[#allocation51_spill] sm:$0xff] }
 0x23c   :  { %v1389_v5 = vadd.f32 %v1388_v39, %v7911_v16  ;;  %v1403_v6 = vadd.f32 %v1402_v0, %v7912_v63 }
 0x23d   :  { %v4000_v58 = vmul.f32 -1.442695, %v1429_v12 }
 0x23e   :  { %v4285_v19 = vpop.eup %4284  ;;  %v3997_v40 = vmul.f32 -1.442695, %v1389_v5  ;;  %v3999_v32 = vmul.f32 -1.442695, %v1403_v6 }
 0x23f   :  { %v4287_v45 = vpop.eup %4286  ;;  %v1501_v55 = vadd.f32 1.0, %v4285_v19  ;;  %4288 = vpow2.f32 %v4000_v58  ;;  %v7915_v58 = vld [vmem:[#allocation53_spill] sm:$0xff] }
 0x240   :  { %v1539_v17 = vadd.f32 1.0, %v4287_v45  ;;  %4290 = vpow2.f32 %v3997_v40 }
 0x241   :  { %4292 = vrcp.f32 %v1501_v55  ;;  %vm1508_vm2 = vweird.f32 %v1501_v55  ;;  %v1512_v45 = vand.u32 2147483647, %v1501_v55  ;;  %v1514_v63 = vand.u32 2147483648, %v1501_v55 }
 0x242   :  { %4294 = vrcp.f32 %v1539_v17  ;;  %v1430_v11 = vpop.f32.mrf.mxu3  ;;  %v1416_v19 = vpop.f32.mrf.mxu2  ;;  %vm1546_vm3 = vweird.f32 %v1539_v17  ;;  %v1550_v60 = vand.u32 2147483647, %v1539_v17 }
 0x243   :  { %4296 = vpow2.f32 %v3999_v32  ;;  %v1448_v31 = vpop.f32.mrf.mxu0  ;;  %v1431_v39 = vadd.f32 %v1430_v11, %v7914_v52  ;;  %v1462_v0 = vpop.f32.mrf.mxu1  ;;  %v7916_v11 = vld [vmem:[#allocation54_spill] sm:$0xff]  ;;  %vm6100_vm4 = vcmp.eq.f32.partialorder %v1512_v45, 8.507059e+37 }
 0x244   :  { %4298 = vtanh.f32 %v1415_v4  ;;  %v1449_v6 = vadd.f32 %v1448_v31, %v7915_v58  ;;  %v1463_v52 = vadd.f32 %v1462_v0, %v7916_v11  ;;  %v1417_v31 = vadd.f32 %v1416_v19, %v7917_v59 }
 0x245   :  { %v4289_v16 = vpop.eup %4288  ;;  %v4001_v46 = vmul.f32 -1.442695, %v1431_v39  ;;  %vm6108_vm6 = vcmp.eq.f32.partialorder %v1550_v60, 8.507059e+37 }
 0x246   :  { %v4291_v12 = vpop.eup %4290  ;;  %v6089_v5 = vadd.f32 1.0, %v4289_v16  ;;  %v1552_v16 = vand.u32 2147483648, %v1539_v17  ;;  %v4004_v20 = vmul.f32 -1.442695, %v1463_v52 }
 0x247   :  { %v4293_v40 = vpop.eup %4292  ;;  %v6092_v28 = vadd.f32 1.0, %v4291_v12  ;;  %v4002_v12 = vmul.f32 -1.442695, %v1449_v6 }
 0x248   :  { %v4295_v32 = vpop.eup %4294  ;;  %v1504_v24 = vmul.f32 %v4293_v40, %v1501_v55  ;;  %4300 = vrcp.f32 %v6089_v5  ;;  %v1592_v15 = vand.u32 2147483648, %v6089_v5  ;;  %vm1509_vm7 = vweird.f32 %v4293_v40 }
 0x249   :  { %v4297_v44 = vpop.eup %4296  ;;  %v1542_v4 = vmul.f32 %v4295_v32, %v1539_v17  ;;  %4302 = vrcp.f32 %v6092_v28  ;;  %vm1547_vm5 = vweird.f32 %v4295_v32  ;;  %v1553_v6 = vor.u32 1.1754944e-38, %v1552_v16  ;;  %vm1510_vm8 = vmor %vm1508_vm2, %vm1509_vm7 }
 0x24a   :  { %v1505_v58 = vsub.f32 1.0, %v1504_v24  ;;  %v6098_v33 = vadd.f32 1.0, %v4297_v44  ;;  %4304 = vpow2.f32 %v4001_v46  ;;  %v4299_v0 = vpop.eup %4298  ;;  %v1515_v24 = vor.u32 1.1754944e-38, %v1514_v63  ;;  %vm1548_vm10 = vmor %vm1546_vm3, %vm1547_vm5 }
 0x24b   :  { %v1543_v39 = vsub.f32 1.0, %v1542_v4  ;;  %v6113_v59 = vor.u32 1.1754944e-38, %v1592_v15  ;;  %vm1523_vm9 = vweird.f32 %v6092_v28  ;;  %v1527_v63 = vand.u32 2147483647, %v6092_v28 }
 0x24c   :  { %v1506_v11 = vmul.f32 %v4293_v40, %v1505_v58  ;;  %4306 = vrcp.f32 %v6098_v33  ;;  %v1529_v60 = vand.u32 2147483648, %v6092_v28  ;;  %vm1561_vm11 = vweird.f32 %v6098_v33 }
 0x24d   :  { %v1544_v19 = vmul.f32 %v4295_v32, %v1543_v39  ;;  %4308 = vtanh.f32 %v1417_v31  ;;  %v1567_v15 = vand.u32 2147483648, %v6098_v33  ;;  %vm6132_vm12 = vcmp.eq.f32.partialorder %v1527_v63, 8.507059e+37 }
 0x24e   :  { %v6106_v44 = vpop.eup %4300  ;;  %v1507_v45 = vadd.f32 %v4293_v40, %v1506_v11  ;;  %4310 = vpow2.f32 %v4002_v12  ;;  %v1490_v12 = vpop.f32.mrf.mxu3  ;;  %vm1586_vm1 = vweird.f32 %v6089_v5 }
 0x24f   :  { %v4303_v46 = vpop.eup %4302  ;;  %v1545_v58 = vadd.f32 %v4295_v32, %v1544_v19  ;;  %4312 = vpow2.f32 %v4004_v20  ;;  %vm1587_vm14 = vweird.f32 %v6106_v44 }
 0x250   :  { %v1511_v52 = vsel %vm1510_vm8, %v4293_v40, %v1507_v45  ;;  %v1519_v11 = vmul.f32 %v4303_v46, %v6092_v28  ;;  %v4305_v16 = vpop.eup %4304  ;;  %v1582_v40 = vmul.f32 %v6106_v44, %v6089_v5  ;;  %vm1524_vm13 = vweird.f32 %v4303_v46 }
 0x251   :  { %v1516_v55 = vsel %vm6100_vm4, %v1515_v24, %v1511_v52  ;;  %v1549_v31 = vsel %vm1548_vm10, %v4295_v32, %v1545_v58  ;;  %v6128_v45 = vadd.f32 1.0, %v4305_v16  ;;  %v1476_v52 = vpop.f32.mrf.mxu2  ;;  %v1568_v16 = vor.u32 1.1754944e-38, %v1567_v15  ;;  %vm1525_vm0 = vmor %vm1523_vm9, %vm1524_vm13  ;;  %v1464_v15 = vpop.f32.mrf.mxu1 }
 0x252   :  { %v4307_v39 = vpop.eup %4306  ;;  %v1554_v17 = vsel %vm6108_vm6, %v1553_v6, %v1549_v31  ;;  %v1520_v19 = vsub.f32 1.0, %v1519_v11  ;;  %v1613_v24 = vmul.f32 %v4299_v0, %v1516_v55  ;;  %v1530_v6 = vor.u32 1.1754944e-38, %v1529_v60  ;;  %vm6194_vm9 = vmor %vm1586_vm1, %vm1587_vm14 }
 0x253   :  { %v4309_v20 = vpop.eup %4308  ;;  %v1611_v57 = vmul.f32 %v1554_v17, %v7922_v18  ;;  %v1557_v32 = vmul.f32 %v4307_v39, %v6098_v33  ;;  %4314 = vrcp.f32 %v6128_v45  ;;  %v1565_v31 = vand.u32 2147483647, %v6098_v33  ;;  %v1450_v18 = vpop.f32.mrf.mxu0 }
 0x254   :  { %v4311_v56 = vpop.eup %4310  ;;  %v1521_v4 = vmul.f32 %v4303_v46, %v1520_v19  ;;  %v1583_v55 = vsub.f32 1.0, %v1582_v40  ;;  %v1607_v17 = vand.u32 2147483648, %v6128_v45  ;;  %v1477_v35 = vadd.f32 %v1476_v52, %v7925_v30  ;;  %v7926_v40 = vld [vmem:[#allocation56_spill] sm:$0xff] }
 0x255   :  { %v1558_v11 = vsub.f32 1.0, %v1557_v32  ;;  %v6138_v51 = vadd.f32 1.0, %v4311_v56  ;;  %v4313_v0 = vpop.eup %4312  ;;  %v6142_v8 = vadd.f32 %v1613_v24, %v1611_v57  ;;  %vm1562_vm15 = vweird.f32 %v4307_v39 }
 0x256   :  { %v1522_v63 = vadd.f32 %v4303_v46, %v1521_v4  ;;  %v6148_v56 = vadd.f32 1.0, %v4313_v0  ;;  %v1491_v32 = vadd.f32 %v1490_v12, %v7926_v40  ;;  %v7927_v4 = vld [vmem:[#allocation57_spill] sm:$0xff]  ;;  %vm1566_vm2 = vcmp.eq.f32.partialorder %v1565_v31, 8.507059e+37  ;;  %vm1563_vm3 = vmor %vm1561_vm11, %vm1562_vm15  ;;  %v7928_v12 = vld [vmem:[#allocation58_spill] sm:$0xff]  ;;  %v1492_v0 = vpop.f32.mrf.mxu3 }
 0x257   :  { %v1559_v60 = vmul.f32 %v4307_v39, %v1558_v11  ;;  %4316 = vrcp.f32 %v6138_v51  ;;  %v1451_v52 = vadd.f32 %v1450_v18, %v7927_v4  ;;  %v1584_v11 = vmul.f32 %v6106_v44, %v1583_v55 }
 0x258   :  { %v1526_v19 = vsel %vm1525_vm0, %v4303_v46, %v1522_v63  ;;  %4318 = vrcp.f32 %v6148_v56  ;;  %v6163_v46 = vor.u32 1.1754944e-38, %v1607_v17  ;;  %v1465_v18 = vadd.f32 %v1464_v15, %v7928_v12  ;;  %v7929_v17 = vld [vmem:[#allocation60_spill] sm:$0xff] }
 0x259   :  { %v1531_v57 = vsel %vm6132_vm12, %v1530_v6, %v1526_v19  ;;  %v1560_v24 = vadd.f32 %v4307_v39, %v1559_v60  ;;  %v6157_v28 = vpop.eup %4314  ;;  %4320 = vtanh.f32 %v1477_v35  ;;  %vm1601_vm4 = vweird.f32 %v6128_v45 }
 0x25a   :  { %4322 = vtanh.f32 %v6142_v8  ;;  %v1614_v6 = vmul.f32 %v4309_v20, %v1531_v57  ;;  %v1597_v31 = vmul.f32 %v6157_v28, %v6128_v45  ;;  %v1638_v63 = vand.u32 2147483647, %v6138_v51 }
 0x25b   :  { %v1564_v58 = vsel %vm1563_vm3, %v4307_v39, %v1560_v24  ;;  %v4006_v33 = vmul.f32 -1.442695, %v1491_v32  ;;  %v4003_v60 = vmul.f32 -1.442695, %v1451_v52  ;;  %vm1634_vm7 = vweird.f32 %v6138_v51  ;;  %v7930_v24 = vld [vmem:[#allocation62_spill] sm:$0xff] }
 0x25c   :  { %v1569_v55 = vsel %vm1566_vm2, %v1568_v16, %v1564_v58  ;;  %v1598_v35 = vsub.f32 1.0, %v1597_v31  ;;  %v1640_v15 = vand.u32 2147483648, %v6138_v51  ;;  %vm1672_vm5 = vweird.f32 %v6148_v56 }
 0x25d   :  { %v1612_v19 = vmul.f32 %v1569_v55, %v7929_v17  ;;  %v4317_v39 = vpop.eup %4316  ;;  %v1678_v20 = vand.u32 2147483648, %v6148_v56  ;;  %4324 = vpow2.f32 %v4006_v33  ;;  %v4005_v57 = vmul.f32 -1.442695, %v1465_v18 }
 0x25e   :  { %v1493_v16 = vadd.f32 %v1492_v0, %v7930_v24  ;;  %v4319_v58 = vpop.eup %4318  ;;  %v1599_v32 = vmul.f32 %v6157_v28, %v1598_v35  ;;  %v1630_v52 = vmul.f32 %v4317_v39, %v6138_v51  ;;  %v1585_v31 = vadd.f32 %v6106_v44, %v1584_v11 }
 0x25f   :  { %v6177_v30 = vadd.f32 %v1614_v6, %v1612_v19  ;;  %v4321_v55 = vpop.eup %4320  ;;  %v1668_v17 = vmul.f32 %v4319_v58, %v6148_v56  ;;  %vm6183_vm6 = vcmp.eq.f32.partialorder %v1638_v63, 8.507059e+37  ;;  %4326 = vpow2.f32 %v4003_v60 }
 0x260   :  { %v4007_v18 = vmul.f32 -1.442695, %v1493_v16  ;;  %v4323_v33 = vpop.eup %4322  ;;  %vm1602_vm8 = vweird.f32 %v6157_v28  ;;  %v1631_v6 = vsub.f32 1.0, %v1630_v52  ;;  %v1590_v0 = vand.u32 2147483647, %v6089_v5  ;;  %v7937_v5 = vld [vmem:[#allocation61_spill] sm:$0xff] }
 0x261   :  { %4328 = vtanh.f32 %v6177_v30  ;;  %v1669_v63 = vsub.f32 1.0, %v1668_v17  ;;  %v1676_v60 = vand.u32 2147483647, %v6148_v56  ;;  %v1600_v19 = vadd.f32 %v6157_v28, %v1599_v32  ;;  %vm6206_vm11 = vmor %vm1601_vm4, %vm1602_vm8 }
 0x262   :  { %4330 = vpow2.f32 %v4005_v57  ;;  %v1632_v35 = vmul.f32 %v4317_v39, %v1631_v6  ;;  %vm1635_vm10 = vweird.f32 %v4317_v39  ;;  %v1589_v16 = vsel %vm6194_vm9, %v6106_v44, %v1585_v31 }
 0x263   :  { %v1605_v52 = vand.u32 2147483647, %v6128_v45  ;;  %v4325_v24 = vpop.eup %4324  ;;  %v1670_v17 = vmul.f32 %v4319_v58, %v1669_v63  ;;  %vm1673_vm12 = vweird.f32 %v4319_v58  ;;  %v1641_v57 = vor.u32 1.1754944e-38, %v1640_v15  ;;  %vm1636_vm14 = vmor %vm1634_vm7, %vm1635_vm10 }
 0x264   :  { %4332 = vpow2.f32 %v4007_v18  ;;  %v1633_v32 = vadd.f32 %v4317_v39, %v1632_v35  ;;  %v6210_v6 = vadd.f32 1.0, %v4325_v24  ;;  %vm1591_vm13 = vcmp.eq.f32.partialorder %v1590_v0, 8.507059e+37  ;;  %vm1674_vm0 = vmor %vm1672_vm5, %vm1673_vm12 }
 0x265   :  { %v1604_v44 = vsel %vm6206_vm11, %v6157_v28, %v1600_v19  ;;  %v4327_v31 = vpop.eup %4326  ;;  %v1679_v11 = vor.u32 1.1754944e-38, %v1678_v20  ;;  %v1671_v45 = vadd.f32 %v4319_v58, %v1670_v17  ;;  %vm1677_vm15 = vcmp.eq.f32.partialorder %v1676_v60, 8.507059e+37 }
 0x266   :  { %v1594_v63 = vsel %vm1591_vm13, %v6113_v59, %v1589_v16  ;;  %v1637_v24 = vsel %vm1636_vm14, %v4317_v39, %v1633_v32  ;;  %4334 = vrcp.f32 %v6210_v6  ;;  %vm1606_vm1 = vcmp.eq.f32.partialorder %v1605_v52, 8.507059e+37 }
 0x267   :  { %v4329_v15 = vpop.eup %4328  ;;  %v1619_v18 = vmul.f32 %v4323_v33, %v1594_v63  ;;  %v1642_v20 = vsel %vm6183_vm6, %v1641_v57, %v1637_v24  ;;  %v1675_v0 = vsel %vm1674_vm0, %v4319_v58, %v1671_v45  ;;  %v6224_v51 = vadd.f32 1.0, %v4327_v31  ;;  %v1478_v33 = vpop.f32.mrf.mxu2 }
 0x268   :  { %v4331_v28 = vpop.eup %4330  ;;  %v1609_v60 = vsel %vm1606_vm1, %v6163_v46, %v1604_v44  ;;  %v1680_v19 = vsel %vm1677_vm15, %v1679_v11, %v1675_v0  ;;  %v1739_v59 = vmul.f32 %v4321_v55, %v1642_v20  ;;  %v1479_v46 = vadd.f32 %v1478_v33, %v7937_v5 }
 0x269   :  { %v6227_v35 = vadd.f32 1.0, %v4331_v28  ;;  %v1620_v56 = vmul.f32 %v4329_v15, %v1609_v60  ;;  %v1737_v39 = vmul.f32 %v1680_v19, %v5968_v7  ;;  %4336 = vrcp.f32 %v6224_v51 }
 0x26a   :  { %v4333_v16 = vpop.eup %4332  ;;  %v1747_v17 = vpack.c.bf16 %v1619_v18, %v1619_v18  ;;  %v1718_v7 = vand.u32 2147483648, %v6210_v6  ;;  %v1716_v28 = vand.u32 2147483647, %v6210_v6  ;;  %vm1712_vm3 = vweird.f32 %v6210_v6 }
 0x26b   :  { %4338 = vrcp.f32 %v6227_v35  ;;  %v6232_v12 = vadd.f32 %v1739_v59, %v1737_v39  ;;  %v6234_v58 = vadd.f32 1.0, %v4333_v16  ;;  %v1748_v55 = vpack.c.bf16 %v1620_v56, %v1620_v56 }
 0x26c   :  { %v4335_v52 = vpop.eup %4334  ;;  %4008 = vst [vmem:[%s7553_s7 + $0x20] sm:$0xf] %v1747_v17  ;;  %v1763_v31 = vunpack.c.l.b16 %v1747_v17  ;;  %v1719_v20 = vor.u32 1.1754944e-38, %v1718_v7  ;;  %v1653_v60 = vand.u32 2147483647, %v6224_v51  ;;  %v1693_v56 = vand.u32 2147483648, %v6227_v35 }
 0x26d   :  { %4340 = vtanh.f32 %v6232_v12  ;;  %v1708_v57 = vmul.f32 %v4335_v52, %v6210_v6  ;;  %4009 = vst [vmem:[%s7553_s7 + $0x28] sm:$0xf] %v1748_v55  ;;  %v1764_v11 = vunpack.c.l.b16 %v1748_v55  ;;  %vm1713_vm2 = vweird.f32 %v4335_v52 }
 0x26e   :  { %4342 = vrcp.f32 %v6234_v58  ;;  %v1655_v16 = vand.u32 2147483648, %v6224_v51  ;;  %vm6257_vm4 = vmor %vm1712_vm3, %vm1713_vm2  ;;  %v1691_v17 = vand.u32 2147483647, %v6227_v35  ;;  %vm1717_vm6 = vcmp.eq.f32.partialorder %v1716_v28, 8.507059e+37 }
 0x26f   :  { %v4337_v32 = vpop.eup %4336  ;;  %v1709_v44 = vsub.f32 1.0, %v1708_v57  ;;  %4344 = vtanh.f32 %v1479_v46  ;;  %v1765_v18 = vpack.c.b16 %v1764_v11, %v1763_v31  ;;  %vm1687_vm8 = vweird.f32 %v6227_v35 }
 0x270   :  { %v1645_v63 = vmul.f32 %v4337_v32, %v6224_v51  ;;  %vm1650_vm5 = vweird.f32 %v4337_v32  ;;  %vm1649_vm9 = vweird.f32 %v6224_v51  ;;  %vm1654_vm12 = vcmp.eq.f32.partialorder %v1653_v60, 8.507059e+37 }
 0x271   :  { %v4339_v45 = vpop.eup %4338  ;;  %v1710_v15 = vmul.f32 %v4335_v52, %v1709_v44  ;;  %1775 = vmatmul.bf16.vlgmr.msra.gmra.mxu0 %v1765_v18  ;;  %1789 = vmatmul.bf16.vlgmr.msra.gmra.mxu1 %v1765_v18  ;;  %vm1651_vm10 = vmor %vm1649_vm9, %vm1650_vm5  ;;  %vm1692_vm13 = vcmp.eq.f32.partialorder %v1691_v17, 8.507059e+37  ;;  %vm1727_vm15 = vweird.f32 %v6234_v58  ;;  %v1731_v60 = vand.u32 2147483647, %v6234_v58 }
 0x272   :  { %v1683_v24 = vmul.f32 %v4339_v45, %v6227_v35  ;;  %v1646_v0 = vsub.f32 1.0, %v1645_v63  ;;  %vm1688_vm7 = vweird.f32 %v4339_v45  ;;  %1803 = vmatmul.bf16.vlgmr.msra.gmra.mxu2 %v1765_v18  ;;  %1817 = vmatmul.bf16.vlgmr.msra.gmra.mxu3 %v1765_v18  ;;  %v1656_v63 = vor.u32 1.1754944e-38, %v1655_v16 }
 0x273   :  { %v4341_v19 = vpop.eup %4340  ;;  %v1711_v39 = vadd.f32 %v4335_v52, %v1710_v15  ;;  %2157 = vmatpush.bf16.msra.mxu0 %v4758_v37  ;;  %2171 = vmatpush.bf16.msra.mxu1 %v4760_v38  ;;  %vm1689_vm11 = vmor %vm1687_vm8, %vm1688_vm7  ;;  %v1694_v18 = vor.u32 1.1754944e-38, %v1693_v56  ;;  %vm1732_vm1 = vcmp.eq.f32.partialorder %v1731_v60, 8.507059e+37  ;;  %v7959_v60 = vld [vmem:[#allocation28_spill] sm:$0xff] }
 0x274   :  { %v1684_v59 = vsub.f32 1.0, %v1683_v24  ;;  %v6254_v33 = vpop.eup %4342  ;;  %v1647_v6 = vmul.f32 %v4337_v32, %v1646_v0  ;;  %2185 = vmatpush.bf16.msra.mxu2 %v4772_v41  ;;  %2199 = vmatpush.bf16.msra.mxu3 %v4774_v42 }
 0x275   :  { %v1723_v57 = vmul.f32 %v6254_v33, %v6234_v58  ;;  %v1715_v7 = vsel %vm6257_vm4, %v4335_v52, %v1711_v39  ;;  %v4345_v44 = vpop.eup %4344  ;;  %vm1728_vm14 = vweird.f32 %v6254_v33 }
 0x276   :  { %v1685_v55 = vmul.f32 %v4339_v45, %v1684_v59  ;;  %v1648_v31 = vadd.f32 %v4337_v32, %v1647_v6  ;;  %v1720_v11 = vsel %vm1717_vm6, %v1719_v20, %v1715_v7  ;;  %vm1729_vm0 = vmor %vm1727_vm15, %vm1728_vm14  ;;  %v7940_v7 = vld [vmem:[#allocation9_spill] sm:$0xff] }
 0x277   :  { %v1724_v15 = vsub.f32 1.0, %v1723_v57  ;;  %v1745_v24 = vmul.f32 %v4341_v19, %v1720_v11  ;;  %2158 = vmatpush.bf16.msra.mxu0 %v4800_v49  ;;  %2172 = vmatpush.bf16.msra.mxu1 %v4802_v50  ;;  %v7943_v11 = vld [vmem:[#allocation11_spill] sm:$0xff] }
 0x278   :  { %v1686_v52 = vadd.f32 %v4339_v45, %v1685_v55  ;;  %v1652_v28 = vsel %vm1651_vm10, %v4337_v32, %v1648_v31  ;;  %2186 = vmatpush.bf16.msra.mxu2 %v4812_v53  ;;  %2200 = vmatpush.bf16.msra.mxu3 %v4814_v54  ;;  %v7942_v31 = vld [vmem:[#allocation10_spill] sm:$0xff] }
 0x279   :  { %v1657_v35 = vsel %vm1654_vm12, %v1656_v63, %v1652_v28  ;;  %v1749_v51 = vpack.c.bf16 %v1745_v24, %v1745_v24  ;;  %v1725_v39 = vmul.f32 %v6254_v33, %v1724_v15  ;;  %v7944_v63 = vld [vmem:[#allocation12_spill] sm:$0xff]  ;;  %v7946_v15 = vld [vmem:[#allocation15_spill] sm:$0xff]  ;;  %v7949_v28 = vld [vmem:[#allocation18_spill] sm:$0xff] }
 0x27a   :  { %v1690_v0 = vsel %vm1689_vm11, %v4339_v45, %v1686_v52  ;;  %v1740_v59 = vmul.f32 %v4345_v44, %v1657_v35  ;;  %v7941_v44 = vld [vmem:[#allocation13_spill] sm:$0xff]  ;;  %v7945_v52 = vld [vmem:[#allocation14_spill] sm:$0xff]  ;;  %v7947_v24 = vld [vmem:[#allocation16_spill] sm:$0xff] }
 0x27b   :  { %v1695_v20 = vsel %vm1692_vm13, %v1694_v18, %v1690_v0  ;;  %4010 = vst [vmem:[%s7553_s7 + $0x54] sm:$0xf] %v1749_v51  ;;  %2159 = vmatpush.bf16.msra.mxu0 %v4836_v61  ;;  %v1726_v45 = vadd.f32 %v6254_v33, %v1725_v39  ;;  %2173 = vmatpush.bf16.msra.mxu1 %v4838_v62  ;;  %v7948_v18 = vld [vmem:[#allocation17_spill] sm:$0xff]  ;;  %v7950_v35 = vld [vmem:[#allocation19_spill] sm:$0xff]  ;;  %v7951_v0 = vld [vmem:[#allocation20_spill] sm:$0xff] }
 0x27c   :  { %v1738_v19 = vmul.f32 %v1695_v20, %v6006_v48  ;;  %2187 = vmatpush.bf16.msra.mxu2 %v4848_v1  ;;  %v1733_v48 = vand.u32 2147483648, %v6234_v58  ;;  %2201 = vmatpush.bf16.msra.mxu3 %v4850_v2  ;;  %v7953_v20 = vld [vmem:[#allocation22_spill] sm:$0xff]  ;;  %v7955_v39 = vld [vmem:[#allocation24_spill] sm:$0xff] }
 0x27d   :  { %v1730_v56 = vsel %vm1729_vm0, %v6254_v33, %v1726_v45  ;;  %v1825_v33 = vunpack.c.l.b16 %v1749_v51  ;;  %v7952_v51 = vld [vmem:[#allocation21_spill] sm:$0xff]  ;;  %v7957_v45 = vld [vmem:[#allocation26_spill] sm:$0xff] }
 0x27e   :  { %v6283_v32 = vadd.f32 %v1740_v59, %v1738_v19  ;;  %v1734_v16 = vor.u32 1.1754944e-38, %v1733_v48  ;;  %v7954_v59 = vld [vmem:[#allocation23_spill] sm:$0xff]  ;;  %v7956_v19 = vld [vmem:[#allocation25_spill] sm:$0xff] }
 0x27f   :  { %2160 = vmatpush.bf16.msra.mxu0 %v4872_v9  ;;  %2174 = vmatpush.bf16.msra.mxu1 %v4874_v10  ;;  %v7958_v48 = vld [vmem:[#allocation27_spill] sm:$0xff] }
 0x280   :  { %4346 = vtanh.f32 %v6283_v32  ;;  %2188 = vmatpush.bf16.msra.mxu2 %v4884_v13  ;;  %2202 = vmatpush.bf16.msra.mxu3 %v4886_v14  ;;  %v1735_v6 = vsel %vm1732_vm1, %v1734_v16, %v1730_v56  ;;  %v7960_v56 = vld [vmem:[#allocation29_spill] sm:$0xff]  ;;  %v7961_v16 = vld [vmem:[#allocation30_spill] sm:$0xff] }
 0x283   :  { %2161 = vmatpush.bf16.msra.mxu0 %v4908_v22  ;;  %2175 = vmatpush.bf16.msra.mxu1 %v4910_v23 }
 0x284   :  { %2189 = vmatpush.bf16.msra.mxu2 %v4920_v26  ;;  %2203 = vmatpush.bf16.msra.mxu3 %v4922_v27 }
 0x286   :  { %v4347_v46 = vpop.eup %4346 }
 0x287   :  { %v1746_v17 = vmul.f32 %v4347_v46, %v1735_v6  ;;  %2162 = vmatpush.bf16.msra.mxu0 %v4952_v34  ;;  %2176 = vmatpush.bf16.msra.mxu1 %v7865_v3  ;;  %v7962_v46 = vld [vmem:[#allocation31_spill] sm:$0xff]  ;;  %v7963_v6 = vld [vmem:[#allocation32_spill] sm:$0xff] }
 0x288   :  { %2190 = vmatpush.bf16.msra.mxu2 %v7866_v25  ;;  %2204 = vmatpush.bf16.msra.mxu3 %v7867_v21 }
 0x289   :  { %v1750_v58 = vpack.c.bf16 %v1746_v17, %v1746_v17  ;;  %v7964_v17 = vld [vmem:[#allocation33_spill] sm:$0xff] }
 0x28b   :  { %4011 = vst [vmem:[%s7553_s7 + $0x5c] sm:$0xf] %v1750_v58  ;;  %v1826_v55 = vunpack.c.l.b16 %v1750_v58  ;;  %2163 = vmatpush.bf16.msra.mxu0 %v7868_v29  ;;  %2177 = vmatpush.bf16.msra.mxu1 %v7869_v36  ;;  %v7965_v58 = vld [vmem:[#allocation34_spill] sm:$0xff] }
 0x28c   :  { %2191 = vmatpush.bf16.msra.mxu2 %v7870_v43  ;;  %2205 = vmatpush.bf16.msra.mxu3 %v7871_v47 }
 0x28d   :  { %v1827_v57 = vpack.c.b16 %v1826_v55, %v1825_v33  ;;  %v7966_v33 = vld [vmem:[#allocation35_spill] sm:$0xff]  ;;  %v7967_v55 = vld [vmem:[#allocation36_spill] sm:$0xff] }
 0x28f   :  { %1837 = vmatmul.bf16.vlgmr.msrb.gmra.mxu0 %v1827_v57  ;;  %1851 = vmatmul.bf16.vlgmr.msrb.gmra.mxu1 %v1827_v57 }
 0x290   :  { %1865 = vmatmul.bf16.vlgmr.msrb.gmra.mxu2 %v1827_v57  ;;  %1879 = vmatmul.bf16.vlgmr.msrb.gmra.mxu3 %v1827_v57  ;;  %v7968_v57 = vld [vmem:[#allocation37_spill] sm:$0xff] }
 0x291   :  { %2164 = vmatpush.bf16.msra.mxu0 %v7940_v7  ;;  %2178 = vmatpush.bf16.msra.mxu1 %v7942_v31 }
 0x292   :  { %2192 = vmatpush.bf16.msra.mxu2 %v7943_v11  ;;  %2206 = vmatpush.bf16.msra.mxu3 %v7944_v63 }
 0x295   :  { %2219 = vmatpush.bf16.msrb.mxu0 %v7941_v44  ;;  %2233 = vmatpush.bf16.msrb.mxu1 %v7945_v52 }
 0x296   :  { %2247 = vmatpush.bf16.msrb.mxu2 %v7946_v15  ;;  %2261 = vmatpush.bf16.msrb.mxu3 %v7947_v24 }
 0x299   :  { %2220 = vmatpush.bf16.msrb.mxu0 %v7948_v18  ;;  %2234 = vmatpush.bf16.msrb.mxu1 %v7949_v28 }
 0x29a   :  { %2248 = vmatpush.bf16.msrb.mxu2 %v7950_v35  ;;  %2262 = vmatpush.bf16.msrb.mxu3 %v7951_v0 }
 0x29d   :  { %2221 = vmatpush.bf16.msrb.mxu0 %v7952_v51  ;;  %2235 = vmatpush.bf16.msrb.mxu1 %v7953_v20 }
 0x29e   :  { %2249 = vmatpush.bf16.msrb.mxu2 %v7954_v59  ;;  %2263 = vmatpush.bf16.msrb.mxu3 %v7955_v39 }
 0x2a1   :  { %2222 = vmatpush.bf16.msrb.mxu0 %v7956_v19  ;;  %2236 = vmatpush.bf16.msrb.mxu1 %v7957_v45  ;;  %v7976_v45 = vld [vmem:[#allocation45_spill] sm:$0xff]  ;;  %v7977_v19 = vld [vmem:[#allocation46_spill] sm:$0xff] }
 0x2a2   :  { %2250 = vmatpush.bf16.msrb.mxu2 %v7958_v48  ;;  %2264 = vmatpush.bf16.msrb.mxu3 %v7959_v60  ;;  %v7969_v48 = vld [vmem:[#allocation38_spill] sm:$0xff]  ;;  %v7970_v60 = vld [vmem:[#allocation39_spill] sm:$0xff] }
 0x2a5   :  { %2223 = vmatpush.bf16.msrb.mxu0 %v7960_v56  ;;  %2237 = vmatpush.bf16.msrb.mxu1 %v7961_v16  ;;  %v7971_v56 = vld [vmem:[#allocation40_spill] sm:$0xff]  ;;  %v7972_v16 = vld [vmem:[#allocation41_spill] sm:$0xff] }
 0x2a6   :  { %2251 = vmatpush.bf16.msrb.mxu2 %v7962_v46  ;;  %2265 = vmatpush.bf16.msrb.mxu3 %v7963_v6  ;;  %v7973_v46 = vld [vmem:[#allocation42_spill] sm:$0xff]  ;;  %v7974_v6 = vld [vmem:[#allocation43_spill] sm:$0xff] }
 0x2a9   :  { %2224 = vmatpush.bf16.msrb.mxu0 %v7964_v17  ;;  %2238 = vmatpush.bf16.msrb.mxu1 %v7965_v58  ;;  %v7975_v17 = vld [vmem:[#allocation44_spill] sm:$0xff] }
 0x2aa   :  { %2252 = vmatpush.bf16.msrb.mxu2 %v7966_v33  ;;  %2266 = vmatpush.bf16.msrb.mxu3 %v7967_v55 }
 0x2ad   :  { %2225 = vmatpush.bf16.msrb.mxu0 %v7968_v57  ;;  %2239 = vmatpush.bf16.msrb.mxu1 %v7969_v48 }
 0x2ae   :  { %2253 = vmatpush.bf16.msrb.mxu2 %v7970_v60  ;;  %2267 = vmatpush.bf16.msrb.mxu3 %v7971_v56  ;;  %v7978_v56 = vld [vmem:[#allocation47_spill] sm:$0xff] }
 0x2b1   :  { %2226 = vmatpush.bf16.msrb.mxu0 %v7972_v16  ;;  %2240 = vmatpush.bf16.msrb.mxu1 %v7973_v46  ;;  %v7979_v46 = vld [vmem:[#allocation48_spill] sm:$0xff] }
 0x2b2   :  { %2254 = vmatpush.bf16.msrb.mxu2 %v7974_v6  ;;  %2268 = vmatpush.bf16.msrb.mxu3 %v7975_v17  ;;  %v7980_v6 = vld [vmem:[#allocation49_spill] sm:$0xff] }
 0x2ee   :  { %v1776_v58 = vpop.f32.mrf.mxu0  ;;  %v1790_v33 = vpop.f32.mrf.mxu1 }
 0x2ef   :  { %v1777_v55 = vadd.f32 %v1776_v58, %v7976_v45  ;;  %v1791_v57 = vadd.f32 %v1790_v33, %v7977_v19 }
 0x2f1   :  { %v4012_v39 = vmul.f32 -1.442695, %v1777_v55  ;;  %v4014_v48 = vmul.f32 -1.442695, %v1791_v57  ;;  %v7982_v57 = vld [vmem:[#allocation51_spill] sm:$0xff] }
 0x2f3   :  { %4348 = vpow2.f32 %v4012_v39  ;;  %v7981_v39 = vld [vmem:[#allocation50_spill] sm:$0xff] }
 0x2f4   :  { %4350 = vpow2.f32 %v4014_v48 }
 0x2f5   :  { %v1818_v60 = vpop.f32.mrf.mxu3  ;;  %v1804_v17 = vpop.f32.mrf.mxu2 }
 0x2f6   :  { %v1819_v59 = vadd.f32 %v1818_v60, %v7978_v56  ;;  %v1778_v16 = vpop.f32.mrf.mxu0  ;;  %v1792_v20 = vpop.f32.mrf.mxu1  ;;  %v1805_v48 = vadd.f32 %v1804_v17, %v7981_v39 }
 0x2f7   :  { %v1779_v51 = vadd.f32 %v1778_v16, %v7979_v46  ;;  %v1793_v0 = vadd.f32 %v1792_v20, %v7980_v6 }
 0x2f8   :  { %v4016_v35 = vmul.f32 -1.442695, %v1819_v59 }
 0x2f9   :  { %v4349_v28 = vpop.eup %4348  ;;  %v4013_v18 = vmul.f32 -1.442695, %v1779_v51  ;;  %v4015_v33 = vmul.f32 -1.442695, %v1793_v0 }
 0x2fa   :  { %v4351_v58 = vpop.eup %4350  ;;  %v1891_v45 = vadd.f32 1.0, %v4349_v28  ;;  %4352 = vpow2.f32 %v4016_v35 }
 0x2fb   :  { %v1929_v55 = vadd.f32 1.0, %v4351_v58  ;;  %4354 = vpow2.f32 %v4013_v18 }
 0x2fc   :  { %4356 = vrcp.f32 %v1891_v45  ;;  %v1902_v20 = vand.u32 2147483647, %v1891_v45  ;;  %vm1898_vm2 = vweird.f32 %v1891_v45  ;;  %v1904_v28 = vand.u32 2147483648, %v1891_v45 }
 0x2fd   :  { %4358 = vrcp.f32 %v1929_v55  ;;  %v1820_v60 = vpop.f32.mrf.mxu3  ;;  %v1806_v18 = vpop.f32.mrf.mxu2  ;;  %vm1936_vm3 = vweird.f32 %v1929_v55  ;;  %v1942_v17 = vand.u32 2147483648, %v1929_v55 }
 0x2fe   :  { %4360 = vpow2.f32 %v4015_v33  ;;  %v1821_v16 = vadd.f32 %v1820_v60, %v7982_v57  ;;  %vm6363_vm4 = vcmp.eq.f32.partialorder %v1902_v20, 8.507059e+37  ;;  %v1905_v15 = vor.u32 1.1754944e-38, %v1904_v28 }
 0x2ff   :  { %4362 = vtanh.f32 %v1805_v48 }
 0x300   :  { %v4353_v46 = vpop.eup %4352  ;;  %v4017_v0 = vmul.f32 -1.442695, %v1821_v16  ;;  %v7985_v16 = vld [vmem:[#allocation52_spill] sm:$0xff] }
 0x301   :  { %v4355_v6 = vpop.eup %4354  ;;  %v6358_v59 = vadd.f32 1.0, %v4353_v46  ;;  %v1940_v46 = vand.u32 2147483647, %v1929_v55  ;;  %v1807_v19 = vadd.f32 %v1806_v18, %v7985_v16 }
 0x302   :  { %v4357_v51 = vpop.eup %4356  ;;  %v6360_v35 = vadd.f32 1.0, %v4355_v6 }
 0x303   :  { %v4359_v58 = vpop.eup %4358  ;;  %v1894_v56 = vmul.f32 %v4357_v51, %v1891_v45  ;;  %4364 = vrcp.f32 %v6358_v59  ;;  %v1982_v6 = vand.u32 2147483648, %v6358_v59  ;;  %vm1899_vm7 = vweird.f32 %v4357_v51  ;;  %v7990_v45 = vld [vmem:[#allocation53_spill] sm:$0xff] }
 0x304   :  { %v4361_v33 = vpop.eup %4360  ;;  %v1932_v60 = vmul.f32 %v4359_v58, %v1929_v55  ;;  %4366 = vrcp.f32 %v6360_v35  ;;  %v1919_v52 = vand.u32 2147483648, %v6360_v35  ;;  %v1917_v63 = vand.u32 2147483647, %v6360_v35  ;;  %vm1900_vm9 = vmor %vm1898_vm2, %vm1899_vm7 }
 0x305   :  { %v1895_v48 = vsub.f32 1.0, %v1894_v56  ;;  %v6369_v39 = vadd.f32 1.0, %v4361_v33  ;;  %4368 = vpow2.f32 %v4017_v0  ;;  %v4363_v44 = vpop.eup %4362  ;;  %vm1937_vm5 = vweird.f32 %v4359_v58 }
 0x306   :  { %v1933_v24 = vsub.f32 1.0, %v1932_v60  ;;  %v1943_v56 = vor.u32 1.1754944e-38, %v1942_v17  ;;  %vm6375_vm6 = vcmp.eq.f32.partialorder %v1940_v46, 8.507059e+37  ;;  %v6381_v60 = vor.u32 1.1754944e-38, %v1982_v6  ;;  %vm1938_vm10 = vmor %vm1936_vm3, %vm1937_vm5 }
 0x307   :  { %v1896_v20 = vmul.f32 %v4357_v51, %v1895_v48  ;;  %4370 = vrcp.f32 %v6369_v39  ;;  %vm1913_vm8 = vweird.f32 %v6360_v35  ;;  %v1957_v46 = vand.u32 2147483648, %v6369_v39 }
 0x308   :  { %v1934_v11 = vmul.f32 %v4359_v58, %v1933_v24  ;;  %4372 = vtanh.f32 %v1807_v19  ;;  %v1920_v31 = vor.u32 1.1754944e-38, %v1919_v52  ;;  %vm1976_vm11 = vweird.f32 %v6358_v59 }
 0x309   :  { %v6379_v18 = vpop.eup %4364  ;;  %v1897_v28 = vadd.f32 %v4357_v51, %v1896_v20  ;;  %vm6393_vm12 = vcmp.eq.f32.partialorder %v1917_v63, 8.507059e+37  ;;  %vm1951_vm13 = vweird.f32 %v6369_v39  ;;  %v1958_v57 = vor.u32 1.1754944e-38, %v1957_v46 }
 0x30a   :  { %v4367_v16 = vpop.eup %4366  ;;  %v1935_v24 = vadd.f32 %v4359_v58, %v1934_v11  ;;  %v1972_v17 = vmul.f32 %v6379_v18, %v6358_v59  ;;  %v1955_v11 = vand.u32 2147483647, %v6369_v39  ;;  %vm1977_vm15 = vweird.f32 %v6379_v18 }
 0x30b   :  { %v1901_v6 = vsel %vm1900_vm9, %v4357_v51, %v1897_v28  ;;  %v1909_v19 = vmul.f32 %v4367_v16, %v6360_v35  ;;  %v4369_v47 = vpop.eup %4368  ;;  %v7991_v51 = vld [vmem:[#allocation54_spill] sm:$0xff]  ;;  %vm1914_vm14 = vweird.f32 %v4367_v16  ;;  %vm6427_vm2 = vmor %vm1976_vm11, %vm1977_vm15 }
 0x30c   :  { %v1838_v0 = vpop.f32.mrf.mxu0  ;;  %v1852_v48 = vpop.f32.mrf.mxu1  ;;  %v1906_v52 = vsel %vm6363_vm4, %v1905_v15, %v1901_v6  ;;  %v1939_v43 = vsel %vm1938_vm10, %v4359_v58, %v1935_v24  ;;  %v1973_v55 = vsub.f32 1.0, %v1972_v17  ;;  %v6405_v25 = vadd.f32 1.0, %v4369_v47  ;;  %vm1915_vm1 = vmor %vm1913_vm8, %vm1914_vm14 }
 0x30d   :  { %v1839_v7 = vadd.f32 %v1838_v0, %v7990_v45  ;;  %v1853_v28 = vadd.f32 %v1852_v48, %v7991_v51  ;;  %v4371_v36 = vpop.eup %4370  ;;  %v1944_v63 = vsel %vm6375_vm6, %v1943_v56, %v1939_v43  ;;  %v2003_v29 = vmul.f32 %v4363_v44, %v1906_v52 }
 0x30e   :  { %v1910_v21 = vsub.f32 1.0, %v1909_v19  ;;  %v2001_v0 = vmul.f32 %v1944_v63, %v6142_v8  ;;  %v1947_v45 = vmul.f32 %v4371_v36, %v6369_v39  ;;  %v1980_v15 = vand.u32 2147483647, %v6358_v59  ;;  %v4373_v58 = vpop.eup %4372 }
 0x30f   :  { %v1974_v24 = vmul.f32 %v6379_v18, %v1973_v55  ;;  %4374 = vrcp.f32 %v6405_v25  ;;  %v4018_v44 = vmul.f32 -1.442695, %v1839_v7  ;;  %v4020_v47 = vmul.f32 -1.442695, %v1853_v28  ;;  %v7992_v7 = vld [vmem:[#allocation58_spill] sm:$0xff] }
 0x310   :  { %v1911_v17 = vmul.f32 %v4367_v16, %v1910_v21  ;;  %v6412_v33 = vadd.f32 %v2003_v29, %v2001_v0  ;;  %v1948_v43 = vsub.f32 1.0, %v1947_v45  ;;  %vm1952_vm0 = vweird.f32 %v4371_v36 }
 0x311   :  { %v1975_v28 = vadd.f32 %v6379_v18, %v1974_v24  ;;  %vm1953_vm3 = vmor %vm1951_vm13, %vm1952_vm0  ;;  %vm1956_vm4 = vcmp.eq.f32.partialorder %v1955_v11, 8.507059e+37  ;;  %vm1981_vm7 = vcmp.eq.f32.partialorder %v1980_v15, 8.507059e+37  ;;  %vm1991_vm6 = vweird.f32 %v6405_v25 }
 0x312   :  { %v1912_v8 = vadd.f32 %v4367_v16, %v1911_v17  ;;  %4376 = vtanh.f32 %v6412_v33  ;;  %v1949_v21 = vmul.f32 %v4371_v36, %v1948_v43 }
 0x313   :  { %v1866_v56 = vpop.f32.mrf.mxu2  ;;  %v1880_v48 = vpop.f32.mrf.mxu3  ;;  %4378 = vpow2.f32 %v4018_v44  ;;  %v1979_v44 = vsel %vm6427_vm2, %v6379_v18, %v1975_v28  ;;  %v1997_v28 = vand.u32 2147483648, %v6405_v25 }
 0x314   :  { %v1881_v46 = vadd.f32 %v1880_v48, %v7926_v40  ;;  %v1840_v6 = vpop.f32.mrf.mxu0  ;;  %v1854_v19 = vpop.f32.mrf.mxu1  ;;  %v1916_v52 = vsel %vm1915_vm1, %v4367_v16, %v1912_v8  ;;  %v1950_v0 = vadd.f32 %v4371_v36, %v1949_v21  ;;  %4380 = vpow2.f32 %v4020_v47  ;;  %v7995_v16 = vld [vmem:[#allocation55_spill] sm:$0xff] }
 0x315   :  { %v1841_v29 = vadd.f32 %v1840_v6, %v7927_v4  ;;  %v1855_v45 = vadd.f32 %v1854_v19, %v7992_v7  ;;  %v1921_v35 = vsel %vm6393_vm12, %v1920_v31, %v1916_v52  ;;  %v6433_v43 = vpop.eup %4374  ;;  %v1867_v24 = vadd.f32 %v1866_v56, %v7995_v16 }
 0x316   :  { %v4022_v55 = vmul.f32 -1.442695, %v1881_v46  ;;  %v1954_v48 = vsel %vm1953_vm3, %v4371_v36, %v1950_v0  ;;  %v2004_v20 = vmul.f32 %v4373_v58, %v1921_v35  ;;  %v1987_v31 = vmul.f32 %v6433_v43, %v6405_v25 }
 0x317   :  { %v4019_v17 = vmul.f32 -1.442695, %v1841_v29  ;;  %v4021_v59 = vmul.f32 -1.442695, %v1855_v45  ;;  %v1959_v47 = vsel %vm1956_vm4, %v1958_v57, %v1954_v48  ;;  %v1984_v6 = vsel %vm1981_vm7, %v6381_v60, %v1979_v44 }
 0x318   :  { %4382 = vpow2.f32 %v4022_v55  ;;  %v4377_v8 = vpop.eup %4376  ;;  %v2002_v39 = vmul.f32 %v1959_v47, %v6177_v30  ;;  %v1988_v11 = vsub.f32 1.0, %v1987_v31  ;;  %v7997_v30 = vld [vmem:[#allocation62_spill] sm:$0xff]  ;;  %vm1992_vm5 = vweird.f32 %v6433_v43 }
 0x319   :  { %4384 = vpow2.f32 %v4019_v17  ;;  %v4379_v19 = vpop.eup %4378  ;;  %v2009_v18 = vmul.f32 %v4377_v8, %v1984_v6  ;;  %v1995_v0 = vand.u32 2147483647, %v6405_v25  ;;  %vm6487_vm8 = vmor %vm1991_vm6, %vm1992_vm5 }
 0x31a   :  { %4386 = vpow2.f32 %v4021_v59  ;;  %v4381_v58 = vpop.eup %4380  ;;  %v6447_v21 = vadd.f32 %v2004_v20, %v2002_v39  ;;  %v6449_v29 = vadd.f32 1.0, %v4379_v19  ;;  %v1989_v60 = vmul.f32 %v6433_v43, %v1988_v11 }
 0x31b   :  { %v1868_v56 = vpop.f32.mrf.mxu2  ;;  %v1882_v46 = vpop.f32.mrf.mxu3  ;;  %4388 = vtanh.f32 %v1867_v24  ;;  %v6451_v57 = vadd.f32 1.0, %v4381_v58  ;;  %v6454_v45 = vpack.c.bf16 %v2009_v18, %v2009_v18  ;;  %vm1996_vm9 = vcmp.eq.f32.partialorder %v1995_v0, 8.507059e+37 }
 0x31c   :  { %v1869_v36 = vadd.f32 %v1868_v56, %v7937_v5  ;;  %7996 = vst [vmem:[#allocation2_spill] sm:$0xff] %v6447_v21  ;;  %v1883_v15 = vadd.f32 %v1882_v46, %v7997_v30  ;;  %v2028_v17 = vand.u32 2147483647, %v6449_v29  ;;  %v2030_v31 = vand.u32 2147483648, %v6449_v29 }
 0x31d   :  { %4024 = vst [vmem:[%s7553_s7 + $0x30] sm:$0xf] %v6454_v45  ;;  %v2068_v20 = vand.u32 2147483648, %v6451_v57  ;;  %v1990_v47 = vadd.f32 %v6433_v43, %v1989_v60  ;;  %v2066_v39 = vand.u32 2147483647, %v6451_v57  ;;  %v1998_v46 = vor.u32 1.1754944e-38, %v1997_v28 }
 0x31e   :  { %4390 = vtanh.f32 %v1869_v36  ;;  %v4383_v52 = vpop.eup %4382  ;;  %v4023_v44 = vmul.f32 -1.442695, %v1883_v15  ;;  %vm2062_vm10 = vweird.f32 %v6451_v57  ;;  %vm2024_vm11 = vweird.f32 %v6449_v29 }
 0x31f   :  { %4392 = vtanh.f32 %v6447_v21  ;;  %v4385_v55 = vpop.eup %4384  ;;  %v6466_v35 = vadd.f32 1.0, %v4383_v52  ;;  %v1994_v25 = vsel %vm6487_vm8, %v6433_v43, %v1990_v47  ;;  %v2069_v18 = vor.u32 1.1754944e-38, %v2068_v20 }
 0x320   :  { %4394 = vrcp.f32 %v6449_v29  ;;  %v4387_v63 = vpop.eup %4386  ;;  %v6470_v24 = vadd.f32 1.0, %v4385_v55  ;;  %vm6498_vm12 = vcmp.eq.f32.partialorder %v2028_v17, 8.507059e+37  ;;  %v2031_v15 = vor.u32 1.1754944e-38, %v2030_v31 }
 0x321   :  { %4396 = vrcp.f32 %v6451_v57  ;;  %v6472_v59 = vadd.f32 1.0, %v4387_v63  ;;  %v6474_v48 = vpop.eup %4388  ;;  %vm6503_vm13 = vcmp.eq.f32.partialorder %v2066_v39, 8.507059e+37  ;;  %v1999_v28 = vsel %vm1996_vm9, %v1998_v46, %v1994_v25 }
 0x322   :  { %4398 = vrcp.f32 %v6466_v35  ;;  %vm2039_vm14 = vweird.f32 %v6470_v24  ;;  %v2043_v0 = vand.u32 2147483647, %v6470_v24  ;;  %v2045_v47 = vand.u32 2147483648, %v6470_v24 }
 0x323   :  { %4400 = vrcp.f32 %v6470_v24  ;;  %v2083_v55 = vand.u32 2147483648, %v6472_v59  ;;  %v2081_v39 = vand.u32 2147483647, %v6472_v59  ;;  %vm2077_vm7 = vweird.f32 %v6472_v59 }
 0x324   :  { %v6480_v8 = vpop.eup %4390  ;;  %4402 = vrcp.f32 %v6472_v59  ;;  %v2046_v58 = vor.u32 1.1754944e-38, %v2045_v47  ;;  %vm2044_vm8 = vcmp.eq.f32.partialorder %v2043_v0, 8.507059e+37 }
 0x325   :  { %v4393_v11 = vpop.eup %4392  ;;  %4404 = vpow2.f32 %v4023_v44  ;;  %vm2082_vm9 = vcmp.eq.f32.partialorder %v2081_v39, 8.507059e+37 }
 0x326   :  { %v4395_v6 = vpop.eup %4394  ;;  %v2010_v17 = vmul.f32 %v4393_v11, %v1999_v28 }
 0x327   :  { %v4397_v19 = vpop.eup %4396  ;;  %v2020_v36 = vmul.f32 %v4395_v6, %v6449_v29  ;;  %vm2025_vm15 = vweird.f32 %v4395_v6 }
 0x328   :  { %v2058_v52 = vmul.f32 %v4397_v19, %v6451_v57  ;;  %v6508_v63 = vpop.eup %4398  ;;  %v2138_v25 = vpack.c.bf16 %v2010_v17, %v2010_v17  ;;  %vm2063_vm0 = vweird.f32 %v4397_v19  ;;  %vm2026_vm1 = vmor %vm2024_vm11, %vm2025_vm15  ;;  %vm2102_vm11 = vweird.f32 %v6466_v35 }
 0x329   :  { %v2021_v43 = vsub.f32 1.0, %v2020_v36  ;;  %v4401_v44 = vpop.eup %4400  ;;  %v2098_v31 = vmul.f32 %v6508_v63, %v6466_v35  ;;  %vm2064_vm3 = vmor %vm2062_vm10, %vm2063_vm0  ;;  %vm2103_vm10 = vweird.f32 %v6508_v63 }
 0x32a   :  { %v2059_v20 = vsub.f32 1.0, %v2058_v52  ;;  %v4403_v56 = vpop.eup %4402  ;;  %v2035_v46 = vmul.f32 %v4401_v44, %v6470_v24  ;;  %4025 = vst [vmem:[%s7553_s7 + $0x38] sm:$0xf] %v2138_v25  ;;  %v2154_v21 = vunpack.c.l.b16 %v2138_v25  ;;  %vm2040_vm2 = vweird.f32 %v4401_v44 }
 0x32b   :  { %v2022_v5 = vmul.f32 %v4395_v6, %v2021_v43  ;;  %v4405_v36 = vpop.eup %4404  ;;  %v2099_v7 = vsub.f32 1.0, %v2098_v31  ;;  %v2073_v11 = vmul.f32 %v4403_v56, %v6472_v59  ;;  %vm2078_vm4 = vweird.f32 %v4403_v56  ;;  %vm2041_vm5 = vmor %vm2039_vm14, %vm2040_vm2 }
 0x32c   :  { %v2060_v30 = vmul.f32 %v4397_v19, %v2059_v20  ;;  %v2036_v28 = vsub.f32 1.0, %v2035_v46  ;;  %v6518_v16 = vadd.f32 1.0, %v4405_v36  ;;  %v2153_v20 = vunpack.c.l.b16 %v6454_v45  ;;  %vm2079_vm6 = vmor %vm2077_vm7, %vm2078_vm4 }
 0x32d   :  { %v2023_v52 = vadd.f32 %v4395_v6, %v2022_v5  ;;  %v2074_v17 = vsub.f32 1.0, %v2073_v11  ;;  %v2100_v29 = vmul.f32 %v6508_v63, %v2099_v7  ;;  %v2108_v7 = vand.u32 2147483648, %v6466_v35 }
 0x32e   :  { %v2061_v43 = vadd.f32 %v4397_v19, %v2060_v30  ;;  %v2037_v31 = vmul.f32 %v4401_v44, %v2036_v28  ;;  %4406 = vrcp.f32 %v6518_v16  ;;  %v2155_v57 = vpack.c.b16 %v2154_v21, %v2153_v20 }
 0x32f   :  { %v2027_v5 = vsel %vm2026_vm1, %v4395_v6, %v2023_v52  ;;  %v2075_v36 = vmul.f32 %v4403_v56, %v2074_v17  ;;  %v2101_v47 = vadd.f32 %v6508_v63, %v2100_v29  ;;  %v2109_v52 = vor.u32 1.1754944e-38, %v2108_v7  ;;  %v8009_v7 = vld [vmem:[#allocation6_spill] sm:$0xff] }
 0x330   :  { %v2032_v46 = vsel %vm6498_vm12, %v2031_v15, %v2027_v5  ;;  %v2065_v25 = vsel %vm2064_vm3, %v4397_v19, %v2061_v43  ;;  %v2038_v11 = vadd.f32 %v4401_v44, %v2037_v31  ;;  %v2084_v15 = vor.u32 1.1754944e-38, %v2083_v55  ;;  %2165 = vmatmul.bf16.vlgmr.msra.gmra.mxu0 %v2155_v57  ;;  %2179 = vmatmul.bf16.vlgmr.msra.gmra.mxu1 %v2155_v57  ;;  %vm6556_vm12 = vmor %vm2102_vm11, %vm2103_vm10 }
 0x331   :  { %v2070_v30 = vsel %vm6503_vm13, %v2069_v18, %v2065_v25  ;;  %v2129_v45 = vmul.f32 %v6474_v48, %v2032_v46  ;;  %v2076_v19 = vadd.f32 %v4403_v56, %v2075_v36  ;;  %2193 = vmatmul.bf16.vlgmr.msra.gmra.mxu2 %v2155_v57  ;;  %2207 = vmatmul.bf16.vlgmr.msra.gmra.mxu3 %v2155_v57  ;;  %v2121_v43 = vand.u32 2147483647, %v6518_v16 }
 0x332   :  { %v2127_v6 = vmul.f32 %v2070_v30, %v6232_v12  ;;  %v2042_v18 = vsel %vm2041_vm5, %v4401_v44, %v2038_v11  ;;  %2541 = vmatpush.bf16.msra.mxu0 %v4758_v37  ;;  %2555 = vmatpush.bf16.msra.mxu1 %v4760_v38  ;;  %vm2117_vm15 = vweird.f32 %v6518_v16  ;;  %v8021_v44 = vld [vmem:[#allocation18_spill] sm:$0xff] }
 0x333   :  { %v2047_v12 = vsel %vm2044_vm8, %v2046_v58, %v2042_v18  ;;  %v2080_v48 = vsel %vm2079_vm6, %v4403_v56, %v2076_v19  ;;  %2569 = vmatpush.bf16.msra.mxu2 %v4772_v41  ;;  %2583 = vmatpush.bf16.msra.mxu3 %v4774_v42  ;;  %vm2122_vm1 = vcmp.eq.f32.partialorder %v2121_v43, 8.507059e+37  ;;  %v8007_v58 = vld [vmem:[#allocation4_spill] sm:$0xff]  ;;  %v8008_v19 = vld [vmem:[#allocation5_spill] sm:$0xff] }
 0x334   :  { %v6542_v21 = vadd.f32 %v2129_v45, %v2127_v6  ;;  %v4407_v24 = vpop.eup %4406  ;;  %v2085_v59 = vsel %vm2082_vm9, %v2084_v15, %v2080_v48  ;;  %v2130_v60 = vmul.f32 %v6480_v8, %v2047_v12  ;;  %v2106_v8 = vand.u32 2147483647, %v6466_v35  ;;  %v8006_v6 = vld [vmem:[#allocation3_spill] sm:$0xff]  ;;  %v8011_v18 = vld [vmem:[#allocation8_spill] sm:$0xff]  ;;  %v8012_v12 = vld [vmem:[#allocation9_spill] sm:$0xff] }
 0x335   :  { %v2128_v55 = vmul.f32 %v2085_v59, %v6283_v32  ;;  %v2113_v0 = vmul.f32 %v4407_v24, %v6518_v16  ;;  %v2105_v32 = vsel %vm6556_vm12, %v6508_v63, %v2101_v47  ;;  %vm2118_vm13 = vweird.f32 %v4407_v24  ;;  %v8010_v15 = vld [vmem:[#allocation7_spill] sm:$0xff]  ;;  %v8013_v48 = vld [vmem:[#allocation10_spill] sm:$0xff]  ;;  %v8015_v59 = vld [vmem:[#allocation12_spill] sm:$0xff] }
 0x336   :  { %4408 = vtanh.f32 %v6542_v21  ;;  %2542 = vmatpush.bf16.msra.mxu0 %v4800_v49  ;;  %2556 = vmatpush.bf16.msra.mxu1 %v4802_v50  ;;  %v2123_v35 = vand.u32 2147483648, %v6518_v16  ;;  %vm2107_vm14 = vcmp.eq.f32.partialorder %v2106_v8, 8.507059e+37  ;;  %vm2119_vm0 = vmor %vm2117_vm15, %vm2118_vm13  ;;  %v8017_v47 = vld [vmem:[#allocation14_spill] sm:$0xff]  ;;  %v8020_v8 = vld [vmem:[#allocation17_spill] sm:$0xff] }
 0x337   :  { %v6560_v39 = vadd.f32 %v2130_v60, %v2128_v55  ;;  %v2114_v56 = vsub.f32 1.0, %v2113_v0  ;;  %2570 = vmatpush.bf16.msra.mxu2 %v4812_v53  ;;  %2584 = vmatpush.bf16.msra.mxu3 %v4814_v54  ;;  %v2110_v63 = vsel %vm2107_vm14, %v2109_v52, %v2105_v32  ;;  %v8016_v60 = vld [vmem:[#allocation13_spill] sm:$0xff]  ;;  %v8018_v55 = vld [vmem:[#allocation15_spill] sm:$0xff]  ;;  %v8019_v0 = vld [vmem:[#allocation16_spill] sm:$0xff] }
 0x338   :  { %v2124_v31 = vor.u32 1.1754944e-38, %v2123_v35  ;;  %v8023_v52 = vld [vmem:[#allocation20_spill] sm:$0xff]  ;;  %v8024_v32 = vld [vmem:[#allocation21_spill] sm:$0xff]  ;;  %v8026_v35 = vld [vmem:[#allocation23_spill] sm:$0xff] }
 0x339   :  { %4410 = vtanh.f32 %v6560_v39  ;;  %v2115_v28 = vmul.f32 %v4407_v24, %v2114_v56  ;;  %v8022_v56 = vld [vmem:[#allocation19_spill] sm:$0xff]  ;;  %v8027_v43 = vld [vmem:[#allocation24_spill] sm:$0xff] }
 0x33a   :  { %2543 = vmatpush.bf16.msra.mxu0 %v4836_v61  ;;  %2557 = vmatpush.bf16.msra.mxu1 %v4838_v62 }
 0x33b   :  { %v2116_v20 = vadd.f32 %v4407_v24, %v2115_v28  ;;  %2571 = vmatpush.bf16.msra.mxu2 %v4848_v1  ;;  %2585 = vmatpush.bf16.msra.mxu3 %v4850_v2  ;;  %v8025_v28 = vld [vmem:[#allocation22_spill] sm:$0xff] }
 0x33c   :  { %v4409_v17 = vpop.eup %4408 }
 0x33d   :  { %v2135_v5 = vmul.f32 %v4409_v17, %v2110_v63  ;;  %v2120_v46 = vsel %vm2119_vm0, %v4407_v24, %v2116_v20  ;;  %v8014_v24 = vld [vmem:[#allocation11_spill] sm:$0xff]  ;;  %v8028_v17 = vld [vmem:[#allocation25_spill] sm:$0xff]  ;;  %v8029_v63 = vld [vmem:[#allocation26_spill] sm:$0xff] }
 0x33e   :  { %v2125_v36 = vsel %vm2122_vm1, %v2124_v31, %v2120_v46  ;;  %2544 = vmatpush.bf16.msra.mxu0 %v4872_v9  ;;  %2558 = vmatpush.bf16.msra.mxu1 %v4874_v10  ;;  %v8030_v20 = vld [vmem:[#allocation27_spill] sm:$0xff]  ;;  %v8032_v31 = vld [vmem:[#allocation29_spill] sm:$0xff]  ;;  %v8033_v46 = vld [vmem:[#allocation30_spill] sm:$0xff] }
 0x33f   :  { %v2139_v25 = vpack.c.bf16 %v2135_v5, %v2135_v5  ;;  %v4411_v29 = vpop.eup %4410  ;;  %2572 = vmatpush.bf16.msra.mxu2 %v4884_v13  ;;  %2586 = vmatpush.bf16.msra.mxu3 %v4886_v14  ;;  %v8031_v5 = vld [vmem:[#allocation28_spill] sm:$0xff] }
 0x340   :  { %v2136_v30 = vmul.f32 %v4411_v29, %v2125_v36  ;;  %v8035_v29 = vld [vmem:[#allocation32_spill] sm:$0xff]  ;;  %v8036_v36 = vld [vmem:[#allocation33_spill] sm:$0xff] }
 0x341   :  { %4026 = vst [vmem:[%s7553_s7 + $0x44] sm:$0xf] %v2139_v25  ;;  %v2215_v45 = vunpack.c.l.b16 %v2139_v25  ;;  %v8034_v25 = vld [vmem:[#allocation31_spill] sm:$0xff] }
 0x342   :  { %v2140_v16 = vpack.c.bf16 %v2136_v30, %v2136_v30  ;;  %2545 = vmatpush.bf16.msra.mxu0 %v4908_v22  ;;  %2559 = vmatpush.bf16.msra.mxu1 %v4910_v23  ;;  %v8037_v30 = vld [vmem:[#allocation34_spill] sm:$0xff] }
 0x343   :  { %2573 = vmatpush.bf16.msra.mxu2 %v4920_v26  ;;  %2587 = vmatpush.bf16.msra.mxu3 %v4922_v27 }
 0x344   :  { %4027 = vst [vmem:[%s7553_s7 + $0x4c] sm:$0xf] %v2140_v16  ;;  %v2216_v11 = vunpack.c.l.b16 %v2140_v16  ;;  %v8038_v16 = vld [vmem:[#allocation35_spill] sm:$0xff] }
 0x346   :  { %v2217_v57 = vpack.c.b16 %v2216_v11, %v2215_v45  ;;  %2546 = vmatpush.bf16.msra.mxu0 %v4952_v34  ;;  %2560 = vmatpush.bf16.msra.mxu1 %v7865_v3  ;;  %v8039_v45 = vld [vmem:[#allocation36_spill] sm:$0xff]  ;;  %v8040_v11 = vld [vmem:[#allocation37_spill] sm:$0xff] }
 0x347   :  { %2574 = vmatpush.bf16.msra.mxu2 %v8006_v6  ;;  %2588 = vmatpush.bf16.msra.mxu3 %v8007_v58 }
 0x348   :  { %2227 = vmatmul.bf16.vlgmr.msrb.gmra.mxu0 %v2217_v57  ;;  %2241 = vmatmul.bf16.vlgmr.msrb.gmra.mxu1 %v2217_v57 }
 0x349   :  { %2255 = vmatmul.bf16.vlgmr.msrb.gmra.mxu2 %v2217_v57  ;;  %2269 = vmatmul.bf16.vlgmr.msrb.gmra.mxu3 %v2217_v57  ;;  %v8041_v57 = vld [vmem:[#allocation38_spill] sm:$0xff] }
 0x34a   :  { %2547 = vmatpush.bf16.msra.mxu0 %v8008_v19  ;;  %2561 = vmatpush.bf16.msra.mxu1 %v8009_v7 }
 0x34b   :  { %2575 = vmatpush.bf16.msra.mxu2 %v8010_v15  ;;  %2589 = vmatpush.bf16.msra.mxu3 %v8011_v18 }
 0x34e   :  { %2548 = vmatpush.bf16.msra.mxu0 %v8012_v12  ;;  %2562 = vmatpush.bf16.msra.mxu1 %v8013_v48 }
 0x34f   :  { %2576 = vmatpush.bf16.msra.mxu2 %v8014_v24  ;;  %2590 = vmatpush.bf16.msra.mxu3 %v8015_v59 }
 0x352   :  { %2603 = vmatpush.bf16.msrb.mxu0 %v8016_v60  ;;  %2617 = vmatpush.bf16.msrb.mxu1 %v8017_v47 }
 0x353   :  { %2631 = vmatpush.bf16.msrb.mxu2 %v8018_v55  ;;  %2645 = vmatpush.bf16.msrb.mxu3 %v8019_v0 }
 0x356   :  { %2604 = vmatpush.bf16.msrb.mxu0 %v8020_v8  ;;  %2618 = vmatpush.bf16.msrb.mxu1 %v8021_v44 }
 0x357   :  { %2632 = vmatpush.bf16.msrb.mxu2 %v8022_v56  ;;  %2646 = vmatpush.bf16.msrb.mxu3 %v8023_v52 }
 0x35a   :  { %2605 = vmatpush.bf16.msrb.mxu0 %v8024_v32  ;;  %2619 = vmatpush.bf16.msrb.mxu1 %v8025_v28 }
 0x35b   :  { %2633 = vmatpush.bf16.msrb.mxu2 %v8026_v35  ;;  %2647 = vmatpush.bf16.msrb.mxu3 %v8027_v43 }
 0x35e   :  { %2606 = vmatpush.bf16.msrb.mxu0 %v8028_v17  ;;  %2620 = vmatpush.bf16.msrb.mxu1 %v8029_v63  ;;  %v8049_v63 = vld [vmem:[#allocation46_spill] sm:$0xff] }
 0x35f   :  { %2634 = vmatpush.bf16.msrb.mxu2 %v8030_v20  ;;  %2648 = vmatpush.bf16.msrb.mxu3 %v8031_v5  ;;  %v8042_v5 = vld [vmem:[#allocation39_spill] sm:$0xff]  ;;  %v8048_v20 = vld [vmem:[#allocation45_spill] sm:$0xff] }
 0x362   :  { %2607 = vmatpush.bf16.msrb.mxu0 %v8032_v31  ;;  %2621 = vmatpush.bf16.msrb.mxu1 %v8033_v46  ;;  %v8043_v31 = vld [vmem:[#allocation40_spill] sm:$0xff]  ;;  %v8044_v46 = vld [vmem:[#allocation41_spill] sm:$0xff] }
 0x363   :  { %2635 = vmatpush.bf16.msrb.mxu2 %v8034_v25  ;;  %2649 = vmatpush.bf16.msrb.mxu3 %v8035_v29  ;;  %v8045_v25 = vld [vmem:[#allocation42_spill] sm:$0xff]  ;;  %v8046_v29 = vld [vmem:[#allocation43_spill] sm:$0xff] }
 0x366   :  { %2608 = vmatpush.bf16.msrb.mxu0 %v8036_v36  ;;  %2622 = vmatpush.bf16.msrb.mxu1 %v8037_v30  ;;  %v8047_v36 = vld [vmem:[#allocation44_spill] sm:$0xff] }
 0x367   :  { %2636 = vmatpush.bf16.msrb.mxu2 %v8038_v16  ;;  %2650 = vmatpush.bf16.msrb.mxu3 %v8039_v45 }
 0x36a   :  { %2609 = vmatpush.bf16.msrb.mxu0 %v8040_v11  ;;  %2623 = vmatpush.bf16.msrb.mxu1 %v8041_v57 }
 0x36b   :  { %2637 = vmatpush.bf16.msrb.mxu2 %v8042_v5  ;;  %2651 = vmatpush.bf16.msrb.mxu3 %v8043_v31  ;;  %v8050_v31 = vld [vmem:[#allocation47_spill] sm:$0xff] }
 0x36e   :  { %2610 = vmatpush.bf16.msrb.mxu0 %v8044_v46  ;;  %2624 = vmatpush.bf16.msrb.mxu1 %v8045_v25  ;;  %v8051_v25 = vld [vmem:[#allocation48_spill] sm:$0xff] }
 0x36f   :  { %2638 = vmatpush.bf16.msrb.mxu2 %v8046_v29  ;;  %2652 = vmatpush.bf16.msrb.mxu3 %v8047_v36  ;;  %v8052_v29 = vld [vmem:[#allocation49_spill] sm:$0xff] }
 0x3ad   :  { %v2166_v30 = vpop.f32.mrf.mxu0  ;;  %v2180_v16 = vpop.f32.mrf.mxu1 }
 0x3ae   :  { %v2167_v45 = vadd.f32 %v2166_v30, %v8048_v20  ;;  %v2181_v11 = vadd.f32 %v2180_v16, %v8049_v63 }
 0x3b0   :  { %v4028_v17 = vmul.f32 -1.442695, %v2167_v45  ;;  %v4030_v57 = vmul.f32 -1.442695, %v2181_v11 }
 0x3b2   :  { %4412 = vpow2.f32 %v4028_v17 }
 0x3b3   :  { %4414 = vpow2.f32 %v4030_v57 }
 0x3b4   :  { %v2208_v5 = vpop.f32.mrf.mxu3  ;;  %v2194_v20 = vpop.f32.mrf.mxu2 }
 0x3b5   :  { %v2209_v43 = vadd.f32 %v2208_v5, %v8050_v31  ;;  %v2168_v46 = vpop.f32.mrf.mxu0  ;;  %v2182_v35 = vpop.f32.mrf.mxu1  ;;  %v8053_v5 = vld [vmem:[#allocation50_spill] sm:$0xff] }
 0x3b6   :  { %v2169_v28 = vadd.f32 %v2168_v46, %v8051_v25  ;;  %v2183_v32 = vadd.f32 %v2182_v35, %v8052_v29  ;;  %v2195_v11 = vadd.f32 %v2194_v20, %v8053_v5  ;;  %v8054_v35 = vld [vmem:[#allocation51_spill] sm:$0xff] }
 0x3b7   :  { %v4032_v36 = vmul.f32 -1.442695, %v2209_v43 }
 0x3b8   :  { %v4413_v52 = vpop.eup %4412  ;;  %v4029_v56 = vmul.f32 -1.442695, %v2169_v28  ;;  %v4031_v16 = vmul.f32 -1.442695, %v2183_v32 }
 0x3b9   :  { %v4415_v44 = vpop.eup %4414  ;;  %v2281_v30 = vadd.f32 1.0, %v4413_v52  ;;  %4416 = vpow2.f32 %v4032_v36 }
 0x3ba   :  { %v2319_v45 = vadd.f32 1.0, %v4415_v44  ;;  %4418 = vpow2.f32 %v4029_v56 }
 0x3bb   :  { %4420 = vrcp.f32 %v2281_v30  ;;  %v2292_v36 = vand.u32 2147483647, %v2281_v30  ;;  %v2294_v5 = vand.u32 2147483648, %v2281_v30  ;;  %vm2288_vm2 = vweird.f32 %v2281_v30 }
 0x3bc   :  { %4422 = vrcp.f32 %v2319_v45  ;;  %v2210_v17 = vpop.f32.mrf.mxu3  ;;  %v2196_v20 = vpop.f32.mrf.mxu2  ;;  %v2330_v31 = vand.u32 2147483647, %v2319_v45  ;;  %vm2326_vm3 = vweird.f32 %v2319_v45 }
 0x3bd   :  { %4424 = vpow2.f32 %v4031_v16  ;;  %v2211_v43 = vadd.f32 %v2210_v17, %v8054_v35  ;;  %vm6656_vm7 = vcmp.eq.f32.partialorder %v2292_v36, 8.507059e+37 }
 0x3be   :  { %4426 = vtanh.f32 %v2195_v11  ;;  %v8055_v11 = vld [vmem:[#allocation52_spill] sm:$0xff]  ;;  %vm6665_vm6 = vcmp.eq.f32.partialorder %v2330_v31, 8.507059e+37 }
 0x3bf   :  { %v4417_v57 = vpop.eup %4416  ;;  %v4033_v17 = vmul.f32 -1.442695, %v2211_v43  ;;  %v2197_v0 = vadd.f32 %v2196_v20, %v8055_v11  ;;  %v2295_v20 = vor.u32 1.1754944e-38, %v2294_v5 }
 0x3c0   :  { %v4419_v46 = vpop.eup %4418  ;;  %v6641_v25 = vadd.f32 1.0, %v4417_v57 }
 0x3c1   :  { %v4421_v28 = vpop.eup %4420  ;;  %v6644_v29 = vadd.f32 1.0, %v4419_v46  ;;  %v2332_v46 = vand.u32 2147483648, %v2319_v45 }
 0x3c2   :  { %v6646_v52 = vpop.eup %4422  ;;  %v2284_v32 = vmul.f32 %v4421_v28, %v2281_v30  ;;  %4428 = vrcp.f32 %v6641_v25  ;;  %vm2289_vm4 = vweird.f32 %v4421_v28 }
 0x3c3   :  { %v4425_v44 = vpop.eup %4424  ;;  %v2322_v56 = vmul.f32 %v6646_v52, %v2319_v45  ;;  %4430 = vrcp.f32 %v6644_v29  ;;  %vm2327_vm5 = vweird.f32 %v6646_v52  ;;  %v2333_v59 = vor.u32 1.1754944e-38, %v2332_v46  ;;  %vm6670_vm8 = vmor %vm2288_vm2, %vm2289_vm4 }
 0x3c4   :  { %v2285_v16 = vsub.f32 1.0, %v2284_v32  ;;  %v6651_v57 = vadd.f32 1.0, %v4425_v44  ;;  %v4427_v44 = vpop.eup %4426  ;;  %vm6679_vm9 = vmor %vm2326_vm3, %vm2327_vm5  ;;  %vm2303_vm10 = vweird.f32 %v6644_v29  ;;  %v2307_v5 = vand.u32 2147483647, %v6644_v29 }
 0x3c5   :  { %v2323_v35 = vsub.f32 1.0, %v2322_v56  ;;  %v2228_v63 = vpop.f32.mrf.mxu0  ;;  %v2242_v43 = vpop.f32.mrf.mxu1  ;;  %vm2366_vm2 = vweird.f32 %v6641_v25 }
 0x3c6   :  { %v2286_v8 = vmul.f32 %v4421_v28, %v2285_v16  ;;  %4432 = vrcp.f32 %v6651_v57  ;;  %v8058_v16 = vld [vmem:[#allocation53_spill] sm:$0xff]  ;;  %vm2341_vm11 = vweird.f32 %v6651_v57  ;;  %vm2308_vm15 = vcmp.eq.f32.partialorder %v2307_v5, 8.507059e+37 }
 0x3c7   :  { %v2324_v55 = vmul.f32 %v6646_v52, %v2323_v35  ;;  %4434 = vpow2.f32 %v4033_v17  ;;  %v2229_v47 = vadd.f32 %v2228_v63, %v8058_v16  ;;  %v2243_v17 = vadd.f32 %v2242_v43, %v7991_v51 }
 0x3c8   :  { %v2287_v56 = vadd.f32 %v4421_v28, %v2286_v8  ;;  %v6662_v60 = vpop.eup %4428  ;;  %4436 = vtanh.f32 %v2197_v0  ;;  %v2347_v43 = vand.u32 2147483648, %v6651_v57  ;;  %v2372_v5 = vand.u32 2147483648, %v6641_v25 }
 0x3c9   :  { %v2325_v35 = vadd.f32 %v6646_v52, %v2324_v55  ;;  %v4431_v36 = vpop.eup %4430  ;;  %v4034_v63 = vmul.f32 -1.442695, %v2229_v47  ;;  %v2362_v45 = vmul.f32 %v6662_v60, %v6641_v25  ;;  %v2345_v55 = vand.u32 2147483647, %v6651_v57 }
 0x3ca   :  { %v2291_v31 = vsel %vm6670_vm8, %v4421_v28, %v2287_v56  ;;  %v2299_v30 = vmul.f32 %v4431_v36, %v6644_v29  ;;  %v2309_v56 = vand.u32 2147483648, %v6644_v29  ;;  %vm2304_vm12 = vweird.f32 %v4431_v36 }
 0x3cb   :  { %v2329_v46 = vsel %vm6679_vm9, %v6646_v52, %v2325_v35  ;;  %4438 = vpow2.f32 %v4034_v63  ;;  %v2296_v51 = vsel %vm6656_vm7, %v2295_v20, %v2291_v31  ;;  %v4036_v52 = vmul.f32 -1.442695, %v2243_v17  ;;  %vm2305_vm14 = vmor %vm2303_vm10, %vm2304_vm12 }
 0x3cc   :  { %v2270_v0 = vpop.f32.mrf.mxu3  ;;  %v4433_v47 = vpop.eup %4432  ;;  %v2300_v24 = vsub.f32 1.0, %v2299_v30  ;;  %v2334_v16 = vsel %vm6665_vm6, %v2333_v59, %v2329_v46  ;;  %v2363_v18 = vsub.f32 1.0, %v2362_v45  ;;  %v2310_v31 = vor.u32 1.1754944e-38, %v2309_v56  ;;  %v8065_v56 = vld [vmem:[#allocation2_spill] sm:$0xff] }
 0x3cd   :  { %v2337_v28 = vmul.f32 %v4433_v47, %v6651_v57  ;;  %v4435_v8 = vpop.eup %4434  ;;  %v2271_v35 = vadd.f32 %v2270_v0, %v7926_v40  ;;  %v2230_v48 = vpop.f32.mrf.mxu0  ;;  %4440 = vpow2.f32 %v4036_v52  ;;  %vm2342_vm13 = vweird.f32 %v4433_v47 }
 0x3ce   :  { %v2301_v30 = vmul.f32 %v4431_v36, %v2300_v24  ;;  %v4437_v12 = vpop.eup %4436  ;;  %v6703_v15 = vadd.f32 1.0, %v4435_v8  ;;  %v2391_v0 = vmul.f32 %v2334_v16, %v6412_v33  ;;  %v2393_v40 = vmul.f32 %v4427_v44, %v2296_v51  ;;  %vm2343_vm0 = vmor %vm2341_vm11, %vm2342_vm13  ;;  %v2256_v51 = vpop.f32.mrf.mxu2 }
 0x3cf   :  { %v2338_v63 = vsub.f32 1.0, %v2337_v28  ;;  %v4038_v7 = vmul.f32 -1.442695, %v2271_v35  ;;  %v2231_v59 = vadd.f32 %v2230_v48, %v7927_v4  ;;  %v2364_v45 = vmul.f32 %v6662_v60, %v2363_v18  ;;  %v2244_v29 = vpop.f32.mrf.mxu1 }
 0x3d0   :  { %v2302_v20 = vadd.f32 %v4431_v36, %v2301_v30  ;;  %4442 = vrcp.f32 %v6703_v15  ;;  %v2348_v24 = vor.u32 1.1754944e-38, %v2347_v43  ;;  %vm2346_vm1 = vcmp.eq.f32.partialorder %v2345_v55, 8.507059e+37  ;;  %v8066_v43 = vld [vmem:[#allocation55_spill] sm:$0xff] }
 0x3d1   :  { %v2339_v32 = vmul.f32 %v4433_v47, %v2338_v63  ;;  %v4439_v17 = vpop.eup %4438  ;;  %4444 = vpow2.f32 %v4038_v7  ;;  %v4035_v18 = vmul.f32 -1.442695, %v2231_v59  ;;  %v2257_v35 = vadd.f32 %v2256_v51, %v8066_v43  ;;  %v8067_v7 = vld [vmem:[#allocation58_spill] sm:$0xff] }
 0x3d2   :  { %v2306_v11 = vsel %vm2305_vm14, %v4431_v36, %v2302_v20  ;;  %v6710_v46 = vadd.f32 1.0, %v4439_v17  ;;  %v6716_v36 = vadd.f32 %v2393_v40, %v2391_v0  ;;  %v2245_v63 = vadd.f32 %v2244_v29, %v8067_v7  ;;  %v8071_v59 = vld [vmem:[#allocation62_spill] sm:$0xff] }
 0x3d3   :  { %v2340_v8 = vadd.f32 %v4433_v47, %v2339_v32  ;;  %v2311_v33 = vsel %vm2308_vm15, %v2310_v31, %v2306_v11  ;;  %v4441_v48 = vpop.eup %4440  ;;  %vm2367_vm3 = vweird.f32 %v6662_v60  ;;  %v8068_v40 = vand.u32 2147483647, %v6641_v25 }
 0x3d4   :  { %v2394_v16 = vmul.f32 %v4437_v12, %v2311_v33  ;;  %4446 = vrcp.f32 %v6710_v46  ;;  %v6720_v52 = vadd.f32 1.0, %v4441_v48  ;;  %v2365_v12 = vadd.f32 %v6662_v60, %v2364_v45  ;;  %vm6742_vm7 = vmor %vm2366_vm2, %vm2367_vm3 }
 0x3d5   :  { %v2344_v44 = vsel %vm2343_vm0, %v4433_v47, %v2340_v8  ;;  %v2272_v47 = vpop.f32.mrf.mxu3  ;;  %4448 = vpow2.f32 %v4035_v18  ;;  %vm6731_vm4 = vcmp.eq.f32.partialorder %v8068_v40, 8.507059e+37  ;;  %v2373_v17 = vor.u32 1.1754944e-38, %v2372_v5 }
 0x3d6   :  { %v2349_v28 = vsel %vm2346_vm1, %v2348_v24, %v2344_v44  ;;  %v6724_v55 = vpop.eup %4442  ;;  %4450 = vrcp.f32 %v6720_v52  ;;  %v4037_v0 = vmul.f32 -1.442695, %v2245_v63  ;;  %v2273_v11 = vadd.f32 %v2272_v47, %v8071_v59 }
 0x3d7   :  { %v2392_v57 = vmul.f32 %v2349_v28, %v8065_v56  ;;  %v2377_v20 = vmul.f32 %v6724_v55, %v6703_v15  ;;  %v4445_v31 = vpop.eup %4444  ;;  %4452 = vtanh.f32 %v6716_v36  ;;  %v2385_v24 = vand.u32 2147483647, %v6703_v15 }
 0x3d8   :  { %4454 = vtanh.f32 %v2257_v35  ;;  %v6747_v33 = vadd.f32 1.0, %v4445_v31  ;;  %v2369_v51 = vsel %vm6742_vm7, %v6662_v60, %v2365_v12  ;;  %v2387_v29 = vand.u32 2147483648, %v6703_v15 }
 0x3d9   :  { %v6735_v32 = vadd.f32 %v2394_v16, %v2392_v57  ;;  %v2378_v45 = vsub.f32 1.0, %v2377_v20  ;;  %vm2381_vm5 = vweird.f32 %v6703_v15  ;;  %v2418_v48 = vand.u32 2147483647, %v6710_v46 }
 0x3da   :  { %v4447_v8 = vpop.eup %4446  ;;  %vm2382_vm6 = vweird.f32 %v6724_v55  ;;  %v4039_v60 = vmul.f32 -1.442695, %v2273_v11  ;;  %vm6761_vm8 = vcmp.eq.f32.partialorder %v2385_v24, 8.507059e+37  ;;  %v2420_v35 = vand.u32 2147483648, %v6710_v46 }
 0x3db   :  { %4456 = vtanh.f32 %v6735_v32  ;;  %v2410_v44 = vmul.f32 %v4447_v8, %v6710_v46  ;;  %v2379_v16 = vmul.f32 %v6724_v55, %v2378_v45  ;;  %v4449_v5 = vpop.eup %4448  ;;  %v2388_v12 = vor.u32 1.1754944e-38, %v2387_v29  ;;  %vm6773_vm10 = vmor %vm2381_vm5, %vm2382_vm6 }
 0x3dc   :  { %4458 = vrcp.f32 %v6747_v33  ;;  %v4451_v18 = vpop.eup %4450  ;;  %v6766_v63 = vadd.f32 1.0, %v4449_v5  ;;  %vm2415_vm9 = vweird.f32 %v4447_v8  ;;  %vm2414_vm11 = vweird.f32 %v6710_v46 }
 0x3dd   :  { %v2411_v28 = vsub.f32 1.0, %v2410_v44  ;;  %4460 = vpow2.f32 %v4037_v0  ;;  %v2380_v56 = vadd.f32 %v6724_v55, %v2379_v16  ;;  %v4453_v47 = vpop.eup %4452  ;;  %v2448_v40 = vmul.f32 %v4451_v18, %v6720_v52  ;;  %vm2416_vm13 = vmor %vm2414_vm11, %vm2415_vm9 }
 0x3de   :  { %v4455_v31 = vpop.eup %4454  ;;  %vm6778_vm12 = vcmp.eq.f32.partialorder %v2418_v48, 8.507059e+37  ;;  %4462 = vrcp.f32 %v6766_v63  ;;  %v2374_v25 = vsel %vm6731_vm4, %v2373_v17, %v2369_v51  ;;  %v2458_v46 = vand.u32 2147483648, %v6720_v52 }
 0x3df   :  { %v2412_v20 = vmul.f32 %v4447_v8, %v2411_v28  ;;  %v2384_v15 = vsel %vm6773_vm10, %v6724_v55, %v2380_v56  ;;  %v2449_v24 = vsub.f32 1.0, %v2448_v40  ;;  %4464 = vpow2.f32 %v4039_v60 }
 0x3e0   :  { %v2421_v16 = vor.u32 1.1754944e-38, %v2420_v35  ;;  %v2456_v48 = vand.u32 2147483647, %v6720_v52  ;;  %v2399_v5 = vmul.f32 %v4453_v47, %v2374_v25  ;;  %vm2453_vm14 = vweird.f32 %v4451_v18 }
 0x3e1   :  { %v4457_v45 = vpop.eup %4456  ;;  %v2413_v29 = vadd.f32 %v4447_v8, %v2412_v20  ;;  %v2450_v30 = vmul.f32 %v4451_v18, %v2449_v24  ;;  %vm2452_vm15 = vweird.f32 %v6720_v52  ;;  %v2389_v56 = vsel %vm6761_vm8, %v2388_v12, %v2384_v15 }
 0x3e2   :  { %v6788_v44 = vpop.eup %4458  ;;  %v2400_v47 = vmul.f32 %v4457_v45, %v2389_v56  ;;  %v2527_v20 = vpack.c.bf16 %v2399_v5, %v2399_v5  ;;  %vm2454_vm0 = vmor %vm2452_vm15, %vm2453_vm14  ;;  %vm2457_vm1 = vcmp.eq.f32.partialorder %v2456_v48, 8.507059e+37  ;;  %v8080_v48 = vld [vmem:[#allocation61_spill] sm:$0xff]  ;;  %v2433_v5 = vand.u32 2147483647, %v6766_v63 }
 0x3e3   :  { %v4461_v28 = vpop.eup %4460  ;;  %v2417_v17 = vsel %vm2416_vm13, %v4447_v8, %v2413_v29  ;;  %v2488_v51 = vmul.f32 %v6788_v44, %v6747_v33  ;;  %v2451_v35 = vadd.f32 %v4451_v18, %v2450_v30  ;;  %v2459_v8 = vor.u32 1.1754944e-38, %v2458_v46  ;;  %v2258_v29 = vpop.f32.mrf.mxu2 }
 0x3e4   :  { %v2422_v55 = vsel %vm6778_vm12, %v2421_v16, %v2417_v17  ;;  %v6797_v60 = vadd.f32 1.0, %v4461_v28  ;;  %v4463_v0 = vpop.eup %4462  ;;  %4040 = vst [vmem:[%s7553_s7 + $0x40] sm:$0xf] %v2527_v20  ;;  %v2528_v16 = vpack.c.bf16 %v2400_v47, %v2400_v47  ;;  %v2435_v17 = vand.u32 2147483648, %v6766_v63 }
 0x3e5   :  { %v2489_v40 = vsub.f32 1.0, %v2488_v51  ;;  %v4465_v25 = vpop.eup %4464  ;;  %v2455_v24 = vsel %vm2454_vm0, %v4451_v18, %v2451_v35  ;;  %v2519_v52 = vmul.f32 %v4455_v31, %v2422_v55  ;;  %v2425_v11 = vmul.f32 %v4463_v0, %v6766_v63 }
 0x3e6   :  { %4466 = vrcp.f32 %v6797_v60  ;;  %v2460_v57 = vsel %vm2457_vm1, %v2459_v8, %v2455_v24  ;;  %v6807_v45 = vadd.f32 1.0, %v4465_v25  ;;  %v2498_v18 = vand.u32 2147483648, %v6747_v33  ;;  %4041 = vst [vmem:[%s7553_s7 + $0x48] sm:$0xf] %v2528_v16 }
 0x3e7   :  { %v2490_v12 = vmul.f32 %v6788_v44, %v2489_v40  ;;  %v2517_v15 = vmul.f32 %v2460_v57, %v6542_v21  ;;  %v2426_v46 = vsub.f32 1.0, %v2425_v11  ;;  %v2259_v31 = vadd.f32 %v2258_v29, %v8080_v48 }
 0x3e8   :  { %4468 = vrcp.f32 %v6807_v45  ;;  %vm2430_vm2 = vweird.f32 %v4463_v0  ;;  %vm2493_vm3 = vweird.f32 %v6788_v44  ;;  %v2537_v55 = vunpack.c.l.b16 %v2527_v20 }
 0x3e9   :  { %v6814_v28 = vadd.f32 %v2519_v52, %v2517_v15  ;;  %v2427_v30 = vmul.f32 %v4463_v0, %v2426_v46  ;;  %v2491_v51 = vadd.f32 %v6788_v44, %v2490_v12  ;;  %v2538_v56 = vunpack.c.l.b16 %v2528_v16 }
 0x3ea   :  { %vm2429_vm4 = vweird.f32 %v6766_v63  ;;  %vm2492_vm7 = vweird.f32 %v6747_v33  ;;  %v2496_v47 = vand.u32 2147483647, %v6747_v33  ;;  %v2499_v24 = vor.u32 1.1754944e-38, %v2498_v18 }
 0x3eb   :  { %4470 = vtanh.f32 %v6814_v28  ;;  %v2428_v40 = vadd.f32 %v4463_v0, %v2427_v30  ;;  %vm6827_vm5 = vmor %vm2429_vm4, %vm2430_vm2  ;;  %v2539_v25 = vpack.c.b16 %v2538_v56, %v2537_v55  ;;  %v2473_v29 = vand.u32 2147483648, %v6797_v60 }
 0x3ec   :  { %v4467_v21 = vpop.eup %4466  ;;  %4472 = vtanh.f32 %v2259_v31  ;;  %vm6831_vm6 = vmor %vm2492_vm7, %vm2493_vm3  ;;  %vm2434_vm8 = vcmp.eq.f32.partialorder %v2433_v5, 8.507059e+37  ;;  %v2436_v57 = vor.u32 1.1754944e-38, %v2435_v17  ;;  %v2471_v15 = vand.u32 2147483647, %v6797_v60 }
 0x3ed   :  { %v2463_v35 = vmul.f32 %v4467_v21, %v6797_v60  ;;  %v2432_v11 = vsel %vm6827_vm5, %v4463_v0, %v2428_v40  ;;  %v2495_v33 = vsel %vm6831_vm6, %v6788_v44, %v2491_v51  ;;  %2549 = vmatmul.bf16.vlgmr.msra.gmra.mxu0 %v2539_v25  ;;  %2563 = vmatmul.bf16.vlgmr.msra.gmra.mxu1 %v2539_v25  ;;  %vm2468_vm9 = vweird.f32 %v4467_v21 }
 0x3ee   :  { %v4469_v63 = vpop.eup %4468  ;;  %2577 = vmatmul.bf16.vlgmr.msra.gmra.mxu2 %v2539_v25  ;;  %2591 = vmatmul.bf16.vlgmr.msra.gmra.mxu3 %v2539_v25  ;;  %vm2497_vm10 = vcmp.eq.f32.partialorder %v2496_v47, 8.507059e+37  ;;  %v2437_v0 = vsel %vm2434_vm8, %v2436_v57, %v2432_v11  ;;  %vm2467_vm11 = vweird.f32 %v6797_v60  ;;  %v2474_v30 = vor.u32 1.1754944e-38, %v2473_v29  ;;  %v8085_v57 = vld [vmem:[#allocation6_spill] sm:$0xff] }
 0x3ef   :  { %v2464_v52 = vsub.f32 1.0, %v2463_v35  ;;  %v2503_v46 = vmul.f32 %v4469_v63, %v6807_v45  ;;  %2925 = vmatpush.bf16.msra.mxu0 %v4758_v37  ;;  %2939 = vmatpush.bf16.msra.mxu1 %v4760_v38  ;;  %v2500_v31 = vsel %vm2497_vm10, %v2499_v24, %v2495_v33  ;;  %vm2469_vm12 = vmor %vm2467_vm11, %vm2468_vm9  ;;  %vm2472_vm13 = vcmp.eq.f32.partialorder %v2471_v15, 8.507059e+37  ;;  %v8087_v15 = vld [vmem:[#allocation8_spill] sm:$0xff] }
 0x3f0   :  { %2953 = vmatpush.bf16.msra.mxu2 %v4772_v41  ;;  %2967 = vmatpush.bf16.msra.mxu3 %v4774_v42  ;;  %vm2508_vm14 = vweird.f32 %v4469_v63  ;;  %vm2507_vm15 = vweird.f32 %v6807_v45  ;;  %v2511_v8 = vand.u32 2147483647, %v6807_v45 }
 0x3f1   :  { %v2465_v12 = vmul.f32 %v4467_v21, %v2464_v52  ;;  %v4471_v44 = vpop.eup %4470  ;;  %v2504_v18 = vsub.f32 1.0, %v2503_v46  ;;  %vm2509_vm0 = vmor %vm2507_vm15, %vm2508_vm14  ;;  %v8088_v46 = vld [vmem:[#allocation9_spill] sm:$0xff] }
 0x3f2   :  { %v4473_v5 = vpop.eup %4472  ;;  %v2525_v17 = vmul.f32 %v4471_v44, %v2500_v31  ;;  %vm2512_vm1 = vcmp.eq.f32.partialorder %v2511_v8, 8.507059e+37  ;;  %v8090_v44 = vld [vmem:[#allocation11_spill] sm:$0xff]  ;;  %v8093_v31 = vld [vmem:[#allocation14_spill] sm:$0xff] }
 0x3f3   :  { %v2466_v16 = vadd.f32 %v4467_v21, %v2465_v12  ;;  %v2520_v55 = vmul.f32 %v4473_v5, %v2437_v0  ;;  %v2505_v35 = vmul.f32 %v4469_v63, %v2504_v18  ;;  %2926 = vmatpush.bf16.msra.mxu0 %v4800_v49  ;;  %2940 = vmatpush.bf16.msra.mxu1 %v4802_v50  ;;  %v8086_v12 = vld [vmem:[#allocation7_spill] sm:$0xff]  ;;  %v8089_v0 = vld [vmem:[#allocation10_spill] sm:$0xff]  ;;  %v8092_v18 = vld [vmem:[#allocation13_spill] sm:$0xff] }
 0x3f4   :  { %v2529_v40 = vpack.c.bf16 %v2525_v17, %v2525_v17  ;;  %2954 = vmatpush.bf16.msra.mxu2 %v4812_v53  ;;  %2968 = vmatpush.bf16.msra.mxu3 %v4814_v54  ;;  %v8094_v5 = vld [vmem:[#allocation15_spill] sm:$0xff]  ;;  %v8096_v17 = vld [vmem:[#allocation17_spill] sm:$0xff]  ;;  %v8105_v8 = vld [vmem:[#allocation26_spill] sm:$0xff] }
 0x3f5   :  { %v2470_v51 = vsel %vm2469_vm12, %v4467_v21, %v2466_v16  ;;  %v2506_v47 = vadd.f32 %v4469_v63, %v2505_v35  ;;  %v8091_v16 = vld [vmem:[#allocation12_spill] sm:$0xff]  ;;  %v8100_v35 = vld [vmem:[#allocation21_spill] sm:$0xff] }
 0x3f6   :  { %v2475_v56 = vsel %vm2472_vm13, %v2474_v30, %v2470_v51  ;;  %4042 = vst [vmem:[%s7553_s7 + $0x34] sm:$0xf] %v2529_v40  ;;  %v8095_v30 = vld [vmem:[#allocation16_spill] sm:$0xff]  ;;  %v8097_v51 = vld [vmem:[#allocation18_spill] sm:$0xff] }
 0x3f7   :  { %v2518_v60 = vmul.f32 %v2475_v56, %v6560_v39  ;;  %2927 = vmatpush.bf16.msra.mxu0 %v4836_v61  ;;  %2941 = vmatpush.bf16.msra.mxu1 %v4838_v62  ;;  %v2513_v39 = vand.u32 2147483648, %v6807_v45  ;;  %v2510_v25 = vsel %vm2509_vm0, %v4469_v63, %v2506_v47  ;;  %v2599_v63 = vunpack.c.l.b16 %v2529_v40  ;;  %v8099_v56 = vld [vmem:[#allocation20_spill] sm:$0xff]  ;;  %v8101_v40 = vld [vmem:[#allocation22_spill] sm:$0xff] }
 0x3f8   :  { %2955 = vmatpush.bf16.msra.mxu2 %v4848_v1  ;;  %2969 = vmatpush.bf16.msra.mxu3 %v4850_v2  ;;  %v8103_v47 = vld [vmem:[#allocation24_spill] sm:$0xff] }
 0x3f9   :  { %v6857_v21 = vadd.f32 %v2520_v55, %v2518_v60  ;;  %v2514_v20 = vor.u32 1.1754944e-38, %v2513_v39  ;;  %v8098_v55 = vld [vmem:[#allocation19_spill] sm:$0xff]  ;;  %v8104_v39 = vld [vmem:[#allocation25_spill] sm:$0xff] }
 0x3fa   :  { %v8102_v60 = vld [vmem:[#allocation23_spill] sm:$0xff] }
 0x3fb   :  { %4474 = vtanh.f32 %v6857_v21  ;;  %2928 = vmatpush.bf16.msra.mxu0 %v4872_v9  ;;  %2942 = vmatpush.bf16.msra.mxu1 %v4874_v10  ;;  %v2515_v52 = vsel %vm2512_vm1, %v2514_v20, %v2510_v25  ;;  %v8106_v25 = vld [vmem:[#allocation27_spill] sm:$0xff]  ;;  %v8107_v20 = vld [vmem:[#allocation28_spill] sm:$0xff] }
 0x3fc   :  { %2956 = vmatpush.bf16.msra.mxu2 %v4884_v13  ;;  %2970 = vmatpush.bf16.msra.mxu3 %v4886_v14 }
 0x3ff   :  { %2929 = vmatpush.bf16.msra.mxu0 %v4908_v22  ;;  %2943 = vmatpush.bf16.msra.mxu1 %v4910_v23 }
 0x400   :  { %2957 = vmatpush.bf16.msra.mxu2 %v4920_v26  ;;  %2971 = vmatpush.bf16.msra.mxu3 %v4922_v27 }
 0x401   :  { %v4475_v24 = vpop.eup %4474 }
 0x402   :  { %v2526_v11 = vmul.f32 %v4475_v24, %v2515_v52  ;;  %v8108_v24 = vld [vmem:[#allocation29_spill] sm:$0xff]  ;;  %v8109_v52 = vld [vmem:[#allocation30_spill] sm:$0xff] }
 0x403   :  { %2930 = vmatpush.bf16.msra.mxu0 %v4952_v34  ;;  %2944 = vmatpush.bf16.msra.mxu1 %v7865_v3 }
 0x404   :  { %v2530_v45 = vpack.c.bf16 %v2526_v11, %v2526_v11  ;;  %2958 = vmatpush.bf16.msra.mxu2 %v8006_v6  ;;  %2972 = vmatpush.bf16.msra.mxu3 %v8007_v58  ;;  %v8110_v11 = vld [vmem:[#allocation31_spill] sm:$0xff] }
 0x406   :  { %4043 = vst [vmem:[%s7553_s7 + $0x3c] sm:$0xf] %v2530_v45  ;;  %v2600_v33 = vunpack.c.l.b16 %v2530_v45  ;;  %v8111_v45 = vld [vmem:[#allocation32_spill] sm:$0xff] }
 0x407   :  { %2931 = vmatpush.bf16.msra.mxu0 %v8008_v19  ;;  %2945 = vmatpush.bf16.msra.mxu1 %v8085_v57 }
 0x408   :  { %v2601_v29 = vpack.c.b16 %v2600_v33, %v2599_v63  ;;  %2959 = vmatpush.bf16.msra.mxu2 %v8086_v12  ;;  %2973 = vmatpush.bf16.msra.mxu3 %v8087_v15  ;;  %v8112_v63 = vld [vmem:[#allocation33_spill] sm:$0xff]  ;;  %v8113_v33 = vld [vmem:[#allocation34_spill] sm:$0xff] }
 0x40a   :  { %2611 = vmatmul.bf16.vlgmr.msrb.gmra.mxu0 %v2601_v29  ;;  %2625 = vmatmul.bf16.vlgmr.msrb.gmra.mxu1 %v2601_v29 }
 0x40b   :  { %2639 = vmatmul.bf16.vlgmr.msrb.gmra.mxu2 %v2601_v29  ;;  %2653 = vmatmul.bf16.vlgmr.msrb.gmra.mxu3 %v2601_v29  ;;  %v8114_v29 = vld [vmem:[#allocation35_spill] sm:$0xff] }
 0x40c   :  { %2932 = vmatpush.bf16.msra.mxu0 %v8088_v46  ;;  %2946 = vmatpush.bf16.msra.mxu1 %v8089_v0 }
 0x40d   :  { %2960 = vmatpush.bf16.msra.mxu2 %v8090_v44  ;;  %2974 = vmatpush.bf16.msra.mxu3 %v8091_v16 }
 0x410   :  { %2987 = vmatpush.bf16.msrb.mxu0 %v8092_v18  ;;  %3001 = vmatpush.bf16.msrb.mxu1 %v8093_v31 }
 0x411   :  { %3015 = vmatpush.bf16.msrb.mxu2 %v8094_v5  ;;  %3029 = vmatpush.bf16.msrb.mxu3 %v8095_v30 }
 0x414   :  { %2988 = vmatpush.bf16.msrb.mxu0 %v8096_v17  ;;  %3002 = vmatpush.bf16.msrb.mxu1 %v8097_v51 }
 0x415   :  { %3016 = vmatpush.bf16.msrb.mxu2 %v8098_v55  ;;  %3030 = vmatpush.bf16.msrb.mxu3 %v8099_v56 }
 0x418   :  { %2989 = vmatpush.bf16.msrb.mxu0 %v8100_v35  ;;  %3003 = vmatpush.bf16.msrb.mxu1 %v8101_v40 }
 0x419   :  { %3017 = vmatpush.bf16.msrb.mxu2 %v8102_v60  ;;  %3031 = vmatpush.bf16.msrb.mxu3 %v8103_v47  ;;  %v8124_v47 = vld [vmem:[#allocation45_spill] sm:$0xff]  ;;  %v8125_v60 = vld [vmem:[#allocation46_spill] sm:$0xff] }
 0x41c   :  { %2990 = vmatpush.bf16.msrb.mxu0 %v8104_v39  ;;  %3004 = vmatpush.bf16.msrb.mxu1 %v8105_v8  ;;  %v8115_v39 = vld [vmem:[#allocation36_spill] sm:$0xff]  ;;  %v8116_v8 = vld [vmem:[#allocation37_spill] sm:$0xff] }
 0x41d   :  { %3018 = vmatpush.bf16.msrb.mxu2 %v8106_v25  ;;  %3032 = vmatpush.bf16.msrb.mxu3 %v8107_v20  ;;  %v8117_v25 = vld [vmem:[#allocation38_spill] sm:$0xff]  ;;  %v8118_v20 = vld [vmem:[#allocation39_spill] sm:$0xff] }
 0x420   :  { %2991 = vmatpush.bf16.msrb.mxu0 %v8108_v24  ;;  %3005 = vmatpush.bf16.msrb.mxu1 %v8109_v52  ;;  %v8119_v24 = vld [vmem:[#allocation40_spill] sm:$0xff]  ;;  %v8120_v52 = vld [vmem:[#allocation41_spill] sm:$0xff] }
 0x421   :  { %3019 = vmatpush.bf16.msrb.mxu2 %v8110_v11  ;;  %3033 = vmatpush.bf16.msrb.mxu3 %v8111_v45  ;;  %v8121_v11 = vld [vmem:[#allocation42_spill] sm:$0xff]  ;;  %v8122_v45 = vld [vmem:[#allocation43_spill] sm:$0xff] }
 0x424   :  { %2992 = vmatpush.bf16.msrb.mxu0 %v8112_v63  ;;  %3006 = vmatpush.bf16.msrb.mxu1 %v8113_v33  ;;  %v8123_v63 = vld [vmem:[#allocation44_spill] sm:$0xff] }
 0x425   :  { %3020 = vmatpush.bf16.msrb.mxu2 %v8114_v29  ;;  %3034 = vmatpush.bf16.msrb.mxu3 %v8115_v39 }
 0x428   :  { %2993 = vmatpush.bf16.msrb.mxu0 %v8116_v8  ;;  %3007 = vmatpush.bf16.msrb.mxu1 %v8117_v25 }
 0x429   :  { %3021 = vmatpush.bf16.msrb.mxu2 %v8118_v20  ;;  %3035 = vmatpush.bf16.msrb.mxu3 %v8119_v24  ;;  %v8126_v24 = vld [vmem:[#allocation47_spill] sm:$0xff] }
 0x42c   :  { %2994 = vmatpush.bf16.msrb.mxu0 %v8120_v52  ;;  %3008 = vmatpush.bf16.msrb.mxu1 %v8121_v11  ;;  %v8127_v11 = vld [vmem:[#allocation48_spill] sm:$0xff] }
 0x42d   :  { %3022 = vmatpush.bf16.msrb.mxu2 %v8122_v45  ;;  %3036 = vmatpush.bf16.msrb.mxu3 %v8123_v63  ;;  %v8128_v45 = vld [vmem:[#allocation49_spill] sm:$0xff] }
 0x46a   :  { %v2550_v33 = vpop.f32.mrf.mxu0  ;;  %v2564_v29 = vpop.f32.mrf.mxu1 }
 0x46b   :  { %v2551_v39 = vadd.f32 %v2550_v33, %v8124_v47  ;;  %v2565_v8 = vadd.f32 %v2564_v29, %v8125_v60 }
 0x46d   :  { %v4044_v40 = vmul.f32 -1.442695, %v2551_v39  ;;  %v4046_v25 = vmul.f32 -1.442695, %v2565_v8 }
 0x46f   :  { %4476 = vpow2.f32 %v4044_v40 }
 0x470   :  { %4478 = vpow2.f32 %v4046_v25 }
 0x471   :  { %v2592_v20 = vpop.f32.mrf.mxu3  ;;  %v2578_v30 = vpop.f32.mrf.mxu2 }
 0x472   :  { %v2593_v35 = vadd.f32 %v2592_v20, %v8126_v24  ;;  %v2552_v52 = vpop.f32.mrf.mxu0  ;;  %v2566_v56 = vpop.f32.mrf.mxu1  ;;  %v8129_v20 = vld [vmem:[#allocation50_spill] sm:$0xff] }
 0x473   :  { %v2553_v55 = vadd.f32 %v2552_v52, %v8127_v11  ;;  %v2567_v51 = vadd.f32 %v2566_v56, %v8128_v45  ;;  %v2579_v29 = vadd.f32 %v2578_v30, %v8129_v20  ;;  %v8130_v56 = vld [vmem:[#allocation51_spill] sm:$0xff]  ;;  %v8131_v20 = vld [vmem:[#allocation52_spill] sm:$0xff] }
 0x474   :  { %v4048_v63 = vmul.f32 -1.442695, %v2593_v35 }
 0x475   :  { %v4477_v17 = vpop.eup %4476  ;;  %v4045_v5 = vmul.f32 -1.442695, %v2553_v55  ;;  %v4047_v39 = vmul.f32 -1.442695, %v2567_v51 }
 0x476   :  { %v4479_v33 = vpop.eup %4478  ;;  %v2665_v47 = vadd.f32 1.0, %v4477_v17  ;;  %4480 = vpow2.f32 %v4048_v63 }
 0x477   :  { %v2703_v8 = vadd.f32 1.0, %v4479_v33  ;;  %4482 = vpow2.f32 %v4045_v5 }
 0x478   :  { %4484 = vrcp.f32 %v2665_v47  ;;  %v2678_v24 = vand.u32 2147483648, %v2665_v47  ;;  %vm2672_vm2 = vweird.f32 %v2665_v47 }
 0x479   :  { %4486 = vrcp.f32 %v2703_v8  ;;  %v2594_v40 = vpop.f32.mrf.mxu3  ;;  %v2580_v5 = vpop.f32.mrf.mxu2  ;;  %vm2710_vm4 = vweird.f32 %v2703_v8 }
 0x47a   :  { %4488 = vpow2.f32 %v4047_v39  ;;  %v2595_v35 = vadd.f32 %v2594_v40, %v8130_v56  ;;  %v2676_v39 = vand.u32 2147483647, %v2665_v47  ;;  %v2716_v56 = vand.u32 2147483648, %v2703_v8 }
 0x47b   :  { %v2581_v31 = vadd.f32 %v2580_v5, %v8131_v20  ;;  %v2679_v44 = vor.u32 1.1754944e-38, %v2678_v24  ;;  %v8134_v5 = vld [vmem:[#allocation53_spill] sm:$0xff] }
 0x47c   :  { %v4481_v25 = vpop.eup %4480  ;;  %vm6939_vm5 = vcmp.eq.f32.partialorder %v2676_v39, 8.507059e+37  ;;  %v2717_v0 = vor.u32 1.1754944e-38, %v2716_v56 }
 0x47d   :  { %v4483_v52 = vpop.eup %4482  ;;  %v6928_v11 = vadd.f32 1.0, %v4481_v25  ;;  %v4049_v25 = vmul.f32 -1.442695, %v2595_v35 }
 0x47e   :  { %v4485_v45 = vpop.eup %4484  ;;  %v6931_v55 = vadd.f32 1.0, %v4483_v52  ;;  %v2714_v52 = vand.u32 2147483647, %v2703_v8 }
 0x47f   :  { %v4487_v17 = vpop.eup %4486  ;;  %v2668_v63 = vmul.f32 %v4485_v45, %v2665_v47  ;;  %4490 = vrcp.f32 %v6928_v11  ;;  %vm2673_vm3 = vweird.f32 %v4485_v45 }
 0x480   :  { %v4489_v51 = vpop.eup %4488  ;;  %v2706_v33 = vmul.f32 %v4487_v17, %v2703_v8  ;;  %4492 = vtanh.f32 %v2579_v29  ;;  %vm2711_vm7 = vweird.f32 %v4487_v17  ;;  %vm2674_vm6 = vmor %vm2672_vm2, %vm2673_vm3  ;;  %vm2715_vm8 = vcmp.eq.f32.partialorder %v2714_v52, 8.507059e+37 }
 0x481   :  { %v2669_v60 = vsub.f32 1.0, %v2668_v63  ;;  %4494 = vrcp.f32 %v6931_v55  ;;  %v6935_v30 = vadd.f32 1.0, %v4489_v51  ;;  %vm2712_vm9 = vmor %vm2710_vm4, %vm2711_vm7  ;;  %vm2687_vm10 = vweird.f32 %v6931_v55 }
 0x482   :  { %v2707_v40 = vsub.f32 1.0, %v2706_v33  ;;  %vm2750_vm3 = vweird.f32 %v6928_v11 }
 0x483   :  { %v2670_v18 = vmul.f32 %v4485_v45, %v2669_v60  ;;  %4496 = vrcp.f32 %v6935_v30  ;;  %v2729_v47 = vand.u32 2147483647, %v6935_v30  ;;  %vm2725_vm13 = vweird.f32 %v6935_v30 }
 0x484   :  { %v2708_v16 = vmul.f32 %v4487_v17, %v2707_v40  ;;  %4498 = vpow2.f32 %v4049_v25  ;;  %v8135_v25 = vld [vmem:[#allocation54_spill] sm:$0xff] }
 0x485   :  { %v6943_v35 = vpop.eup %4490  ;;  %v2671_v33 = vadd.f32 %v4485_v45, %v2670_v18  ;;  %4500 = vtanh.f32 %v2581_v31  ;;  %vm2730_vm1 = vcmp.eq.f32.partialorder %v2729_v47, 8.507059e+37 }
 0x486   :  { %v4493_v20 = vpop.eup %4492  ;;  %v2709_v40 = vadd.f32 %v4487_v17, %v2708_v16  ;;  %v2746_v18 = vmul.f32 %v6943_v35, %v6928_v11  ;;  %vm2751_vm2 = vweird.f32 %v6943_v35 }
 0x487   :  { %v2612_v63 = vpop.f32.mrf.mxu0  ;;  %v2626_v51 = vpop.f32.mrf.mxu1  ;;  %v2675_v46 = vsel %vm2674_vm6, %v4485_v45, %v2671_v33  ;;  %vm6989_vm4 = vmor %vm2750_vm3, %vm2751_vm2 }
 0x488   :  { %v2613_v60 = vadd.f32 %v2612_v63, %v8134_v5  ;;  %v4495_v39 = vpop.eup %4494  ;;  %v2627_v15 = vadd.f32 %v2626_v51, %v8135_v25  ;;  %v2680_v56 = vsel %vm6939_vm5, %v2679_v44, %v2675_v46  ;;  %v2713_v63 = vsel %vm2712_vm9, %v4487_v17, %v2709_v40 }
 0x489   :  { %v2683_v16 = vmul.f32 %v4495_v39, %v6931_v55  ;;  %v4497_v31 = vpop.eup %4496  ;;  %v2718_v52 = vsel %vm2715_vm8, %v2717_v0, %v2713_v63  ;;  %v2777_v5 = vmul.f32 %v4493_v20, %v2680_v56  ;;  %v2747_v46 = vsub.f32 1.0, %v2746_v18 }
 0x48a   :  { %v4050_v24 = vmul.f32 -1.442695, %v2613_v60  ;;  %v2775_v45 = vmul.f32 %v2718_v52, %v6716_v36  ;;  %v2721_v60 = vmul.f32 %v4497_v31, %v6935_v30  ;;  %v4499_v29 = vpop.eup %4498  ;;  %v2691_v44 = vand.u32 2147483647, %v6931_v55 }
 0x48b   :  { %v2684_v33 = vsub.f32 1.0, %v2683_v16  ;;  %v2693_v17 = vand.u32 2147483648, %v6931_v55  ;;  %v4052_v51 = vmul.f32 -1.442695, %v2627_v15  ;;  %v4501_v0 = vpop.eup %4500  ;;  %v2731_v56 = vand.u32 2147483648, %v6935_v30  ;;  %v8136_v16 = vld [vmem:[#allocation56_spill] sm:$0xff] }
 0x48c   :  { %4502 = vpow2.f32 %v4050_v24  ;;  %v2722_v20 = vsub.f32 1.0, %v2721_v60  ;;  %vm2688_vm11 = vweird.f32 %v4495_v39  ;;  %v6964_v36 = vadd.f32 %v2777_v5, %v2775_v45 }
 0x48d   :  { %v2685_v24 = vmul.f32 %v4495_v39, %v2684_v33  ;;  %v6966_v63 = vadd.f32 1.0, %v4499_v29  ;;  %4504 = vpow2.f32 %v4052_v51  ;;  %vm2726_vm12 = vweird.f32 %v4497_v31  ;;  %vm2689_vm14 = vmor %vm2687_vm10, %vm2688_vm11 }
 0x48e   :  { %v2654_v40 = vpop.f32.mrf.mxu3  ;;  %v2723_v18 = vmul.f32 %v4497_v31, %v2722_v20  ;;  %v2748_v25 = vmul.f32 %v6943_v35, %v2747_v46  ;;  %v2694_v5 = vor.u32 1.1754944e-38, %v2693_v17  ;;  %vm2692_vm15 = vcmp.eq.f32.partialorder %v2691_v44, 8.507059e+37  ;;  %vm2727_vm0 = vmor %vm2725_vm13, %vm2726_vm12 }
 0x48f   :  { %v2655_v52 = vadd.f32 %v2654_v40, %v8136_v16  ;;  %v2686_v8 = vadd.f32 %v4495_v39, %v2685_v24  ;;  %4506 = vrcp.f32 %v6966_v63  ;;  %v2732_v29 = vor.u32 1.1754944e-38, %v2731_v56  ;;  %v2614_v46 = vpop.f32.mrf.mxu0  ;;  %v2628_v20 = vpop.f32.mrf.mxu1 }
 0x490   :  { %v2724_v33 = vadd.f32 %v4497_v31, %v2723_v18  ;;  %4508 = vtanh.f32 %v6964_v36  ;;  %v2615_v56 = vadd.f32 %v2614_v46, %v7927_v4  ;;  %v8139_v18 = vand.u32 2147483647, %v6928_v11 }
 0x491   :  { %v2690_v45 = vsel %vm2689_vm14, %v4495_v39, %v2686_v8  ;;  %v4054_v40 = vmul.f32 -1.442695, %v2655_v52  ;;  %v2749_v39 = vadd.f32 %v6943_v35, %v2748_v25  ;;  %v2629_v52 = vadd.f32 %v2628_v20, %v8067_v7 }
 0x492   :  { %v4503_v15 = vpop.eup %4502  ;;  %v2695_v51 = vsel %vm2692_vm15, %v2694_v5, %v2690_v45  ;;  %v2728_v30 = vsel %vm2727_vm0, %v4497_v31, %v2724_v33  ;;  %vm6995_vm7 = vcmp.eq.f32.partialorder %v8139_v18, 8.507059e+37  ;;  %vm2765_vm5 = vweird.f32 %v6966_v63 }
 0x493   :  { %v6975_v60 = vadd.f32 1.0, %v4503_v15  ;;  %v2778_v55 = vmul.f32 %v4501_v0, %v2695_v51  ;;  %v4505_v17 = vpop.eup %4504  ;;  %v2733_v8 = vsel %vm2730_vm1, %v2732_v29, %v2728_v30  ;;  %v2640_v0 = vpop.f32.mrf.mxu2  ;;  %v2753_v33 = vsel %vm6989_vm4, %v6943_v35, %v2749_v39 }
 0x494   :  { %v2776_v44 = vmul.f32 %v2733_v8, %v6735_v32  ;;  %v6982_v24 = vadd.f32 1.0, %v4505_v17  ;;  %v8142_v29 = vand.u32 2147483648, %v6928_v11  ;;  %v4053_v17 = vmul.f32 -1.442695, %v2629_v52 }
 0x495   :  { %4510 = vrcp.f32 %v6975_v60  ;;  %v6986_v47 = vpop.eup %4506  ;;  %v2802_v11 = vand.u32 2147483647, %v6975_v60  ;;  %vm2798_vm9 = vweird.f32 %v6975_v60 }
 0x496   :  { %4512 = vpow2.f32 %v4054_v40  ;;  %v2656_v31 = vpop.f32.mrf.mxu3  ;;  %v6999_v15 = vadd.f32 %v2778_v55, %v2776_v44  ;;  %v2761_v5 = vmul.f32 %v6986_v47, %v6966_v63  ;;  %v4509_v45 = vpop.eup %4508  ;;  %v2757_v51 = vor.u32 1.1754944e-38, %v8142_v29 }
 0x497   :  { %4514 = vrcp.f32 %v6982_v24  ;;  %v4051_v40 = vmul.f32 -1.442695, %v2615_v56  ;;  %v2657_v46 = vadd.f32 %v2656_v31, %v8071_v59  ;;  %v2641_v55 = vadd.f32 %v2640_v0, %v8066_v43 }
 0x498   :  { %v2762_v30 = vsub.f32 1.0, %v2761_v5  ;;  %4516 = vtanh.f32 %v6999_v15  ;;  %v2771_v44 = vand.u32 2147483648, %v6966_v63  ;;  %v2758_v31 = vsel %vm6995_vm7, %v2757_v51, %v2753_v33 }
 0x499   :  { %4518 = vpow2.f32 %v4051_v40  ;;  %v4055_v52 = vmul.f32 -1.442695, %v2657_v46  ;;  %v2783_v0 = vmul.f32 %v4509_v45, %v2758_v31  ;;  %vm2766_vm6 = vweird.f32 %v6986_v47 }
 0x49a   :  { %v2763_v39 = vmul.f32 %v6986_v47, %v2762_v30  ;;  %4520 = vpow2.f32 %v4053_v17  ;;  %v2804_v29 = vand.u32 2147483648, %v6975_v60  ;;  %v2769_v30 = vand.u32 2147483647, %v6966_v63  ;;  %vm7032_vm10 = vmor %vm2765_vm5, %vm2766_vm6 }
 0x49b   :  { %v4511_v20 = vpop.eup %4510  ;;  %v2772_v32 = vor.u32 1.1754944e-38, %v2771_v44  ;;  %v7028_v45 = vpack.c.bf16 %v2783_v0, %v2783_v0  ;;  %vm7036_vm11 = vcmp.eq.f32.partialorder %v2802_v11, 8.507059e+37  ;;  %vm2836_vm15 = vweird.f32 %v6982_v24 }
 0x49c   :  { %v4513_v8 = vpop.eup %4512  ;;  %v2794_v35 = vmul.f32 %v4511_v20, %v6975_v60  ;;  %v2764_v5 = vadd.f32 %v6986_v47, %v2763_v39  ;;  %vm2799_vm8 = vweird.f32 %v4511_v20  ;;  %v2805_v63 = vor.u32 1.1754944e-38, %v2804_v29 }
 0x49d   :  { %v7017_v56 = vadd.f32 1.0, %v4513_v8  ;;  %v4515_v18 = vpop.eup %4514  ;;  %vm2800_vm12 = vmor %vm2798_vm9, %vm2799_vm8  ;;  %v2840_v39 = vand.u32 2147483647, %v6982_v24  ;;  %4056 = vst [vmem:[%s7553_s7 + $0x50] sm:$0xf] %v7028_v45  ;;  %vm2770_vm14 = vcmp.eq.f32.partialorder %v2769_v30, 8.507059e+37 }
 0x49e   :  { %v2795_v25 = vsub.f32 1.0, %v2794_v35  ;;  %v2832_v40 = vmul.f32 %v4515_v18, %v6982_v24  ;;  %v4517_v33 = vpop.eup %4516  ;;  %v2768_v60 = vsel %vm7032_vm10, %v6986_v47, %v2764_v5  ;;  %vm2837_vm13 = vweird.f32 %v4515_v18 }
 0x49f   :  { %4522 = vrcp.f32 %v7017_v56  ;;  %v4519_v44 = vpop.eup %4518  ;;  %vm2838_vm0 = vmor %vm2836_vm15, %vm2837_vm13  ;;  %vm2841_vm1 = vcmp.eq.f32.partialorder %v2840_v39, 8.507059e+37  ;;  %v2880_v39 = vand.u32 2147483647, %v7017_v56  ;;  %vm2876_vm3 = vweird.f32 %v7017_v56 }
 0x4a0   :  { %v2796_v8 = vmul.f32 %v4511_v20, %v2795_v25  ;;  %4524 = vtanh.f32 %v2641_v55  ;;  %v2833_v46 = vsub.f32 1.0, %v2832_v40  ;;  %v2842_v55 = vand.u32 2147483648, %v6982_v24  ;;  %v4521_v11 = vpop.eup %4520  ;;  %v2642_v24 = vpop.f32.mrf.mxu2 }
 0x4a1   :  { %4526 = vpow2.f32 %v4055_v52  ;;  %v7049_v52 = vadd.f32 1.0, %v4519_v44  ;;  %v7055_v5 = vadd.f32 1.0, %v4521_v11  ;;  %vm7086_vm7 = vcmp.eq.f32.partialorder %v2880_v39, 8.507059e+37 }
 0x4a2   :  { %v2797_v17 = vadd.f32 %v4511_v20, %v2796_v8  ;;  %v2834_v31 = vmul.f32 %v4515_v18, %v2833_v46  ;;  %v2773_v8 = vsel %vm2770_vm14, %v2772_v32, %v2768_v60 }
 0x4a3   :  { %4528 = vrcp.f32 %v7049_v52  ;;  %v2784_v46 = vmul.f32 %v4517_v33, %v2773_v8  ;;  %v2643_v33 = vadd.f32 %v2642_v24, %v8080_v48  ;;  %v2921_v8 = vunpack.c.l.b16 %v7028_v45 }
 0x4a4   :  { %v2801_v25 = vsel %vm2800_vm12, %v4511_v20, %v2797_v17  ;;  %v2835_v29 = vadd.f32 %v4515_v18, %v2834_v31  ;;  %v2843_v20 = vor.u32 1.1754944e-38, %v2842_v55  ;;  %4530 = vrcp.f32 %v7055_v5 }
 0x4a5   :  { %v7051_v0 = vpop.eup %4522  ;;  %v2806_v47 = vsel %vm7036_vm11, %v2805_v63, %v2801_v25  ;;  %v2912_v60 = vpack.c.bf16 %v2784_v46, %v2784_v46  ;;  %v2857_v24 = vand.u32 2147483648, %v7055_v5  ;;  %v2855_v39 = vand.u32 2147483647, %v7055_v5 }
 0x4a6   :  { %v2872_v40 = vmul.f32 %v7051_v0, %v7017_v56  ;;  %v4525_v51 = vpop.eup %4524  ;;  %v2839_v17 = vsel %vm2838_vm0, %v4515_v18, %v2835_v29  ;;  %vm2877_vm2 = vweird.f32 %v7051_v0  ;;  %vm2851_vm8 = vweird.f32 %v7055_v5 }
 0x4a7   :  { %v4527_v30 = vpop.eup %4526  ;;  %v2903_v35 = vmul.f32 %v4525_v51, %v2806_v47  ;;  %v2844_v63 = vsel %vm2841_vm1, %v2843_v20, %v2839_v17  ;;  %4057 = vst [vmem:[%s7553_s7 + $0x58] sm:$0xf] %v2912_v60  ;;  %v2922_v47 = vunpack.c.l.b16 %v2912_v60  ;;  %vm7082_vm4 = vmor %vm2876_vm3, %vm2877_vm2  ;;  %vm2813_vm9 = vweird.f32 %v7049_v52 }
 0x4a8   :  { %v2873_v44 = vsub.f32 1.0, %v2872_v40  ;;  %v2901_v11 = vmul.f32 %v2844_v63, %v6814_v28  ;;  %v7064_v32 = vadd.f32 1.0, %v4527_v30  ;;  %v2882_v28 = vand.u32 2147483648, %v7017_v56 }
 0x4a9   :  { %v4529_v18 = vpop.eup %4528  ;;  %v2923_v17 = vpack.c.b16 %v2922_v47, %v2921_v8  ;;  %v2819_v56 = vand.u32 2147483648, %v7049_v52  ;;  %vm2856_vm13 = vcmp.eq.f32.partialorder %v2855_v39, 8.507059e+37  ;;  %v8174_v39 = vld [vmem:[#allocation31_spill] sm:$0xff] }
 0x4aa   :  { %v2874_v31 = vmul.f32 %v7051_v0, %v2873_v44  ;;  %v7066_v55 = vadd.f32 %v2903_v35, %v2901_v11  ;;  %4532 = vrcp.f32 %v7064_v32  ;;  %v4531_v29 = vpop.eup %4530  ;;  %v2809_v40 = vmul.f32 %v4529_v18, %v7049_v52 }
 0x4ab   :  { %v2847_v51 = vmul.f32 %v4531_v29, %v7055_v5  ;;  %v2883_v45 = vor.u32 1.1754944e-38, %v2882_v28  ;;  %vm2814_vm5 = vweird.f32 %v4529_v18  ;;  %2933 = vmatmul.bf16.vlgmr.msra.gmra.mxu0 %v2923_v17  ;;  %2947 = vmatmul.bf16.vlgmr.msra.gmra.mxu1 %v2923_v17  ;;  %vm2852_vm6 = vweird.f32 %v4531_v29 }
 0x4ac   :  { %v2875_v25 = vadd.f32 %v7051_v0, %v2874_v31  ;;  %4534 = vtanh.f32 %v7066_v55  ;;  %v2810_v30 = vsub.f32 1.0, %v2809_v40  ;;  %v2817_v31 = vand.u32 2147483647, %v7049_v52  ;;  %2961 = vmatmul.bf16.vlgmr.msra.gmra.mxu2 %v2923_v17  ;;  %2975 = vmatmul.bf16.vlgmr.msra.gmra.mxu3 %v2923_v17  ;;  %vm2815_vm10 = vmor %vm2813_vm9, %vm2814_vm5 }
 0x4ad   :  { %4536 = vtanh.f32 %v2643_v33  ;;  %v2848_v44 = vsub.f32 1.0, %v2847_v51  ;;  %3309 = vmatpush.bf16.msra.mxu0 %v4758_v37  ;;  %3323 = vmatpush.bf16.msra.mxu1 %v4760_v38  ;;  %v2820_v47 = vor.u32 1.1754944e-38, %v2819_v56  ;;  %vm2853_vm11 = vmor %vm2851_vm8, %vm2852_vm6  ;;  %v2858_v52 = vor.u32 1.1754944e-38, %v2857_v24  ;;  %v8168_v56 = vld [vmem:[#allocation25_spill] sm:$0xff]  ;;  %v8170_v24 = vld [vmem:[#allocation27_spill] sm:$0xff] }
 0x4ae   :  { %v2879_v35 = vsel %vm7082_vm4, %v7051_v0, %v2875_v25  ;;  %v2811_v11 = vmul.f32 %v4529_v18, %v2810_v30  ;;  %3337 = vmatpush.bf16.msra.mxu2 %v4772_v41  ;;  %3351 = vmatpush.bf16.msra.mxu3 %v4774_v42  ;;  %vm2818_vm12 = vcmp.eq.f32.partialorder %v2817_v31, 8.507059e+37  ;;  %vm2891_vm15 = vweird.f32 %v7064_v32  ;;  %v8172_v31 = vld [vmem:[#allocation29_spill] sm:$0xff] }
 0x4af   :  { %v2849_v60 = vmul.f32 %v4531_v29, %v2848_v44  ;;  %v2884_v28 = vsel %vm7086_vm7, %v2883_v45, %v2879_v35  ;;  %v8166_v45 = vld [vmem:[#allocation23_spill] sm:$0xff]  ;;  %v8167_v44 = vld [vmem:[#allocation24_spill] sm:$0xff] }
 0x4b0   :  { %v7094_v63 = vpop.eup %4532  ;;  %v2812_v25 = vadd.f32 %v4529_v18, %v2811_v11  ;;  %v8171_v11 = vld [vmem:[#allocation28_spill] sm:$0xff] }
 0x4b1   :  { %v2887_v0 = vmul.f32 %v7094_v63, %v7064_v32  ;;  %v2850_v40 = vadd.f32 %v4531_v29, %v2849_v60  ;;  %3310 = vmatpush.bf16.msra.mxu0 %v4800_v49  ;;  %3324 = vmatpush.bf16.msra.mxu1 %v4802_v50  ;;  %vm2892_vm14 = vweird.f32 %v7094_v63  ;;  %v2897_v49 = vand.u32 2147483648, %v7064_v32  ;;  %v8173_v60 = vld [vmem:[#allocation30_spill] sm:$0xff] }
 0x4b2   :  { %v4535_v33 = vpop.eup %4534  ;;  %v2816_v20 = vsel %vm2815_vm10, %v4529_v18, %v2812_v25  ;;  %3338 = vmatpush.bf16.msra.mxu2 %v4812_v53  ;;  %3352 = vmatpush.bf16.msra.mxu3 %v4814_v54  ;;  %v2895_v50 = vand.u32 2147483647, %v7064_v32  ;;  %vm2893_vm0 = vmor %vm2891_vm15, %vm2892_vm14  ;;  %v8164_v32 = vld [vmem:[#allocation21_spill] sm:$0xff]  ;;  %v8177_v25 = vld [vmem:[#allocation34_spill] sm:$0xff] }
 0x4b3   :  { %v2888_v8 = vsub.f32 1.0, %v2887_v0  ;;  %v2909_v51 = vmul.f32 %v4535_v33, %v2884_v28  ;;  %v4537_v5 = vpop.eup %4536  ;;  %v2821_v46 = vsel %vm2818_vm12, %v2820_v47, %v2816_v20  ;;  %v2854_v37 = vsel %vm2853_vm11, %v4531_v29, %v2850_v40  ;;  %v8165_v29 = vld [vmem:[#allocation22_spill] sm:$0xff]  ;;  %v8175_v0 = vld [vmem:[#allocation32_spill] sm:$0xff]  ;;  %v8176_v33 = vld [vmem:[#allocation33_spill] sm:$0xff] }
 0x4b4   :  { %v2859_v30 = vsel %vm2856_vm13, %v2858_v52, %v2854_v37  ;;  %v2904_v17 = vmul.f32 %v4537_v5, %v2821_v46  ;;  %v2898_v54 = vor.u32 1.1754944e-38, %v2897_v49  ;;  %vm2896_vm1 = vcmp.eq.f32.partialorder %v2895_v50, 8.507059e+37  ;;  %v8178_v28 = vld [vmem:[#allocation35_spill] sm:$0xff]  ;;  %v8179_v47 = vld [vmem:[#allocation36_spill] sm:$0xff]  ;;  %v8180_v40 = vld [vmem:[#allocation37_spill] sm:$0xff] }
 0x4b5   :  { %v2913_v38 = vpack.c.bf16 %v2909_v51, %v2909_v51  ;;  %v2889_v35 = vmul.f32 %v7094_v63, %v2888_v8  ;;  %v2902_v41 = vmul.f32 %v2859_v30, %v6857_v21  ;;  %3311 = vmatpush.bf16.msra.mxu0 %v4836_v61  ;;  %3325 = vmatpush.bf16.msra.mxu1 %v4838_v62  ;;  %v8161_v21 = vld [vmem:[#allocation18_spill] sm:$0xff]  ;;  %v8182_v51 = vld [vmem:[#allocation39_spill] sm:$0xff]  ;;  %v8183_v5 = vld [vmem:[#allocation40_spill] sm:$0xff] }
 0x4b6   :  { %3339 = vmatpush.bf16.msra.mxu2 %v4848_v1  ;;  %3353 = vmatpush.bf16.msra.mxu3 %v4850_v2  ;;  %v8181_v8 = vld [vmem:[#allocation38_spill] sm:$0xff]  ;;  %v8184_v52 = vld [vmem:[#allocation41_spill] sm:$0xff]  ;;  %v8186_v46 = vld [vmem:[#allocation43_spill] sm:$0xff] }
 0x4b7   :  { %4058 = vst [vmem:[%s7553_s7 + $0x24] sm:$0xf] %v2913_v38  ;;  %v7120_v42 = vadd.f32 %v2904_v17, %v2902_v41  ;;  %v2890_v18 = vadd.f32 %v7094_v63, %v2889_v35  ;;  %v8185_v20 = vld [vmem:[#allocation42_spill] sm:$0xff]  ;;  %v8187_v37 = vld [vmem:[#allocation44_spill] sm:$0xff]  ;;  %v8188_v17 = vld [vmem:[#allocation45_spill] sm:$0xff] }
 0x4b8   :  { %v8189_v41 = vld [vmem:[#allocation46_spill] sm:$0xff] }
 0x4b9   :  { %4538 = vtanh.f32 %v7120_v42  ;;  %v2894_v53 = vsel %vm2893_vm0, %v7094_v63, %v2890_v18  ;;  %3312 = vmatpush.bf16.msra.mxu0 %v4872_v9  ;;  %3326 = vmatpush.bf16.msra.mxu1 %v4874_v10  ;;  %v2983_v9 = vunpack.c.l.b16 %v2913_v38  ;;  %v8169_v63 = vld [vmem:[#allocation26_spill] sm:$0xff] }
 0x4ba   :  { %3340 = vmatpush.bf16.msra.mxu2 %v4884_v13  ;;  %3354 = vmatpush.bf16.msra.mxu3 %v4886_v14  ;;  %v2899_v62 = vsel %vm2896_vm1, %v2898_v54, %v2894_v53  ;;  %v8151_v14 = vld [vmem:[#allocation8_spill] sm:$0xff]  ;;  %v8190_v54 = vld [vmem:[#allocation47_spill] sm:$0xff] }
 0x4bd   :  { %3313 = vmatpush.bf16.msra.mxu0 %v4908_v22  ;;  %3327 = vmatpush.bf16.msra.mxu1 %v4910_v23  ;;  %v8152_v22 = vld [vmem:[#allocation9_spill] sm:$0xff]  ;;  %v8153_v23 = vld [vmem:[#allocation10_spill] sm:$0xff] }
 0x4be   :  { %3341 = vmatpush.bf16.msra.mxu2 %v4920_v26  ;;  %3355 = vmatpush.bf16.msra.mxu3 %v4922_v27  ;;  %v8154_v26 = vld [vmem:[#allocation11_spill] sm:$0xff]  ;;  %v8155_v27 = vld [vmem:[#allocation12_spill] sm:$0xff] }
 0x4bf   :  { %v4539_v61 = vpop.eup %4538 }
 0x4c0   :  { %v2910_v1 = vmul.f32 %v4539_v61, %v2899_v62 }
 0x4c1   :  { %3314 = vmatpush.bf16.msra.mxu0 %v4952_v34  ;;  %3328 = vmatpush.bf16.msra.mxu1 %v7865_v3  ;;  %v8156_v34 = vld [vmem:[#allocation13_spill] sm:$0xff]  ;;  %v8157_v3 = vld [vmem:[#allocation14_spill] sm:$0xff] }
 0x4c2   :  { %v2914_v2 = vpack.c.bf16 %v2910_v1, %v2910_v1  ;;  %3342 = vmatpush.bf16.msra.mxu2 %v8006_v6  ;;  %3356 = vmatpush.bf16.msra.mxu3 %v8007_v58  ;;  %v8158_v6 = vld [vmem:[#allocation15_spill] sm:$0xff]  ;;  %v8159_v58 = vld [vmem:[#allocation16_spill] sm:$0xff] }
 0x4c4   :  { %4059 = vst [vmem:[%s7553_s7 + $0x2c] sm:$0xf] %v2914_v2  ;;  %v2984_v10 = vunpack.c.l.b16 %v2914_v2  ;;  %v8191_v2 = vld [vmem:[#allocation48_spill] sm:$0xff] }
 0x4c5   :  { %3315 = vmatpush.bf16.msra.mxu0 %v8008_v19  ;;  %3329 = vmatpush.bf16.msra.mxu1 %v8085_v57  ;;  %v8160_v19 = vld [vmem:[#allocation17_spill] sm:$0xff]  ;;  %v8162_v57 = vld [vmem:[#allocation19_spill] sm:$0xff] }
 0x4c6   :  { %v2985_v13 = vpack.c.b16 %v2984_v10, %v2983_v9  ;;  %3343 = vmatpush.bf16.msra.mxu2 %v8086_v12  ;;  %3357 = vmatpush.bf16.msra.mxu3 %v8151_v14  ;;  %v8163_v12 = vld [vmem:[#allocation20_spill] sm:$0xff]  ;;  %v8192_v10 = vld [vmem:[#allocation49_spill] sm:$0xff] }
 0x4c8   :  { %2995 = vmatmul.bf16.vlgmr.msrb.gmra.mxu0 %v2985_v13  ;;  %3009 = vmatmul.bf16.vlgmr.msrb.gmra.mxu1 %v2985_v13 }
 0x4c9   :  { %3023 = vmatmul.bf16.vlgmr.msrb.gmra.mxu2 %v2985_v13  ;;  %3037 = vmatmul.bf16.vlgmr.msrb.gmra.mxu3 %v2985_v13 }
 0x4ca   :  { %3316 = vmatpush.bf16.msra.mxu0 %v8152_v22  ;;  %3330 = vmatpush.bf16.msra.mxu1 %v8153_v23 }
 0x4cb   :  { %3344 = vmatpush.bf16.msra.mxu2 %v8154_v26  ;;  %3358 = vmatpush.bf16.msra.mxu3 %v8155_v27 }
 0x4ce   :  { %3371 = vmatpush.bf16.msrb.mxu0 %v8156_v34  ;;  %3385 = vmatpush.bf16.msrb.mxu1 %v8157_v3 }
 0x4cf   :  { %3399 = vmatpush.bf16.msrb.mxu2 %v8158_v6  ;;  %3413 = vmatpush.bf16.msrb.mxu3 %v8159_v58 }
 0x4d2   :  { %3372 = vmatpush.bf16.msrb.mxu0 %v8160_v19  ;;  %3386 = vmatpush.bf16.msrb.mxu1 %v8161_v21  ;;  %v8193_v21 = vld [vmem:[#allocation50_spill] sm:$0xff] }
 0x4d3   :  { %3400 = vmatpush.bf16.msrb.mxu2 %v8162_v57  ;;  %3414 = vmatpush.bf16.msrb.mxu3 %v8163_v12 }
 0x4d6   :  { %3373 = vmatpush.bf16.msrb.mxu0 %v8164_v32  ;;  %3387 = vmatpush.bf16.msrb.mxu1 %v8165_v29  ;;  %v8194_v29 = vld [vmem:[#allocation51_spill] sm:$0xff] }
 0x4d7   :  { %3401 = vmatpush.bf16.msrb.mxu2 %v8166_v45  ;;  %3415 = vmatpush.bf16.msrb.mxu3 %v8167_v44 }
 0x4da   :  { %3374 = vmatpush.bf16.msrb.mxu0 %v8168_v56  ;;  %3388 = vmatpush.bf16.msrb.mxu1 %v8169_v63 }
 0x4db   :  { %3402 = vmatpush.bf16.msrb.mxu2 %v8170_v24  ;;  %3416 = vmatpush.bf16.msrb.mxu3 %v8171_v11 }
 0x4de   :  { %3375 = vmatpush.bf16.msrb.mxu0 %v8172_v31  ;;  %3389 = vmatpush.bf16.msrb.mxu1 %v8173_v60 }
 0x4df   :  { %3403 = vmatpush.bf16.msrb.mxu2 %v8174_v39  ;;  %3417 = vmatpush.bf16.msrb.mxu3 %v8175_v0 }
 0x4e2   :  { %3376 = vmatpush.bf16.msrb.mxu0 %v8176_v33  ;;  %3390 = vmatpush.bf16.msrb.mxu1 %v8177_v25 }
 0x4e3   :  { %3404 = vmatpush.bf16.msrb.mxu2 %v8178_v28  ;;  %3418 = vmatpush.bf16.msrb.mxu3 %v8179_v47 }
 0x4e6   :  { %3377 = vmatpush.bf16.msrb.mxu0 %v8180_v40  ;;  %3391 = vmatpush.bf16.msrb.mxu1 %v8181_v8 }
 0x4e7   :  { %3405 = vmatpush.bf16.msrb.mxu2 %v8182_v51  ;;  %3419 = vmatpush.bf16.msrb.mxu3 %v8183_v5  ;;  %v8195_v51 = vld [vmem:[#allocation52_spill] sm:$0xff] }
 0x4ea   :  { %3378 = vmatpush.bf16.msrb.mxu0 %v8184_v52  ;;  %3392 = vmatpush.bf16.msrb.mxu1 %v8185_v20 }
 0x4eb   :  { %3406 = vmatpush.bf16.msrb.mxu2 %v8186_v46  ;;  %3420 = vmatpush.bf16.msrb.mxu3 %v8187_v37 }
 0x528   :  { %v2934_v38 = vpop.f32.mrf.mxu0  ;;  %v2948_v30 = vpop.f32.mrf.mxu1 }
 0x529   :  { %v2935_v35 = vadd.f32 %v2934_v38, %v8188_v17  ;;  %v2949_v18 = vadd.f32 %v2948_v30, %v8189_v41 }
 0x52b   :  { %v4060_v49 = vmul.f32 -1.442695, %v2935_v35  ;;  %v4062_v50 = vmul.f32 -1.442695, %v2949_v18 }
 0x52d   :  { %4540 = vpow2.f32 %v4060_v49  ;;  %v8198_v49 = vld [vmem:[#allocation53_spill] sm:$0xff] }
 0x52e   :  { %4542 = vpow2.f32 %v4062_v50 }
 0x52f   :  { %v2976_v53 = vpop.f32.mrf.mxu3  ;;  %v2962_v23 = vpop.f32.mrf.mxu2 }
 0x530   :  { %v2977_v61 = vadd.f32 %v2976_v53, %v8190_v54  ;;  %v2936_v62 = vpop.f32.mrf.mxu0  ;;  %v2950_v1 = vpop.f32.mrf.mxu1  ;;  %v2963_v57 = vadd.f32 %v2962_v23, %v8193_v21 }
 0x531   :  { %v2937_v9 = vadd.f32 %v2936_v62, %v8191_v2  ;;  %v2951_v13 = vadd.f32 %v2950_v1, %v8192_v10 }
 0x532   :  { %v4064_v14 = vmul.f32 -1.442695, %v2977_v61 }
 0x533   :  { %v4541_v22 = vpop.eup %4540  ;;  %v4061_v26 = vmul.f32 -1.442695, %v2937_v9  ;;  %v4063_v3 = vmul.f32 -1.442695, %v2951_v13 }
 0x534   :  { %v4543_v27 = vpop.eup %4542  ;;  %v3049_v34 = vadd.f32 1.0, %v4541_v22  ;;  %4544 = vpow2.f32 %v4064_v14  ;;  %v8199_v22 = vld [vmem:[#allocation54_spill] sm:$0xff] }
 0x535   :  { %v3087_v6 = vadd.f32 1.0, %v4543_v27  ;;  %4546 = vpow2.f32 %v4061_v26 }
 0x536   :  { %4548 = vrcp.f32 %v3049_v34  ;;  %v3060_v39 = vand.u32 2147483647, %v3049_v34  ;;  %v3062_v0 = vand.u32 2147483648, %v3049_v34  ;;  %vm3056_vm2 = vweird.f32 %v3049_v34 }
 0x537   :  { %4550 = vrcp.f32 %v3087_v6  ;;  %v2978_v58 = vpop.f32.mrf.mxu3  ;;  %v2964_v11 = vpop.f32.mrf.mxu2  ;;  %v3100_v40 = vand.u32 2147483648, %v3087_v6  ;;  %v3098_v8 = vand.u32 2147483647, %v3087_v6  ;;  %vm3094_vm4 = vweird.f32 %v3087_v6 }
 0x538   :  { %4552 = vpow2.f32 %v4063_v3  ;;  %v2979_v45 = vadd.f32 %v2978_v58, %v8194_v29  ;;  %v2965_v5 = vadd.f32 %v2964_v11, %v8195_v51  ;;  %vm7205_vm5 = vcmp.eq.f32.partialorder %v3060_v39, 8.507059e+37 }
 0x539   :  { %v3063_v18 = vor.u32 1.1754944e-38, %v3062_v0  ;;  %v3101_v61 = vor.u32 1.1754944e-38, %v3100_v40  ;;  %vm3099_vm8 = vcmp.eq.f32.partialorder %v3098_v8, 8.507059e+37 }
 0x53a   :  { %v4545_v19 = vpop.eup %4544  ;;  %v4065_v28 = vmul.f32 -1.442695, %v2979_v45 }
 0x53b   :  { %v4547_v12 = vpop.eup %4546  ;;  %v7194_v32 = vadd.f32 1.0, %v4545_v19 }
 0x53c   :  { %v4549_v44 = vpop.eup %4548  ;;  %v7197_v56 = vadd.f32 1.0, %v4547_v12 }
 0x53d   :  { %v4551_v63 = vpop.eup %4550  ;;  %v3052_v24 = vmul.f32 %v4549_v44, %v3049_v34  ;;  %4554 = vrcp.f32 %v7194_v32  ;;  %vm3057_vm3 = vweird.f32 %v4549_v44  ;;  %v3138_v34 = vand.u32 2147483647, %v7194_v32 }
 0x53e   :  { %v4553_v31 = vpop.eup %4552  ;;  %v3090_v60 = vmul.f32 %v4551_v63, %v3087_v6  ;;  %4556 = vtanh.f32 %v2963_v57  ;;  %vm3095_vm7 = vweird.f32 %v4551_v63  ;;  %vm3058_vm6 = vmor %vm3056_vm2, %vm3057_vm3  ;;  %v3140_v6 = vand.u32 2147483648, %v7194_v32 }
 0x53f   :  { %v3053_v33 = vsub.f32 1.0, %v3052_v24  ;;  %4558 = vrcp.f32 %v7197_v56  ;;  %v7201_v25 = vadd.f32 1.0, %v4553_v31  ;;  %vm3096_vm9 = vmor %vm3094_vm4, %vm3095_vm7  ;;  %vm3071_vm10 = vweird.f32 %v7197_v56 }
 0x540   :  { %v3091_v47 = vsub.f32 1.0, %v3090_v60  ;;  %v3077_v31 = vand.u32 2147483648, %v7197_v56  ;;  %vm3134_vm3 = vweird.f32 %v7194_v32  ;;  %vm7261_vm7 = vcmp.eq.f32.partialorder %v3138_v34, 8.507059e+37 }
 0x541   :  { %v3054_v52 = vmul.f32 %v4549_v44, %v3053_v33  ;;  %4560 = vrcp.f32 %v7201_v25  ;;  %vm3109_vm13 = vweird.f32 %v7201_v25 }
 0x542   :  { %v3092_v20 = vmul.f32 %v4551_v63, %v3091_v47  ;;  %4562 = vpow2.f32 %v4065_v28  ;;  %v3115_v28 = vand.u32 2147483648, %v7201_v25 }
 0x543   :  { %v7209_v30 = vpop.eup %4554  ;;  %v3055_v35 = vadd.f32 %v4549_v44, %v3054_v52  ;;  %4564 = vtanh.f32 %v2965_v5 }
 0x544   :  { %v4557_v53 = vpop.eup %4556  ;;  %v3093_v62 = vadd.f32 %v4551_v63, %v3092_v20  ;;  %v3130_v13 = vmul.f32 %v7209_v30, %v7194_v32  ;;  %v3113_v20 = vand.u32 2147483647, %v7201_v25  ;;  %vm3135_vm2 = vweird.f32 %v7209_v30 }
 0x545   :  { %v2996_v37 = vpop.f32.mrf.mxu0  ;;  %v3010_v38 = vpop.f32.mrf.mxu1  ;;  %v3059_v9 = vsel %vm3058_vm6, %v4549_v44, %v3055_v35  ;;  %vm7255_vm4 = vmor %vm3134_vm3, %vm3135_vm2 }
 0x546   :  { %v2997_v50 = vadd.f32 %v2996_v37, %v8198_v49  ;;  %v4559_v1 = vpop.eup %4558  ;;  %v3011_v23 = vadd.f32 %v3010_v38, %v8199_v22  ;;  %v3064_v26 = vsel %vm7205_vm5, %v3063_v18, %v3059_v9  ;;  %v3097_v27 = vsel %vm3096_vm9, %v4551_v63, %v3093_v62 }
 0x547   :  { %v3067_v3 = vmul.f32 %v4559_v1, %v7197_v56  ;;  %v4561_v58 = vpop.eup %4560  ;;  %v3102_v19 = vsel %vm3099_vm8, %v3101_v61, %v3097_v27  ;;  %v3161_v57 = vmul.f32 %v4557_v53, %v3064_v26  ;;  %v3131_v11 = vsub.f32 1.0, %v3130_v13 }
 0x548   :  { %v4066_v14 = vmul.f32 -1.442695, %v2997_v50  ;;  %v3159_v12 = vmul.f32 %v3102_v19, %v6964_v36  ;;  %v3105_v44 = vmul.f32 %v4561_v58, %v7201_v25  ;;  %v4563_v24 = vpop.eup %4562  ;;  %v3075_v63 = vand.u32 2147483647, %v7197_v56 }
 0x549   :  { %v3068_v45 = vsub.f32 1.0, %v3067_v3  ;;  %v4068_v60 = vmul.f32 -1.442695, %v3011_v23  ;;  %v4565_v0 = vpop.eup %4564  ;;  %vm3072_vm11 = vweird.f32 %v4559_v1  ;;  %v7232_v40 = vadd.f32 1.0, %v4563_v24 }
 0x54a   :  { %4566 = vpow2.f32 %v4066_v14  ;;  %v3106_v33 = vsub.f32 1.0, %v3105_v44  ;;  %v7230_v36 = vadd.f32 %v3161_v57, %v3159_v12  ;;  %vm3110_vm12 = vweird.f32 %v4561_v58  ;;  %vm3073_vm14 = vmor %vm3071_vm10, %vm3072_vm11 }
 0x54b   :  { %v3069_v47 = vmul.f32 %v4559_v1, %v3068_v45  ;;  %4568 = vpow2.f32 %v4068_v60  ;;  %v3132_v37 = vmul.f32 %v7209_v30, %v3131_v11  ;;  %v3078_v38 = vor.u32 1.1754944e-38, %v3077_v31  ;;  %vm3111_vm0 = vmor %vm3109_vm13, %vm3110_vm12 }
 0x54c   :  { %v3038_v39 = vpop.f32.mrf.mxu3  ;;  %v3107_v5 = vmul.f32 %v4561_v58, %v3106_v33  ;;  %4570 = vrcp.f32 %v7232_v40  ;;  %vm3076_vm15 = vcmp.eq.f32.partialorder %v3075_v63, 8.507059e+37  ;;  %v3116_v53 = vor.u32 1.1754944e-38, %v3115_v28  ;;  %v3024_v12 = vpop.f32.mrf.mxu2 }
 0x54d   :  { %v3039_v8 = vadd.f32 %v3038_v39, %v8136_v16  ;;  %v3070_v52 = vadd.f32 %v4559_v1, %v3069_v47  ;;  %4572 = vtanh.f32 %v7230_v36  ;;  %v2998_v9 = vpop.f32.mrf.mxu0  ;;  %v3012_v13 = vpop.f32.mrf.mxu1  ;;  %vm3114_vm1 = vcmp.eq.f32.partialorder %v3113_v20, 8.507059e+37 }
 0x54e   :  { %v3108_v18 = vadd.f32 %v4561_v58, %v3107_v5  ;;  %v2999_v3 = vadd.f32 %v2998_v9, %v7927_v4  ;;  %v3013_v19 = vadd.f32 %v3012_v13, %v8067_v7  ;;  %v3141_v31 = vor.u32 1.1754944e-38, %v3140_v6 }
 0x54f   :  { %v3074_v35 = vsel %vm3073_vm14, %v4559_v1, %v3070_v52  ;;  %v4070_v62 = vmul.f32 -1.442695, %v3039_v8  ;;  %v3133_v1 = vadd.f32 %v7209_v30, %v3132_v37  ;;  %vm3149_vm5 = vweird.f32 %v7232_v40 }
 0x550   :  { %v4567_v46 = vpop.eup %4566  ;;  %v3079_v61 = vsel %vm3076_vm15, %v3078_v38, %v3074_v35  ;;  %v3112_v25 = vsel %vm3111_vm0, %v4561_v58, %v3108_v18  ;;  %v4067_v60 = vmul.f32 -1.442695, %v2999_v3  ;;  %v3025_v33 = vadd.f32 %v3024_v12, %v8066_v43 }
 0x551   :  { %v7241_v50 = vadd.f32 1.0, %v4567_v46  ;;  %v3162_v56 = vmul.f32 %v4565_v0, %v3079_v61  ;;  %v4569_v14 = vpop.eup %4568  ;;  %v3117_v23 = vsel %vm3114_vm1, %v3116_v53, %v3112_v25  ;;  %v3137_v63 = vsel %vm7255_vm4, %v7209_v30, %v3133_v1 }
 0x552   :  { %v3160_v26 = vmul.f32 %v3117_v23, %v6999_v15  ;;  %v7248_v27 = vadd.f32 1.0, %v4569_v14  ;;  %v7252_v57 = vpop.eup %4570  ;;  %v4069_v28 = vmul.f32 -1.442695, %v3013_v19  ;;  %v3155_v8 = vand.u32 2147483648, %v7232_v40 }
 0x553   :  { %4574 = vrcp.f32 %v7241_v50  ;;  %v3145_v24 = vmul.f32 %v7252_v57, %v7232_v40  ;;  %v4573_v11 = vpop.eup %4572  ;;  %v3186_v32 = vand.u32 2147483647, %v7241_v50  ;;  %v3142_v52 = vsel %vm7261_vm7, %v3141_v31, %v3137_v63 }
 0x554   :  { %4576 = vpow2.f32 %v4070_v62  ;;  %v3040_v58 = vpop.f32.mrf.mxu3  ;;  %v7265_v44 = vadd.f32 %v3162_v56, %v3160_v26  ;;  %v3167_v37 = vmul.f32 %v4573_v11, %v3142_v52  ;;  %vm3150_vm6 = vweird.f32 %v7252_v57 }
 0x555   :  { %4578 = vrcp.f32 %v7248_v27  ;;  %v3041_v34 = vadd.f32 %v3040_v58, %v8071_v59  ;;  %v3146_v0 = vsub.f32 1.0, %v3145_v24  ;;  %v3188_v18 = vand.u32 2147483648, %v7241_v50  ;;  %vm7298_vm10 = vmor %vm3149_vm5, %vm3150_vm6 }
 0x556   :  { %4580 = vtanh.f32 %v7265_v44  ;;  %v3153_v53 = vand.u32 2147483647, %v7232_v40  ;;  %v3156_v9 = vor.u32 1.1754944e-38, %v3155_v8  ;;  %vm3182_vm9 = vweird.f32 %v7241_v50 }
 0x557   :  { %v3147_v6 = vmul.f32 %v7252_v57, %v3146_v0  ;;  %4582 = vpow2.f32 %v4067_v60  ;;  %v4071_v46 = vmul.f32 -1.442695, %v3041_v34  ;;  %v7294_v13 = vpack.c.bf16 %v3167_v37, %v3167_v37 }
 0x558   :  { %4584 = vpow2.f32 %v4069_v28  ;;  %vm7302_vm11 = vcmp.eq.f32.partialorder %v3186_v32, 8.507059e+37  ;;  %v3226_v3 = vand.u32 2147483648, %v7248_v27  ;;  %v3189_v40 = vor.u32 1.1754944e-38, %v3188_v18 }
 0x559   :  { %v4575_v39 = vpop.eup %4574  ;;  %v3148_v35 = vadd.f32 %v7252_v57, %v3147_v6  ;;  %v3224_v19 = vand.u32 2147483647, %v7248_v27  ;;  %4072 = vst [vmem:[%s7553_s7 + $0x60] sm:$0xf] %v7294_v13  ;;  %vm3154_vm14 = vcmp.eq.f32.partialorder %v3153_v53, 8.507059e+37  ;;  %vm3220_vm15 = vweird.f32 %v7248_v27 }
 0x55a   :  { %v4577_v47 = vpop.eup %4576  ;;  %v3178_v30 = vmul.f32 %v4575_v39, %v7241_v50  ;;  %vm3183_vm8 = vweird.f32 %v4575_v39 }
 0x55b   :  { %v7283_v5 = vadd.f32 1.0, %v4577_v47  ;;  %v4579_v38 = vpop.eup %4578  ;;  %v3152_v50 = vsel %vm7298_vm10, %v7252_v57, %v3148_v35  ;;  %vm3184_vm12 = vmor %vm3182_vm9, %vm3183_vm8  ;;  %vm3225_vm1 = vcmp.eq.f32.partialorder %v3224_v19, 8.507059e+37 }
 0x55c   :  { %v3179_v20 = vsub.f32 1.0, %v3178_v30  ;;  %v3216_v61 = vmul.f32 %v4579_v38, %v7248_v27  ;;  %v4581_v25 = vpop.eup %4580  ;;  %vm3221_vm13 = vweird.f32 %v4579_v38  ;;  %v3157_v60 = vsel %vm3154_vm14, %v3156_v9, %v3152_v50  ;;  %v3026_v27 = vpop.f32.mrf.mxu2 }
 0x55d   :  { %4586 = vrcp.f32 %v7283_v5  ;;  %v4583_v26 = vpop.eup %4582  ;;  %vm3222_vm0 = vmor %vm3220_vm15, %vm3221_vm13  ;;  %v3168_v0 = vmul.f32 %v4581_v25, %v3157_v60  ;;  %v3264_v37 = vand.u32 2147483647, %v7283_v5  ;;  %v3027_v35 = vadd.f32 %v3026_v27, %v8080_v48 }
 0x55e   :  { %v3180_v62 = vmul.f32 %v4575_v39, %v3179_v20  ;;  %4588 = vtanh.f32 %v3025_v33  ;;  %v3217_v14 = vsub.f32 1.0, %v3216_v61  ;;  %v4585_v58 = vpop.eup %4584  ;;  %v7315_v15 = vadd.f32 1.0, %v4583_v26 }
 0x55f   :  { %4590 = vpow2.f32 %v4071_v46  ;;  %v7321_v11 = vadd.f32 1.0, %v4585_v58  ;;  %v3296_v20 = vpack.c.bf16 %v3168_v0, %v3168_v0  ;;  %v3305_v9 = vunpack.c.l.b16 %v7294_v13 }
 0x560   :  { %v3181_v1 = vadd.f32 %v4575_v39, %v3180_v62  ;;  %v3218_v12 = vmul.f32 %v4579_v38, %v3217_v14  ;;  %4592 = vrcp.f32 %v7315_v15  ;;  %vm3260_vm3 = vweird.f32 %v7283_v5 }
 0x561   :  { %4594 = vrcp.f32 %v7321_v11  ;;  %4073 = vst [vmem:[%s7553_s7 + $0x68] sm:$0xf] %v3296_v20  ;;  %v3306_v53 = vunpack.c.l.b16 %v3296_v20  ;;  %vm7352_vm7 = vcmp.eq.f32.partialorder %v3264_v37, 8.507059e+37  ;;  %v3201_v58 = vand.u32 2147483647, %v7315_v15 }
 0x562   :  { %v3185_v45 = vsel %vm3184_vm12, %v4575_v39, %v3181_v1  ;;  %v3219_v63 = vadd.f32 %v4579_v38, %v3218_v12  ;;  %v3227_v39 = vor.u32 1.1754944e-38, %v3226_v3  ;;  %vm3235_vm8 = vweird.f32 %v7321_v11 }
 0x563   :  { %v7317_v24 = vpop.eup %4586  ;;  %v3190_v57 = vsel %vm7302_vm11, %v3189_v40, %v3185_v45  ;;  %v3307_v23 = vpack.c.b16 %v3306_v53, %v3305_v9  ;;  %v3241_v40 = vand.u32 2147483648, %v7321_v11  ;;  %v3239_v45 = vand.u32 2147483647, %v7321_v11 }
 0x564   :  { %v3256_v31 = vmul.f32 %v7317_v24, %v7283_v5  ;;  %v4589_v34 = vpop.eup %4588  ;;  %v3223_v28 = vsel %vm3222_vm0, %v4579_v38, %v3219_v63  ;;  %vm3261_vm2 = vweird.f32 %v7317_v24  ;;  %vm3197_vm9 = vweird.f32 %v7315_v15 }
 0x565   :  { %v4591_v33 = vpop.eup %4590  ;;  %v3287_v47 = vmul.f32 %v4589_v34, %v3190_v57  ;;  %v3228_v30 = vsel %vm3225_vm1, %v3227_v39, %v3223_v28  ;;  %vm7348_vm4 = vmor %vm3260_vm3, %vm3261_vm2  ;;  %3317 = vmatmul.bf16.vlgmr.msra.gmra.mxu0 %v3307_v23  ;;  %3331 = vmatmul.bf16.vlgmr.msra.gmra.mxu1 %v3307_v23  ;;  %v3242_v28 = vor.u32 1.1754944e-38, %v3241_v40  ;;  %vm3202_vm12 = vcmp.eq.f32.partialorder %v3201_v58, 8.507059e+37 }
 0x566   :  { %v3257_v8 = vsub.f32 1.0, %v3256_v31  ;;  %v3285_v32 = vmul.f32 %v3228_v30, %v7066_v55  ;;  %v7330_v52 = vadd.f32 1.0, %v4591_v33  ;;  %v4593_v38 = vpop.eup %4592  ;;  %v3266_v55 = vand.u32 2147483648, %v7283_v5  ;;  %3345 = vmatmul.bf16.vlgmr.msra.gmra.mxu2 %v3307_v23  ;;  %3359 = vmatmul.bf16.vlgmr.msra.gmra.mxu3 %v3307_v23 }
 0x567   :  { %v4595_v61 = vpop.eup %4594  ;;  %v3193_v62 = vmul.f32 %v4593_v38, %v7315_v15  ;;  %v3203_v5 = vand.u32 2147483648, %v7315_v15  ;;  %vm3198_vm5 = vweird.f32 %v4593_v38  ;;  %vm3240_vm13 = vcmp.eq.f32.partialorder %v3239_v45, 8.507059e+37 }
 0x568   :  { %v3258_v6 = vmul.f32 %v7317_v24, %v3257_v8  ;;  %v7332_v46 = vadd.f32 %v3287_v47, %v3285_v32  ;;  %4596 = vrcp.f32 %v7330_v52  ;;  %v3231_v25 = vmul.f32 %v4595_v61, %v7321_v11  ;;  %vm3199_vm10 = vmor %vm3197_vm9, %vm3198_vm5 }
 0x569   :  { %v3194_v1 = vsub.f32 1.0, %v3193_v62  ;;  %v3267_v13 = vor.u32 1.1754944e-38, %v3266_v55  ;;  %vm3236_vm6 = vweird.f32 %v4595_v61  ;;  %v3204_v60 = vor.u32 1.1754944e-38, %v3203_v5 }
 0x56a   :  { %v3259_v18 = vadd.f32 %v7317_v24, %v3258_v6  ;;  %4598 = vtanh.f32 %v7332_v46  ;;  %v3232_v50 = vsub.f32 1.0, %v3231_v25  ;;  %vm3237_vm11 = vmor %vm3235_vm8, %vm3236_vm6  ;;  %vm3275_vm15 = vweird.f32 %v7330_v52 }
 0x56b   :  { %4600 = vtanh.f32 %v3027_v35  ;;  %v3195_v19 = vmul.f32 %v4593_v38, %v3194_v1  ;;  %v3281_v35 = vand.u32 2147483648, %v7330_v52 }
 0x56c   :  { %v3263_v26 = vsel %vm7348_vm4, %v7317_v24, %v3259_v18  ;;  %v3233_v12 = vmul.f32 %v4595_v61, %v3232_v50 }
 0x56d   :  { %v3196_v63 = vadd.f32 %v4593_v38, %v3195_v19  ;;  %v3268_v31 = vsel %vm7352_vm7, %v3267_v13, %v3263_v26  ;;  %v3282_v55 = vor.u32 1.1754944e-38, %v3281_v35 }
 0x56e   :  { %v4597_v3 = vpop.eup %4596  ;;  %v3234_v34 = vadd.f32 %v4595_v61, %v3233_v12 }
 0x56f   :  { %v3271_v57 = vmul.f32 %v4597_v3, %v7330_v52  ;;  %v3200_v47 = vsel %vm3199_vm10, %v4593_v38, %v3196_v63  ;;  %vm3276_vm14 = vweird.f32 %v4597_v3  ;;  %v3279_v38 = vand.u32 2147483647, %v7330_v52 }
 0x570   :  { %v4599_v24 = vpop.eup %4598  ;;  %v3205_v8 = vsel %vm3202_vm12, %v3204_v60, %v3200_v47  ;;  %v3238_v11 = vsel %vm3237_vm11, %v4595_v61, %v3234_v34  ;;  %vm3277_vm0 = vmor %vm3275_vm15, %vm3276_vm14 }
 0x571   :  { %v3272_v39 = vsub.f32 1.0, %v3271_v57  ;;  %v3293_v0 = vmul.f32 %v4599_v24, %v3268_v31  ;;  %v4601_v33 = vpop.eup %4600  ;;  %v3243_v15 = vsel %vm3240_vm13, %v3242_v28, %v3238_v11  ;;  %vm3280_vm1 = vcmp.eq.f32.partialorder %v3279_v38, 8.507059e+37 }
 0x572   :  { %v3288_v27 = vmul.f32 %v4601_v33, %v3205_v8  ;;  %v3286_v6 = vmul.f32 %v3243_v15, %v7120_v42 }
 0x573   :  { %v3297_v30 = vpack.c.bf16 %v3293_v0, %v3293_v0  ;;  %v3273_v32 = vmul.f32 %v4597_v3, %v3272_v39 }
 0x574   :  { %v7374_v20 = vadd.f32 %v3288_v27, %v3286_v6 }
 0x575   :  { %4074 = vst [vmem:[%s7553_s7 + $0x14] sm:$0xf] %v3297_v30  ;;  %v3274_v37 = vadd.f32 %v4597_v3, %v3273_v32  ;;  %v3367_v9 = vunpack.c.l.b16 %v3297_v30 }
 0x576   :  { %4602 = vtanh.f32 %v7374_v20 }
 0x577   :  { %v3278_v18 = vsel %vm3277_vm0, %v4597_v3, %v3274_v37 }
 0x578   :  { %v3283_v53 = vsel %vm3280_vm1, %v3282_v55, %v3278_v18 }
 0x57c   :  { %v4603_v42 = vpop.eup %4602 }
 0x57d   :  { %v3294_v61 = vmul.f32 %v4603_v42, %v3283_v53 }
 0x57f   :  { %v3298_v62 = vpack.c.bf16 %v3294_v61, %v3294_v61 }
 0x581   :  { %4075 = vst [vmem:[%s7553_s7 + $0x1c] sm:$0xf] %v3298_v62  ;;  %v3368_v25 = vunpack.c.l.b16 %v3298_v62 }
 0x583   :  { %v3369_v56 = vpack.c.b16 %v3368_v25, %v3367_v9 }
 0x585   :  { %3379 = vmatmul.bf16.vlgmr.msrb.gmra.mxu0 %v3369_v56  ;;  %3393 = vmatmul.bf16.vlgmr.msrb.gmra.mxu1 %v3369_v56 }
 0x586   :  { %3407 = vmatmul.bf16.vlgmr.msrb.gmra.mxu2 %v3369_v56  ;;  %3421 = vmatmul.bf16.vlgmr.msrb.gmra.mxu3 %v3369_v56 }
 0x5e2   :  { %v3318_v52 = vpop.f32.mrf.mxu0  ;;  %v3332_v14 = vpop.f32.mrf.mxu1 }
 0x5e3   :  { %v3319_v1 = vadd.f32 %v3318_v52, %v8188_v17  ;;  %v3333_v23 = vadd.f32 %v3332_v14, %v8189_v41 }
 0x5e5   :  { %v4076_v26 = vmul.f32 -1.442695, %v3319_v1  ;;  %v4078_v13 = vmul.f32 -1.442695, %v3333_v23 }
 0x5e7   :  { %4604 = vpow2.f32 %v4076_v26 }
 0x5e8   :  { %4606 = vpow2.f32 %v4078_v13 }
 0x5e9   :  { %v3360_v50 = vpop.f32.mrf.mxu3  ;;  %v3346_v19 = vpop.f32.mrf.mxu2 }
 0x5ea   :  { %v3361_v5 = vadd.f32 %v3360_v50, %v8190_v54  ;;  %v3320_v3 = vpop.f32.mrf.mxu0  ;;  %v3334_v40 = vpop.f32.mrf.mxu1  ;;  %v3347_v54 = vadd.f32 %v3346_v19, %v8193_v21 }
 0x5eb   :  { %v3321_v58 = vadd.f32 %v3320_v3, %v8191_v2  ;;  %v3335_v12 = vadd.f32 %v3334_v40, %v8192_v10 }
 0x5ec   :  { %v4080_v45 = vmul.f32 -1.442695, %v3361_v5 }
 0x5ed   :  { %v4605_v57 = vpop.eup %4604  ;;  %v4077_v24 = vmul.f32 -1.442695, %v3321_v58  ;;  %v4079_v41 = vmul.f32 -1.442695, %v3335_v12 }
 0x5ee   :  { %v4607_v17 = vpop.eup %4606  ;;  %v3433_v63 = vadd.f32 1.0, %v4605_v57  ;;  %4608 = vpow2.f32 %v4080_v45 }
 0x5ef   :  { %v3471_v31 = vadd.f32 1.0, %v4607_v17  ;;  %4610 = vpow2.f32 %v4077_v24 }
 0x5f0   :  { %4612 = vrcp.f32 %v3433_v63  ;;  %v3444_v28 = vand.u32 2147483647, %v3433_v63  ;;  %v3446_v47 = vand.u32 2147483648, %v3433_v63  ;;  %vm3440_vm2 = vweird.f32 %v3433_v63 }
 0x5f1   :  { %4614 = vrcp.f32 %v3471_v31  ;;  %v3362_v60 = vpop.f32.mrf.mxu3  ;;  %v3348_v10 = vpop.f32.mrf.mxu2  ;;  %v3484_v15 = vand.u32 2147483648, %v3471_v31  ;;  %v3482_v32 = vand.u32 2147483647, %v3471_v31  ;;  %vm3478_vm3 = vweird.f32 %v3471_v31 }
 0x5f2   :  { %4616 = vpow2.f32 %v4079_v41  ;;  %v3363_v0 = vadd.f32 %v3362_v60, %v8194_v29  ;;  %v3349_v6 = vadd.f32 %v3348_v10, %v8195_v51  ;;  %vm7399_vm4 = vcmp.eq.f32.partialorder %v3444_v28, 8.507059e+37 }
 0x5f3   :  { %4618 = vtanh.f32 %v3347_v54  ;;  %v3447_v55 = vor.u32 1.1754944e-38, %v3446_v47  ;;  %v3485_v42 = vor.u32 1.1754944e-38, %v3484_v15  ;;  %vm7404_vm6 = vcmp.eq.f32.partialorder %v3482_v32, 8.507059e+37 }
 0x5f4   :  { %v4609_v34 = vpop.eup %4608  ;;  %v4081_v35 = vmul.f32 -1.442695, %v3363_v0 }
 0x5f5   :  { %v4611_v39 = vpop.eup %4610  ;;  %v7389_v2 = vadd.f32 1.0, %v4609_v34 }
 0x5f6   :  { %v4613_v33 = vpop.eup %4612  ;;  %v7392_v8 = vadd.f32 1.0, %v4611_v39 }
 0x5f7   :  { %v4615_v11 = vpop.eup %4614  ;;  %v3436_v30 = vmul.f32 %v4613_v33, %v3433_v63  ;;  %4620 = vrcp.f32 %v7389_v2  ;;  %vm3441_vm7 = vweird.f32 %v4613_v33  ;;  %vm3518_vm8 = vweird.f32 %v7389_v2 }
 0x5f8   :  { %v4617_v21 = vpop.eup %4616  ;;  %v3474_v27 = vmul.f32 %v4615_v11, %v3471_v31  ;;  %4622 = vrcp.f32 %v7392_v8  ;;  %vm3479_vm5 = vweird.f32 %v4615_v11  ;;  %v3522_v14 = vand.u32 2147483647, %v7389_v2  ;;  %vm3442_vm9 = vmor %vm3440_vm2, %vm3441_vm7 }
 0x5f9   :  { %v3437_v37 = vsub.f32 1.0, %v3436_v30  ;;  %v7397_v29 = vadd.f32 1.0, %v4617_v21  ;;  %v4619_v61 = vpop.eup %4618  ;;  %v3524_v13 = vand.u32 2147483648, %v7389_v2  ;;  %vm3455_vm10 = vweird.f32 %v7392_v8  ;;  %vm3480_vm11 = vmor %vm3478_vm3, %vm3479_vm5 }
 0x5fa   :  { %v3475_v38 = vsub.f32 1.0, %v3474_v27  ;;  %v3459_v3 = vand.u32 2147483647, %v7392_v8  ;;  %vm7431_vm12 = vcmp.eq.f32.partialorder %v3522_v14, 8.507059e+37  ;;  %v3461_v10 = vand.u32 2147483648, %v7392_v8 }
 0x5fb   :  { %v3438_v53 = vmul.f32 %v4613_v33, %v3437_v37  ;;  %4624 = vrcp.f32 %v7397_v29  ;;  %v3499_v63 = vand.u32 2147483648, %v7397_v29  ;;  %v3497_v30 = vand.u32 2147483647, %v7397_v29 }
 0x5fc   :  { %v3476_v51 = vmul.f32 %v4615_v11, %v3475_v38  ;;  %4626 = vtanh.f32 %v3349_v6  ;;  %vm3493_vm1 = vweird.f32 %v7397_v29  ;;  %vm3460_vm3 = vcmp.eq.f32.partialorder %v3459_v3, 8.507059e+37 }
 0x5fd   :  { %v7408_v56 = vpop.eup %4620  ;;  %v3439_v52 = vadd.f32 %v4613_v33, %v3438_v53  ;;  %4628 = vpow2.f32 %v4081_v35  ;;  %v3462_v35 = vor.u32 1.1754944e-38, %v3461_v10  ;;  %vm3498_vm7 = vcmp.eq.f32.partialorder %v3497_v30, 8.507059e+37 }
 0x5fe   :  { %v3477_v23 = vadd.f32 %v4615_v11, %v3476_v51  ;;  %v3514_v26 = vmul.f32 %v7408_v56, %v7389_v2  ;;  %v4623_v50 = vpop.eup %4622  ;;  %vm3519_vm13 = vweird.f32 %v7408_v56 }
 0x5ff   :  { %v3443_v5 = vsel %vm3442_vm9, %v4613_v33, %v3439_v52  ;;  %v3451_v45 = vmul.f32 %v4623_v50, %v7392_v8  ;;  %vm3456_vm14 = vweird.f32 %v4623_v50  ;;  %vm7445_vm15 = vmor %vm3518_vm8, %vm3519_vm13 }
 0x600   :  { %v3448_v19 = vsel %vm7399_vm4, %v3447_v55, %v3443_v5  ;;  %v3481_v58 = vsel %vm3480_vm11, %v4615_v11, %v3477_v23  ;;  %v3515_v12 = vsub.f32 1.0, %v3514_v26  ;;  %vm3457_vm2 = vmor %vm3455_vm10, %vm3456_vm14  ;;  %v3525_v55 = vor.u32 1.1754944e-38, %v3524_v13 }
 0x601   :  { %v4625_v57 = vpop.eup %4624  ;;  %v3486_v24 = vsel %vm7404_vm6, %v3485_v42, %v3481_v58  ;;  %v3545_v17 = vmul.f32 %v4619_v61, %v3448_v19  ;;  %v3452_v60 = vsub.f32 1.0, %v3451_v45  ;;  %v3500_v42 = vor.u32 1.1754944e-38, %v3499_v63 }
 0x602   :  { %v3380_v9 = vpop.f32.mrf.mxu0  ;;  %v3394_v25 = vpop.f32.mrf.mxu1  ;;  %v3543_v31 = vmul.f32 %v3486_v24, %v7230_v36  ;;  %v3489_v34 = vmul.f32 %v4625_v57, %v7397_v29  ;;  %vm3494_vm0 = vweird.f32 %v4625_v57 }
 0x603   :  { %v3381_v1 = vadd.f32 %v3380_v9, %v8198_v49  ;;  %v3395_v49 = vadd.f32 %v3394_v25, %v8199_v22  ;;  %v4627_v41 = vpop.eup %4626  ;;  %v3516_v22 = vmul.f32 %v7408_v56, %v3515_v12  ;;  %v3453_v11 = vmul.f32 %v4623_v50, %v3452_v60  ;;  %vm3495_vm4 = vmor %vm3493_vm1, %vm3494_vm0 }
 0x604   :  { %v4629_v39 = vpop.eup %4628  ;;  %v3547_v28 = vadd.f32 %v3545_v17, %v3543_v31  ;;  %v3490_v47 = vsub.f32 1.0, %v3489_v34 }
 0x605   :  { %v4082_v40 = vmul.f32 -1.442695, %v3381_v1  ;;  %v4084_v0 = vmul.f32 -1.442695, %v3395_v49  ;;  %v3517_v36 = vadd.f32 %v7408_v56, %v3516_v22  ;;  %v7440_v15 = vadd.f32 1.0, %v4629_v39 }
 0x606   :  { %v3491_v32 = vmul.f32 %v4625_v57, %v3490_v47  ;;  %v3454_v6 = vadd.f32 %v4623_v50, %v3453_v11 }
 0x607   :  { %4630 = vpow2.f32 %v4082_v40  ;;  %v3537_v19 = vand.u32 2147483647, %v7440_v15  ;;  %vm3533_vm5 = vweird.f32 %v7440_v15 }
 0x608   :  { %4632 = vpow2.f32 %v4084_v0  ;;  %v3458_v2 = vsel %vm3457_vm2, %v4623_v50, %v3454_v6  ;;  %v3492_v38 = vadd.f32 %v4625_v57, %v3491_v32 }
 0x609   :  { %v3422_v33 = vpop.f32.mrf.mxu3  ;;  %4634 = vtanh.f32 %v3547_v28  ;;  %v3463_v29 = vsel %vm3460_vm3, %v3462_v35, %v3458_v2  ;;  %v3408_v40 = vpop.f32.mrf.mxu2  ;;  %vm7479_vm8 = vcmp.eq.f32.partialorder %v3537_v19, 8.507059e+37 }
 0x60a   :  { %v3423_v21 = vadd.f32 %v3422_v33, %v8136_v16  ;;  %4636 = vrcp.f32 %v7440_v15  ;;  %v3521_v16 = vsel %vm7445_vm15, %v7408_v56, %v3517_v36  ;;  %v3382_v61 = vpop.f32.mrf.mxu0  ;;  %v3496_v8 = vsel %vm3495_vm4, %v4625_v57, %v3492_v38  ;;  %v3396_v62 = vpop.f32.mrf.mxu1 }
 0x60b   :  { %v3546_v51 = vmul.f32 %v4627_v41, %v3463_v29  ;;  %v3526_v25 = vsel %vm7431_vm12, %v3525_v55, %v3521_v16  ;;  %v3501_v56 = vsel %vm3498_vm7, %v3500_v42, %v3496_v8  ;;  %v3383_v23 = vadd.f32 %v3382_v61, %v7927_v4 }
 0x60c   :  { %v4086_v53 = vmul.f32 -1.442695, %v3423_v21  ;;  %v3544_v14 = vmul.f32 %v3501_v56, %v7265_v44  ;;  %v3397_v50 = vadd.f32 %v3396_v62, %v8067_v7  ;;  %v3539_v44 = vand.u32 2147483648, %v7440_v15 }
 0x60d   :  { %v4631_v37 = vpop.eup %4630  ;;  %v4083_v4 = vmul.f32 -1.442695, %v3383_v23  ;;  %v3409_v24 = vadd.f32 %v3408_v40, %v8066_v43 }
 0x60e   :  { %v7457_v18 = vadd.f32 1.0, %v4631_v37  ;;  %v4633_v9 = vpop.eup %4632  ;;  %v3548_v5 = vadd.f32 %v3546_v51, %v3544_v14  ;;  %v4085_v57 = vmul.f32 -1.442695, %v3397_v50  ;;  %v3540_v10 = vor.u32 1.1754944e-38, %v3539_v44 }
 0x60f   :  { %v4635_v52 = vpop.eup %4634  ;;  %v7463_v1 = vadd.f32 1.0, %v4633_v9 }
 0x610   :  { %4638 = vrcp.f32 %v7457_v18  ;;  %v4637_v26 = vpop.eup %4636  ;;  %v3551_v13 = vmul.f32 %v4635_v52, %v3526_v25  ;;  %v3570_v17 = vand.u32 2147483647, %v7457_v18  ;;  %v3572_v43 = vand.u32 2147483648, %v7457_v18 }
 0x611   :  { %4640 = vpow2.f32 %v4086_v53  ;;  %v3529_v3 = vmul.f32 %v4637_v26, %v7440_v15  ;;  %v3424_v58 = vpop.f32.mrf.mxu3  ;;  %vm3534_vm6 = vweird.f32 %v4637_v26  ;;  %vm3566_vm11 = vweird.f32 %v7457_v18  ;;  %v3410_v56 = vpop.f32.mrf.mxu2 }
 0x612   :  { %4642 = vrcp.f32 %v7463_v1  ;;  %v3679_v49 = vpack.c.bf16 %v3551_v13, %v3551_v13  ;;  %v3425_v31 = vadd.f32 %v3424_v58, %v8071_v59  ;;  %vm3535_vm9 = vmor %vm3533_vm5, %vm3534_vm6  ;;  %vm7491_vm12 = vcmp.eq.f32.partialorder %v3570_v17, 8.507059e+37 }
 0x613   :  { %4644 = vtanh.f32 %v3548_v5  ;;  %v3530_v45 = vsub.f32 1.0, %v3529_v3  ;;  %v3610_v32 = vand.u32 2147483648, %v7463_v1  ;;  %v3573_v6 = vor.u32 1.1754944e-38, %v3572_v43 }
 0x614   :  { %4088 = vst [vmem:[%s7553_s7 + $0x70] sm:$0xf] %v3679_v49  ;;  %4646 = vpow2.f32 %v4083_v4  ;;  %v4087_v0 = vmul.f32 -1.442695, %v3425_v31  ;;  %v3608_v37 = vand.u32 2147483647, %v7463_v1  ;;  %vm3604_vm15 = vweird.f32 %v7463_v1 }
 0x615   :  { %v3531_v41 = vmul.f32 %v4637_v26, %v3530_v45  ;;  %4648 = vpow2.f32 %v4085_v57  ;;  %v3611_v8 = vor.u32 1.1754944e-38, %v3610_v32  ;;  %v3411_v13 = vadd.f32 %v3410_v56, %v8080_v48 }
 0x616   :  { %v4639_v12 = vpop.eup %4638  ;;  %vm3609_vm1 = vcmp.eq.f32.partialorder %v3608_v37, 8.507059e+37 }
 0x617   :  { %v3562_v7 = vmul.f32 %v4639_v12, %v7457_v18  ;;  %v4641_v63 = vpop.eup %4640  ;;  %v3532_v39 = vadd.f32 %v4637_v26, %v3531_v41  ;;  %vm3567_vm10 = vweird.f32 %v4639_v12 }
 0x618   :  { %v7483_v60 = vadd.f32 1.0, %v4641_v63  ;;  %v4643_v34 = vpop.eup %4642  ;;  %vm3568_vm13 = vmor %vm3566_vm11, %vm3567_vm10 }
 0x619   :  { %v3563_v54 = vsub.f32 1.0, %v3562_v7  ;;  %v3600_v33 = vmul.f32 %v4643_v34, %v7463_v1  ;;  %v4645_v28 = vpop.eup %4644  ;;  %v3536_v36 = vsel %vm3535_vm9, %v4637_v26, %v3532_v39  ;;  %vm3605_vm14 = vweird.f32 %v4643_v34 }
 0x61a   :  { %4650 = vrcp.f32 %v7483_v60  ;;  %v3541_v11 = vsel %vm7479_vm8, %v3540_v10, %v3536_v36  ;;  %v4647_v21 = vpop.eup %4646  ;;  %vm3606_vm0 = vmor %vm3604_vm15, %vm3605_vm14  ;;  %v3650_v3 = vand.u32 2147483648, %v7483_v60  ;;  %vm3644_vm3 = vweird.f32 %v7483_v60 }
 0x61b   :  { %v3564_v59 = vmul.f32 %v4639_v12, %v3563_v54  ;;  %4652 = vtanh.f32 %v3409_v24  ;;  %v3601_v30 = vsub.f32 1.0, %v3600_v33  ;;  %v3552_v27 = vmul.f32 %v4645_v28, %v3541_v11  ;;  %v4649_v35 = vpop.eup %4648 }
 0x61c   :  { %4654 = vpow2.f32 %v4087_v0  ;;  %v7499_v38 = vadd.f32 1.0, %v4647_v21  ;;  %v7503_v42 = vadd.f32 1.0, %v4649_v35 }
 0x61d   :  { %v3565_v15 = vadd.f32 %v4639_v12, %v3564_v59  ;;  %v3602_v16 = vmul.f32 %v4643_v34, %v3601_v30  ;;  %v3680_v18 = vpack.c.bf16 %v3552_v27, %v3552_v27 }
 0x61e   :  { %4656 = vrcp.f32 %v7499_v38  ;;  %v3625_v4 = vand.u32 2147483648, %v7503_v42  ;;  %v3587_v57 = vand.u32 2147483648, %v7499_v38  ;;  %v3585_v63 = vand.u32 2147483647, %v7499_v38 }
 0x61f   :  { %v3569_v2 = vsel %vm3568_vm13, %v4639_v12, %v3565_v15  ;;  %v3603_v53 = vadd.f32 %v4643_v34, %v3602_v16  ;;  %4089 = vst [vmem:[%s7553_s7 + $0x78] sm:$0xf] %v3680_v18  ;;  %4658 = vrcp.f32 %v7503_v42  ;;  %v3651_v12 = vor.u32 1.1754944e-38, %v3650_v3 }
 0x620   :  { %v3574_v55 = vsel %vm7491_vm12, %v3573_v6, %v3569_v2  ;;  %v4651_v29 = vpop.eup %4650  ;;  %v3623_v31 = vand.u32 2147483647, %v7503_v42  ;;  %vm3619_vm8 = vweird.f32 %v7503_v42  ;;  %vm3581_vm9 = vweird.f32 %v7499_v38 }
 0x621   :  { %v4653_v61 = vpop.eup %4652  ;;  %v3640_v51 = vmul.f32 %v4651_v29, %v7483_v60  ;;  %v3607_v9 = vsel %vm3606_vm0, %v4643_v34, %v3603_v53  ;;  %vm3645_vm2 = vweird.f32 %v4651_v29  ;;  %v3588_v39 = vor.u32 1.1754944e-38, %v3587_v57 }
 0x622   :  { %v4655_v62 = vpop.eup %4654  ;;  %v3671_v25 = vmul.f32 %v4653_v61, %v3574_v55  ;;  %v3612_v52 = vsel %vm3609_vm1, %v3611_v8, %v3607_v9  ;;  %vm7522_vm4 = vmor %vm3644_vm3, %vm3645_vm2  ;;  %v3626_v59 = vor.u32 1.1754944e-38, %v3625_v4  ;;  %vm3586_vm12 = vcmp.eq.f32.partialorder %v3585_v63, 8.507059e+37 }
 0x623   :  { %v3641_v14 = vsub.f32 1.0, %v3640_v51  ;;  %v7512_v1 = vadd.f32 1.0, %v4655_v62  ;;  %v3669_v23 = vmul.f32 %v3612_v52, %v7332_v46  ;;  %v3648_v46 = vand.u32 2147483647, %v7483_v60 }
 0x624   :  { %v4657_v50 = vpop.eup %4656  ;;  %vm3624_vm13 = vcmp.eq.f32.partialorder %v3623_v31, 8.507059e+37 }
 0x625   :  { %v3642_v26 = vmul.f32 %v4651_v29, %v3641_v14  ;;  %4660 = vrcp.f32 %v7512_v1  ;;  %v3673_v5 = vadd.f32 %v3671_v25, %v3669_v23  ;;  %v4659_v40 = vpop.eup %4658  ;;  %v3577_v19 = vmul.f32 %v4657_v50, %v7499_v38 }
 0x626   :  { %v3615_v44 = vmul.f32 %v4659_v40, %v7503_v42  ;;  %vm3582_vm7 = vweird.f32 %v4657_v50  ;;  %vm3620_vm5 = vweird.f32 %v4659_v40  ;;  %vm3649_vm6 = vcmp.eq.f32.partialorder %v3648_v46, 8.507059e+37 }
 0x627   :  { %v3643_v49 = vadd.f32 %v4651_v29, %v3642_v26  ;;  %4662 = vtanh.f32 %v3673_v5  ;;  %v3578_v58 = vsub.f32 1.0, %v3577_v19  ;;  %vm3583_vm10 = vmor %vm3581_vm9, %vm3582_vm7  ;;  %v3665_v37 = vand.u32 2147483648, %v7512_v1 }
 0x628   :  { %4664 = vtanh.f32 %v3411_v13  ;;  %v3616_v45 = vsub.f32 1.0, %v3615_v44  ;;  %vm3621_vm11 = vmor %vm3619_vm8, %vm3620_vm5  ;;  %vm3659_vm15 = vweird.f32 %v7512_v1  ;;  %v3663_v35 = vand.u32 2147483647, %v7512_v1 }
 0x629   :  { %v3647_v24 = vsel %vm7522_vm4, %v4651_v29, %v3643_v49  ;;  %v3579_v17 = vmul.f32 %v4657_v50, %v3578_v58  ;;  %v3666_v2 = vor.u32 1.1754944e-38, %v3665_v37 }
 0x62a   :  { %v3617_v41 = vmul.f32 %v4659_v40, %v3616_v45  ;;  %v3652_v34 = vsel %vm3649_vm6, %v3651_v12, %v3647_v24  ;;  %vm3664_vm1 = vcmp.eq.f32.partialorder %v3663_v35, 8.507059e+37 }
 0x62b   :  { %v4661_v7 = vpop.eup %4660  ;;  %v3580_v54 = vadd.f32 %v4657_v50, %v3579_v17 }
 0x62c   :  { %v3655_v22 = vmul.f32 %v4661_v7, %v7512_v1  ;;  %v3618_v10 = vadd.f32 %v4659_v40, %v3617_v41  ;;  %vm3660_vm14 = vweird.f32 %v4661_v7 }
 0x62d   :  { %v4663_v60 = vpop.eup %4662  ;;  %v3584_v28 = vsel %vm3583_vm10, %v4657_v50, %v3580_v54  ;;  %vm3661_vm0 = vmor %vm3659_vm15, %vm3660_vm14 }
 0x62e   :  { %v3656_v43 = vsub.f32 1.0, %v3655_v22  ;;  %v4665_v0 = vpop.eup %4664  ;;  %v3677_v33 = vmul.f32 %v4663_v60, %v3652_v34  ;;  %v3589_v36 = vsel %vm3586_vm12, %v3588_v39, %v3584_v28  ;;  %v3622_v47 = vsel %vm3621_vm11, %v4659_v40, %v3618_v10 }
 0x62f   :  { %v3627_v30 = vsel %vm3624_vm13, %v3626_v59, %v3622_v47  ;;  %v3672_v15 = vmul.f32 %v4665_v0, %v3589_v36 }
 0x630   :  { %v3681_v11 = vpack.c.bf16 %v3677_v33, %v3677_v33  ;;  %v3657_v21 = vmul.f32 %v4661_v7, %v3656_v43  ;;  %v3670_v27 = vmul.f32 %v3627_v30, %v7374_v20 }
 0x632   :  { %3685 = vst [vmem:[%s7553_s7 + $0x4] sm:$0xf] %v3681_v11  ;;  %v3674_v32 = vadd.f32 %v3672_v15, %v3670_v27  ;;  %v3658_v6 = vadd.f32 %v4661_v7, %v3657_v21 }
 0x634   :  { %4666 = vtanh.f32 %v3674_v32  ;;  %v3662_v16 = vsel %vm3661_vm0, %v4661_v7, %v3658_v6 }
 0x635   :  { %v3667_v20 = vsel %vm3664_vm1, %v3666_v2, %v3662_v16 }
 0x63a   :  { %v4667_v38 = vpop.eup %4666 }
 0x63b   :  { %v3678_v18 = vmul.f32 %v4667_v38, %v3667_v20 }
 0x63d   :  { %v3682_v55 = vpack.c.bf16 %v3678_v18, %v3678_v18 }
 0x63f   :  { %3686 = vst [vmem:[%s7553_s7 + $0xc] sm:$0xf] %v3682_v55 }

</bundles_post_ra>
